<compile_context>
chip_gen: v6e
topology: v6e:2x2x1
jax: 0.10.0
libtpu: 0.0.40
codegen_flags: <defaults>
</compile_context>

<pallas_src>
import numpy as np
import jax
import jax.numpy as jnp
from jax.experimental import pallas as pl
from jax.experimental.pallas import tpu as pltpu

LANE = 128


def _round_up(n, m):
    return ((n + m - 1) // m) * m


# -----------------------------------------------------------------------------
# Core Pallas kernel: multi-tap (shifted-window) accumulated matmul + epilogue
# -----------------------------------------------------------------------------
def _multi_tap_matmul(inputs, taps, wstack, shift, *, ho, wo, relu,
                      residual=None, out_dtype=jnp.bfloat16):
    """out[b] = act( sum_t patch_t(inputs)[b] @ wstack[t] + shift [+ residual[b]] )

    inputs   : list of (B, Hi, Wi, Cin_pad) bf16 arrays (phase/branch tensors).
    taps     : list of static (input_idx, row_off, col_off) tuples.
    wstack   : (len(taps), Cin_pad, Cout_pad) bf16 (BN scale already folded in).
    shift    : (1 or B, 1, Cout_pad) f32 bias (per-image when leading dim == B).
    residual : optional (B, ho, wo, Cout_pad), added pre-activation.
    """
    B = int(inputs[0].shape[0])
    n_in = len(inputs)
    cin_list = [int(a.shape[-1]) for a in inputs]
    T, cin_w, cout = (int(s) for s in wstack.shape)
    assert T == len(taps)
    has_res = residual is not None

    def kernel(*refs):
        x_refs = refs[:n_in]
        w_ref = refs[n_in]
        s_ref = refs[n_in + 1]
        r_ref = refs[n_in + 2] if has_res else None
        o_ref = refs[-1]

        acc = jnp.zeros((ho * wo, cout), jnp.float32)
        for t, (pi, ro, co) in enumerate(taps):
            patch = x_refs[pi][:, ro:ro + ho, co:co + wo, :]        # (1,ho,wo,cin)
            a = patch.reshape(ho * wo, cin_list[pi])                # bf16
            acc = acc + jnp.dot(a, w_ref[t],
                                preferred_element_type=jnp.float32)
        acc = acc + s_ref[...].reshape(1, cout).astype(jnp.float32)
        if has_res:
            acc = acc + r_ref[...].reshape(ho * wo, cout).astype(jnp.float32)
        if relu:
            acc = jnp.maximum(acc, 0.0)
        o_ref[...] = acc.reshape(1, ho, wo, cout).astype(o_ref.dtype)

    in_specs = []
    args = []
    for a in inputs:
        _, hi, wi, ci = (int(s) for s in a.shape)
        in_specs.append(pl.BlockSpec((1, hi, wi, ci), lambda b: (b, 0, 0, 0)))
        args.append(a)
    in_specs.append(pl.BlockSpec((T, cin_w, cout), lambda b: (0, 0, 0)))
    args.append(wstack)
    if int(shift.shape[0]) == B:
        in_specs.append(pl.BlockSpec((1, 1, cout), lambda b: (b, 0, 0)))
    else:
        in_specs.append(pl.BlockSpec((1, 1, cout), lambda b: (0, 0, 0)))
    args.append(shift)
    if has_res:
        in_specs.append(pl.BlockSpec((1, ho, wo, cout), lambda b: (b, 0, 0, 0)))
        args.append(residual)

    flops = 2 * B * ho * wo * cout * sum(cin_list[pi] for pi, _, _ in taps)
    bytes_accessed = sum(int(np.prod(a.shape)) * a.dtype.itemsize for a in args)
    bytes_accessed += B * ho * wo * cout * jnp.dtype(out_dtype).itemsize

    return pl.pallas_call(
        kernel,
        out_shape=jax.ShapeDtypeStruct((B, ho, wo, cout), out_dtype),
        grid=(B,),
        in_specs=in_specs,
        out_specs=pl.BlockSpec((1, ho, wo, cout), lambda b: (b, 0, 0, 0)),
        compiler_params=pltpu.CompilerParams(dimension_semantics=("parallel",)),
        cost_estimate=pl.CostEstimate(flops=int(flops), transcendentals=0,
                                      bytes_accessed=int(bytes_accessed)),
    )(*args)


def conv_block(x, wstack, shift, *, stride=1, dilation=1, padding=0,
               relu=True, residual=None, out_dtype=jnp.bfloat16):
    """Conv2d(kxk) + folded eval-BN + optional residual + optional ReLU (NHWC)."""
    B, H, W, _ = (int(s) for s in x.shape)
    T = int(wstack.shape[0])
    k = int(round(T ** 0.5))
    assert k * k == T, "square kernels only"
    Hp, Wp = H + 2 * padding, W + 2 * padding
    Ho = (Hp - (dilation * (k - 1) + 1)) // stride + 1
    Wo = (Wp - (dilation * (k - 1) + 1)) // stride + 1

    xp = x
    if padding:
        xp = jnp.pad(x, ((0, 0), (padding, padding), (padding, padding), (0, 0)))

    if stride == 1:
        phase_arrays = [xp]
        taps = [(0, i * dilation, j * dilation)
                for i in range(k) for j in range(k)]
    else:
        # stride-phase decomposition: total bytes == padded activation (no blowup)
        phase_arrays = []
        pidx = {}
        for pr in range(stride):
            for pc in range(stride):
                pidx[(pr, pc)] = len(phase_arrays)
                phase_arrays.append(xp[:, pr::stride, pc::stride, :])
        taps = []
        for i in range(k):
            for j in range(k):
                r, c = i * dilation, j * dilation
                taps.append((pidx[(r % stride, c % stride)],
                             r // stride, c // stride))

    return _multi_tap_matmul(phase_arrays, taps, wstack, shift,
                             ho=Ho, wo=Wo, relu=relu, residual=residual,
                             out_dtype=out_dtype)


# -----------------------------------------------------------------------------
# Global average pool (AdaptiveAvgPool2d(1)) and bilinear resize kernels
# -----------------------------------------------------------------------------
def global_avg_pool(x):
    B, H, W, C = (int(s) for s in x.shape)

    def kernel(x_ref, o_ref):
        v = x_ref[...].astype(jnp.float32).reshape(H * W, C)
        m = jnp.mean(v, axis=0, keepdims=True)          # (1, C)
        o_ref[...] = m.reshape(1, 1, 1, C).astype(o_ref.dtype)

    return pl.pallas_call(
        kernel,
        out_shape=jax.ShapeDtypeStruct((B, 1, 1, C), x.dtype),
        grid=(B,),
        in_specs=[pl.BlockSpec((1, H, W, C), lambda b: (b, 0, 0, 0))],
        out_specs=pl.BlockSpec((1, 1, 1, C), lambda b: (b, 0, 0, 0)),
        compiler_params=pltpu.CompilerParams(dimension_semantics=("parallel",)),
    )(x)


def bilinear_matrix(out_size, in_size):
    """Row-stochastic interpolation matrix, torch align_corners=False (numpy)."""
    if in_size == 1:
        return np.ones((out_size, 1), np.float32)
    scale = in_size / out_size
    o = np.arange(out_size, dtype=np.float64)
    src = np.maximum((o + 0.5) * scale - 0.5, 0.0)
    x0 = np.minimum(np.floor(src).astype(np.int64), in_size - 1)
    x1 = np.minimum(x0 + 1, in_size - 1)
    lam = (src - x0).astype(np.float32)
    m = np.zeros((out_size, in_size), np.float32)
    m[np.arange(out_size), x0] += (1.0 - lam)
    m[np.arange(out_size), x1] += lam
    return m


def bilinear_resize(x, out_h, out_w):
    """F.interpolate(mode='bilinear', align_corners=False) on NHWC, one matmul."""
    B, h, w, C = (int(s) for s in x.shape)
    u = jnp.asarray(np.kron(bilinear_matrix(out_h, h), bilinear_matrix(out_w, w)),
                    jnp.float32)                         # (out_h*out_w, h*w)

    def kernel(x_ref, u_ref, o_ref):
        xm = x_ref[...].astype(jnp.float32).reshape(h * w, C)
        y = jnp.dot(u_ref[...], xm, preferred_element_type=jnp.float32)
        o_ref[...] = y.reshape(1, out_h, out_w, C).astype(o_ref.dtype)

    return pl.pallas_call(
        kernel,
        out_shape=jax.ShapeDtypeStruct((B, out_h, out_w, C), jnp.float32),
        grid=(B,),
        in_specs=[pl.BlockSpec((1, h, w, C), lambda b: (b, 0, 0, 0)),
                  pl.BlockSpec((out_h * out_w, h * w), lambda b: (0, 0))],
        out_specs=pl.BlockSpec((1, out_h, out_w, C), lambda b: (b, 0, 0, 0)),
        compiler_params=pltpu.CompilerParams(dimension_semantics=("parallel",)),
    )(x, u)


# -----------------------------------------------------------------------------
# Parameter construction (deterministic, synthetic): fold BN, pad, cast bf16
# -----------------------------------------------------------------------------
def _fold_pad(w, scale, shift):
    kh, kw, cin, cout = w.shape
    wf = w * scale.reshape(1, 1, 1, cout)
    cin_p, cout_p = _round_up(cin, LANE), _round_up(cout, LANE)
    wf = jnp.pad(wf, ((0, 0), (0, 0), (0, cin_p - cin), (0, cout_p - cout)))
    wf = wf.reshape(kh * kw, cin_p, cout_p).astype(jnp.bfloat16)
    sh = jnp.pad(shift, (0, cout_p - cout)).reshape(1, 1, cout_p).astype(jnp.float32)
    return wf, sh


def _bn_stats(keys, cout):
    k2, k3, k4, k5 = keys
    gamma = 1.0 + 0.1 * jax.random.normal(k2, (cout,), jnp.float32)
    beta = 0.1 * jax.random.normal(k3, (cout,), jnp.float32)
    mean = 0.1 * jax.random.normal(k4, (cout,), jnp.float32)
    var = 1.0 + 0.1 * jnp.abs(jax.random.normal(k5, (cout,), jnp.float32))
    scale = gamma / jnp.sqrt(var + 1e-5)
    shift = beta - mean * scale
    return scale, shift


def init_conv(key, kh, kw, cin, cout, *, bn=True, bias=False):
    k1, k2, k3, k4, k5 = jax.random.split(key, 5)
    w = jax.random.normal(k1, (kh, kw, cin, cout), jnp.float32)
    w = w * (1.0 / np.sqrt(kh * kw * cin))
    if bn:
        scale, shift = _bn_stats((k2, k3, k4, k5), cout)
    elif bias:
        scale = jnp.ones((cout,), jnp.float32)
        shift = 0.1 * jax.random.normal(k2, (cout,), jnp.float32)
    else:
        scale = jnp.ones((cout,), jnp.float32)
        shift = jnp.zeros((cout,), jnp.float32)
    wf, sh = _fold_pad(w, scale, shift)
    return {"w": wf, "shift": sh}


def init_proj(key, cin_branch, n_spatial, cout):
    """ASPP projection: 1x1 conv over concat of n_spatial + 1 (pooled) branches,
    split per-branch so the forward can accumulate without materializing the concat."""
    n_total = n_spatial + 1
    cin_total = cin_branch * n_total
    k1, k2, k3, k4, k5 = jax.random.split(key, 5)
    w = jax.random.normal(k1, (1, 1, cin_total, cout), jnp.float32)
    w = w * (1.0 / np.sqrt(cin_total))
    scale, shift = _bn_stats((k2, k3, k4, k5), cout)
    wf = w * scale.reshape(1, 1, 1, cout)

    cin_p, cout_p = _round_up(cin_branch, LANE), _round_up(cout, LANE)
    chunks = []
    for i in range(n_total):
        c = wf[:, :, i * cin_branch:(i + 1) * cin_branch, :]
        c = jnp.pad(c, ((0, 0), (0, 0), (0, cin_p - cin_branch),
                        (0, cout_p - cout)))
        chunks.append(c.reshape(1, cin_p, cout_p))
    branches_w = jnp.concatenate(chunks[:n_spatial], axis=0).astype(jnp.bfloat16)
    pool_w = chunks[-1].astype(jnp.bfloat16)
    shift_p = jnp.pad(shift, (0, cout_p - cout)).reshape(1, 1, cout_p)
    shift_p = shift_p.astype(jnp.float32)
    return {"branches": {"w": branches_w},
            "pool": {"w": pool_w, "shift": shift_p}}


def init_params(key, in_ch=4, backbone_ch=32, aspp_ch=16, num_classes=21):
    keys = jax.random.split(key, 16)
    p = {}
    p["stem1"] = init_conv(keys[0], 3, 3, in_ch, 16)
    p["stem2"] = init_conv(keys[1], 3, 3, 16, backbone_ch)
    p["res_a"] = init_conv(keys[2], 3, 3, backbone_ch, backbone_ch)
    p["res_b"] = init_conv(keys[3], 3, 3, backbone_ch, backbone_ch)
    # ASPP
    p["aspp0"] = init_conv(keys[4], 1, 1, backbone_ch, aspp_ch)
    p["aspp1"] = init_conv(keys[5], 3, 3, backbone_ch, aspp_ch)
    p["aspp2"] = init_conv(keys[6], 3, 3, backbone_ch, aspp_ch)
    p["aspp3"] = init_conv(keys[7], 3, 3, backbone_ch, aspp_ch)
    p["aspp_pool"] = init_conv(keys[8], 1, 1, backbone_ch, aspp_ch)
    proj = init_proj(keys[9], aspp_ch, 4, aspp_ch)
    p["proj_branches"] = proj["branches"]
    p["proj_pool"] = proj["pool"]
    # DeepLabHead tail
    p["head_conv"] = init_conv(keys[10], 3, 3, aspp_ch, aspp_ch)
    p["classifier"] = init_conv(keys[11], 1, 1, aspp_ch, num_classes,
                                bn=False, bias=True)
    return p


# -----------------------------------------------------------------------------
# Forward pass (DeepLabV3.forward -> {'output': model(x)})
# -----------------------------------------------------------------------------
def deeplabv3_forward(params, x_nchw, num_classes=21):
    p = params
    x = jnp.transpose(x_nchw, (0, 2, 3, 1)).astype(jnp.float32)   # NCHW -> NHWC
    B, H, W, Cin = (int(s) for s in x.shape)
    cpad = _round_up(Cin, LANE)
    x = jnp.pad(x, ((0, 0), (0, 0), (0, 0), (0, cpad - Cin))).astype(jnp.bfloat16)

    # --- backbone (small dilated residual stack, output stride 4) ---
    f = conv_block(x, p["stem1"]["w"], p["stem1"]["shift"], stride=2, padding=1)
    f = conv_block(f, p["stem2"]["w"], p["stem2"]["shift"], stride=2, padding=1)
    identity = f
    g = conv_block(f, p["res_a"]["w"], p["res_a"]["shift"], dilation=2, padding=2)
    f = conv_block(g, p["res_b"]["w"], p["res_b"]["shift"], dilation=2, padding=2,
                   residual=identity)

    fh, fw = int(f.shape[1]), int(f.shape[2])

    # --- ASPP, atrous rates (12, 24, 36) ---
    b0 = conv_block(f, p["aspp0"]["w"], p["aspp0"]["shift"])
    b1 = conv_block(f, p["aspp1"]["w"], p["aspp1"]["shift"], dilation=12, padding=12)
    b2 = conv_block(f, p["aspp2"]["w"], p["aspp2"]["shift"], dilation=24, padding=24)
    b3 = conv_block(f, p["aspp3"]["w"], p["aspp3"]["shift"], dilation=36, padding=36)

    gp = global_avg_pool(f)                                              # (B,1,1,C)
    gp = conv_block(gp, p["aspp_pool"]["w"], p["aspp_pool"]["shift"])    # (B,1,1,C)
    # pooled branch is spatially constant -> fold its projection into the proj bias
    pooled_bias = conv_block(gp, p["proj_pool"]["w"], p["proj_pool"]["shift"],
                             relu=False, out_dtype=jnp.float32)          # (B,1,1,C)
    pooled_bias = pooled_bias.reshape(B, 1, int(pooled_bias.shape[-1]))

    # projection over the 4 spatial ASPP branches, accumulated (no concat)
    proj = _multi_tap_matmul(
        [b0, b1, b2, b3], [(0, 0, 0), (1, 0, 0), (2, 0, 0), (3, 0, 0)],
        p["proj_branches"]["w"], pooled_bias, ho=fh, wo=fw, relu=True)
    # Dropout(0.5) in eval mode is the identity.

    # --- head: 3x3 conv + BN + ReLU, then 1x1 classifier ---
    hd = conv_block(proj, p["head_conv"]["w"], p["head_conv"]["shift"], padding=1)
    logits = conv_block(hd, p["classifier"]["w"], p["classifier"]["shift"],
                        relu=False)

    # --- upsample to input resolution (bilinear, align_corners=False) ---
    up = bilinear_resize(logits, H, W)                   # (B, H, W, Cpad) f32
    out = jnp.transpose(up[..., :num_classes], (0, 3, 1, 2))
    return {"output": {"out": out}}


if __name__ == "__main__":
    key = jax.random.PRNGKey(0)
    k_in, k_par = jax.random.split(key)

    x = jax.random.normal(k_in, (2, 4, 16, 16), jnp.float32)   # NCHW input
    params = init_params(k_par, in_ch=4, backbone_ch=32, aspp_ch=16,
                         num_classes=21)

    fwd = jax.jit(deeplabv3_forward)
    result = fwd(params, x)
    out = jax.block_until_ready(result["output"]["out"])

    assert out.shape == (2, 21, 16, 16), out.shape
    assert bool(jnp.all(jnp.isfinite(out)))
    print("KERNEL_OK")
</pallas_src>

<mosaic_0001>
module attributes {stable_mosaic.version = 11 : i64} {
  func.func @kernel(%arg0: i32, %arg1: memref<1x9x9x128xbf16, #tpu.memory_space<vmem>>, %arg2: memref<1x9x9x128xbf16, #tpu.memory_space<vmem>>, %arg3: memref<1x9x9x128xbf16, #tpu.memory_space<vmem>>, %arg4: memref<1x9x9x128xbf16, #tpu.memory_space<vmem>>, %arg5: memref<9x128x128xbf16, #tpu.memory_space<vmem>>, %arg6: memref<1x1x128xf32, #tpu.memory_space<vmem>>, %arg7: memref<1x8x8x128xbf16, #tpu.memory_space<vmem>>) attributes {dimension_semantics = [#tpu.dimension_semantics<parallel>], iteration_bounds = array<i64: 2>, scalar_prefetch = 0 : i64, scratch_operands = 0 : i64, tpu.core_type = #tpu.core_type<tc>, window_params = [{transform_indices = @transform_0, window_bounds = array<i64: 1, 9, 9, 128>}, {transform_indices = @transform_1, window_bounds = array<i64: 1, 9, 9, 128>}, {transform_indices = @transform_2, window_bounds = array<i64: 1, 9, 9, 128>}, {transform_indices = @transform_3, window_bounds = array<i64: 1, 9, 9, 128>}, {pipeline_mode = #tpu.pipeline_mode<synchronous>, transform_indices = @transform_4, window_bounds = array<i64: 9, 128, 128>}, {pipeline_mode = #tpu.pipeline_mode<synchronous>, transform_indices = @transform_5, window_bounds = array<i64: 1, 1, 128>}, {transform_indices = @transform_6, window_bounds = array<i64: 1, 8, 8, 128>}]} {
    %cst = arith.constant 0.000000e+00 : f32
    %0 = vector.broadcast %cst : f32 to vector<64x128xf32>
    %c0 = arith.constant 0 : index
    %c0_0 = arith.constant 0 : index
    %c0_1 = arith.constant 0 : index
    %c0_2 = arith.constant 0 : index
    %1 = vector.load %arg1[%c0, %c0_0, %c0_1, %c0_2] : memref<1x9x9x128xbf16, #tpu.memory_space<vmem>>, vector<1x8x8x128xbf16>
    %2 = vector.shape_cast %1 : vector<1x8x8x128xbf16> to vector<64x128xbf16>
    %c0_3 = arith.constant 0 : index
    %c0_4 = arith.constant 0 : index
    %c0_5 = arith.constant 0 : index
    %3 = vector.load %arg5[%c0_3, %c0_4, %c0_5] : memref<9x128x128xbf16, #tpu.memory_space<vmem>>, vector<1x128x128xbf16>
    %4 = vector.shape_cast %3 : vector<1x128x128xbf16> to vector<128x128xbf16>
    %cst_6 = arith.constant dense<0.000000e+00> : vector<64x128xf32>
    %5 = tpu.matmul %2, %4, %cst_6 {dimension_numbers = #tpu.dot_dimension_numbers<[1], [0], [0], [1], [0, 0, 1, 1], [], []>} : vector<64x128xbf16>, vector<128x128xbf16>, vector<64x128xf32> -> vector<64x128xf32>
    %6 = arith.addf %0, %5 : vector<64x128xf32>
    %c0_7 = arith.constant 0 : index
    %c0_8 = arith.constant 0 : index
    %c0_9 = arith.constant 0 : index
    %c0_10 = arith.constant 0 : index
    %7 = vector.load %arg2[%c0_7, %c0_8, %c0_9, %c0_10] : memref<1x9x9x128xbf16, #tpu.memory_space<vmem>>, vector<1x8x8x128xbf16>
    %8 = vector.shape_cast %7 : vector<1x8x8x128xbf16> to vector<64x128xbf16>
    %c1 = arith.constant 1 : index
    %c0_11 = arith.constant 0 : index
    %c0_12 = arith.constant 0 : index
    %9 = vector.load %arg5[%c1, %c0_11, %c0_12] : memref<9x128x128xbf16, #tpu.memory_space<vmem>>, vector<1x128x128xbf16>
    %10 = vector.shape_cast %9 : vector<1x128x128xbf16> to vector<128x128xbf16>
    %cst_13 = arith.constant dense<0.000000e+00> : vector<64x128xf32>
    %11 = tpu.matmul %8, %10, %cst_13 {dimension_numbers = #tpu.dot_dimension_numbers<[1], [0], [0], [1], [0, 0, 1, 1], [], []>} : vector<64x128xbf16>, vector<128x128xbf16>, vector<64x128xf32> -> vector<64x128xf32>
    %12 = arith.addf %6, %11 : vector<64x128xf32>
    %c0_14 = arith.constant 0 : index
    %c0_15 = arith.constant 0 : index
    %c1_16 = arith.constant 1 : index
    %c0_17 = arith.constant 0 : index
    %13 = vector.load %arg1[%c0_14, %c0_15, %c1_16, %c0_17] : memref<1x9x9x128xbf16, #tpu.memory_space<vmem>>, vector<1x8x8x128xbf16>
    %14 = vector.shape_cast %13 : vector<1x8x8x128xbf16> to vector<64x128xbf16>
    %c2 = arith.constant 2 : index
    %c0_18 = arith.constant 0 : index
    %c0_19 = arith.constant 0 : index
    %15 = vector.load %arg5[%c2, %c0_18, %c0_19] : memref<9x128x128xbf16, #tpu.memory_space<vmem>>, vector<1x128x128xbf16>
    %16 = vector.shape_cast %15 : vector<1x128x128xbf16> to vector<128x128xbf16>
    %cst_20 = arith.constant dense<0.000000e+00> : vector<64x128xf32>
    %17 = tpu.matmul %14, %16, %cst_20 {dimension_numbers = #tpu.dot_dimension_numbers<[1], [0], [0], [1], [0, 0, 1, 1], [], []>} : vector<64x128xbf16>, vector<128x128xbf16>, vector<64x128xf32> -> vector<64x128xf32>
    %18 = arith.addf %12, %17 : vector<64x128xf32>
    %c0_21 = arith.constant 0 : index
    %c0_22 = arith.constant 0 : index
    %c0_23 = arith.constant 0 : index
    %c0_24 = arith.constant 0 : index
    %19 = vector.load %arg3[%c0_21, %c0_22, %c0_23, %c0_24] : memref<1x9x9x128xbf16, #tpu.memory_space<vmem>>, vector<1x8x8x128xbf16>
    %20 = vector.shape_cast %19 : vector<1x8x8x128xbf16> to vector<64x128xbf16>
    %c3 = arith.constant 3 : index
    %c0_25 = arith.constant 0 : index
    %c0_26 = arith.constant 0 : index
    %21 = vector.load %arg5[%c3, %c0_25, %c0_26] : memref<9x128x128xbf16, #tpu.memory_space<vmem>>, vector<1x128x128xbf16>
    %22 = vector.shape_cast %21 : vector<1x128x128xbf16> to vector<128x128xbf16>
    %cst_27 = arith.constant dense<0.000000e+00> : vector<64x128xf32>
    %23 = tpu.matmul %20, %22, %cst_27 {dimension_numbers = #tpu.dot_dimension_numbers<[1], [0], [0], [1], [0, 0, 1, 1], [], []>} : vector<64x128xbf16>, vector<128x128xbf16>, vector<64x128xf32> -> vector<64x128xf32>
    %24 = arith.addf %18, %23 : vector<64x128xf32>
    %c0_28 = arith.constant 0 : index
    %c0_29 = arith.constant 0 : index
    %c0_30 = arith.constant 0 : index
    %c0_31 = arith.constant 0 : index
    %25 = vector.load %arg4[%c0_28, %c0_29, %c0_30, %c0_31] : memref<1x9x9x128xbf16, #tpu.memory_space<vmem>>, vector<1x8x8x128xbf16>
    %26 = vector.shape_cast %25 : vector<1x8x8x128xbf16> to vector<64x128xbf16>
    %c4 = arith.constant 4 : index
    %c0_32 = arith.constant 0 : index
    %c0_33 = arith.constant 0 : index
    %27 = vector.load %arg5[%c4, %c0_32, %c0_33] : memref<9x128x128xbf16, #tpu.memory_space<vmem>>, vector<1x128x128xbf16>
    %28 = vector.shape_cast %27 : vector<1x128x128xbf16> to vector<128x128xbf16>
    %cst_34 = arith.constant dense<0.000000e+00> : vector<64x128xf32>
    %29 = tpu.matmul %26, %28, %cst_34 {dimension_numbers = #tpu.dot_dimension_numbers<[1], [0], [0], [1], [0, 0, 1, 1], [], []>} : vector<64x128xbf16>, vector<128x128xbf16>, vector<64x128xf32> -> vector<64x128xf32>
    %30 = arith.addf %24, %29 : vector<64x128xf32>
    %c0_35 = arith.constant 0 : index
    %c0_36 = arith.constant 0 : index
    %c1_37 = arith.constant 1 : index
    %c0_38 = arith.constant 0 : index
    %31 = vector.load %arg3[%c0_35, %c0_36, %c1_37, %c0_38] : memref<1x9x9x128xbf16, #tpu.memory_space<vmem>>, vector<1x8x8x128xbf16>
    %32 = vector.shape_cast %31 : vector<1x8x8x128xbf16> to vector<64x128xbf16>
    %c5 = arith.constant 5 : index
    %c0_39 = arith.constant 0 : index
    %c0_40 = arith.constant 0 : index
    %33 = vector.load %arg5[%c5, %c0_39, %c0_40] : memref<9x128x128xbf16, #tpu.memory_space<vmem>>, vector<1x128x128xbf16>
    %34 = vector.shape_cast %33 : vector<1x128x128xbf16> to vector<128x128xbf16>
    %cst_41 = arith.constant dense<0.000000e+00> : vector<64x128xf32>
    %35 = tpu.matmul %32, %34, %cst_41 {dimension_numbers = #tpu.dot_dimension_numbers<[1], [0], [0], [1], [0, 0, 1, 1], [], []>} : vector<64x128xbf16>, vector<128x128xbf16>, vector<64x128xf32> -> vector<64x128xf32>
    %36 = arith.addf %30, %35 : vector<64x128xf32>
    %c0_42 = arith.constant 0 : index
    %c1_43 = arith.constant 1 : index
    %c0_44 = arith.constant 0 : index
    %c0_45 = arith.constant 0 : index
    %37 = vector.load %arg1[%c0_42, %c1_43, %c0_44, %c0_45] : memref<1x9x9x128xbf16, #tpu.memory_space<vmem>>, vector<1x8x8x128xbf16>
    %38 = vector.shape_cast %37 : vector<1x8x8x128xbf16> to vector<64x128xbf16>
    %c6 = arith.constant 6 : index
    %c0_46 = arith.constant 0 : index
    %c0_47 = arith.constant 0 : index
    %39 = vector.load %arg5[%c6, %c0_46, %c0_47] : memref<9x128x128xbf16, #tpu.memory_space<vmem>>, vector<1x128x128xbf16>
    %40 = vector.shape_cast %39 : vector<1x128x128xbf16> to vector<128x128xbf16>
    %cst_48 = arith.constant dense<0.000000e+00> : vector<64x128xf32>
    %41 = tpu.matmul %38, %40, %cst_48 {dimension_numbers = #tpu.dot_dimension_numbers<[1], [0], [0], [1], [0, 0, 1, 1], [], []>} : vector<64x128xbf16>, vector<128x128xbf16>, vector<64x128xf32> -> vector<64x128xf32>
    %42 = arith.addf %36, %41 : vector<64x128xf32>
    %c0_49 = arith.constant 0 : index
    %c1_50 = arith.constant 1 : index
    %c0_51 = arith.constant 0 : index
    %c0_52 = arith.constant 0 : index
    %43 = vector.load %arg2[%c0_49, %c1_50, %c0_51, %c0_52] : memref<1x9x9x128xbf16, #tpu.memory_space<vmem>>, vector<1x8x8x128xbf16>
    %44 = vector.shape_cast %43 : vector<1x8x8x128xbf16> to vector<64x128xbf16>
    %c7 = arith.constant 7 : index
    %c0_53 = arith.constant 0 : index
    %c0_54 = arith.constant 0 : index
    %45 = vector.load %arg5[%c7, %c0_53, %c0_54] : memref<9x128x128xbf16, #tpu.memory_space<vmem>>, vector<1x128x128xbf16>
    %46 = vector.shape_cast %45 : vector<1x128x128xbf16> to vector<128x128xbf16>
    %cst_55 = arith.constant dense<0.000000e+00> : vector<64x128xf32>
    %47 = tpu.matmul %44, %46, %cst_55 {dimension_numbers = #tpu.dot_dimension_numbers<[1], [0], [0], [1], [0, 0, 1, 1], [], []>} : vector<64x128xbf16>, vector<128x128xbf16>, vector<64x128xf32> -> vector<64x128xf32>
    %48 = arith.addf %42, %47 : vector<64x128xf32>
    %c0_56 = arith.constant 0 : index
    %c1_57 = arith.constant 1 : index
    %c1_58 = arith.constant 1 : index
    %c0_59 = arith.constant 0 : index
    %49 = vector.load %arg1[%c0_56, %c1_57, %c1_58, %c0_59] : memref<1x9x9x128xbf16, #tpu.memory_space<vmem>>, vector<1x8x8x128xbf16>
    %50 = vector.shape_cast %49 : vector<1x8x8x128xbf16> to vector<64x128xbf16>
    %c8 = arith.constant 8 : index
    %c0_60 = arith.constant 0 : index
    %c0_61 = arith.constant 0 : index
    %51 = vector.load %arg5[%c8, %c0_60, %c0_61] : memref<9x128x128xbf16, #tpu.memory_space<vmem>>, vector<1x128x128xbf16>
    %52 = vector.shape_cast %51 : vector<1x128x128xbf16> to vector<128x128xbf16>
    %cst_62 = arith.constant dense<0.000000e+00> : vector<64x128xf32>
    %53 = tpu.matmul %50, %52, %cst_62 {dimension_numbers = #tpu.dot_dimension_numbers<[1], [0], [0], [1], [0, 0, 1, 1], [], []>} : vector<64x128xbf16>, vector<128x128xbf16>, vector<64x128xf32> -> vector<64x128xf32>
    %54 = arith.addf %48, %53 : vector<64x128xf32>
    %c0_63 = arith.constant 0 : index
    %c0_64 = arith.constant 0 : index
    %c0_65 = arith.constant 0 : index
    %55 = vector.load %arg6[%c0_63, %c0_64, %c0_65] : memref<1x1x128xf32, #tpu.memory_space<vmem>>, vector<1x1x128xf32>
    %56 = vector.shape_cast %55 : vector<1x1x128xf32> to vector<1x128xf32>
    %57 = vector.broadcast %56 : vector<1x128xf32> to vector<64x128xf32>
    %58 = arith.addf %54, %57 : vector<64x128xf32>
    %cst_66 = arith.constant 0.000000e+00 : f32
    %59 = vector.broadcast %cst_66 : f32 to vector<64x128xf32>
    %60 = arith.maximumf %58, %59 : vector<64x128xf32>
    %61 = vector.shape_cast %60 : vector<64x128xf32> to vector<1x8x8x128xf32>
    %62 = arith.truncf %61 : vector<1x8x8x128xf32> to vector<1x8x8x128xbf16>
    %c0_67 = arith.constant 0 : index
    %c0_68 = arith.constant 0 : index
    %c0_69 = arith.constant 0 : index
    %c0_70 = arith.constant 0 : index
    %63 = vector.load %arg7[%c0_67, %c0_68, %c0_69, %c0_70] : memref<1x8x8x128xbf16, #tpu.memory_space<vmem>>, vector<1x8x8x128xbf16>
    tpu.vector_store %arg7[%c0_67, %c0_68, %c0_69, %c0_70], %62 {strides = array<i32>} : memref<1x8x8x128xbf16, #tpu.memory_space<vmem>>, vector<1x8x8x128xbf16>,
    return
  }
  func.func @transform_0(%arg0: i32) -> (i32, i32, i32, i32) {
    %c0_i32 = arith.constant 0 : i32
    %c0_i32_0 = arith.constant 0 : i32
    %c0_i32_1 = arith.constant 0 : i32
    %c0_i32_2 = arith.constant 0 : i32
    return %arg0, %c0_i32, %c0_i32_0, %c0_i32_1 : i32, i32, i32, i32
  }
  func.func @transform_1(%arg0: i32) -> (i32, i32, i32, i32) {
    %c0_i32 = arith.constant 0 : i32
    %c0_i32_0 = arith.constant 0 : i32
    %c0_i32_1 = arith.constant 0 : i32
    %c0_i32_2 = arith.constant 0 : i32
    return %arg0, %c0_i32, %c0_i32_0, %c0_i32_1 : i32, i32, i32, i32
  }
  func.func @transform_2(%arg0: i32) -> (i32, i32, i32, i32) {
    %c0_i32 = arith.constant 0 : i32
    %c0_i32_0 = arith.constant 0 : i32
    %c0_i32_1 = arith.constant 0 : i32
    %c0_i32_2 = arith.constant 0 : i32
    return %arg0, %c0_i32, %c0_i32_0, %c0_i32_1 : i32, i32, i32, i32
  }
  func.func @transform_3(%arg0: i32) -> (i32, i32, i32, i32) {
    %c0_i32 = arith.constant 0 : i32
    %c0_i32_0 = arith.constant 0 : i32
    %c0_i32_1 = arith.constant 0 : i32
    %c0_i32_2 = arith.constant 0 : i32
    return %arg0, %c0_i32, %c0_i32_0, %c0_i32_1 : i32, i32, i32, i32
  }
  func.func @transform_4(%arg0: i32) -> (i32, i32, i32) {
    %c0_i32 = arith.constant 0 : i32
    %c0_i32_0 = arith.constant 0 : i32
    %c0_i32_1 = arith.constant 0 : i32
    %c0_i32_2 = arith.constant 0 : i32
    return %c0_i32, %c0_i32_0, %c0_i32_1 : i32, i32, i32
  }
  func.func @transform_5(%arg0: i32) -> (i32, i32, i32) {
    %c0_i32 = arith.constant 0 : i32
    %c0_i32_0 = arith.constant 0 : i32
    %c0_i32_1 = arith.constant 0 : i32
    %c0_i32_2 = arith.constant 0 : i32
    return %c0_i32, %c0_i32_0, %c0_i32_1 : i32, i32, i32
  }
  func.func @transform_6(%arg0: i32) -> (i32, i32, i32, i32) {
    %c0_i32 = arith.constant 0 : i32
    %c0_i32_0 = arith.constant 0 : i32
    %c0_i32_1 = arith.constant 0 : i32
    %c0_i32_2 = arith.constant 0 : i32
    return %arg0, %c0_i32, %c0_i32_0, %c0_i32_1 : i32, i32, i32, i32
  }
}

module attributes {stable_mosaic.version = 11 : i64} {
  func.func @kernel(%arg0: i32, %arg1: memref<1x5x5x128xbf16, #tpu.memory_space<vmem>>, %arg2: memref<1x5x5x128xbf16, #tpu.memory_space<vmem>>, %arg3: memref<1x5x5x128xbf16, #tpu.memory_space<vmem>>, %arg4: memref<1x5x5x128xbf16, #tpu.memory_space<vmem>>, %arg5: memref<9x128x128xbf16, #tpu.memory_space<vmem>>, %arg6: memref<1x1x128xf32, #tpu.memory_space<vmem>>, %arg7: memref<1x4x4x128xbf16, #tpu.memory_space<vmem>>) attributes {dimension_semantics = [#tpu.dimension_semantics<parallel>], iteration_bounds = array<i64: 2>, scalar_prefetch = 0 : i64, scratch_operands = 0 : i64, tpu.core_type = #tpu.core_type<tc>, window_params = [{transform_indices = @transform_0, window_bounds = array<i64: 1, 5, 5, 128>}, {transform_indices = @transform_1, window_bounds = array<i64: 1, 5, 5, 128>}, {transform_indices = @transform_2, window_bounds = array<i64: 1, 5, 5, 128>}, {transform_indices = @transform_3, window_bounds = array<i64: 1, 5, 5, 128>}, {pipeline_mode = #tpu.pipeline_mode<synchronous>, transform_indices = @transform_4, window_bounds = array<i64: 9, 128, 128>}, {pipeline_mode = #tpu.pipeline_mode<synchronous>, transform_indices = @transform_5, window_bounds = array<i64: 1, 1, 128>}, {transform_indices = @transform_6, window_bounds = array<i64: 1, 4, 4, 128>}]} {
    %cst = arith.constant 0.000000e+00 : f32
    %0 = vector.broadcast %cst : f32 to vector<16x128xf32>
    %c0 = arith.constant 0 : index
    %c0_0 = arith.constant 0 : index
    %c0_1 = arith.constant 0 : index
    %c0_2 = arith.constant 0 : index
    %1 = vector.load %arg1[%c0, %c0_0, %c0_1, %c0_2] : memref<1x5x5x128xbf16, #tpu.memory_space<vmem>>, vector<1x4x4x128xbf16>
    %2 = vector.shape_cast %1 : vector<1x4x4x128xbf16> to vector<16x128xbf16>
    %c0_3 = arith.constant 0 : index
    %c0_4 = arith.constant 0 : index
    %c0_5 = arith.constant 0 : index
    %3 = vector.load %arg5[%c0_3, %c0_4, %c0_5] : memref<9x128x128xbf16, #tpu.memory_space<vmem>>, vector<1x128x128xbf16>
    %4 = vector.shape_cast %3 : vector<1x128x128xbf16> to vector<128x128xbf16>
    %cst_6 = arith.constant dense<0.000000e+00> : vector<16x128xf32>
    %5 = tpu.matmul %2, %4, %cst_6 {dimension_numbers = #tpu.dot_dimension_numbers<[1], [0], [0], [1], [0, 0, 1, 1], [], []>} : vector<16x128xbf16>, vector<128x128xbf16>, vector<16x128xf32> -> vector<16x128xf32>
    %6 = arith.addf %0, %5 : vector<16x128xf32>
    %c0_7 = arith.constant 0 : index
    %c0_8 = arith.constant 0 : index
    %c0_9 = arith.constant 0 : index
    %c0_10 = arith.constant 0 : index
    %7 = vector.load %arg2[%c0_7, %c0_8, %c0_9, %c0_10] : memref<1x5x5x128xbf16, #tpu.memory_space<vmem>>, vector<1x4x4x128xbf16>
    %8 = vector.shape_cast %7 : vector<1x4x4x128xbf16> to vector<16x128xbf16>
    %c1 = arith.constant 1 : index
    %c0_11 = arith.constant 0 : index
    %c0_12 = arith.constant 0 : index
    %9 = vector.load %arg5[%c1, %c0_11, %c0_12] : memref<9x128x128xbf16, #tpu.memory_space<vmem>>, vector<1x128x128xbf16>
    %10 = vector.shape_cast %9 : vector<1x128x128xbf16> to vector<128x128xbf16>
    %cst_13 = arith.constant dense<0.000000e+00> : vector<16x128xf32>
    %11 = tpu.matmul %8, %10, %cst_13 {dimension_numbers = #tpu.dot_dimension_numbers<[1], [0], [0], [1], [0, 0, 1, 1], [], []>} : vector<16x128xbf16>, vector<128x128xbf16>, vector<16x128xf32> -> vector<16x128xf32>
    %12 = arith.addf %6, %11 : vector<16x128xf32>
    %c0_14 = arith.constant 0 : index
    %c0_15 = arith.constant 0 : index
    %c1_16 = arith.constant 1 : index
    %c0_17 = arith.constant 0 : index
    %13 = vector.load %arg1[%c0_14, %c0_15, %c1_16, %c0_17] : memref<1x5x5x128xbf16, #tpu.memory_space<vmem>>, vector<1x4x4x128xbf16>
    %14 = vector.shape_cast %13 : vector<1x4x4x128xbf16> to vector<16x128xbf16>
    %c2 = arith.constant 2 : index
    %c0_18 = arith.constant 0 : index
    %c0_19 = arith.constant 0 : index
    %15 = vector.load %arg5[%c2, %c0_18, %c0_19] : memref<9x128x128xbf16, #tpu.memory_space<vmem>>, vector<1x128x128xbf16>
    %16 = vector.shape_cast %15 : vector<1x128x128xbf16> to vector<128x128xbf16>
    %cst_20 = arith.constant dense<0.000000e+00> : vector<16x128xf32>
    %17 = tpu.matmul %14, %16, %cst_20 {dimension_numbers = #tpu.dot_dimension_numbers<[1], [0], [0], [1], [0, 0, 1, 1], [], []>} : vector<16x128xbf16>, vector<128x128xbf16>, vector<16x128xf32> -> vector<16x128xf32>
    %18 = arith.addf %12, %17 : vector<16x128xf32>
    %c0_21 = arith.constant 0 : index
    %c0_22 = arith.constant 0 : index
    %c0_23 = arith.constant 0 : index
    %c0_24 = arith.constant 0 : index
    %19 = vector.load %arg3[%c0_21, %c0_22, %c0_23, %c0_24] : memref<1x5x5x128xbf16, #tpu.memory_space<vmem>>, vector<1x4x4x128xbf16>
    %20 = vector.shape_cast %19 : vector<1x4x4x128xbf16> to vector<16x128xbf16>
    %c3 = arith.constant 3 : index
    %c0_25 = arith.constant 0 : index
    %c0_26 = arith.constant 0 : index
    %21 = vector.load %arg5[%c3, %c0_25, %c0_26] : memref<9x128x128xbf16, #tpu.memory_space<vmem>>, vector<1x128x128xbf16>
    %22 = vector.shape_cast %21 : vector<1x128x128xbf16> to vector<128x128xbf16>
    %cst_27 = arith.constant dense<0.000000e+00> : vector<16x128xf32>
    %23 = tpu.matmul %20, %22, %cst_27 {dimension_numbers = #tpu.dot_dimension_numbers<[1], [0], [0], [1], [0, 0, 1, 1], [], []>} : vector<16x128xbf16>, vector<128x128xbf16>, vector<16x128xf32> -> vector<16x128xf32>
    %24 = arith.addf %18, %23 : vector<16x128xf32>
    %c0_28 = arith.constant 0 : index
    %c0_29 = arith.constant 0 : index
    %c0_30 = arith.constant 0 : index
    %c0_31 = arith.constant 0 : index
    %25 = vector.load %arg4[%c0_28, %c0_29, %c0_30, %c0_31] : memref<1x5x5x128xbf16, #tpu.memory_space<vmem>>, vector<1x4x4x128xbf16>
    %26 = vector.shape_cast %25 : vector<1x4x4x128xbf16> to vector<16x128xbf16>
    %c4 = arith.constant 4 : index
    %c0_32 = arith.constant 0 : index
    %c0_33 = arith.constant 0 : index
    %27 = vector.load %arg5[%c4, %c0_32, %c0_33] : memref<9x128x128xbf16, #tpu.memory_space<vmem>>, vector<1x128x128xbf16>
    %28 = vector.shape_cast %27 : vector<1x128x128xbf16> to vector<128x128xbf16>
    %cst_34 = arith.constant dense<0.000000e+00> : vector<16x128xf32>
    %29 = tpu.matmul %26, %28, %cst_34 {dimension_numbers = #tpu.dot_dimension_numbers<[1], [0], [0], [1], [0, 0, 1, 1], [], []>} : vector<16x128xbf16>, vector<128x128xbf16>, vector<16x128xf32> -> vector<16x128xf32>
    %30 = arith.addf %24, %29 : vector<16x128xf32>
    %c0_35 = arith.constant 0 : index
    %c0_36 = arith.constant 0 : index
    %c1_37 = arith.constant 1 : index
    %c0_38 = arith.constant 0 : index
    %31 = vector.load %arg3[%c0_35, %c0_36, %c1_37, %c0_38] : memref<1x5x5x128xbf16, #tpu.memory_space<vmem>>, vector<1x4x4x128xbf16>
    %32 = vector.shape_cast %31 : vector<1x4x4x128xbf16> to vector<16x128xbf16>
    %c5 = arith.constant 5 : index
    %c0_39 = arith.constant 0 : index
    %c0_40 = arith.constant 0 : index
    %33 = vector.load %arg5[%c5, %c0_39, %c0_40] : memref<9x128x128xbf16, #tpu.memory_space<vmem>>, vector<1x128x128xbf16>
    %34 = vector.shape_cast %33 : vector<1x128x128xbf16> to vector<128x128xbf16>
    %cst_41 = arith.constant dense<0.000000e+00> : vector<16x128xf32>
    %35 = tpu.matmul %32, %34, %cst_41 {dimension_numbers = #tpu.dot_dimension_numbers<[1], [0], [0], [1], [0, 0, 1, 1], [], []>} : vector<16x128xbf16>, vector<128x128xbf16>, vector<16x128xf32> -> vector<16x128xf32>
    %36 = arith.addf %30, %35 : vector<16x128xf32>
    %c0_42 = arith.constant 0 : index
    %c1_43 = arith.constant 1 : index
    %c0_44 = arith.constant 0 : index
    %c0_45 = arith.constant 0 : index
    %37 = vector.load %arg1[%c0_42, %c1_43, %c0_44, %c0_45] : memref<1x5x5x128xbf16, #tpu.memory_space<vmem>>, vector<1x4x4x128xbf16>
    %38 = vector.shape_cast %37 : vector<1x4x4x128xbf16> to vector<16x128xbf16>
    %c6 = arith.constant 6 : index
    %c0_46 = arith.constant 0 : index
    %c0_47 = arith.constant 0 : index
    %39 = vector.load %arg5[%c6, %c0_46, %c0_47] : memref<9x128x128xbf16, #tpu.memory_space<vmem>>, vector<1x128x128xbf16>
    %40 = vector.shape_cast %39 : vector<1x128x128xbf16> to vector<128x128xbf16>
    %cst_48 = arith.constant dense<0.000000e+00> : vector<16x128xf32>
    %41 = tpu.matmul %38, %40, %cst_48 {dimension_numbers = #tpu.dot_dimension_numbers<[1], [0], [0], [1], [0, 0, 1, 1], [], []>} : vector<16x128xbf16>, vector<128x128xbf16>, vector<16x128xf32> -> vector<16x128xf32>
    %42 = arith.addf %36, %41 : vector<16x128xf32>
    %c0_49 = arith.constant 0 : index
    %c1_50 = arith.constant 1 : index
    %c0_51 = arith.constant 0 : index
    %c0_52 = arith.constant 0 : index
    %43 = vector.load %arg2[%c0_49, %c1_50, %c0_51, %c0_52] : memref<1x5x5x128xbf16, #tpu.memory_space<vmem>>, vector<1x4x4x128xbf16>
    %44 = vector.shape_cast %43 : vector<1x4x4x128xbf16> to vector<16x128xbf16>
    %c7 = arith.constant 7 : index
    %c0_53 = arith.constant 0 : index
    %c0_54 = arith.constant 0 : index
    %45 = vector.load %arg5[%c7, %c0_53, %c0_54] : memref<9x128x128xbf16, #tpu.memory_space<vmem>>, vector<1x128x128xbf16>
    %46 = vector.shape_cast %45 : vector<1x128x128xbf16> to vector<128x128xbf16>
    %cst_55 = arith.constant dense<0.000000e+00> : vector<16x128xf32>
    %47 = tpu.matmul %44, %46, %cst_55 {dimension_numbers = #tpu.dot_dimension_numbers<[1], [0], [0], [1], [0, 0, 1, 1], [], []>} : vector<16x128xbf16>, vector<128x128xbf16>, vector<16x128xf32> -> vector<16x128xf32>
    %48 = arith.addf %42, %47 : vector<16x128xf32>
    %c0_56 = arith.constant 0 : index
    %c1_57 = arith.constant 1 : index
    %c1_58 = arith.constant 1 : index
    %c0_59 = arith.constant 0 : index
    %49 = vector.load %arg1[%c0_56, %c1_57, %c1_58, %c0_59] : memref<1x5x5x128xbf16, #tpu.memory_space<vmem>>, vector<1x4x4x128xbf16>
    %50 = vector.shape_cast %49 : vector<1x4x4x128xbf16> to vector<16x128xbf16>
    %c8 = arith.constant 8 : index
    %c0_60 = arith.constant 0 : index
    %c0_61 = arith.constant 0 : index
    %51 = vector.load %arg5[%c8, %c0_60, %c0_61] : memref<9x128x128xbf16, #tpu.memory_space<vmem>>, vector<1x128x128xbf16>
    %52 = vector.shape_cast %51 : vector<1x128x128xbf16> to vector<128x128xbf16>
    %cst_62 = arith.constant dense<0.000000e+00> : vector<16x128xf32>
    %53 = tpu.matmul %50, %52, %cst_62 {dimension_numbers = #tpu.dot_dimension_numbers<[1], [0], [0], [1], [0, 0, 1, 1], [], []>} : vector<16x128xbf16>, vector<128x128xbf16>, vector<16x128xf32> -> vector<16x128xf32>
    %54 = arith.addf %48, %53 : vector<16x128xf32>
    %c0_63 = arith.constant 0 : index
    %c0_64 = arith.constant 0 : index
    %c0_65 = arith.constant 0 : index
    %55 = vector.load %arg6[%c0_63, %c0_64, %c0_65] : memref<1x1x128xf32, #tpu.memory_space<vmem>>, vector<1x1x128xf32>
    %56 = vector.shape_cast %55 : vector<1x1x128xf32> to vector<1x128xf32>
    %57 = vector.broadcast %56 : vector<1x128xf32> to vector<16x128xf32>
    %58 = arith.addf %54, %57 : vector<16x128xf32>
    %cst_66 = arith.constant 0.000000e+00 : f32
    %59 = vector.broadcast %cst_66 : f32 to vector<16x128xf32>
    %60 = arith.maximumf %58, %59 : vector<16x128xf32>
    %61 = vector.shape_cast %60 : vector<16x128xf32> to vector<1x4x4x128xf32>
    %62 = arith.truncf %61 : vector<1x4x4x128xf32> to vector<1x4x4x128xbf16>
    %c0_67 = arith.constant 0 : index
    %c0_68 = arith.constant 0 : index
    %c0_69 = arith.constant 0 : index
    %c0_70 = arith.constant 0 : index
    %63 = vector.load %arg7[%c0_67, %c0_68, %c0_69, %c0_70] : memref<1x4x4x128xbf16, #tpu.memory_space<vmem>>, vector<1x4x4x128xbf16>
    tpu.vector_store %arg7[%c0_67, %c0_68, %c0_69, %c0_70], %62 {strides = array<i32>} : memref<1x4x4x128xbf16, #tpu.memory_space<vmem>>, vector<1x4x4x128xbf16>,
    return
  }
  func.func @transform_0(%arg0: i32) -> (i32, i32, i32, i32) {
    %c0_i32 = arith.constant 0 : i32
    %c0_i32_0 = arith.constant 0 : i32
    %c0_i32_1 = arith.constant 0 : i32
    %c0_i32_2 = arith.constant 0 : i32
    return %arg0, %c0_i32, %c0_i32_0, %c0_i32_1 : i32, i32, i32, i32
  }
  func.func @transform_1(%arg0: i32) -> (i32, i32, i32, i32) {
    %c0_i32 = arith.constant 0 : i32
    %c0_i32_0 = arith.constant 0 : i32
    %c0_i32_1 = arith.constant 0 : i32
    %c0_i32_2 = arith.constant 0 : i32
    return %arg0, %c0_i32, %c0_i32_0, %c0_i32_1 : i32, i32, i32, i32
  }
  func.func @transform_2(%arg0: i32) -> (i32, i32, i32, i32) {
    %c0_i32 = arith.constant 0 : i32
    %c0_i32_0 = arith.constant 0 : i32
    %c0_i32_1 = arith.constant 0 : i32
    %c0_i32_2 = arith.constant 0 : i32
    return %arg0, %c0_i32, %c0_i32_0, %c0_i32_1 : i32, i32, i32, i32
  }
  func.func @transform_3(%arg0: i32) -> (i32, i32, i32, i32) {
    %c0_i32 = arith.constant 0 : i32
    %c0_i32_0 = arith.constant 0 : i32
    %c0_i32_1 = arith.constant 0 : i32
    %c0_i32_2 = arith.constant 0 : i32
    return %arg0, %c0_i32, %c0_i32_0, %c0_i32_1 : i32, i32, i32, i32
  }
  func.func @transform_4(%arg0: i32) -> (i32, i32, i32) {
    %c0_i32 = arith.constant 0 : i32
    %c0_i32_0 = arith.constant 0 : i32
    %c0_i32_1 = arith.constant 0 : i32
    %c0_i32_2 = arith.constant 0 : i32
    return %c0_i32, %c0_i32_0, %c0_i32_1 : i32, i32, i32
  }
  func.func @transform_5(%arg0: i32) -> (i32, i32, i32) {
    %c0_i32 = arith.constant 0 : i32
    %c0_i32_0 = arith.constant 0 : i32
    %c0_i32_1 = arith.constant 0 : i32
    %c0_i32_2 = arith.constant 0 : i32
    return %c0_i32, %c0_i32_0, %c0_i32_1 : i32, i32, i32
  }
  func.func @transform_6(%arg0: i32) -> (i32, i32, i32, i32) {
    %c0_i32 = arith.constant 0 : i32
    %c0_i32_0 = arith.constant 0 : i32
    %c0_i32_1 = arith.constant 0 : i32
    %c0_i32_2 = arith.constant 0 : i32
    return %arg0, %c0_i32, %c0_i32_0, %c0_i32_1 : i32, i32, i32, i32
  }
}

module attributes {stable_mosaic.version = 11 : i64} {
  func.func @kernel(%arg0: i32, %arg1: memref<1x8x8x128xbf16, #tpu.memory_space<vmem>>, %arg2: memref<9x128x128xbf16, #tpu.memory_space<vmem>>, %arg3: memref<1x1x128xf32, #tpu.memory_space<vmem>>, %arg4: memref<1x4x4x128xbf16, #tpu.memory_space<vmem>>) attributes {dimension_semantics = [#tpu.dimension_semantics<parallel>], iteration_bounds = array<i64: 2>, scalar_prefetch = 0 : i64, scratch_operands = 0 : i64, tpu.core_type = #tpu.core_type<tc>, window_params = [{transform_indices = @transform_0, window_bounds = array<i64: 1, 8, 8, 128>}, {pipeline_mode = #tpu.pipeline_mode<synchronous>, transform_indices = @transform_1, window_bounds = array<i64: 9, 128, 128>}, {pipeline_mode = #tpu.pipeline_mode<synchronous>, transform_indices = @transform_2, window_bounds = array<i64: 1, 1, 128>}, {transform_indices = @transform_3, window_bounds = array<i64: 1, 4, 4, 128>}]} {
    %cst = arith.constant 0.000000e+00 : f32
    %0 = vector.broadcast %cst : f32 to vector<16x128xf32>
    %c0 = arith.constant 0 : index
    %c0_0 = arith.constant 0 : index
    %c0_1 = arith.constant 0 : index
    %c0_2 = arith.constant 0 : index
    %1 = vector.load %arg1[%c0, %c0_0, %c0_1, %c0_2] : memref<1x8x8x128xbf16, #tpu.memory_space<vmem>>, vector<1x4x4x128xbf16>
    %2 = vector.shape_cast %1 : vector<1x4x4x128xbf16> to vector<16x128xbf16>
    %c0_3 = arith.constant 0 : index
    %c0_4 = arith.constant 0 : index
    %c0_5 = arith.constant 0 : index
    %3 = vector.load %arg2[%c0_3, %c0_4, %c0_5] : memref<9x128x128xbf16, #tpu.memory_space<vmem>>, vector<1x128x128xbf16>
    %4 = vector.shape_cast %3 : vector<1x128x128xbf16> to vector<128x128xbf16>
    %cst_6 = arith.constant dense<0.000000e+00> : vector<16x128xf32>
    %5 = tpu.matmul %2, %4, %cst_6 {dimension_numbers = #tpu.dot_dimension_numbers<[1], [0], [0], [1], [0, 0, 1, 1], [], []>} : vector<16x128xbf16>, vector<128x128xbf16>, vector<16x128xf32> -> vector<16x128xf32>
    %6 = arith.addf %0, %5 : vector<16x128xf32>
    %c0_7 = arith.constant 0 : index
    %c0_8 = arith.constant 0 : index
    %c2 = arith.constant 2 : index
    %c0_9 = arith.constant 0 : index
    %7 = vector.load %arg1[%c0_7, %c0_8, %c2, %c0_9] : memref<1x8x8x128xbf16, #tpu.memory_space<vmem>>, vector<1x4x4x128xbf16>
    %8 = vector.shape_cast %7 : vector<1x4x4x128xbf16> to vector<16x128xbf16>
    %c1 = arith.constant 1 : index
    %c0_10 = arith.constant 0 : index
    %c0_11 = arith.constant 0 : index
    %9 = vector.load %arg2[%c1, %c0_10, %c0_11] : memref<9x128x128xbf16, #tpu.memory_space<vmem>>, vector<1x128x128xbf16>
    %10 = vector.shape_cast %9 : vector<1x128x128xbf16> to vector<128x128xbf16>
    %cst_12 = arith.constant dense<0.000000e+00> : vector<16x128xf32>
    %11 = tpu.matmul %8, %10, %cst_12 {dimension_numbers = #tpu.dot_dimension_numbers<[1], [0], [0], [1], [0, 0, 1, 1], [], []>} : vector<16x128xbf16>, vector<128x128xbf16>, vector<16x128xf32> -> vector<16x128xf32>
    %12 = arith.addf %6, %11 : vector<16x128xf32>
    %c0_13 = arith.constant 0 : index
    %c0_14 = arith.constant 0 : index
    %c4 = arith.constant 4 : index
    %c0_15 = arith.constant 0 : index
    %13 = vector.load %arg1[%c0_13, %c0_14, %c4, %c0_15] : memref<1x8x8x128xbf16, #tpu.memory_space<vmem>>, vector<1x4x4x128xbf16>
    %14 = vector.shape_cast %13 : vector<1x4x4x128xbf16> to vector<16x128xbf16>
    %c2_16 = arith.constant 2 : index
    %c0_17 = arith.constant 0 : index
    %c0_18 = arith.constant 0 : index
    %15 = vector.load %arg2[%c2_16, %c0_17, %c0_18] : memref<9x128x128xbf16, #tpu.memory_space<vmem>>, vector<1x128x128xbf16>
    %16 = vector.shape_cast %15 : vector<1x128x128xbf16> to vector<128x128xbf16>
    %cst_19 = arith.constant dense<0.000000e+00> : vector<16x128xf32>
    %17 = tpu.matmul %14, %16, %cst_19 {dimension_numbers = #tpu.dot_dimension_numbers<[1], [0], [0], [1], [0, 0, 1, 1], [], []>} : vector<16x128xbf16>, vector<128x128xbf16>, vector<16x128xf32> -> vector<16x128xf32>
    %18 = arith.addf %12, %17 : vector<16x128xf32>
    %c0_20 = arith.constant 0 : index
    %c2_21 = arith.constant 2 : index
    %c0_22 = arith.constant 0 : index
    %c0_23 = arith.constant 0 : index
    %19 = vector.load %arg1[%c0_20, %c2_21, %c0_22, %c0_23] : memref<1x8x8x128xbf16, #tpu.memory_space<vmem>>, vector<1x4x4x128xbf16>
    %20 = vector.shape_cast %19 : vector<1x4x4x128xbf16> to vector<16x128xbf16>
    %c3 = arith.constant 3 : index
    %c0_24 = arith.constant 0 : index
    %c0_25 = arith.constant 0 : index
    %21 = vector.load %arg2[%c3, %c0_24, %c0_25] : memref<9x128x128xbf16, #tpu.memory_space<vmem>>, vector<1x128x128xbf16>
    %22 = vector.shape_cast %21 : vector<1x128x128xbf16> to vector<128x128xbf16>
    %cst_26 = arith.constant dense<0.000000e+00> : vector<16x128xf32>
    %23 = tpu.matmul %20, %22, %cst_26 {dimension_numbers = #tpu.dot_dimension_numbers<[1], [0], [0], [1], [0, 0, 1, 1], [], []>} : vector<16x128xbf16>, vector<128x128xbf16>, vector<16x128xf32> -> vector<16x128xf32>
    %24 = arith.addf %18, %23 : vector<16x128xf32>
    %c0_27 = arith.constant 0 : index
    %c2_28 = arith.constant 2 : index
    %c2_29 = arith.constant 2 : index
    %c0_30 = arith.constant 0 : index
    %25 = vector.load %arg1[%c0_27, %c2_28, %c2_29, %c0_30] : memref<1x8x8x128xbf16, #tpu.memory_space<vmem>>, vector<1x4x4x128xbf16>
    %26 = vector.shape_cast %25 : vector<1x4x4x128xbf16> to vector<16x128xbf16>
    %c4_31 = arith.constant 4 : index
    %c0_32 = arith.constant 0 : index
    %c0_33 = arith.constant 0 : index
    %27 = vector.load %arg2[%c4_31, %c0_32, %c0_33] : memref<9x128x128xbf16, #tpu.memory_space<vmem>>, vector<1x128x128xbf16>
    %28 = vector.shape_cast %27 : vector<1x128x128xbf16> to vector<128x128xbf16>
    %cst_34 = arith.constant dense<0.000000e+00> : vector<16x128xf32>
    %29 = tpu.matmul %26, %28, %cst_34 {dimension_numbers = #tpu.dot_dimension_numbers<[1], [0], [0], [1], [0, 0, 1, 1], [], []>} : vector<16x128xbf16>, vector<128x128xbf16>, vector<16x128xf32> -> vector<16x128xf32>
    %30 = arith.addf %24, %29 : vector<16x128xf32>
    %c0_35 = arith.constant 0 : index
    %c2_36 = arith.constant 2 : index
    %c4_37 = arith.constant 4 : index
    %c0_38 = arith.constant 0 : index
    %31 = vector.load %arg1[%c0_35, %c2_36, %c4_37, %c0_38] : memref<1x8x8x128xbf16, #tpu.memory_space<vmem>>, vector<1x4x4x128xbf16>
    %32 = vector.shape_cast %31 : vector<1x4x4x128xbf16> to vector<16x128xbf16>
    %c5 = arith.constant 5 : index
    %c0_39 = arith.constant 0 : index
    %c0_40 = arith.constant 0 : index
    %33 = vector.load %arg2[%c5, %c0_39, %c0_40] : memref<9x128x128xbf16, #tpu.memory_space<vmem>>, vector<1x128x128xbf16>
    %34 = vector.shape_cast %33 : vector<1x128x128xbf16> to vector<128x128xbf16>
    %cst_41 = arith.constant dense<0.000000e+00> : vector<16x128xf32>
    %35 = tpu.matmul %32, %34, %cst_41 {dimension_numbers = #tpu.dot_dimension_numbers<[1], [0], [0], [1], [0, 0, 1, 1], [], []>} : vector<16x128xbf16>, vector<128x128xbf16>, vector<16x128xf32> -> vector<16x128xf32>
    %36 = arith.addf %30, %35 : vector<16x128xf32>
    %c0_42 = arith.constant 0 : index
    %c4_43 = arith.constant 4 : index
    %c0_44 = arith.constant 0 : index
    %c0_45 = arith.constant 0 : index
    %37 = vector.load %arg1[%c0_42, %c4_43, %c0_44, %c0_45] : memref<1x8x8x128xbf16, #tpu.memory_space<vmem>>, vector<1x4x4x128xbf16>
    %38 = vector.shape_cast %37 : vector<1x4x4x128xbf16> to vector<16x128xbf16>
    %c6 = arith.constant 6 : index
    %c0_46 = arith.constant 0 : index
    %c0_47 = arith.constant 0 : index
    %39 = vector.load %arg2[%c6, %c0_46, %c0_47] : memref<9x128x128xbf16, #tpu.memory_space<vmem>>, vector<1x128x128xbf16>
    %40 = vector.shape_cast %39 : vector<1x128x128xbf16> to vector<128x128xbf16>
    %cst_48 = arith.constant dense<0.000000e+00> : vector<16x128xf32>
    %41 = tpu.matmul %38, %40, %cst_48 {dimension_numbers = #tpu.dot_dimension_numbers<[1], [0], [0], [1], [0, 0, 1, 1], [], []>} : vector<16x128xbf16>, vector<128x128xbf16>, vector<16x128xf32> -> vector<16x128xf32>
    %42 = arith.addf %36, %41 : vector<16x128xf32>
    %c0_49 = arith.constant 0 : index
    %c4_50 = arith.constant 4 : index
    %c2_51 = arith.constant 2 : index
    %c0_52 = arith.constant 0 : index
    %43 = vector.load %arg1[%c0_49, %c4_50, %c2_51, %c0_52] : memref<1x8x8x128xbf16, #tpu.memory_space<vmem>>, vector<1x4x4x128xbf16>
    %44 = vector.shape_cast %43 : vector<1x4x4x128xbf16> to vector<16x128xbf16>
    %c7 = arith.constant 7 : index
    %c0_53 = arith.constant 0 : index
    %c0_54 = arith.constant 0 : index
    %45 = vector.load %arg2[%c7, %c0_53, %c0_54] : memref<9x128x128xbf16, #tpu.memory_space<vmem>>, vector<1x128x128xbf16>
    %46 = vector.shape_cast %45 : vector<1x128x128xbf16> to vector<128x128xbf16>
    %cst_55 = arith.constant dense<0.000000e+00> : vector<16x128xf32>
    %47 = tpu.matmul %44, %46, %cst_55 {dimension_numbers = #tpu.dot_dimension_numbers<[1], [0], [0], [1], [0, 0, 1, 1], [], []>} : vector<16x128xbf16>, vector<128x128xbf16>, vector<16x128xf32> -> vector<16x128xf32>
    %48 = arith.addf %42, %47 : vector<16x128xf32>
    %c0_56 = arith.constant 0 : index
    %c4_57 = arith.constant 4 : index
    %c4_58 = arith.constant 4 : index
    %c0_59 = arith.constant 0 : index
    %49 = vector.load %arg1[%c0_56, %c4_57, %c4_58, %c0_59] : memref<1x8x8x128xbf16, #tpu.memory_space<vmem>>, vector<1x4x4x128xbf16>
    %50 = vector.shape_cast %49 : vector<1x4x4x128xbf16> to vector<16x128xbf16>
    %c8 = arith.constant 8 : index
    %c0_60 = arith.constant 0 : index
    %c0_61 = arith.constant 0 : index
    %51 = vector.load %arg2[%c8, %c0_60, %c0_61] : memref<9x128x128xbf16, #tpu.memory_space<vmem>>, vector<1x128x128xbf16>
    %52 = vector.shape_cast %51 : vector<1x128x128xbf16> to vector<128x128xbf16>
    %cst_62 = arith.constant dense<0.000000e+00> : vector<16x128xf32>
    %53 = tpu.matmul %50, %52, %cst_62 {dimension_numbers = #tpu.dot_dimension_numbers<[1], [0], [0], [1], [0, 0, 1, 1], [], []>} : vector<16x128xbf16>, vector<128x128xbf16>, vector<16x128xf32> -> vector<16x128xf32>
    %54 = arith.addf %48, %53 : vector<16x128xf32>
    %c0_63 = arith.constant 0 : index
    %c0_64 = arith.constant 0 : index
    %c0_65 = arith.constant 0 : index
    %55 = vector.load %arg3[%c0_63, %c0_64, %c0_65] : memref<1x1x128xf32, #tpu.memory_space<vmem>>, vector<1x1x128xf32>
    %56 = vector.shape_cast %55 : vector<1x1x128xf32> to vector<1x128xf32>
    %57 = vector.broadcast %56 : vector<1x128xf32> to vector<16x128xf32>
    %58 = arith.addf %54, %57 : vector<16x128xf32>
    %cst_66 = arith.constant 0.000000e+00 : f32
    %59 = vector.broadcast %cst_66 : f32 to vector<16x128xf32>
    %60 = arith.maximumf %58, %59 : vector<16x128xf32>
    %61 = vector.shape_cast %60 : vector<16x128xf32> to vector<1x4x4x128xf32>
    %62 = arith.truncf %61 : vector<1x4x4x128xf32> to vector<1x4x4x128xbf16>
    %c0_67 = arith.constant 0 : index
    %c0_68 = arith.constant 0 : index
    %c0_69 = arith.constant 0 : index
    %c0_70 = arith.constant 0 : index
    %63 = vector.load %arg4[%c0_67, %c0_68, %c0_69, %c0_70] : memref<1x4x4x128xbf16, #tpu.memory_space<vmem>>, vector<1x4x4x128xbf16>
    tpu.vector_store %arg4[%c0_67, %c0_68, %c0_69, %c0_70], %62 {strides = array<i32>} : memref<1x4x4x128xbf16, #tpu.memory_space<vmem>>, vector<1x4x4x128xbf16>,
    return
  }
  func.func @transform_0(%arg0: i32) -> (i32, i32, i32, i32) {
    %c0_i32 = arith.constant 0 : i32
    %c0_i32_0 = arith.constant 0 : i32
    %c0_i32_1 = arith.constant 0 : i32
    %c0_i32_2 = arith.constant 0 : i32
    return %arg0, %c0_i32, %c0_i32_0, %c0_i32_1 : i32, i32, i32, i32
  }
  func.func @transform_1(%arg0: i32) -> (i32, i32, i32) {
    %c0_i32 = arith.constant 0 : i32
    %c0_i32_0 = arith.constant 0 : i32
    %c0_i32_1 = arith.constant 0 : i32
    %c0_i32_2 = arith.constant 0 : i32
    return %c0_i32, %c0_i32_0, %c0_i32_1 : i32, i32, i32
  }
  func.func @transform_2(%arg0: i32) -> (i32, i32, i32) {
    %c0_i32 = arith.constant 0 : i32
    %c0_i32_0 = arith.constant 0 : i32
    %c0_i32_1 = arith.constant 0 : i32
    %c0_i32_2 = arith.constant 0 : i32
    return %c0_i32, %c0_i32_0, %c0_i32_1 : i32, i32, i32
  }
  func.func @transform_3(%arg0: i32) -> (i32, i32, i32, i32) {
    %c0_i32 = arith.constant 0 : i32
    %c0_i32_0 = arith.constant 0 : i32
    %c0_i32_1 = arith.constant 0 : i32
    %c0_i32_2 = arith.constant 0 : i32
    return %arg0, %c0_i32, %c0_i32_0, %c0_i32_1 : i32, i32, i32, i32
  }
}

module attributes {stable_mosaic.version = 11 : i64} {
  func.func @kernel(%arg0: i32, %arg1: memref<1x8x8x128xbf16, #tpu.memory_space<vmem>>, %arg2: memref<9x128x128xbf16, #tpu.memory_space<vmem>>, %arg3: memref<1x1x128xf32, #tpu.memory_space<vmem>>, %arg4: memref<1x4x4x128xbf16, #tpu.memory_space<vmem>>, %arg5: memref<1x4x4x128xbf16, #tpu.memory_space<vmem>>) attributes {dimension_semantics = [#tpu.dimension_semantics<parallel>], iteration_bounds = array<i64: 2>, scalar_prefetch = 0 : i64, scratch_operands = 0 : i64, tpu.core_type = #tpu.core_type<tc>, window_params = [{transform_indices = @transform_0, window_bounds = array<i64: 1, 8, 8, 128>}, {pipeline_mode = #tpu.pipeline_mode<synchronous>, transform_indices = @transform_1, window_bounds = array<i64: 9, 128, 128>}, {pipeline_mode = #tpu.pipeline_mode<synchronous>, transform_indices = @transform_2, window_bounds = array<i64: 1, 1, 128>}, {transform_indices = @transform_3, window_bounds = array<i64: 1, 4, 4, 128>}, {transform_indices = @transform_4, window_bounds = array<i64: 1, 4, 4, 128>}]} {
    %cst = arith.constant 0.000000e+00 : f32
    %0 = vector.broadcast %cst : f32 to vector<16x128xf32>
    %c0 = arith.constant 0 : index
    %c0_0 = arith.constant 0 : index
    %c0_1 = arith.constant 0 : index
    %c0_2 = arith.constant 0 : index
    %1 = vector.load %arg1[%c0, %c0_0, %c0_1, %c0_2] : memref<1x8x8x128xbf16, #tpu.memory_space<vmem>>, vector<1x4x4x128xbf16>
    %2 = vector.shape_cast %1 : vector<1x4x4x128xbf16> to vector<16x128xbf16>
    %c0_3 = arith.constant 0 : index
    %c0_4 = arith.constant 0 : index
    %c0_5 = arith.constant 0 : index
    %3 = vector.load %arg2[%c0_3, %c0_4, %c0_5] : memref<9x128x128xbf16, #tpu.memory_space<vmem>>, vector<1x128x128xbf16>
    %4 = vector.shape_cast %3 : vector<1x128x128xbf16> to vector<128x128xbf16>
    %cst_6 = arith.constant dense<0.000000e+00> : vector<16x128xf32>
    %5 = tpu.matmul %2, %4, %cst_6 {dimension_numbers = #tpu.dot_dimension_numbers<[1], [0], [0], [1], [0, 0, 1, 1], [], []>} : vector<16x128xbf16>, vector<128x128xbf16>, vector<16x128xf32> -> vector<16x128xf32>
    %6 = arith.addf %0, %5 : vector<16x128xf32>
    %c0_7 = arith.constant 0 : index
    %c0_8 = arith.constant 0 : index
    %c2 = arith.constant 2 : index
    %c0_9 = arith.constant 0 : index
    %7 = vector.load %arg1[%c0_7, %c0_8, %c2, %c0_9] : memref<1x8x8x128xbf16, #tpu.memory_space<vmem>>, vector<1x4x4x128xbf16>
    %8 = vector.shape_cast %7 : vector<1x4x4x128xbf16> to vector<16x128xbf16>
    %c1 = arith.constant 1 : index
    %c0_10 = arith.constant 0 : index
    %c0_11 = arith.constant 0 : index
    %9 = vector.load %arg2[%c1, %c0_10, %c0_11] : memref<9x128x128xbf16, #tpu.memory_space<vmem>>, vector<1x128x128xbf16>
    %10 = vector.shape_cast %9 : vector<1x128x128xbf16> to vector<128x128xbf16>
    %cst_12 = arith.constant dense<0.000000e+00> : vector<16x128xf32>
    %11 = tpu.matmul %8, %10, %cst_12 {dimension_numbers = #tpu.dot_dimension_numbers<[1], [0], [0], [1], [0, 0, 1, 1], [], []>} : vector<16x128xbf16>, vector<128x128xbf16>, vector<16x128xf32> -> vector<16x128xf32>
    %12 = arith.addf %6, %11 : vector<16x128xf32>
    %c0_13 = arith.constant 0 : index
    %c0_14 = arith.constant 0 : index
    %c4 = arith.constant 4 : index
    %c0_15 = arith.constant 0 : index
    %13 = vector.load %arg1[%c0_13, %c0_14, %c4, %c0_15] : memref<1x8x8x128xbf16, #tpu.memory_space<vmem>>, vector<1x4x4x128xbf16>
    %14 = vector.shape_cast %13 : vector<1x4x4x128xbf16> to vector<16x128xbf16>
    %c2_16 = arith.constant 2 : index
    %c0_17 = arith.constant 0 : index
    %c0_18 = arith.constant 0 : index
    %15 = vector.load %arg2[%c2_16, %c0_17, %c0_18] : memref<9x128x128xbf16, #tpu.memory_space<vmem>>, vector<1x128x128xbf16>
    %16 = vector.shape_cast %15 : vector<1x128x128xbf16> to vector<128x128xbf16>
    %cst_19 = arith.constant dense<0.000000e+00> : vector<16x128xf32>
    %17 = tpu.matmul %14, %16, %cst_19 {dimension_numbers = #tpu.dot_dimension_numbers<[1], [0], [0], [1], [0, 0, 1, 1], [], []>} : vector<16x128xbf16>, vector<128x128xbf16>, vector<16x128xf32> -> vector<16x128xf32>
    %18 = arith.addf %12, %17 : vector<16x128xf32>
    %c0_20 = arith.constant 0 : index
    %c2_21 = arith.constant 2 : index
    %c0_22 = arith.constant 0 : index
    %c0_23 = arith.constant 0 : index
    %19 = vector.load %arg1[%c0_20, %c2_21, %c0_22, %c0_23] : memref<1x8x8x128xbf16, #tpu.memory_space<vmem>>, vector<1x4x4x128xbf16>
    %20 = vector.shape_cast %19 : vector<1x4x4x128xbf16> to vector<16x128xbf16>
    %c3 = arith.constant 3 : index
    %c0_24 = arith.constant 0 : index
    %c0_25 = arith.constant 0 : index
    %21 = vector.load %arg2[%c3, %c0_24, %c0_25] : memref<9x128x128xbf16, #tpu.memory_space<vmem>>, vector<1x128x128xbf16>
    %22 = vector.shape_cast %21 : vector<1x128x128xbf16> to vector<128x128xbf16>
    %cst_26 = arith.constant dense<0.000000e+00> : vector<16x128xf32>
    %23 = tpu.matmul %20, %22, %cst_26 {dimension_numbers = #tpu.dot_dimension_numbers<[1], [0], [0], [1], [0, 0, 1, 1], [], []>} : vector<16x128xbf16>, vector<128x128xbf16>, vector<16x128xf32> -> vector<16x128xf32>
    %24 = arith.addf %18, %23 : vector<16x128xf32>
    %c0_27 = arith.constant 0 : index
    %c2_28 = arith.constant 2 : index
    %c2_29 = arith.constant 2 : index
    %c0_30 = arith.constant 0 : index
    %25 = vector.load %arg1[%c0_27, %c2_28, %c2_29, %c0_30] : memref<1x8x8x128xbf16, #tpu.memory_space<vmem>>, vector<1x4x4x128xbf16>
    %26 = vector.shape_cast %25 : vector<1x4x4x128xbf16> to vector<16x128xbf16>
    %c4_31 = arith.constant 4 : index
    %c0_32 = arith.constant 0 : index
    %c0_33 = arith.constant 0 : index
    %27 = vector.load %arg2[%c4_31, %c0_32, %c0_33] : memref<9x128x128xbf16, #tpu.memory_space<vmem>>, vector<1x128x128xbf16>
    %28 = vector.shape_cast %27 : vector<1x128x128xbf16> to vector<128x128xbf16>
    %cst_34 = arith.constant dense<0.000000e+00> : vector<16x128xf32>
    %29 = tpu.matmul %26, %28, %cst_34 {dimension_numbers = #tpu.dot_dimension_numbers<[1], [0], [0], [1], [0, 0, 1, 1], [], []>} : vector<16x128xbf16>, vector<128x128xbf16>, vector<16x128xf32> -> vector<16x128xf32>
    %30 = arith.addf %24, %29 : vector<16x128xf32>
    %c0_35 = arith.constant 0 : index
    %c2_36 = arith.constant 2 : index
    %c4_37 = arith.constant 4 : index
    %c0_38 = arith.constant 0 : index
    %31 = vector.load %arg1[%c0_35, %c2_36, %c4_37, %c0_38] : memref<1x8x8x128xbf16, #tpu.memory_space<vmem>>, vector<1x4x4x128xbf16>
    %32 = vector.shape_cast %31 : vector<1x4x4x128xbf16> to vector<16x128xbf16>
    %c5 = arith.constant 5 : index
    %c0_39 = arith.constant 0 : index
    %c0_40 = arith.constant 0 : index
    %33 = vector.load %arg2[%c5, %c0_39, %c0_40] : memref<9x128x128xbf16, #tpu.memory_space<vmem>>, vector<1x128x128xbf16>
    %34 = vector.shape_cast %33 : vector<1x128x128xbf16> to vector<128x128xbf16>
    %cst_41 = arith.constant dense<0.000000e+00> : vector<16x128xf32>
    %35 = tpu.matmul %32, %34, %cst_41 {dimension_numbers = #tpu.dot_dimension_numbers<[1], [0], [0], [1], [0, 0, 1, 1], [], []>} : vector<16x128xbf16>, vector<128x128xbf16>, vector<16x128xf32> -> vector<16x128xf32>
    %36 = arith.addf %30, %35 : vector<16x128xf32>
    %c0_42 = arith.constant 0 : index
    %c4_43 = arith.constant 4 : index
    %c0_44 = arith.constant 0 : index
    %c0_45 = arith.constant 0 : index
    %37 = vector.load %arg1[%c0_42, %c4_43, %c0_44, %c0_45] : memref<1x8x8x128xbf16, #tpu.memory_space<vmem>>, vector<1x4x4x128xbf16>
    %38 = vector.shape_cast %37 : vector<1x4x4x128xbf16> to vector<16x128xbf16>
    %c6 = arith.constant 6 : index
    %c0_46 = arith.constant 0 : index
    %c0_47 = arith.constant 0 : index
    %39 = vector.load %arg2[%c6, %c0_46, %c0_47] : memref<9x128x128xbf16, #tpu.memory_space<vmem>>, vector<1x128x128xbf16>
    %40 = vector.shape_cast %39 : vector<1x128x128xbf16> to vector<128x128xbf16>
    %cst_48 = arith.constant dense<0.000000e+00> : vector<16x128xf32>
    %41 = tpu.matmul %38, %40, %cst_48 {dimension_numbers = #tpu.dot_dimension_numbers<[1], [0], [0], [1], [0, 0, 1, 1], [], []>} : vector<16x128xbf16>, vector<128x128xbf16>, vector<16x128xf32> -> vector<16x128xf32>
    %42 = arith.addf %36, %41 : vector<16x128xf32>
    %c0_49 = arith.constant 0 : index
    %c4_50 = arith.constant 4 : index
    %c2_51 = arith.constant 2 : index
    %c0_52 = arith.constant 0 : index
    %43 = vector.load %arg1[%c0_49, %c4_50, %c2_51, %c0_52] : memref<1x8x8x128xbf16, #tpu.memory_space<vmem>>, vector<1x4x4x128xbf16>
    %44 = vector.shape_cast %43 : vector<1x4x4x128xbf16> to vector<16x128xbf16>
    %c7 = arith.constant 7 : index
    %c0_53 = arith.constant 0 : index
    %c0_54 = arith.constant 0 : index
    %45 = vector.load %arg2[%c7, %c0_53, %c0_54] : memref<9x128x128xbf16, #tpu.memory_space<vmem>>, vector<1x128x128xbf16>
    %46 = vector.shape_cast %45 : vector<1x128x128xbf16> to vector<128x128xbf16>
    %cst_55 = arith.constant dense<0.000000e+00> : vector<16x128xf32>
    %47 = tpu.matmul %44, %46, %cst_55 {dimension_numbers = #tpu.dot_dimension_numbers<[1], [0], [0], [1], [0, 0, 1, 1], [], []>} : vector<16x128xbf16>, vector<128x128xbf16>, vector<16x128xf32> -> vector<16x128xf32>
    %48 = arith.addf %42, %47 : vector<16x128xf32>
    %c0_56 = arith.constant 0 : index
    %c4_57 = arith.constant 4 : index
    %c4_58 = arith.constant 4 : index
    %c0_59 = arith.constant 0 : index
    %49 = vector.load %arg1[%c0_56, %c4_57, %c4_58, %c0_59] : memref<1x8x8x128xbf16, #tpu.memory_space<vmem>>, vector<1x4x4x128xbf16>
    %50 = vector.shape_cast %49 : vector<1x4x4x128xbf16> to vector<16x128xbf16>
    %c8 = arith.constant 8 : index
    %c0_60 = arith.constant 0 : index
    %c0_61 = arith.constant 0 : index
    %51 = vector.load %arg2[%c8, %c0_60, %c0_61] : memref<9x128x128xbf16, #tpu.memory_space<vmem>>, vector<1x128x128xbf16>
    %52 = vector.shape_cast %51 : vector<1x128x128xbf16> to vector<128x128xbf16>
    %cst_62 = arith.constant dense<0.000000e+00> : vector<16x128xf32>
    %53 = tpu.matmul %50, %52, %cst_62 {dimension_numbers = #tpu.dot_dimension_numbers<[1], [0], [0], [1], [0, 0, 1, 1], [], []>} : vector<16x128xbf16>, vector<128x128xbf16>, vector<16x128xf32> -> vector<16x128xf32>
    %54 = arith.addf %48, %53 : vector<16x128xf32>
    %c0_63 = arith.constant 0 : index
    %c0_64 = arith.constant 0 : index
    %c0_65 = arith.constant 0 : index
    %55 = vector.load %arg3[%c0_63, %c0_64, %c0_65] : memref<1x1x128xf32, #tpu.memory_space<vmem>>, vector<1x1x128xf32>
    %56 = vector.shape_cast %55 : vector<1x1x128xf32> to vector<1x128xf32>
    %57 = vector.broadcast %56 : vector<1x128xf32> to vector<16x128xf32>
    %58 = arith.addf %54, %57 : vector<16x128xf32>
    %c0_66 = arith.constant 0 : index
    %c0_67 = arith.constant 0 : index
    %c0_68 = arith.constant 0 : index
    %c0_69 = arith.constant 0 : index
    %59 = vector.load %arg4[%c0_66, %c0_67, %c0_68, %c0_69] : memref<1x4x4x128xbf16, #tpu.memory_space<vmem>>, vector<1x4x4x128xbf16>
    %60 = vector.shape_cast %59 : vector<1x4x4x128xbf16> to vector<16x128xbf16>
    %61 = arith.extf %60 : vector<16x128xbf16> to vector<16x128xf32>
    %62 = arith.addf %58, %61 : vector<16x128xf32>
    %cst_70 = arith.constant 0.000000e+00 : f32
    %63 = vector.broadcast %cst_70 : f32 to vector<16x128xf32>
    %64 = arith.maximumf %62, %63 : vector<16x128xf32>
    %65 = vector.shape_cast %64 : vector<16x128xf32> to vector<1x4x4x128xf32>
    %66 = arith.truncf %65 : vector<1x4x4x128xf32> to vector<1x4x4x128xbf16>
    %c0_71 = arith.constant 0 : index
    %c0_72 = arith.constant 0 : index
    %c0_73 = arith.constant 0 : index
    %c0_74 = arith.constant 0 : index
    %67 = vector.load %arg5[%c0_71, %c0_72, %c0_73, %c0_74] : memref<1x4x4x128xbf16, #tpu.memory_space<vmem>>, vector<1x4x4x128xbf16>
    tpu.vector_store %arg5[%c0_71, %c0_72, %c0_73, %c0_74], %66 {strides = array<i32>} : memref<1x4x4x128xbf16, #tpu.memory_space<vmem>>, vector<1x4x4x128xbf16>,
    return
  }
  func.func @transform_0(%arg0: i32) -> (i32, i32, i32, i32) {
    %c0_i32 = arith.constant 0 : i32
    %c0_i32_0 = arith.constant 0 : i32
    %c0_i32_1 = arith.constant 0 : i32
    %c0_i32_2 = arith.constant 0 : i32
    return %arg0, %c0_i32, %c0_i32_0, %c0_i32_1 : i32, i32, i32, i32
  }
  func.func @transform_1(%arg0: i32) -> (i32, i32, i32) {
    %c0_i32 = arith.constant 0 : i32
    %c0_i32_0 = arith.constant 0 : i32
    %c0_i32_1 = arith.constant 0 : i32
    %c0_i32_2 = arith.constant 0 : i32
    return %c0_i32, %c0_i32_0, %c0_i32_1 : i32, i32, i32
  }
  func.func @transform_2(%arg0: i32) -> (i32, i32, i32) {
    %c0_i32 = arith.constant 0 : i32
    %c0_i32_0 = arith.constant 0 : i32
    %c0_i32_1 = arith.constant 0 : i32
    %c0_i32_2 = arith.constant 0 : i32
    return %c0_i32, %c0_i32_0, %c0_i32_1 : i32, i32, i32
  }
  func.func @transform_3(%arg0: i32) -> (i32, i32, i32, i32) {
    %c0_i32 = arith.constant 0 : i32
    %c0_i32_0 = arith.constant 0 : i32
    %c0_i32_1 = arith.constant 0 : i32
    %c0_i32_2 = arith.constant 0 : i32
    return %arg0, %c0_i32, %c0_i32_0, %c0_i32_1 : i32, i32, i32, i32
  }
  func.func @transform_4(%arg0: i32) -> (i32, i32, i32, i32) {
    %c0_i32 = arith.constant 0 : i32
    %c0_i32_0 = arith.constant 0 : i32
    %c0_i32_1 = arith.constant 0 : i32
    %c0_i32_2 = arith.constant 0 : i32
    return %arg0, %c0_i32, %c0_i32_0, %c0_i32_1 : i32, i32, i32, i32
  }
}

module attributes {stable_mosaic.version = 11 : i64} {
  func.func @kernel(%arg0: i32, %arg1: memref<1x76x76x128xbf16, #tpu.memory_space<vmem>>, %arg2: memref<9x128x128xbf16, #tpu.memory_space<vmem>>, %arg3: memref<1x1x128xf32, #tpu.memory_space<vmem>>, %arg4: memref<1x4x4x128xbf16, #tpu.memory_space<vmem>>) attributes {dimension_semantics = [#tpu.dimension_semantics<parallel>], iteration_bounds = array<i64: 2>, scalar_prefetch = 0 : i64, scratch_operands = 0 : i64, tpu.core_type = #tpu.core_type<tc>, window_params = [{transform_indices = @transform_0, window_bounds = array<i64: 1, 76, 76, 128>}, {pipeline_mode = #tpu.pipeline_mode<synchronous>, transform_indices = @transform_1, window_bounds = array<i64: 9, 128, 128>}, {pipeline_mode = #tpu.pipeline_mode<synchronous>, transform_indices = @transform_2, window_bounds = array<i64: 1, 1, 128>}, {transform_indices = @transform_3, window_bounds = array<i64: 1, 4, 4, 128>}]} {
    %cst = arith.constant 0.000000e+00 : f32
    %0 = vector.broadcast %cst : f32 to vector<16x128xf32>
    %c0 = arith.constant 0 : index
    %c0_0 = arith.constant 0 : index
    %c0_1 = arith.constant 0 : index
    %c0_2 = arith.constant 0 : index
    %1 = vector.load %arg1[%c0, %c0_0, %c0_1, %c0_2] : memref<1x76x76x128xbf16, #tpu.memory_space<vmem>>, vector<1x4x4x128xbf16>
    %2 = vector.shape_cast %1 : vector<1x4x4x128xbf16> to vector<16x128xbf16>
    %c0_3 = arith.constant 0 : index
    %c0_4 = arith.constant 0 : index
    %c0_5 = arith.constant 0 : index
    %3 = vector.load %arg2[%c0_3, %c0_4, %c0_5] : memref<9x128x128xbf16, #tpu.memory_space<vmem>>, vector<1x128x128xbf16>
    %4 = vector.shape_cast %3 : vector<1x128x128xbf16> to vector<128x128xbf16>
    %cst_6 = arith.constant dense<0.000000e+00> : vector<16x128xf32>
    %5 = tpu.matmul %2, %4, %cst_6 {dimension_numbers = #tpu.dot_dimension_numbers<[1], [0], [0], [1], [0, 0, 1, 1], [], []>} : vector<16x128xbf16>, vector<128x128xbf16>, vector<16x128xf32> -> vector<16x128xf32>
    %6 = arith.addf %0, %5 : vector<16x128xf32>
    %c0_7 = arith.constant 0 : index
    %c0_8 = arith.constant 0 : index
    %c36 = arith.constant 36 : index
    %c0_9 = arith.constant 0 : index
    %7 = vector.load %arg1[%c0_7, %c0_8, %c36, %c0_9] : memref<1x76x76x128xbf16, #tpu.memory_space<vmem>>, vector<1x4x4x128xbf16>
    %8 = vector.shape_cast %7 : vector<1x4x4x128xbf16> to vector<16x128xbf16>
    %c1 = arith.constant 1 : index
    %c0_10 = arith.constant 0 : index
    %c0_11 = arith.constant 0 : index
    %9 = vector.load %arg2[%c1, %c0_10, %c0_11] : memref<9x128x128xbf16, #tpu.memory_space<vmem>>, vector<1x128x128xbf16>
    %10 = vector.shape_cast %9 : vector<1x128x128xbf16> to vector<128x128xbf16>
    %cst_12 = arith.constant dense<0.000000e+00> : vector<16x128xf32>
    %11 = tpu.matmul %8, %10, %cst_12 {dimension_numbers = #tpu.dot_dimension_numbers<[1], [0], [0], [1], [0, 0, 1, 1], [], []>} : vector<16x128xbf16>, vector<128x128xbf16>, vector<16x128xf32> -> vector<16x128xf32>
    %12 = arith.addf %6, %11 : vector<16x128xf32>
    %c0_13 = arith.constant 0 : index
    %c0_14 = arith.constant 0 : index
    %c72 = arith.constant 72 : index
    %c0_15 = arith.constant 0 : index
    %13 = vector.load %arg1[%c0_13, %c0_14, %c72, %c0_15] : memref<1x76x76x128xbf16, #tpu.memory_space<vmem>>, vector<1x4x4x128xbf16>
    %14 = vector.shape_cast %13 : vector<1x4x4x128xbf16> to vector<16x128xbf16>
    %c2 = arith.constant 2 : index
    %c0_16 = arith.constant 0 : index
    %c0_17 = arith.constant 0 : index
    %15 = vector.load %arg2[%c2, %c0_16, %c0_17] : memref<9x128x128xbf16, #tpu.memory_space<vmem>>, vector<1x128x128xbf16>
    %16 = vector.shape_cast %15 : vector<1x128x128xbf16> to vector<128x128xbf16>
    %cst_18 = arith.constant dense<0.000000e+00> : vector<16x128xf32>
    %17 = tpu.matmul %14, %16, %cst_18 {dimension_numbers = #tpu.dot_dimension_numbers<[1], [0], [0], [1], [0, 0, 1, 1], [], []>} : vector<16x128xbf16>, vector<128x128xbf16>, vector<16x128xf32> -> vector<16x128xf32>
    %18 = arith.addf %12, %17 : vector<16x128xf32>
    %c0_19 = arith.constant 0 : index
    %c36_20 = arith.constant 36 : index
    %c0_21 = arith.constant 0 : index
    %c0_22 = arith.constant 0 : index
    %19 = vector.load %arg1[%c0_19, %c36_20, %c0_21, %c0_22] : memref<1x76x76x128xbf16, #tpu.memory_space<vmem>>, vector<1x4x4x128xbf16>
    %20 = vector.shape_cast %19 : vector<1x4x4x128xbf16> to vector<16x128xbf16>
    %c3 = arith.constant 3 : index
    %c0_23 = arith.constant 0 : index
    %c0_24 = arith.constant 0 : index
    %21 = vector.load %arg2[%c3, %c0_23, %c0_24] : memref<9x128x128xbf16, #tpu.memory_space<vmem>>, vector<1x128x128xbf16>
    %22 = vector.shape_cast %21 : vector<1x128x128xbf16> to vector<128x128xbf16>
    %cst_25 = arith.constant dense<0.000000e+00> : vector<16x128xf32>
    %23 = tpu.matmul %20, %22, %cst_25 {dimension_numbers = #tpu.dot_dimension_numbers<[1], [0], [0], [1], [0, 0, 1, 1], [], []>} : vector<16x128xbf16>, vector<128x128xbf16>, vector<16x128xf32> -> vector<16x128xf32>
    %24 = arith.addf %18, %23 : vector<16x128xf32>
    %c0_26 = arith.constant 0 : index
    %c36_27 = arith.constant 36 : index
    %c36_28 = arith.constant 36 : index
    %c0_29 = arith.constant 0 : index
    %25 = vector.load %arg1[%c0_26, %c36_27, %c36_28, %c0_29] : memref<1x76x76x128xbf16, #tpu.memory_space<vmem>>, vector<1x4x4x128xbf16>
    %26 = vector.shape_cast %25 : vector<1x4x4x128xbf16> to vector<16x128xbf16>
    %c4 = arith.constant 4 : index
    %c0_30 = arith.constant 0 : index
    %c0_31 = arith.constant 0 : index
    %27 = vector.load %arg2[%c4, %c0_30, %c0_31] : memref<9x128x128xbf16, #tpu.memory_space<vmem>>, vector<1x128x128xbf16>
    %28 = vector.shape_cast %27 : vector<1x128x128xbf16> to vector<128x128xbf16>
    %cst_32 = arith.constant dense<0.000000e+00> : vector<16x128xf32>
    %29 = tpu.matmul %26, %28, %cst_32 {dimension_numbers = #tpu.dot_dimension_numbers<[1], [0], [0], [1], [0, 0, 1, 1], [], []>} : vector<16x128xbf16>, vector<128x128xbf16>, vector<16x128xf32> -> vector<16x128xf32>
    %30 = arith.addf %24, %29 : vector<16x128xf32>
    %c0_33 = arith.constant 0 : index
    %c36_34 = arith.constant 36 : index
    %c72_35 = arith.constant 72 : index
    %c0_36 = arith.constant 0 : index
    %31 = vector.load %arg1[%c0_33, %c36_34, %c72_35, %c0_36] : memref<1x76x76x128xbf16, #tpu.memory_space<vmem>>, vector<1x4x4x128xbf16>
    %32 = vector.shape_cast %31 : vector<1x4x4x128xbf16> to vector<16x128xbf16>
    %c5 = arith.constant 5 : index
    %c0_37 = arith.constant 0 : index
    %c0_38 = arith.constant 0 : index
    %33 = vector.load %arg2[%c5, %c0_37, %c0_38] : memref<9x128x128xbf16, #tpu.memory_space<vmem>>, vector<1x128x128xbf16>
    %34 = vector.shape_cast %33 : vector<1x128x128xbf16> to vector<128x128xbf16>
    %cst_39 = arith.constant dense<0.000000e+00> : vector<16x128xf32>
    %35 = tpu.matmul %32, %34, %cst_39 {dimension_numbers = #tpu.dot_dimension_numbers<[1], [0], [0], [1], [0, 0, 1, 1], [], []>} : vector<16x128xbf16>, vector<128x128xbf16>, vector<16x128xf32> -> vector<16x128xf32>
    %36 = arith.addf %30, %35 : vector<16x128xf32>
    %c0_40 = arith.constant 0 : index
    %c72_41 = arith.constant 72 : index
    %c0_42 = arith.constant 0 : index
    %c0_43 = arith.constant 0 : index
    %37 = vector.load %arg1[%c0_40, %c72_41, %c0_42, %c0_43] : memref<1x76x76x128xbf16, #tpu.memory_space<vmem>>, vector<1x4x4x128xbf16>
    %38 = vector.shape_cast %37 : vector<1x4x4x128xbf16> to vector<16x128xbf16>
    %c6 = arith.constant 6 : index
    %c0_44 = arith.constant 0 : index
    %c0_45 = arith.constant 0 : index
    %39 = vector.load %arg2[%c6, %c0_44, %c0_45] : memref<9x128x128xbf16, #tpu.memory_space<vmem>>, vector<1x128x128xbf16>
    %40 = vector.shape_cast %39 : vector<1x128x128xbf16> to vector<128x128xbf16>
    %cst_46 = arith.constant dense<0.000000e+00> : vector<16x128xf32>
    %41 = tpu.matmul %38, %40, %cst_46 {dimension_numbers = #tpu.dot_dimension_numbers<[1], [0], [0], [1], [0, 0, 1, 1], [], []>} : vector<16x128xbf16>, vector<128x128xbf16>, vector<16x128xf32> -> vector<16x128xf32>
    %42 = arith.addf %36, %41 : vector<16x128xf32>
    %c0_47 = arith.constant 0 : index
    %c72_48 = arith.constant 72 : index
    %c36_49 = arith.constant 36 : index
    %c0_50 = arith.constant 0 : index
    %43 = vector.load %arg1[%c0_47, %c72_48, %c36_49, %c0_50] : memref<1x76x76x128xbf16, #tpu.memory_space<vmem>>, vector<1x4x4x128xbf16>
    %44 = vector.shape_cast %43 : vector<1x4x4x128xbf16> to vector<16x128xbf16>
    %c7 = arith.constant 7 : index
    %c0_51 = arith.constant 0 : index
    %c0_52 = arith.constant 0 : index
    %45 = vector.load %arg2[%c7, %c0_51, %c0_52] : memref<9x128x128xbf16, #tpu.memory_space<vmem>>, vector<1x128x128xbf16>
    %46 = vector.shape_cast %45 : vector<1x128x128xbf16> to vector<128x128xbf16>
    %cst_53 = arith.constant dense<0.000000e+00> : vector<16x128xf32>
    %47 = tpu.matmul %44, %46, %cst_53 {dimension_numbers = #tpu.dot_dimension_numbers<[1], [0], [0], [1], [0, 0, 1, 1], [], []>} : vector<16x128xbf16>, vector<128x128xbf16>, vector<16x128xf32> -> vector<16x128xf32>
    %48 = arith.addf %42, %47 : vector<16x128xf32>
    %c0_54 = arith.constant 0 : index
    %c72_55 = arith.constant 72 : index
    %c72_56 = arith.constant 72 : index
    %c0_57 = arith.constant 0 : index
    %49 = vector.load %arg1[%c0_54, %c72_55, %c72_56, %c0_57] : memref<1x76x76x128xbf16, #tpu.memory_space<vmem>>, vector<1x4x4x128xbf16>
    %50 = vector.shape_cast %49 : vector<1x4x4x128xbf16> to vector<16x128xbf16>
    %c8 = arith.constant 8 : index
    %c0_58 = arith.constant 0 : index
    %c0_59 = arith.constant 0 : index
    %51 = vector.load %arg2[%c8, %c0_58, %c0_59] : memref<9x128x128xbf16, #tpu.memory_space<vmem>>, vector<1x128x128xbf16>
    %52 = vector.shape_cast %51 : vector<1x128x128xbf16> to vector<128x128xbf16>
    %cst_60 = arith.constant dense<0.000000e+00> : vector<16x128xf32>
    %53 = tpu.matmul %50, %52, %cst_60 {dimension_numbers = #tpu.dot_dimension_numbers<[1], [0], [0], [1], [0, 0, 1, 1], [], []>} : vector<16x128xbf16>, vector<128x128xbf16>, vector<16x128xf32> -> vector<16x128xf32>
    %54 = arith.addf %48, %53 : vector<16x128xf32>
    %c0_61 = arith.constant 0 : index
    %c0_62 = arith.constant 0 : index
    %c0_63 = arith.constant 0 : index
    %55 = vector.load %arg3[%c0_61, %c0_62, %c0_63] : memref<1x1x128xf32, #tpu.memory_space<vmem>>, vector<1x1x128xf32>
    %56 = vector.shape_cast %55 : vector<1x1x128xf32> to vector<1x128xf32>
    %57 = vector.broadcast %56 : vector<1x128xf32> to vector<16x128xf32>
    %58 = arith.addf %54, %57 : vector<16x128xf32>
    %cst_64 = arith.constant 0.000000e+00 : f32
    %59 = vector.broadcast %cst_64 : f32 to vector<16x128xf32>
    %60 = arith.maximumf %58, %59 : vector<16x128xf32>
    %61 = vector.shape_cast %60 : vector<16x128xf32> to vector<1x4x4x128xf32>
    %62 = arith.truncf %61 : vector<1x4x4x128xf32> to vector<1x4x4x128xbf16>
    %c0_65 = arith.constant 0 : index
    %c0_66 = arith.constant 0 : index
    %c0_67 = arith.constant 0 : index
    %c0_68 = arith.constant 0 : index
    %63 = vector.load %arg4[%c0_65, %c0_66, %c0_67, %c0_68] : memref<1x4x4x128xbf16, #tpu.memory_space<vmem>>, vector<1x4x4x128xbf16>
    tpu.vector_store %arg4[%c0_65, %c0_66, %c0_67, %c0_68], %62 {strides = array<i32>} : memref<1x4x4x128xbf16, #tpu.memory_space<vmem>>, vector<1x4x4x128xbf16>,
    return
  }
  func.func @transform_0(%arg0: i32) -> (i32, i32, i32, i32) {
    %c0_i32 = arith.constant 0 : i32
    %c0_i32_0 = arith.constant 0 : i32
    %c0_i32_1 = arith.constant 0 : i32
    %c0_i32_2 = arith.constant 0 : i32
    return %arg0, %c0_i32, %c0_i32_0, %c0_i32_1 : i32, i32, i32, i32
  }
  func.func @transform_1(%arg0: i32) -> (i32, i32, i32) {
    %c0_i32 = arith.constant 0 : i32
    %c0_i32_0 = arith.constant 0 : i32
    %c0_i32_1 = arith.constant 0 : i32
    %c0_i32_2 = arith.constant 0 : i32
    return %c0_i32, %c0_i32_0, %c0_i32_1 : i32, i32, i32
  }
  func.func @transform_2(%arg0: i32) -> (i32, i32, i32) {
    %c0_i32 = arith.constant 0 : i32
    %c0_i32_0 = arith.constant 0 : i32
    %c0_i32_1 = arith.constant 0 : i32
    %c0_i32_2 = arith.constant 0 : i32
    return %c0_i32, %c0_i32_0, %c0_i32_1 : i32, i32, i32
  }
  func.func @transform_3(%arg0: i32) -> (i32, i32, i32, i32) {
    %c0_i32 = arith.constant 0 : i32
    %c0_i32_0 = arith.constant 0 : i32
    %c0_i32_1 = arith.constant 0 : i32
    %c0_i32_2 = arith.constant 0 : i32
    return %arg0, %c0_i32, %c0_i32_0, %c0_i32_1 : i32, i32, i32, i32
  }
}

module attributes {stable_mosaic.version = 11 : i64} {
  func.func @kernel(%arg0: i32, %arg1: memref<1x52x52x128xbf16, #tpu.memory_space<vmem>>, %arg2: memref<9x128x128xbf16, #tpu.memory_space<vmem>>, %arg3: memref<1x1x128xf32, #tpu.memory_space<vmem>>, %arg4: memref<1x4x4x128xbf16, #tpu.memory_space<vmem>>) attributes {dimension_semantics = [#tpu.dimension_semantics<parallel>], iteration_bounds = array<i64: 2>, scalar_prefetch = 0 : i64, scratch_operands = 0 : i64, tpu.core_type = #tpu.core_type<tc>, window_params = [{transform_indices = @transform_0, window_bounds = array<i64: 1, 52, 52, 128>}, {pipeline_mode = #tpu.pipeline_mode<synchronous>, transform_indices = @transform_1, window_bounds = array<i64: 9, 128, 128>}, {pipeline_mode = #tpu.pipeline_mode<synchronous>, transform_indices = @transform_2, window_bounds = array<i64: 1, 1, 128>}, {transform_indices = @transform_3, window_bounds = array<i64: 1, 4, 4, 128>}]} {
    %cst = arith.constant 0.000000e+00 : f32
    %0 = vector.broadcast %cst : f32 to vector<16x128xf32>
    %c0 = arith.constant 0 : index
    %c0_0 = arith.constant 0 : index
    %c0_1 = arith.constant 0 : index
    %c0_2 = arith.constant 0 : index
    %1 = vector.load %arg1[%c0, %c0_0, %c0_1, %c0_2] : memref<1x52x52x128xbf16, #tpu.memory_space<vmem>>, vector<1x4x4x128xbf16>
    %2 = vector.shape_cast %1 : vector<1x4x4x128xbf16> to vector<16x128xbf16>
    %c0_3 = arith.constant 0 : index
    %c0_4 = arith.constant 0 : index
    %c0_5 = arith.constant 0 : index
    %3 = vector.load %arg2[%c0_3, %c0_4, %c0_5] : memref<9x128x128xbf16, #tpu.memory_space<vmem>>, vector<1x128x128xbf16>
    %4 = vector.shape_cast %3 : vector<1x128x128xbf16> to vector<128x128xbf16>
    %cst_6 = arith.constant dense<0.000000e+00> : vector<16x128xf32>
    %5 = tpu.matmul %2, %4, %cst_6 {dimension_numbers = #tpu.dot_dimension_numbers<[1], [0], [0], [1], [0, 0, 1, 1], [], []>} : vector<16x128xbf16>, vector<128x128xbf16>, vector<16x128xf32> -> vector<16x128xf32>
    %6 = arith.addf %0, %5 : vector<16x128xf32>
    %c0_7 = arith.constant 0 : index
    %c0_8 = arith.constant 0 : index
    %c24 = arith.constant 24 : index
    %c0_9 = arith.constant 0 : index
    %7 = vector.load %arg1[%c0_7, %c0_8, %c24, %c0_9] : memref<1x52x52x128xbf16, #tpu.memory_space<vmem>>, vector<1x4x4x128xbf16>
    %8 = vector.shape_cast %7 : vector<1x4x4x128xbf16> to vector<16x128xbf16>
    %c1 = arith.constant 1 : index
    %c0_10 = arith.constant 0 : index
    %c0_11 = arith.constant 0 : index
    %9 = vector.load %arg2[%c1, %c0_10, %c0_11] : memref<9x128x128xbf16, #tpu.memory_space<vmem>>, vector<1x128x128xbf16>
    %10 = vector.shape_cast %9 : vector<1x128x128xbf16> to vector<128x128xbf16>
    %cst_12 = arith.constant dense<0.000000e+00> : vector<16x128xf32>
    %11 = tpu.matmul %8, %10, %cst_12 {dimension_numbers = #tpu.dot_dimension_numbers<[1], [0], [0], [1], [0, 0, 1, 1], [], []>} : vector<16x128xbf16>, vector<128x128xbf16>, vector<16x128xf32> -> vector<16x128xf32>
    %12 = arith.addf %6, %11 : vector<16x128xf32>
    %c0_13 = arith.constant 0 : index
    %c0_14 = arith.constant 0 : index
    %c48 = arith.constant 48 : index
    %c0_15 = arith.constant 0 : index
    %13 = vector.load %arg1[%c0_13, %c0_14, %c48, %c0_15] : memref<1x52x52x128xbf16, #tpu.memory_space<vmem>>, vector<1x4x4x128xbf16>
    %14 = vector.shape_cast %13 : vector<1x4x4x128xbf16> to vector<16x128xbf16>
    %c2 = arith.constant 2 : index
    %c0_16 = arith.constant 0 : index
    %c0_17 = arith.constant 0 : index
    %15 = vector.load %arg2[%c2, %c0_16, %c0_17] : memref<9x128x128xbf16, #tpu.memory_space<vmem>>, vector<1x128x128xbf16>
    %16 = vector.shape_cast %15 : vector<1x128x128xbf16> to vector<128x128xbf16>
    %cst_18 = arith.constant dense<0.000000e+00> : vector<16x128xf32>
    %17 = tpu.matmul %14, %16, %cst_18 {dimension_numbers = #tpu.dot_dimension_numbers<[1], [0], [0], [1], [0, 0, 1, 1], [], []>} : vector<16x128xbf16>, vector<128x128xbf16>, vector<16x128xf32> -> vector<16x128xf32>
    %18 = arith.addf %12, %17 : vector<16x128xf32>
    %c0_19 = arith.constant 0 : index
    %c24_20 = arith.constant 24 : index
    %c0_21 = arith.constant 0 : index
    %c0_22 = arith.constant 0 : index
    %19 = vector.load %arg1[%c0_19, %c24_20, %c0_21, %c0_22] : memref<1x52x52x128xbf16, #tpu.memory_space<vmem>>, vector<1x4x4x128xbf16>
    %20 = vector.shape_cast %19 : vector<1x4x4x128xbf16> to vector<16x128xbf16>
    %c3 = arith.constant 3 : index
    %c0_23 = arith.constant 0 : index
    %c0_24 = arith.constant 0 : index
    %21 = vector.load %arg2[%c3, %c0_23, %c0_24] : memref<9x128x128xbf16, #tpu.memory_space<vmem>>, vector<1x128x128xbf16>
    %22 = vector.shape_cast %21 : vector<1x128x128xbf16> to vector<128x128xbf16>
    %cst_25 = arith.constant dense<0.000000e+00> : vector<16x128xf32>
    %23 = tpu.matmul %20, %22, %cst_25 {dimension_numbers = #tpu.dot_dimension_numbers<[1], [0], [0], [1], [0, 0, 1, 1], [], []>} : vector<16x128xbf16>, vector<128x128xbf16>, vector<16x128xf32> -> vector<16x128xf32>
    %24 = arith.addf %18, %23 : vector<16x128xf32>
    %c0_26 = arith.constant 0 : index
    %c24_27 = arith.constant 24 : index
    %c24_28 = arith.constant 24 : index
    %c0_29 = arith.constant 0 : index
    %25 = vector.load %arg1[%c0_26, %c24_27, %c24_28, %c0_29] : memref<1x52x52x128xbf16, #tpu.memory_space<vmem>>, vector<1x4x4x128xbf16>
    %26 = vector.shape_cast %25 : vector<1x4x4x128xbf16> to vector<16x128xbf16>
    %c4 = arith.constant 4 : index
    %c0_30 = arith.constant 0 : index
    %c0_31 = arith.constant 0 : index
    %27 = vector.load %arg2[%c4, %c0_30, %c0_31] : memref<9x128x128xbf16, #tpu.memory_space<vmem>>, vector<1x128x128xbf16>
    %28 = vector.shape_cast %27 : vector<1x128x128xbf16> to vector<128x128xbf16>
    %cst_32 = arith.constant dense<0.000000e+00> : vector<16x128xf32>
    %29 = tpu.matmul %26, %28, %cst_32 {dimension_numbers = #tpu.dot_dimension_numbers<[1], [0], [0], [1], [0, 0, 1, 1], [], []>} : vector<16x128xbf16>, vector<128x128xbf16>, vector<16x128xf32> -> vector<16x128xf32>
    %30 = arith.addf %24, %29 : vector<16x128xf32>
    %c0_33 = arith.constant 0 : index
    %c24_34 = arith.constant 24 : index
    %c48_35 = arith.constant 48 : index
    %c0_36 = arith.constant 0 : index
    %31 = vector.load %arg1[%c0_33, %c24_34, %c48_35, %c0_36] : memref<1x52x52x128xbf16, #tpu.memory_space<vmem>>, vector<1x4x4x128xbf16>
    %32 = vector.shape_cast %31 : vector<1x4x4x128xbf16> to vector<16x128xbf16>
    %c5 = arith.constant 5 : index
    %c0_37 = arith.constant 0 : index
    %c0_38 = arith.constant 0 : index
    %33 = vector.load %arg2[%c5, %c0_37, %c0_38] : memref<9x128x128xbf16, #tpu.memory_space<vmem>>, vector<1x128x128xbf16>
    %34 = vector.shape_cast %33 : vector<1x128x128xbf16> to vector<128x128xbf16>
    %cst_39 = arith.constant dense<0.000000e+00> : vector<16x128xf32>
    %35 = tpu.matmul %32, %34, %cst_39 {dimension_numbers = #tpu.dot_dimension_numbers<[1], [0], [0], [1], [0, 0, 1, 1], [], []>} : vector<16x128xbf16>, vector<128x128xbf16>, vector<16x128xf32> -> vector<16x128xf32>
    %36 = arith.addf %30, %35 : vector<16x128xf32>
    %c0_40 = arith.constant 0 : index
    %c48_41 = arith.constant 48 : index
    %c0_42 = arith.constant 0 : index
    %c0_43 = arith.constant 0 : index
    %37 = vector.load %arg1[%c0_40, %c48_41, %c0_42, %c0_43] : memref<1x52x52x128xbf16, #tpu.memory_space<vmem>>, vector<1x4x4x128xbf16>
    %38 = vector.shape_cast %37 : vector<1x4x4x128xbf16> to vector<16x128xbf16>
    %c6 = arith.constant 6 : index
    %c0_44 = arith.constant 0 : index
    %c0_45 = arith.constant 0 : index
    %39 = vector.load %arg2[%c6, %c0_44, %c0_45] : memref<9x128x128xbf16, #tpu.memory_space<vmem>>, vector<1x128x128xbf16>
    %40 = vector.shape_cast %39 : vector<1x128x128xbf16> to vector<128x128xbf16>
    %cst_46 = arith.constant dense<0.000000e+00> : vector<16x128xf32>
    %41 = tpu.matmul %38, %40, %cst_46 {dimension_numbers = #tpu.dot_dimension_numbers<[1], [0], [0], [1], [0, 0, 1, 1], [], []>} : vector<16x128xbf16>, vector<128x128xbf16>, vector<16x128xf32> -> vector<16x128xf32>
    %42 = arith.addf %36, %41 : vector<16x128xf32>
    %c0_47 = arith.constant 0 : index
    %c48_48 = arith.constant 48 : index
    %c24_49 = arith.constant 24 : index
    %c0_50 = arith.constant 0 : index
    %43 = vector.load %arg1[%c0_47, %c48_48, %c24_49, %c0_50] : memref<1x52x52x128xbf16, #tpu.memory_space<vmem>>, vector<1x4x4x128xbf16>
    %44 = vector.shape_cast %43 : vector<1x4x4x128xbf16> to vector<16x128xbf16>
    %c7 = arith.constant 7 : index
    %c0_51 = arith.constant 0 : index
    %c0_52 = arith.constant 0 : index
    %45 = vector.load %arg2[%c7, %c0_51, %c0_52] : memref<9x128x128xbf16, #tpu.memory_space<vmem>>, vector<1x128x128xbf16>
    %46 = vector.shape_cast %45 : vector<1x128x128xbf16> to vector<128x128xbf16>
    %cst_53 = arith.constant dense<0.000000e+00> : vector<16x128xf32>
    %47 = tpu.matmul %44, %46, %cst_53 {dimension_numbers = #tpu.dot_dimension_numbers<[1], [0], [0], [1], [0, 0, 1, 1], [], []>} : vector<16x128xbf16>, vector<128x128xbf16>, vector<16x128xf32> -> vector<16x128xf32>
    %48 = arith.addf %42, %47 : vector<16x128xf32>
    %c0_54 = arith.constant 0 : index
    %c48_55 = arith.constant 48 : index
    %c48_56 = arith.constant 48 : index
    %c0_57 = arith.constant 0 : index
    %49 = vector.load %arg1[%c0_54, %c48_55, %c48_56, %c0_57] : memref<1x52x52x128xbf16, #tpu.memory_space<vmem>>, vector<1x4x4x128xbf16>
    %50 = vector.shape_cast %49 : vector<1x4x4x128xbf16> to vector<16x128xbf16>
    %c8 = arith.constant 8 : index
    %c0_58 = arith.constant 0 : index
    %c0_59 = arith.constant 0 : index
    %51 = vector.load %arg2[%c8, %c0_58, %c0_59] : memref<9x128x128xbf16, #tpu.memory_space<vmem>>, vector<1x128x128xbf16>
    %52 = vector.shape_cast %51 : vector<1x128x128xbf16> to vector<128x128xbf16>
    %cst_60 = arith.constant dense<0.000000e+00> : vector<16x128xf32>
    %53 = tpu.matmul %50, %52, %cst_60 {dimension_numbers = #tpu.dot_dimension_numbers<[1], [0], [0], [1], [0, 0, 1, 1], [], []>} : vector<16x128xbf16>, vector<128x128xbf16>, vector<16x128xf32> -> vector<16x128xf32>
    %54 = arith.addf %48, %53 : vector<16x128xf32>
    %c0_61 = arith.constant 0 : index
    %c0_62 = arith.constant 0 : index
    %c0_63 = arith.constant 0 : index
    %55 = vector.load %arg3[%c0_61, %c0_62, %c0_63] : memref<1x1x128xf32, #tpu.memory_space<vmem>>, vector<1x1x128xf32>
    %56 = vector.shape_cast %55 : vector<1x1x128xf32> to vector<1x128xf32>
    %57 = vector.broadcast %56 : vector<1x128xf32> to vector<16x128xf32>
    %58 = arith.addf %54, %57 : vector<16x128xf32>
    %cst_64 = arith.constant 0.000000e+00 : f32
    %59 = vector.broadcast %cst_64 : f32 to vector<16x128xf32>
    %60 = arith.maximumf %58, %59 : vector<16x128xf32>
    %61 = vector.shape_cast %60 : vector<16x128xf32> to vector<1x4x4x128xf32>
    %62 = arith.truncf %61 : vector<1x4x4x128xf32> to vector<1x4x4x128xbf16>
    %c0_65 = arith.constant 0 : index
    %c0_66 = arith.constant 0 : index
    %c0_67 = arith.constant 0 : index
    %c0_68 = arith.constant 0 : index
    %63 = vector.load %arg4[%c0_65, %c0_66, %c0_67, %c0_68] : memref<1x4x4x128xbf16, #tpu.memory_space<vmem>>, vector<1x4x4x128xbf16>
    tpu.vector_store %arg4[%c0_65, %c0_66, %c0_67, %c0_68], %62 {strides = array<i32>} : memref<1x4x4x128xbf16, #tpu.memory_space<vmem>>, vector<1x4x4x128xbf16>,
    return
  }
  func.func @transform_0(%arg0: i32) -> (i32, i32, i32, i32) {
    %c0_i32 = arith.constant 0 : i32
    %c0_i32_0 = arith.constant 0 : i32
    %c0_i32_1 = arith.constant 0 : i32
    %c0_i32_2 = arith.constant 0 : i32
    return %arg0, %c0_i32, %c0_i32_0, %c0_i32_1 : i32, i32, i32, i32
  }
  func.func @transform_1(%arg0: i32) -> (i32, i32, i32) {
    %c0_i32 = arith.constant 0 : i32
    %c0_i32_0 = arith.constant 0 : i32
    %c0_i32_1 = arith.constant 0 : i32
    %c0_i32_2 = arith.constant 0 : i32
    return %c0_i32, %c0_i32_0, %c0_i32_1 : i32, i32, i32
  }
  func.func @transform_2(%arg0: i32) -> (i32, i32, i32) {
    %c0_i32 = arith.constant 0 : i32
    %c0_i32_0 = arith.constant 0 : i32
    %c0_i32_1 = arith.constant 0 : i32
    %c0_i32_2 = arith.constant 0 : i32
    return %c0_i32, %c0_i32_0, %c0_i32_1 : i32, i32, i32
  }
  func.func @transform_3(%arg0: i32) -> (i32, i32, i32, i32) {
    %c0_i32 = arith.constant 0 : i32
    %c0_i32_0 = arith.constant 0 : i32
    %c0_i32_1 = arith.constant 0 : i32
    %c0_i32_2 = arith.constant 0 : i32
    return %arg0, %c0_i32, %c0_i32_0, %c0_i32_1 : i32, i32, i32, i32
  }
}

module attributes {stable_mosaic.version = 11 : i64} {
  func.func @kernel(%arg0: i32, %arg1: memref<1x4x4x128xbf16, #tpu.memory_space<vmem>>, %arg2: memref<1x128x128xbf16, #tpu.memory_space<vmem>>, %arg3: memref<1x1x128xf32, #tpu.memory_space<vmem>>, %arg4: memref<1x4x4x128xbf16, #tpu.memory_space<vmem>>) attributes {dimension_semantics = [#tpu.dimension_semantics<parallel>], iteration_bounds = array<i64: 2>, scalar_prefetch = 0 : i64, scratch_operands = 0 : i64, tpu.core_type = #tpu.core_type<tc>, window_params = [{transform_indices = @transform_0, window_bounds = array<i64: 1, 4, 4, 128>}, {pipeline_mode = #tpu.pipeline_mode<synchronous>, transform_indices = @transform_1, window_bounds = array<i64: 1, 128, 128>}, {pipeline_mode = #tpu.pipeline_mode<synchronous>, transform_indices = @transform_2, window_bounds = array<i64: 1, 1, 128>}, {transform_indices = @transform_3, window_bounds = array<i64: 1, 4, 4, 128>}]} {
    %cst = arith.constant 0.000000e+00 : f32
    %0 = vector.broadcast %cst : f32 to vector<16x128xf32>
    %c0 = arith.constant 0 : index
    %c0_0 = arith.constant 0 : index
    %c0_1 = arith.constant 0 : index
    %c0_2 = arith.constant 0 : index
    %1 = vector.load %arg1[%c0, %c0_0, %c0_1, %c0_2] : memref<1x4x4x128xbf16, #tpu.memory_space<vmem>>, vector<1x4x4x128xbf16>
    %2 = vector.shape_cast %1 : vector<1x4x4x128xbf16> to vector<16x128xbf16>
    %c0_3 = arith.constant 0 : index
    %c0_4 = arith.constant 0 : index
    %c0_5 = arith.constant 0 : index
    %3 = vector.load %arg2[%c0_3, %c0_4, %c0_5] : memref<1x128x128xbf16, #tpu.memory_space<vmem>>, vector<1x128x128xbf16>
    %4 = vector.shape_cast %3 : vector<1x128x128xbf16> to vector<128x128xbf16>
    %cst_6 = arith.constant dense<0.000000e+00> : vector<16x128xf32>
    %5 = tpu.matmul %2, %4, %cst_6 {dimension_numbers = #tpu.dot_dimension_numbers<[1], [0], [0], [1], [0, 0, 1, 1], [], []>} : vector<16x128xbf16>, vector<128x128xbf16>, vector<16x128xf32> -> vector<16x128xf32>
    %6 = arith.addf %0, %5 : vector<16x128xf32>
    %c0_7 = arith.constant 0 : index
    %c0_8 = arith.constant 0 : index
    %c0_9 = arith.constant 0 : index
    %7 = vector.load %arg3[%c0_7, %c0_8, %c0_9] : memref<1x1x128xf32, #tpu.memory_space<vmem>>, vector<1x1x128xf32>
    %8 = vector.shape_cast %7 : vector<1x1x128xf32> to vector<1x128xf32>
    %9 = vector.broadcast %8 : vector<1x128xf32> to vector<16x128xf32>
    %10 = arith.addf %6, %9 : vector<16x128xf32>
    %cst_10 = arith.constant 0.000000e+00 : f32
    %11 = vector.broadcast %cst_10 : f32 to vector<16x128xf32>
    %12 = arith.maximumf %10, %11 : vector<16x128xf32>
    %13 = vector.shape_cast %12 : vector<16x128xf32> to vector<1x4x4x128xf32>
    %14 = arith.truncf %13 : vector<1x4x4x128xf32> to vector<1x4x4x128xbf16>
    %c0_11 = arith.constant 0 : index
    %c0_12 = arith.constant 0 : index
    %c0_13 = arith.constant 0 : index
    %c0_14 = arith.constant 0 : index
    %15 = vector.load %arg4[%c0_11, %c0_12, %c0_13, %c0_14] : memref<1x4x4x128xbf16, #tpu.memory_space<vmem>>, vector<1x4x4x128xbf16>
    tpu.vector_store %arg4[%c0_11, %c0_12, %c0_13, %c0_14], %14 {strides = array<i32>} : memref<1x4x4x128xbf16, #tpu.memory_space<vmem>>, vector<1x4x4x128xbf16>,
    return
  }
  func.func @transform_0(%arg0: i32) -> (i32, i32, i32, i32) {
    %c0_i32 = arith.constant 0 : i32
    %c0_i32_0 = arith.constant 0 : i32
    %c0_i32_1 = arith.constant 0 : i32
    %c0_i32_2 = arith.constant 0 : i32
    return %arg0, %c0_i32, %c0_i32_0, %c0_i32_1 : i32, i32, i32, i32
  }
  func.func @transform_1(%arg0: i32) -> (i32, i32, i32) {
    %c0_i32 = arith.constant 0 : i32
    %c0_i32_0 = arith.constant 0 : i32
    %c0_i32_1 = arith.constant 0 : i32
    %c0_i32_2 = arith.constant 0 : i32
    return %c0_i32, %c0_i32_0, %c0_i32_1 : i32, i32, i32
  }
  func.func @transform_2(%arg0: i32) -> (i32, i32, i32) {
    %c0_i32 = arith.constant 0 : i32
    %c0_i32_0 = arith.constant 0 : i32
    %c0_i32_1 = arith.constant 0 : i32
    %c0_i32_2 = arith.constant 0 : i32
    return %c0_i32, %c0_i32_0, %c0_i32_1 : i32, i32, i32
  }
  func.func @transform_3(%arg0: i32) -> (i32, i32, i32, i32) {
    %c0_i32 = arith.constant 0 : i32
    %c0_i32_0 = arith.constant 0 : i32
    %c0_i32_1 = arith.constant 0 : i32
    %c0_i32_2 = arith.constant 0 : i32
    return %arg0, %c0_i32, %c0_i32_0, %c0_i32_1 : i32, i32, i32, i32
  }
}

module attributes {stable_mosaic.version = 11 : i64} {
  func.func @kernel(%arg0: i32, %arg1: memref<1x28x28x128xbf16, #tpu.memory_space<vmem>>, %arg2: memref<9x128x128xbf16, #tpu.memory_space<vmem>>, %arg3: memref<1x1x128xf32, #tpu.memory_space<vmem>>, %arg4: memref<1x4x4x128xbf16, #tpu.memory_space<vmem>>) attributes {dimension_semantics = [#tpu.dimension_semantics<parallel>], iteration_bounds = array<i64: 2>, scalar_prefetch = 0 : i64, scratch_operands = 0 : i64, tpu.core_type = #tpu.core_type<tc>, window_params = [{transform_indices = @transform_0, window_bounds = array<i64: 1, 28, 28, 128>}, {pipeline_mode = #tpu.pipeline_mode<synchronous>, transform_indices = @transform_1, window_bounds = array<i64: 9, 128, 128>}, {pipeline_mode = #tpu.pipeline_mode<synchronous>, transform_indices = @transform_2, window_bounds = array<i64: 1, 1, 128>}, {transform_indices = @transform_3, window_bounds = array<i64: 1, 4, 4, 128>}]} {
    %cst = arith.constant 0.000000e+00 : f32
    %0 = vector.broadcast %cst : f32 to vector<16x128xf32>
    %c0 = arith.constant 0 : index
    %c0_0 = arith.constant 0 : index
    %c0_1 = arith.constant 0 : index
    %c0_2 = arith.constant 0 : index
    %1 = vector.load %arg1[%c0, %c0_0, %c0_1, %c0_2] : memref<1x28x28x128xbf16, #tpu.memory_space<vmem>>, vector<1x4x4x128xbf16>
    %2 = vector.shape_cast %1 : vector<1x4x4x128xbf16> to vector<16x128xbf16>
    %c0_3 = arith.constant 0 : index
    %c0_4 = arith.constant 0 : index
    %c0_5 = arith.constant 0 : index
    %3 = vector.load %arg2[%c0_3, %c0_4, %c0_5] : memref<9x128x128xbf16, #tpu.memory_space<vmem>>, vector<1x128x128xbf16>
    %4 = vector.shape_cast %3 : vector<1x128x128xbf16> to vector<128x128xbf16>
    %cst_6 = arith.constant dense<0.000000e+00> : vector<16x128xf32>
    %5 = tpu.matmul %2, %4, %cst_6 {dimension_numbers = #tpu.dot_dimension_numbers<[1], [0], [0], [1], [0, 0, 1, 1], [], []>} : vector<16x128xbf16>, vector<128x128xbf16>, vector<16x128xf32> -> vector<16x128xf32>
    %6 = arith.addf %0, %5 : vector<16x128xf32>
    %c0_7 = arith.constant 0 : index
    %c0_8 = arith.constant 0 : index
    %c12 = arith.constant 12 : index
    %c0_9 = arith.constant 0 : index
    %7 = vector.load %arg1[%c0_7, %c0_8, %c12, %c0_9] : memref<1x28x28x128xbf16, #tpu.memory_space<vmem>>, vector<1x4x4x128xbf16>
    %8 = vector.shape_cast %7 : vector<1x4x4x128xbf16> to vector<16x128xbf16>
    %c1 = arith.constant 1 : index
    %c0_10 = arith.constant 0 : index
    %c0_11 = arith.constant 0 : index
    %9 = vector.load %arg2[%c1, %c0_10, %c0_11] : memref<9x128x128xbf16, #tpu.memory_space<vmem>>, vector<1x128x128xbf16>
    %10 = vector.shape_cast %9 : vector<1x128x128xbf16> to vector<128x128xbf16>
    %cst_12 = arith.constant dense<0.000000e+00> : vector<16x128xf32>
    %11 = tpu.matmul %8, %10, %cst_12 {dimension_numbers = #tpu.dot_dimension_numbers<[1], [0], [0], [1], [0, 0, 1, 1], [], []>} : vector<16x128xbf16>, vector<128x128xbf16>, vector<16x128xf32> -> vector<16x128xf32>
    %12 = arith.addf %6, %11 : vector<16x128xf32>
    %c0_13 = arith.constant 0 : index
    %c0_14 = arith.constant 0 : index
    %c24 = arith.constant 24 : index
    %c0_15 = arith.constant 0 : index
    %13 = vector.load %arg1[%c0_13, %c0_14, %c24, %c0_15] : memref<1x28x28x128xbf16, #tpu.memory_space<vmem>>, vector<1x4x4x128xbf16>
    %14 = vector.shape_cast %13 : vector<1x4x4x128xbf16> to vector<16x128xbf16>
    %c2 = arith.constant 2 : index
    %c0_16 = arith.constant 0 : index
    %c0_17 = arith.constant 0 : index
    %15 = vector.load %arg2[%c2, %c0_16, %c0_17] : memref<9x128x128xbf16, #tpu.memory_space<vmem>>, vector<1x128x128xbf16>
    %16 = vector.shape_cast %15 : vector<1x128x128xbf16> to vector<128x128xbf16>
    %cst_18 = arith.constant dense<0.000000e+00> : vector<16x128xf32>
    %17 = tpu.matmul %14, %16, %cst_18 {dimension_numbers = #tpu.dot_dimension_numbers<[1], [0], [0], [1], [0, 0, 1, 1], [], []>} : vector<16x128xbf16>, vector<128x128xbf16>, vector<16x128xf32> -> vector<16x128xf32>
    %18 = arith.addf %12, %17 : vector<16x128xf32>
    %c0_19 = arith.constant 0 : index
    %c12_20 = arith.constant 12 : index
    %c0_21 = arith.constant 0 : index
    %c0_22 = arith.constant 0 : index
    %19 = vector.load %arg1[%c0_19, %c12_20, %c0_21, %c0_22] : memref<1x28x28x128xbf16, #tpu.memory_space<vmem>>, vector<1x4x4x128xbf16>
    %20 = vector.shape_cast %19 : vector<1x4x4x128xbf16> to vector<16x128xbf16>
    %c3 = arith.constant 3 : index
    %c0_23 = arith.constant 0 : index
    %c0_24 = arith.constant 0 : index
    %21 = vector.load %arg2[%c3, %c0_23, %c0_24] : memref<9x128x128xbf16, #tpu.memory_space<vmem>>, vector<1x128x128xbf16>
    %22 = vector.shape_cast %21 : vector<1x128x128xbf16> to vector<128x128xbf16>
    %cst_25 = arith.constant dense<0.000000e+00> : vector<16x128xf32>
    %23 = tpu.matmul %20, %22, %cst_25 {dimension_numbers = #tpu.dot_dimension_numbers<[1], [0], [0], [1], [0, 0, 1, 1], [], []>} : vector<16x128xbf16>, vector<128x128xbf16>, vector<16x128xf32> -> vector<16x128xf32>
    %24 = arith.addf %18, %23 : vector<16x128xf32>
    %c0_26 = arith.constant 0 : index
    %c12_27 = arith.constant 12 : index
    %c12_28 = arith.constant 12 : index
    %c0_29 = arith.constant 0 : index
    %25 = vector.load %arg1[%c0_26, %c12_27, %c12_28, %c0_29] : memref<1x28x28x128xbf16, #tpu.memory_space<vmem>>, vector<1x4x4x128xbf16>
    %26 = vector.shape_cast %25 : vector<1x4x4x128xbf16> to vector<16x128xbf16>
    %c4 = arith.constant 4 : index
    %c0_30 = arith.constant 0 : index
    %c0_31 = arith.constant 0 : index
    %27 = vector.load %arg2[%c4, %c0_30, %c0_31] : memref<9x128x128xbf16, #tpu.memory_space<vmem>>, vector<1x128x128xbf16>
    %28 = vector.shape_cast %27 : vector<1x128x128xbf16> to vector<128x128xbf16>
    %cst_32 = arith.constant dense<0.000000e+00> : vector<16x128xf32>
    %29 = tpu.matmul %26, %28, %cst_32 {dimension_numbers = #tpu.dot_dimension_numbers<[1], [0], [0], [1], [0, 0, 1, 1], [], []>} : vector<16x128xbf16>, vector<128x128xbf16>, vector<16x128xf32> -> vector<16x128xf32>
    %30 = arith.addf %24, %29 : vector<16x128xf32>
    %c0_33 = arith.constant 0 : index
    %c12_34 = arith.constant 12 : index
    %c24_35 = arith.constant 24 : index
    %c0_36 = arith.constant 0 : index
    %31 = vector.load %arg1[%c0_33, %c12_34, %c24_35, %c0_36] : memref<1x28x28x128xbf16, #tpu.memory_space<vmem>>, vector<1x4x4x128xbf16>
    %32 = vector.shape_cast %31 : vector<1x4x4x128xbf16> to vector<16x128xbf16>
    %c5 = arith.constant 5 : index
    %c0_37 = arith.constant 0 : index
    %c0_38 = arith.constant 0 : index
    %33 = vector.load %arg2[%c5, %c0_37, %c0_38] : memref<9x128x128xbf16, #tpu.memory_space<vmem>>, vector<1x128x128xbf16>
    %34 = vector.shape_cast %33 : vector<1x128x128xbf16> to vector<128x128xbf16>
    %cst_39 = arith.constant dense<0.000000e+00> : vector<16x128xf32>
    %35 = tpu.matmul %32, %34, %cst_39 {dimension_numbers = #tpu.dot_dimension_numbers<[1], [0], [0], [1], [0, 0, 1, 1], [], []>} : vector<16x128xbf16>, vector<128x128xbf16>, vector<16x128xf32> -> vector<16x128xf32>
    %36 = arith.addf %30, %35 : vector<16x128xf32>
    %c0_40 = arith.constant 0 : index
    %c24_41 = arith.constant 24 : index
    %c0_42 = arith.constant 0 : index
    %c0_43 = arith.constant 0 : index
    %37 = vector.load %arg1[%c0_40, %c24_41, %c0_42, %c0_43] : memref<1x28x28x128xbf16, #tpu.memory_space<vmem>>, vector<1x4x4x128xbf16>
    %38 = vector.shape_cast %37 : vector<1x4x4x128xbf16> to vector<16x128xbf16>
    %c6 = arith.constant 6 : index
    %c0_44 = arith.constant 0 : index
    %c0_45 = arith.constant 0 : index
    %39 = vector.load %arg2[%c6, %c0_44, %c0_45] : memref<9x128x128xbf16, #tpu.memory_space<vmem>>, vector<1x128x128xbf16>
    %40 = vector.shape_cast %39 : vector<1x128x128xbf16> to vector<128x128xbf16>
    %cst_46 = arith.constant dense<0.000000e+00> : vector<16x128xf32>
    %41 = tpu.matmul %38, %40, %cst_46 {dimension_numbers = #tpu.dot_dimension_numbers<[1], [0], [0], [1], [0, 0, 1, 1], [], []>} : vector<16x128xbf16>, vector<128x128xbf16>, vector<16x128xf32> -> vector<16x128xf32>
    %42 = arith.addf %36, %41 : vector<16x128xf32>
    %c0_47 = arith.constant 0 : index
    %c24_48 = arith.constant 24 : index
    %c12_49 = arith.constant 12 : index
    %c0_50 = arith.constant 0 : index
    %43 = vector.load %arg1[%c0_47, %c24_48, %c12_49, %c0_50] : memref<1x28x28x128xbf16, #tpu.memory_space<vmem>>, vector<1x4x4x128xbf16>
    %44 = vector.shape_cast %43 : vector<1x4x4x128xbf16> to vector<16x128xbf16>
    %c7 = arith.constant 7 : index
    %c0_51 = arith.constant 0 : index
    %c0_52 = arith.constant 0 : index
    %45 = vector.load %arg2[%c7, %c0_51, %c0_52] : memref<9x128x128xbf16, #tpu.memory_space<vmem>>, vector<1x128x128xbf16>
    %46 = vector.shape_cast %45 : vector<1x128x128xbf16> to vector<128x128xbf16>
    %cst_53 = arith.constant dense<0.000000e+00> : vector<16x128xf32>
    %47 = tpu.matmul %44, %46, %cst_53 {dimension_numbers = #tpu.dot_dimension_numbers<[1], [0], [0], [1], [0, 0, 1, 1], [], []>} : vector<16x128xbf16>, vector<128x128xbf16>, vector<16x128xf32> -> vector<16x128xf32>
    %48 = arith.addf %42, %47 : vector<16x128xf32>
    %c0_54 = arith.constant 0 : index
    %c24_55 = arith.constant 24 : index
    %c24_56 = arith.constant 24 : index
    %c0_57 = arith.constant 0 : index
    %49 = vector.load %arg1[%c0_54, %c24_55, %c24_56, %c0_57] : memref<1x28x28x128xbf16, #tpu.memory_space<vmem>>, vector<1x4x4x128xbf16>
    %50 = vector.shape_cast %49 : vector<1x4x4x128xbf16> to vector<16x128xbf16>
    %c8 = arith.constant 8 : index
    %c0_58 = arith.constant 0 : index
    %c0_59 = arith.constant 0 : index
    %51 = vector.load %arg2[%c8, %c0_58, %c0_59] : memref<9x128x128xbf16, #tpu.memory_space<vmem>>, vector<1x128x128xbf16>
    %52 = vector.shape_cast %51 : vector<1x128x128xbf16> to vector<128x128xbf16>
    %cst_60 = arith.constant dense<0.000000e+00> : vector<16x128xf32>
    %53 = tpu.matmul %50, %52, %cst_60 {dimension_numbers = #tpu.dot_dimension_numbers<[1], [0], [0], [1], [0, 0, 1, 1], [], []>} : vector<16x128xbf16>, vector<128x128xbf16>, vector<16x128xf32> -> vector<16x128xf32>
    %54 = arith.addf %48, %53 : vector<16x128xf32>
    %c0_61 = arith.constant 0 : index
    %c0_62 = arith.constant 0 : index
    %c0_63 = arith.constant 0 : index
    %55 = vector.load %arg3[%c0_61, %c0_62, %c0_63] : memref<1x1x128xf32, #tpu.memory_space<vmem>>, vector<1x1x128xf32>
    %56 = vector.shape_cast %55 : vector<1x1x128xf32> to vector<1x128xf32>
    %57 = vector.broadcast %56 : vector<1x128xf32> to vector<16x128xf32>
    %58 = arith.addf %54, %57 : vector<16x128xf32>
    %cst_64 = arith.constant 0.000000e+00 : f32
    %59 = vector.broadcast %cst_64 : f32 to vector<16x128xf32>
    %60 = arith.maximumf %58, %59 : vector<16x128xf32>
    %61 = vector.shape_cast %60 : vector<16x128xf32> to vector<1x4x4x128xf32>
    %62 = arith.truncf %61 : vector<1x4x4x128xf32> to vector<1x4x4x128xbf16>
    %c0_65 = arith.constant 0 : index
    %c0_66 = arith.constant 0 : index
    %c0_67 = arith.constant 0 : index
    %c0_68 = arith.constant 0 : index
    %63 = vector.load %arg4[%c0_65, %c0_66, %c0_67, %c0_68] : memref<1x4x4x128xbf16, #tpu.memory_space<vmem>>, vector<1x4x4x128xbf16>
    tpu.vector_store %arg4[%c0_65, %c0_66, %c0_67, %c0_68], %62 {strides = array<i32>} : memref<1x4x4x128xbf16, #tpu.memory_space<vmem>>, vector<1x4x4x128xbf16>,
    return
  }
  func.func @transform_0(%arg0: i32) -> (i32, i32, i32, i32) {
    %c0_i32 = arith.constant 0 : i32
    %c0_i32_0 = arith.constant 0 : i32
    %c0_i32_1 = arith.constant 0 : i32
    %c0_i32_2 = arith.constant 0 : i32
    return %arg0, %c0_i32, %c0_i32_0, %c0_i32_1 : i32, i32, i32, i32
  }
  func.func @transform_1(%arg0: i32) -> (i32, i32, i32) {
    %c0_i32 = arith.constant 0 : i32
    %c0_i32_0 = arith.constant 0 : i32
    %c0_i32_1 = arith.constant 0 : i32
    %c0_i32_2 = arith.constant 0 : i32
    return %c0_i32, %c0_i32_0, %c0_i32_1 : i32, i32, i32
  }
  func.func @transform_2(%arg0: i32) -> (i32, i32, i32) {
    %c0_i32 = arith.constant 0 : i32
    %c0_i32_0 = arith.constant 0 : i32
    %c0_i32_1 = arith.constant 0 : i32
    %c0_i32_2 = arith.constant 0 : i32
    return %c0_i32, %c0_i32_0, %c0_i32_1 : i32, i32, i32
  }
  func.func @transform_3(%arg0: i32) -> (i32, i32, i32, i32) {
    %c0_i32 = arith.constant 0 : i32
    %c0_i32_0 = arith.constant 0 : i32
    %c0_i32_1 = arith.constant 0 : i32
    %c0_i32_2 = arith.constant 0 : i32
    return %arg0, %c0_i32, %c0_i32_0, %c0_i32_1 : i32, i32, i32, i32
  }
}

module attributes {stable_mosaic.version = 11 : i64} {
  func.func @kernel(%arg0: i32, %arg1: memref<1x4x4x128xbf16, #tpu.memory_space<vmem>>, %arg2: memref<1x1x1x128xbf16, #tpu.memory_space<vmem>>) attributes {dimension_semantics = [#tpu.dimension_semantics<parallel>], iteration_bounds = array<i64: 2>, scalar_prefetch = 0 : i64, scratch_operands = 0 : i64, tpu.core_type = #tpu.core_type<tc>, window_params = [{transform_indices = @transform_0, window_bounds = array<i64: 1, 4, 4, 128>}, {transform_indices = @transform_1, window_bounds = array<i64: 1, 1, 1, 128>}]} {
    %c0 = arith.constant 0 : index
    %c0_0 = arith.constant 0 : index
    %c0_1 = arith.constant 0 : index
    %c0_2 = arith.constant 0 : index
    %0 = vector.load %arg1[%c0, %c0_0, %c0_1, %c0_2] : memref<1x4x4x128xbf16, #tpu.memory_space<vmem>>, vector<1x4x4x128xbf16>
    %1 = arith.extf %0 : vector<1x4x4x128xbf16> to vector<1x4x4x128xf32>
    %2 = vector.shape_cast %1 : vector<1x4x4x128xf32> to vector<16x128xf32>
    %cst = arith.constant dense<0.000000e+00> : vector<128xf32>
    %3 = vector.multi_reduction <add>, %2, %cst [0] : vector<16x128xf32> to vector<128xf32>
    %4 = vector.shape_cast %3 : vector<128xf32> to vector<1x128xf32>
    %cst_3 = arith.constant 1.600000e+01 : f32
    %5 = vector.broadcast %cst_3 : f32 to vector<1x128xf32>
    %6 = arith.divf %4, %5 : vector<1x128xf32>
    %7 = vector.shape_cast %6 : vector<1x128xf32> to vector<1x1x1x128xf32>
    %8 = arith.truncf %7 : vector<1x1x1x128xf32> to vector<1x1x1x128xbf16>
    %c0_4 = arith.constant 0 : index
    %c0_5 = arith.constant 0 : index
    %c0_6 = arith.constant 0 : index
    %c0_7 = arith.constant 0 : index
    %9 = vector.load %arg2[%c0_4, %c0_5, %c0_6, %c0_7] : memref<1x1x1x128xbf16, #tpu.memory_space<vmem>>, vector<1x1x1x128xbf16>
    tpu.vector_store %arg2[%c0_4, %c0_5, %c0_6, %c0_7], %8 {strides = array<i32>} : memref<1x1x1x128xbf16, #tpu.memory_space<vmem>>, vector<1x1x1x128xbf16>,
    return
  }
  func.func @transform_0(%arg0: i32) -> (i32, i32, i32, i32) {
    %c0_i32 = arith.constant 0 : i32
    %c0_i32_0 = arith.constant 0 : i32
    %c0_i32_1 = arith.constant 0 : i32
    %c0_i32_2 = arith.constant 0 : i32
    return %arg0, %c0_i32, %c0_i32_0, %c0_i32_1 : i32, i32, i32, i32
  }
  func.func @transform_1(%arg0: i32) -> (i32, i32, i32, i32) {
    %c0_i32 = arith.constant 0 : i32
    %c0_i32_0 = arith.constant 0 : i32
    %c0_i32_1 = arith.constant 0 : i32
    %c0_i32_2 = arith.constant 0 : i32
    return %arg0, %c0_i32, %c0_i32_0, %c0_i32_1 : i32, i32, i32, i32
  }
}

module attributes {stable_mosaic.version = 11 : i64} {
  func.func @kernel(%arg0: i32, %arg1: memref<1x1x1x128xbf16, #tpu.memory_space<vmem>>, %arg2: memref<1x128x128xbf16, #tpu.memory_space<vmem>>, %arg3: memref<1x1x128xf32, #tpu.memory_space<vmem>>, %arg4: memref<1x1x1x128xbf16, #tpu.memory_space<vmem>>) attributes {dimension_semantics = [#tpu.dimension_semantics<parallel>], iteration_bounds = array<i64: 2>, scalar_prefetch = 0 : i64, scratch_operands = 0 : i64, tpu.core_type = #tpu.core_type<tc>, window_params = [{transform_indices = @transform_0, window_bounds = array<i64: 1, 1, 1, 128>}, {pipeline_mode = #tpu.pipeline_mode<synchronous>, transform_indices = @transform_1, window_bounds = array<i64: 1, 128, 128>}, {pipeline_mode = #tpu.pipeline_mode<synchronous>, transform_indices = @transform_2, window_bounds = array<i64: 1, 1, 128>}, {transform_indices = @transform_3, window_bounds = array<i64: 1, 1, 1, 128>}]} {
    %cst = arith.constant 0.000000e+00 : f32
    %0 = vector.broadcast %cst : f32 to vector<1x128xf32>
    %c0 = arith.constant 0 : index
    %c0_0 = arith.constant 0 : index
    %c0_1 = arith.constant 0 : index
    %c0_2 = arith.constant 0 : index
    %1 = vector.load %arg1[%c0, %c0_0, %c0_1, %c0_2] : memref<1x1x1x128xbf16, #tpu.memory_space<vmem>>, vector<1x1x1x128xbf16>
    %2 = vector.shape_cast %1 : vector<1x1x1x128xbf16> to vector<1x128xbf16>
    %c0_3 = arith.constant 0 : index
    %c0_4 = arith.constant 0 : index
    %c0_5 = arith.constant 0 : index
    %3 = vector.load %arg2[%c0_3, %c0_4, %c0_5] : memref<1x128x128xbf16, #tpu.memory_space<vmem>>, vector<1x128x128xbf16>
    %4 = vector.shape_cast %3 : vector<1x128x128xbf16> to vector<128x128xbf16>
    %cst_6 = arith.constant dense<0.000000e+00> : vector<1x128xf32>
    %5 = tpu.matmul %2, %4, %cst_6 {dimension_numbers = #tpu.dot_dimension_numbers<[1], [0], [0], [1], [0, 0, 1, 1], [], []>} : vector<1x128xbf16>, vector<128x128xbf16>, vector<1x128xf32> -> vector<1x128xf32>
    %6 = arith.addf %0, %5 : vector<1x128xf32>
    %c0_7 = arith.constant 0 : index
    %c0_8 = arith.constant 0 : index
    %c0_9 = arith.constant 0 : index
    %7 = vector.load %arg3[%c0_7, %c0_8, %c0_9] : memref<1x1x128xf32, #tpu.memory_space<vmem>>, vector<1x1x128xf32>
    %8 = vector.shape_cast %7 : vector<1x1x128xf32> to vector<1x128xf32>
    %9 = arith.addf %6, %8 : vector<1x128xf32>
    %cst_10 = arith.constant 0.000000e+00 : f32
    %10 = vector.broadcast %cst_10 : f32 to vector<1x128xf32>
    %11 = arith.maximumf %9, %10 : vector<1x128xf32>
    %12 = vector.shape_cast %11 : vector<1x128xf32> to vector<1x1x1x128xf32>
    %13 = arith.truncf %12 : vector<1x1x1x128xf32> to vector<1x1x1x128xbf16>
    %c0_11 = arith.constant 0 : index
    %c0_12 = arith.constant 0 : index
    %c0_13 = arith.constant 0 : index
    %c0_14 = arith.constant 0 : index
    %14 = vector.load %arg4[%c0_11, %c0_12, %c0_13, %c0_14] : memref<1x1x1x128xbf16, #tpu.memory_space<vmem>>, vector<1x1x1x128xbf16>
    tpu.vector_store %arg4[%c0_11, %c0_12, %c0_13, %c0_14], %13 {strides = array<i32>} : memref<1x1x1x128xbf16, #tpu.memory_space<vmem>>, vector<1x1x1x128xbf16>,
    return
  }
  func.func @transform_0(%arg0: i32) -> (i32, i32, i32, i32) {
    %c0_i32 = arith.constant 0 : i32
    %c0_i32_0 = arith.constant 0 : i32
    %c0_i32_1 = arith.constant 0 : i32
    %c0_i32_2 = arith.constant 0 : i32
    return %arg0, %c0_i32, %c0_i32_0, %c0_i32_1 : i32, i32, i32, i32
  }
  func.func @transform_1(%arg0: i32) -> (i32, i32, i32) {
    %c0_i32 = arith.constant 0 : i32
    %c0_i32_0 = arith.constant 0 : i32
    %c0_i32_1 = arith.constant 0 : i32
    %c0_i32_2 = arith.constant 0 : i32
    return %c0_i32, %c0_i32_0, %c0_i32_1 : i32, i32, i32
  }
  func.func @transform_2(%arg0: i32) -> (i32, i32, i32) {
    %c0_i32 = arith.constant 0 : i32
    %c0_i32_0 = arith.constant 0 : i32
    %c0_i32_1 = arith.constant 0 : i32
    %c0_i32_2 = arith.constant 0 : i32
    return %c0_i32, %c0_i32_0, %c0_i32_1 : i32, i32, i32
  }
  func.func @transform_3(%arg0: i32) -> (i32, i32, i32, i32) {
    %c0_i32 = arith.constant 0 : i32
    %c0_i32_0 = arith.constant 0 : i32
    %c0_i32_1 = arith.constant 0 : i32
    %c0_i32_2 = arith.constant 0 : i32
    return %arg0, %c0_i32, %c0_i32_0, %c0_i32_1 : i32, i32, i32, i32
  }
}

module attributes {stable_mosaic.version = 11 : i64} {
  func.func @kernel(%arg0: i32, %arg1: memref<1x1x1x128xbf16, #tpu.memory_space<vmem>>, %arg2: memref<1x128x128xbf16, #tpu.memory_space<vmem>>, %arg3: memref<1x1x128xf32, #tpu.memory_space<vmem>>, %arg4: memref<1x1x1x128xf32, #tpu.memory_space<vmem>>) attributes {dimension_semantics = [#tpu.dimension_semantics<parallel>], iteration_bounds = array<i64: 2>, scalar_prefetch = 0 : i64, scratch_operands = 0 : i64, tpu.core_type = #tpu.core_type<tc>, window_params = [{transform_indices = @transform_0, window_bounds = array<i64: 1, 1, 1, 128>}, {pipeline_mode = #tpu.pipeline_mode<synchronous>, transform_indices = @transform_1, window_bounds = array<i64: 1, 128, 128>}, {pipeline_mode = #tpu.pipeline_mode<synchronous>, transform_indices = @transform_2, window_bounds = array<i64: 1, 1, 128>}, {transform_indices = @transform_3, window_bounds = array<i64: 1, 1, 1, 128>}]} {
    %cst = arith.constant 0.000000e+00 : f32
    %0 = vector.broadcast %cst : f32 to vector<1x128xf32>
    %c0 = arith.constant 0 : index
    %c0_0 = arith.constant 0 : index
    %c0_1 = arith.constant 0 : index
    %c0_2 = arith.constant 0 : index
    %1 = vector.load %arg1[%c0, %c0_0, %c0_1, %c0_2] : memref<1x1x1x128xbf16, #tpu.memory_space<vmem>>, vector<1x1x1x128xbf16>
    %2 = vector.shape_cast %1 : vector<1x1x1x128xbf16> to vector<1x128xbf16>
    %c0_3 = arith.constant 0 : index
    %c0_4 = arith.constant 0 : index
    %c0_5 = arith.constant 0 : index
    %3 = vector.load %arg2[%c0_3, %c0_4, %c0_5] : memref<1x128x128xbf16, #tpu.memory_space<vmem>>, vector<1x128x128xbf16>
    %4 = vector.shape_cast %3 : vector<1x128x128xbf16> to vector<128x128xbf16>
    %cst_6 = arith.constant dense<0.000000e+00> : vector<1x128xf32>
    %5 = tpu.matmul %2, %4, %cst_6 {dimension_numbers = #tpu.dot_dimension_numbers<[1], [0], [0], [1], [0, 0, 1, 1], [], []>} : vector<1x128xbf16>, vector<128x128xbf16>, vector<1x128xf32> -> vector<1x128xf32>
    %6 = arith.addf %0, %5 : vector<1x128xf32>
    %c0_7 = arith.constant 0 : index
    %c0_8 = arith.constant 0 : index
    %c0_9 = arith.constant 0 : index
    %7 = vector.load %arg3[%c0_7, %c0_8, %c0_9] : memref<1x1x128xf32, #tpu.memory_space<vmem>>, vector<1x1x128xf32>
    %8 = vector.shape_cast %7 : vector<1x1x128xf32> to vector<1x128xf32>
    %9 = arith.addf %6, %8 : vector<1x128xf32>
    %10 = vector.shape_cast %9 : vector<1x128xf32> to vector<1x1x1x128xf32>
    %c0_10 = arith.constant 0 : index
    %c0_11 = arith.constant 0 : index
    %c0_12 = arith.constant 0 : index
    %c0_13 = arith.constant 0 : index
    %11 = vector.load %arg4[%c0_10, %c0_11, %c0_12, %c0_13] : memref<1x1x1x128xf32, #tpu.memory_space<vmem>>, vector<1x1x1x128xf32>
    tpu.vector_store %arg4[%c0_10, %c0_11, %c0_12, %c0_13], %10 {strides = array<i32>} : memref<1x1x1x128xf32, #tpu.memory_space<vmem>>, vector<1x1x1x128xf32>,
    return
  }
  func.func @transform_0(%arg0: i32) -> (i32, i32, i32, i32) {
    %c0_i32 = arith.constant 0 : i32
    %c0_i32_0 = arith.constant 0 : i32
    %c0_i32_1 = arith.constant 0 : i32
    %c0_i32_2 = arith.constant 0 : i32
    return %arg0, %c0_i32, %c0_i32_0, %c0_i32_1 : i32, i32, i32, i32
  }
  func.func @transform_1(%arg0: i32) -> (i32, i32, i32) {
    %c0_i32 = arith.constant 0 : i32
    %c0_i32_0 = arith.constant 0 : i32
    %c0_i32_1 = arith.constant 0 : i32
    %c0_i32_2 = arith.constant 0 : i32
    return %c0_i32, %c0_i32_0, %c0_i32_1 : i32, i32, i32
  }
  func.func @transform_2(%arg0: i32) -> (i32, i32, i32) {
    %c0_i32 = arith.constant 0 : i32
    %c0_i32_0 = arith.constant 0 : i32
    %c0_i32_1 = arith.constant 0 : i32
    %c0_i32_2 = arith.constant 0 : i32
    return %c0_i32, %c0_i32_0, %c0_i32_1 : i32, i32, i32
  }
  func.func @transform_3(%arg0: i32) -> (i32, i32, i32, i32) {
    %c0_i32 = arith.constant 0 : i32
    %c0_i32_0 = arith.constant 0 : i32
    %c0_i32_1 = arith.constant 0 : i32
    %c0_i32_2 = arith.constant 0 : i32
    return %arg0, %c0_i32, %c0_i32_0, %c0_i32_1 : i32, i32, i32, i32
  }
}

module attributes {stable_mosaic.version = 11 : i64} {
  func.func @kernel(%arg0: i32, %arg1: memref<1x4x4x128xbf16, #tpu.memory_space<vmem>>, %arg2: memref<1x4x4x128xbf16, #tpu.memory_space<vmem>>, %arg3: memref<1x4x4x128xbf16, #tpu.memory_space<vmem>>, %arg4: memref<1x4x4x128xbf16, #tpu.memory_space<vmem>>, %arg5: memref<4x128x128xbf16, #tpu.memory_space<vmem>>, %arg6: memref<1x1x128xf32, #tpu.memory_space<vmem>>, %arg7: memref<1x4x4x128xbf16, #tpu.memory_space<vmem>>) attributes {dimension_semantics = [#tpu.dimension_semantics<parallel>], iteration_bounds = array<i64: 2>, scalar_prefetch = 0 : i64, scratch_operands = 0 : i64, tpu.core_type = #tpu.core_type<tc>, window_params = [{transform_indices = @transform_0, window_bounds = array<i64: 1, 4, 4, 128>}, {transform_indices = @transform_1, window_bounds = array<i64: 1, 4, 4, 128>}, {transform_indices = @transform_2, window_bounds = array<i64: 1, 4, 4, 128>}, {transform_indices = @transform_3, window_bounds = array<i64: 1, 4, 4, 128>}, {pipeline_mode = #tpu.pipeline_mode<synchronous>, transform_indices = @transform_4, window_bounds = array<i64: 4, 128, 128>}, {transform_indices = @transform_5, window_bounds = array<i64: 1, 1, 128>}, {transform_indices = @transform_6, window_bounds = array<i64: 1, 4, 4, 128>}]} {
    %cst = arith.constant 0.000000e+00 : f32
    %0 = vector.broadcast %cst : f32 to vector<16x128xf32>
    %c0 = arith.constant 0 : index
    %c0_0 = arith.constant 0 : index
    %c0_1 = arith.constant 0 : index
    %c0_2 = arith.constant 0 : index
    %1 = vector.load %arg1[%c0, %c0_0, %c0_1, %c0_2] : memref<1x4x4x128xbf16, #tpu.memory_space<vmem>>, vector<1x4x4x128xbf16>
    %2 = vector.shape_cast %1 : vector<1x4x4x128xbf16> to vector<16x128xbf16>
    %c0_3 = arith.constant 0 : index
    %c0_4 = arith.constant 0 : index
    %c0_5 = arith.constant 0 : index
    %3 = vector.load %arg5[%c0_3, %c0_4, %c0_5] : memref<4x128x128xbf16, #tpu.memory_space<vmem>>, vector<1x128x128xbf16>
    %4 = vector.shape_cast %3 : vector<1x128x128xbf16> to vector<128x128xbf16>
    %cst_6 = arith.constant dense<0.000000e+00> : vector<16x128xf32>
    %5 = tpu.matmul %2, %4, %cst_6 {dimension_numbers = #tpu.dot_dimension_numbers<[1], [0], [0], [1], [0, 0, 1, 1], [], []>} : vector<16x128xbf16>, vector<128x128xbf16>, vector<16x128xf32> -> vector<16x128xf32>
    %6 = arith.addf %0, %5 : vector<16x128xf32>
    %c0_7 = arith.constant 0 : index
    %c0_8 = arith.constant 0 : index
    %c0_9 = arith.constant 0 : index
    %c0_10 = arith.constant 0 : index
    %7 = vector.load %arg2[%c0_7, %c0_8, %c0_9, %c0_10] : memref<1x4x4x128xbf16, #tpu.memory_space<vmem>>, vector<1x4x4x128xbf16>
    %8 = vector.shape_cast %7 : vector<1x4x4x128xbf16> to vector<16x128xbf16>
    %c1 = arith.constant 1 : index
    %c0_11 = arith.constant 0 : index
    %c0_12 = arith.constant 0 : index
    %9 = vector.load %arg5[%c1, %c0_11, %c0_12] : memref<4x128x128xbf16, #tpu.memory_space<vmem>>, vector<1x128x128xbf16>
    %10 = vector.shape_cast %9 : vector<1x128x128xbf16> to vector<128x128xbf16>
    %cst_13 = arith.constant dense<0.000000e+00> : vector<16x128xf32>
    %11 = tpu.matmul %8, %10, %cst_13 {dimension_numbers = #tpu.dot_dimension_numbers<[1], [0], [0], [1], [0, 0, 1, 1], [], []>} : vector<16x128xbf16>, vector<128x128xbf16>, vector<16x128xf32> -> vector<16x128xf32>
    %12 = arith.addf %6, %11 : vector<16x128xf32>
    %c0_14 = arith.constant 0 : index
    %c0_15 = arith.constant 0 : index
    %c0_16 = arith.constant 0 : index
    %c0_17 = arith.constant 0 : index
    %13 = vector.load %arg3[%c0_14, %c0_15, %c0_16, %c0_17] : memref<1x4x4x128xbf16, #tpu.memory_space<vmem>>, vector<1x4x4x128xbf16>
    %14 = vector.shape_cast %13 : vector<1x4x4x128xbf16> to vector<16x128xbf16>
    %c2 = arith.constant 2 : index
    %c0_18 = arith.constant 0 : index
    %c0_19 = arith.constant 0 : index
    %15 = vector.load %arg5[%c2, %c0_18, %c0_19] : memref<4x128x128xbf16, #tpu.memory_space<vmem>>, vector<1x128x128xbf16>
    %16 = vector.shape_cast %15 : vector<1x128x128xbf16> to vector<128x128xbf16>
    %cst_20 = arith.constant dense<0.000000e+00> : vector<16x128xf32>
    %17 = tpu.matmul %14, %16, %cst_20 {dimension_numbers = #tpu.dot_dimension_numbers<[1], [0], [0], [1], [0, 0, 1, 1], [], []>} : vector<16x128xbf16>, vector<128x128xbf16>, vector<16x128xf32> -> vector<16x128xf32>
    %18 = arith.addf %12, %17 : vector<16x128xf32>
    %c0_21 = arith.constant 0 : index
    %c0_22 = arith.constant 0 : index
    %c0_23 = arith.constant 0 : index
    %c0_24 = arith.constant 0 : index
    %19 = vector.load %arg4[%c0_21, %c0_22, %c0_23, %c0_24] : memref<1x4x4x128xbf16, #tpu.memory_space<vmem>>, vector<1x4x4x128xbf16>
    %20 = vector.shape_cast %19 : vector<1x4x4x128xbf16> to vector<16x128xbf16>
    %c3 = arith.constant 3 : index
    %c0_25 = arith.constant 0 : index
    %c0_26 = arith.constant 0 : index
    %21 = vector.load %arg5[%c3, %c0_25, %c0_26] : memref<4x128x128xbf16, #tpu.memory_space<vmem>>, vector<1x128x128xbf16>
    %22 = vector.shape_cast %21 : vector<1x128x128xbf16> to vector<128x128xbf16>
    %cst_27 = arith.constant dense<0.000000e+00> : vector<16x128xf32>
    %23 = tpu.matmul %20, %22, %cst_27 {dimension_numbers = #tpu.dot_dimension_numbers<[1], [0], [0], [1], [0, 0, 1, 1], [], []>} : vector<16x128xbf16>, vector<128x128xbf16>, vector<16x128xf32> -> vector<16x128xf32>
    %24 = arith.addf %18, %23 : vector<16x128xf32>
    %c0_28 = arith.constant 0 : index
    %c0_29 = arith.constant 0 : index
    %c0_30 = arith.constant 0 : index
    %25 = vector.load %arg6[%c0_28, %c0_29, %c0_30] : memref<1x1x128xf32, #tpu.memory_space<vmem>>, vector<1x1x128xf32>
    %26 = vector.shape_cast %25 : vector<1x1x128xf32> to vector<1x128xf32>
    %27 = vector.broadcast %26 : vector<1x128xf32> to vector<16x128xf32>
    %28 = arith.addf %24, %27 : vector<16x128xf32>
    %cst_31 = arith.constant 0.000000e+00 : f32
    %29 = vector.broadcast %cst_31 : f32 to vector<16x128xf32>
    %30 = arith.maximumf %28, %29 : vector<16x128xf32>
    %31 = vector.shape_cast %30 : vector<16x128xf32> to vector<1x4x4x128xf32>
    %32 = arith.truncf %31 : vector<1x4x4x128xf32> to vector<1x4x4x128xbf16>
    %c0_32 = arith.constant 0 : index
    %c0_33 = arith.constant 0 : index
    %c0_34 = arith.constant 0 : index
    %c0_35 = arith.constant 0 : index
    %33 = vector.load %arg7[%c0_32, %c0_33, %c0_34, %c0_35] : memref<1x4x4x128xbf16, #tpu.memory_space<vmem>>, vector<1x4x4x128xbf16>
    tpu.vector_store %arg7[%c0_32, %c0_33, %c0_34, %c0_35], %32 {strides = array<i32>} : memref<1x4x4x128xbf16, #tpu.memory_space<vmem>>, vector<1x4x4x128xbf16>,
    return
  }
  func.func @transform_0(%arg0: i32) -> (i32, i32, i32, i32) {
    %c0_i32 = arith.constant 0 : i32
    %c0_i32_0 = arith.constant 0 : i32
    %c0_i32_1 = arith.constant 0 : i32
    %c0_i32_2 = arith.constant 0 : i32
    return %arg0, %c0_i32, %c0_i32_0, %c0_i32_1 : i32, i32, i32, i32
  }
  func.func @transform_1(%arg0: i32) -> (i32, i32, i32, i32) {
    %c0_i32 = arith.constant 0 : i32
    %c0_i32_0 = arith.constant 0 : i32
    %c0_i32_1 = arith.constant 0 : i32
    %c0_i32_2 = arith.constant 0 : i32
    return %arg0, %c0_i32, %c0_i32_0, %c0_i32_1 : i32, i32, i32, i32
  }
  func.func @transform_2(%arg0: i32) -> (i32, i32, i32, i32) {
    %c0_i32 = arith.constant 0 : i32
    %c0_i32_0 = arith.constant 0 : i32
    %c0_i32_1 = arith.constant 0 : i32
    %c0_i32_2 = arith.constant 0 : i32
    return %arg0, %c0_i32, %c0_i32_0, %c0_i32_1 : i32, i32, i32, i32
  }
  func.func @transform_3(%arg0: i32) -> (i32, i32, i32, i32) {
    %c0_i32 = arith.constant 0 : i32
    %c0_i32_0 = arith.constant 0 : i32
    %c0_i32_1 = arith.constant 0 : i32
    %c0_i32_2 = arith.constant 0 : i32
    return %arg0, %c0_i32, %c0_i32_0, %c0_i32_1 : i32, i32, i32, i32
  }
  func.func @transform_4(%arg0: i32) -> (i32, i32, i32) {
    %c0_i32 = arith.constant 0 : i32
    %c0_i32_0 = arith.constant 0 : i32
    %c0_i32_1 = arith.constant 0 : i32
    %c0_i32_2 = arith.constant 0 : i32
    return %c0_i32, %c0_i32_0, %c0_i32_1 : i32, i32, i32
  }
  func.func @transform_5(%arg0: i32) -> (i32, i32, i32) {
    %c0_i32 = arith.constant 0 : i32
    %c0_i32_0 = arith.constant 0 : i32
    %c0_i32_1 = arith.constant 0 : i32
    return %arg0, %c0_i32, %c0_i32_0 : i32, i32, i32
  }
  func.func @transform_6(%arg0: i32) -> (i32, i32, i32, i32) {
    %c0_i32 = arith.constant 0 : i32
    %c0_i32_0 = arith.constant 0 : i32
    %c0_i32_1 = arith.constant 0 : i32
    %c0_i32_2 = arith.constant 0 : i32
    return %arg0, %c0_i32, %c0_i32_0, %c0_i32_1 : i32, i32, i32, i32
  }
}

module attributes {stable_mosaic.version = 11 : i64} {
  func.func @kernel(%arg0: i32, %arg1: memref<1x4x4x128xbf16, #tpu.memory_space<vmem>>, %arg2: memref<1x128x128xbf16, #tpu.memory_space<vmem>>, %arg3: memref<1x1x128xf32, #tpu.memory_space<vmem>>, %arg4: memref<1x4x4x128xbf16, #tpu.memory_space<vmem>>) attributes {dimension_semantics = [#tpu.dimension_semantics<parallel>], iteration_bounds = array<i64: 2>, scalar_prefetch = 0 : i64, scratch_operands = 0 : i64, tpu.core_type = #tpu.core_type<tc>, window_params = [{transform_indices = @transform_0, window_bounds = array<i64: 1, 4, 4, 128>}, {pipeline_mode = #tpu.pipeline_mode<synchronous>, transform_indices = @transform_1, window_bounds = array<i64: 1, 128, 128>}, {pipeline_mode = #tpu.pipeline_mode<synchronous>, transform_indices = @transform_2, window_bounds = array<i64: 1, 1, 128>}, {transform_indices = @transform_3, window_bounds = array<i64: 1, 4, 4, 128>}]} {
    %cst = arith.constant 0.000000e+00 : f32
    %0 = vector.broadcast %cst : f32 to vector<16x128xf32>
    %c0 = arith.constant 0 : index
    %c0_0 = arith.constant 0 : index
    %c0_1 = arith.constant 0 : index
    %c0_2 = arith.constant 0 : index
    %1 = vector.load %arg1[%c0, %c0_0, %c0_1, %c0_2] : memref<1x4x4x128xbf16, #tpu.memory_space<vmem>>, vector<1x4x4x128xbf16>
    %2 = vector.shape_cast %1 : vector<1x4x4x128xbf16> to vector<16x128xbf16>
    %c0_3 = arith.constant 0 : index
    %c0_4 = arith.constant 0 : index
    %c0_5 = arith.constant 0 : index
    %3 = vector.load %arg2[%c0_3, %c0_4, %c0_5] : memref<1x128x128xbf16, #tpu.memory_space<vmem>>, vector<1x128x128xbf16>
    %4 = vector.shape_cast %3 : vector<1x128x128xbf16> to vector<128x128xbf16>
    %cst_6 = arith.constant dense<0.000000e+00> : vector<16x128xf32>
    %5 = tpu.matmul %2, %4, %cst_6 {dimension_numbers = #tpu.dot_dimension_numbers<[1], [0], [0], [1], [0, 0, 1, 1], [], []>} : vector<16x128xbf16>, vector<128x128xbf16>, vector<16x128xf32> -> vector<16x128xf32>
    %6 = arith.addf %0, %5 : vector<16x128xf32>
    %c0_7 = arith.constant 0 : index
    %c0_8 = arith.constant 0 : index
    %c0_9 = arith.constant 0 : index
    %7 = vector.load %arg3[%c0_7, %c0_8, %c0_9] : memref<1x1x128xf32, #tpu.memory_space<vmem>>, vector<1x1x128xf32>
    %8 = vector.shape_cast %7 : vector<1x1x128xf32> to vector<1x128xf32>
    %9 = vector.broadcast %8 : vector<1x128xf32> to vector<16x128xf32>
    %10 = arith.addf %6, %9 : vector<16x128xf32>
    %11 = vector.shape_cast %10 : vector<16x128xf32> to vector<1x4x4x128xf32>
    %12 = arith.truncf %11 : vector<1x4x4x128xf32> to vector<1x4x4x128xbf16>
    %c0_10 = arith.constant 0 : index
    %c0_11 = arith.constant 0 : index
    %c0_12 = arith.constant 0 : index
    %c0_13 = arith.constant 0 : index
    %13 = vector.load %arg4[%c0_10, %c0_11, %c0_12, %c0_13] : memref<1x4x4x128xbf16, #tpu.memory_space<vmem>>, vector<1x4x4x128xbf16>
    tpu.vector_store %arg4[%c0_10, %c0_11, %c0_12, %c0_13], %12 {strides = array<i32>} : memref<1x4x4x128xbf16, #tpu.memory_space<vmem>>, vector<1x4x4x128xbf16>,
    return
  }
  func.func @transform_0(%arg0: i32) -> (i32, i32, i32, i32) {
    %c0_i32 = arith.constant 0 : i32
    %c0_i32_0 = arith.constant 0 : i32
    %c0_i32_1 = arith.constant 0 : i32
    %c0_i32_2 = arith.constant 0 : i32
    return %arg0, %c0_i32, %c0_i32_0, %c0_i32_1 : i32, i32, i32, i32
  }
  func.func @transform_1(%arg0: i32) -> (i32, i32, i32) {
    %c0_i32 = arith.constant 0 : i32
    %c0_i32_0 = arith.constant 0 : i32
    %c0_i32_1 = arith.constant 0 : i32
    %c0_i32_2 = arith.constant 0 : i32
    return %c0_i32, %c0_i32_0, %c0_i32_1 : i32, i32, i32
  }
  func.func @transform_2(%arg0: i32) -> (i32, i32, i32) {
    %c0_i32 = arith.constant 0 : i32
    %c0_i32_0 = arith.constant 0 : i32
    %c0_i32_1 = arith.constant 0 : i32
    %c0_i32_2 = arith.constant 0 : i32
    return %c0_i32, %c0_i32_0, %c0_i32_1 : i32, i32, i32
  }
  func.func @transform_3(%arg0: i32) -> (i32, i32, i32, i32) {
    %c0_i32 = arith.constant 0 : i32
    %c0_i32_0 = arith.constant 0 : i32
    %c0_i32_1 = arith.constant 0 : i32
    %c0_i32_2 = arith.constant 0 : i32
    return %arg0, %c0_i32, %c0_i32_0, %c0_i32_1 : i32, i32, i32, i32
  }
}

module attributes {stable_mosaic.version = 11 : i64} {
  func.func @kernel(%arg0: i32, %arg1: memref<1x6x6x128xbf16, #tpu.memory_space<vmem>>, %arg2: memref<9x128x128xbf16, #tpu.memory_space<vmem>>, %arg3: memref<1x1x128xf32, #tpu.memory_space<vmem>>, %arg4: memref<1x4x4x128xbf16, #tpu.memory_space<vmem>>) attributes {dimension_semantics = [#tpu.dimension_semantics<parallel>], iteration_bounds = array<i64: 2>, scalar_prefetch = 0 : i64, scratch_operands = 0 : i64, tpu.core_type = #tpu.core_type<tc>, window_params = [{transform_indices = @transform_0, window_bounds = array<i64: 1, 6, 6, 128>}, {pipeline_mode = #tpu.pipeline_mode<synchronous>, transform_indices = @transform_1, window_bounds = array<i64: 9, 128, 128>}, {pipeline_mode = #tpu.pipeline_mode<synchronous>, transform_indices = @transform_2, window_bounds = array<i64: 1, 1, 128>}, {transform_indices = @transform_3, window_bounds = array<i64: 1, 4, 4, 128>}]} {
    %cst = arith.constant 0.000000e+00 : f32
    %0 = vector.broadcast %cst : f32 to vector<16x128xf32>
    %c0 = arith.constant 0 : index
    %c0_0 = arith.constant 0 : index
    %c0_1 = arith.constant 0 : index
    %c0_2 = arith.constant 0 : index
    %1 = vector.load %arg1[%c0, %c0_0, %c0_1, %c0_2] : memref<1x6x6x128xbf16, #tpu.memory_space<vmem>>, vector<1x4x4x128xbf16>
    %2 = vector.shape_cast %1 : vector<1x4x4x128xbf16> to vector<16x128xbf16>
    %c0_3 = arith.constant 0 : index
    %c0_4 = arith.constant 0 : index
    %c0_5 = arith.constant 0 : index
    %3 = vector.load %arg2[%c0_3, %c0_4, %c0_5] : memref<9x128x128xbf16, #tpu.memory_space<vmem>>, vector<1x128x128xbf16>
    %4 = vector.shape_cast %3 : vector<1x128x128xbf16> to vector<128x128xbf16>
    %cst_6 = arith.constant dense<0.000000e+00> : vector<16x128xf32>
    %5 = tpu.matmul %2, %4, %cst_6 {dimension_numbers = #tpu.dot_dimension_numbers<[1], [0], [0], [1], [0, 0, 1, 1], [], []>} : vector<16x128xbf16>, vector<128x128xbf16>, vector<16x128xf32> -> vector<16x128xf32>
    %6 = arith.addf %0, %5 : vector<16x128xf32>
    %c0_7 = arith.constant 0 : index
    %c0_8 = arith.constant 0 : index
    %c1 = arith.constant 1 : index
    %c0_9 = arith.constant 0 : index
    %7 = vector.load %arg1[%c0_7, %c0_8, %c1, %c0_9] : memref<1x6x6x128xbf16, #tpu.memory_space<vmem>>, vector<1x4x4x128xbf16>
    %8 = vector.shape_cast %7 : vector<1x4x4x128xbf16> to vector<16x128xbf16>
    %c1_10 = arith.constant 1 : index
    %c0_11 = arith.constant 0 : index
    %c0_12 = arith.constant 0 : index
    %9 = vector.load %arg2[%c1_10, %c0_11, %c0_12] : memref<9x128x128xbf16, #tpu.memory_space<vmem>>, vector<1x128x128xbf16>
    %10 = vector.shape_cast %9 : vector<1x128x128xbf16> to vector<128x128xbf16>
    %cst_13 = arith.constant dense<0.000000e+00> : vector<16x128xf32>
    %11 = tpu.matmul %8, %10, %cst_13 {dimension_numbers = #tpu.dot_dimension_numbers<[1], [0], [0], [1], [0, 0, 1, 1], [], []>} : vector<16x128xbf16>, vector<128x128xbf16>, vector<16x128xf32> -> vector<16x128xf32>
    %12 = arith.addf %6, %11 : vector<16x128xf32>
    %c0_14 = arith.constant 0 : index
    %c0_15 = arith.constant 0 : index
    %c2 = arith.constant 2 : index
    %c0_16 = arith.constant 0 : index
    %13 = vector.load %arg1[%c0_14, %c0_15, %c2, %c0_16] : memref<1x6x6x128xbf16, #tpu.memory_space<vmem>>, vector<1x4x4x128xbf16>
    %14 = vector.shape_cast %13 : vector<1x4x4x128xbf16> to vector<16x128xbf16>
    %c2_17 = arith.constant 2 : index
    %c0_18 = arith.constant 0 : index
    %c0_19 = arith.constant 0 : index
    %15 = vector.load %arg2[%c2_17, %c0_18, %c0_19] : memref<9x128x128xbf16, #tpu.memory_space<vmem>>, vector<1x128x128xbf16>
    %16 = vector.shape_cast %15 : vector<1x128x128xbf16> to vector<128x128xbf16>
    %cst_20 = arith.constant dense<0.000000e+00> : vector<16x128xf32>
    %17 = tpu.matmul %14, %16, %cst_20 {dimension_numbers = #tpu.dot_dimension_numbers<[1], [0], [0], [1], [0, 0, 1, 1], [], []>} : vector<16x128xbf16>, vector<128x128xbf16>, vector<16x128xf32> -> vector<16x128xf32>
    %18 = arith.addf %12, %17 : vector<16x128xf32>
    %c0_21 = arith.constant 0 : index
    %c1_22 = arith.constant 1 : index
    %c0_23 = arith.constant 0 : index
    %c0_24 = arith.constant 0 : index
    %19 = vector.load %arg1[%c0_21, %c1_22, %c0_23, %c0_24] : memref<1x6x6x128xbf16, #tpu.memory_space<vmem>>, vector<1x4x4x128xbf16>
    %20 = vector.shape_cast %19 : vector<1x4x4x128xbf16> to vector<16x128xbf16>
    %c3 = arith.constant 3 : index
    %c0_25 = arith.constant 0 : index
    %c0_26 = arith.constant 0 : index
    %21 = vector.load %arg2[%c3, %c0_25, %c0_26] : memref<9x128x128xbf16, #tpu.memory_space<vmem>>, vector<1x128x128xbf16>
    %22 = vector.shape_cast %21 : vector<1x128x128xbf16> to vector<128x128xbf16>
    %cst_27 = arith.constant dense<0.000000e+00> : vector<16x128xf32>
    %23 = tpu.matmul %20, %22, %cst_27 {dimension_numbers = #tpu.dot_dimension_numbers<[1], [0], [0], [1], [0, 0, 1, 1], [], []>} : vector<16x128xbf16>, vector<128x128xbf16>, vector<16x128xf32> -> vector<16x128xf32>
    %24 = arith.addf %18, %23 : vector<16x128xf32>
    %c0_28 = arith.constant 0 : index
    %c1_29 = arith.constant 1 : index
    %c1_30 = arith.constant 1 : index
    %c0_31 = arith.constant 0 : index
    %25 = vector.load %arg1[%c0_28, %c1_29, %c1_30, %c0_31] : memref<1x6x6x128xbf16, #tpu.memory_space<vmem>>, vector<1x4x4x128xbf16>
    %26 = vector.shape_cast %25 : vector<1x4x4x128xbf16> to vector<16x128xbf16>
    %c4 = arith.constant 4 : index
    %c0_32 = arith.constant 0 : index
    %c0_33 = arith.constant 0 : index
    %27 = vector.load %arg2[%c4, %c0_32, %c0_33] : memref<9x128x128xbf16, #tpu.memory_space<vmem>>, vector<1x128x128xbf16>
    %28 = vector.shape_cast %27 : vector<1x128x128xbf16> to vector<128x128xbf16>
    %cst_34 = arith.constant dense<0.000000e+00> : vector<16x128xf32>
    %29 = tpu.matmul %26, %28, %cst_34 {dimension_numbers = #tpu.dot_dimension_numbers<[1], [0], [0], [1], [0, 0, 1, 1], [], []>} : vector<16x128xbf16>, vector<128x128xbf16>, vector<16x128xf32> -> vector<16x128xf32>
    %30 = arith.addf %24, %29 : vector<16x128xf32>
    %c0_35 = arith.constant 0 : index
    %c1_36 = arith.constant 1 : index
    %c2_37 = arith.constant 2 : index
    %c0_38 = arith.constant 0 : index
    %31 = vector.load %arg1[%c0_35, %c1_36, %c2_37, %c0_38] : memref<1x6x6x128xbf16, #tpu.memory_space<vmem>>, vector<1x4x4x128xbf16>
    %32 = vector.shape_cast %31 : vector<1x4x4x128xbf16> to vector<16x128xbf16>
    %c5 = arith.constant 5 : index
    %c0_39 = arith.constant 0 : index
    %c0_40 = arith.constant 0 : index
    %33 = vector.load %arg2[%c5, %c0_39, %c0_40] : memref<9x128x128xbf16, #tpu.memory_space<vmem>>, vector<1x128x128xbf16>
    %34 = vector.shape_cast %33 : vector<1x128x128xbf16> to vector<128x128xbf16>
    %cst_41 = arith.constant dense<0.000000e+00> : vector<16x128xf32>
    %35 = tpu.matmul %32, %34, %cst_41 {dimension_numbers = #tpu.dot_dimension_numbers<[1], [0], [0], [1], [0, 0, 1, 1], [], []>} : vector<16x128xbf16>, vector<128x128xbf16>, vector<16x128xf32> -> vector<16x128xf32>
    %36 = arith.addf %30, %35 : vector<16x128xf32>
    %c0_42 = arith.constant 0 : index
    %c2_43 = arith.constant 2 : index
    %c0_44 = arith.constant 0 : index
    %c0_45 = arith.constant 0 : index
    %37 = vector.load %arg1[%c0_42, %c2_43, %c0_44, %c0_45] : memref<1x6x6x128xbf16, #tpu.memory_space<vmem>>, vector<1x4x4x128xbf16>
    %38 = vector.shape_cast %37 : vector<1x4x4x128xbf16> to vector<16x128xbf16>
    %c6 = arith.constant 6 : index
    %c0_46 = arith.constant 0 : index
    %c0_47 = arith.constant 0 : index
    %39 = vector.load %arg2[%c6, %c0_46, %c0_47] : memref<9x128x128xbf16, #tpu.memory_space<vmem>>, vector<1x128x128xbf16>
    %40 = vector.shape_cast %39 : vector<1x128x128xbf16> to vector<128x128xbf16>
    %cst_48 = arith.constant dense<0.000000e+00> : vector<16x128xf32>
    %41 = tpu.matmul %38, %40, %cst_48 {dimension_numbers = #tpu.dot_dimension_numbers<[1], [0], [0], [1], [0, 0, 1, 1], [], []>} : vector<16x128xbf16>, vector<128x128xbf16>, vector<16x128xf32> -> vector<16x128xf32>
    %42 = arith.addf %36, %41 : vector<16x128xf32>
    %c0_49 = arith.constant 0 : index
    %c2_50 = arith.constant 2 : index
    %c1_51 = arith.constant 1 : index
    %c0_52 = arith.constant 0 : index
    %43 = vector.load %arg1[%c0_49, %c2_50, %c1_51, %c0_52] : memref<1x6x6x128xbf16, #tpu.memory_space<vmem>>, vector<1x4x4x128xbf16>
    %44 = vector.shape_cast %43 : vector<1x4x4x128xbf16> to vector<16x128xbf16>
    %c7 = arith.constant 7 : index
    %c0_53 = arith.constant 0 : index
    %c0_54 = arith.constant 0 : index
    %45 = vector.load %arg2[%c7, %c0_53, %c0_54] : memref<9x128x128xbf16, #tpu.memory_space<vmem>>, vector<1x128x128xbf16>
    %46 = vector.shape_cast %45 : vector<1x128x128xbf16> to vector<128x128xbf16>
    %cst_55 = arith.constant dense<0.000000e+00> : vector<16x128xf32>
    %47 = tpu.matmul %44, %46, %cst_55 {dimension_numbers = #tpu.dot_dimension_numbers<[1], [0], [0], [1], [0, 0, 1, 1], [], []>} : vector<16x128xbf16>, vector<128x128xbf16>, vector<16x128xf32> -> vector<16x128xf32>
    %48 = arith.addf %42, %47 : vector<16x128xf32>
    %c0_56 = arith.constant 0 : index
    %c2_57 = arith.constant 2 : index
    %c2_58 = arith.constant 2 : index
    %c0_59 = arith.constant 0 : index
    %49 = vector.load %arg1[%c0_56, %c2_57, %c2_58, %c0_59] : memref<1x6x6x128xbf16, #tpu.memory_space<vmem>>, vector<1x4x4x128xbf16>
    %50 = vector.shape_cast %49 : vector<1x4x4x128xbf16> to vector<16x128xbf16>
    %c8 = arith.constant 8 : index
    %c0_60 = arith.constant 0 : index
    %c0_61 = arith.constant 0 : index
    %51 = vector.load %arg2[%c8, %c0_60, %c0_61] : memref<9x128x128xbf16, #tpu.memory_space<vmem>>, vector<1x128x128xbf16>
    %52 = vector.shape_cast %51 : vector<1x128x128xbf16> to vector<128x128xbf16>
    %cst_62 = arith.constant dense<0.000000e+00> : vector<16x128xf32>
    %53 = tpu.matmul %50, %52, %cst_62 {dimension_numbers = #tpu.dot_dimension_numbers<[1], [0], [0], [1], [0, 0, 1, 1], [], []>} : vector<16x128xbf16>, vector<128x128xbf16>, vector<16x128xf32> -> vector<16x128xf32>
    %54 = arith.addf %48, %53 : vector<16x128xf32>
    %c0_63 = arith.constant 0 : index
    %c0_64 = arith.constant 0 : index
    %c0_65 = arith.constant 0 : index
    %55 = vector.load %arg3[%c0_63, %c0_64, %c0_65] : memref<1x1x128xf32, #tpu.memory_space<vmem>>, vector<1x1x128xf32>
    %56 = vector.shape_cast %55 : vector<1x1x128xf32> to vector<1x128xf32>
    %57 = vector.broadcast %56 : vector<1x128xf32> to vector<16x128xf32>
    %58 = arith.addf %54, %57 : vector<16x128xf32>
    %cst_66 = arith.constant 0.000000e+00 : f32
    %59 = vector.broadcast %cst_66 : f32 to vector<16x128xf32>
    %60 = arith.maximumf %58, %59 : vector<16x128xf32>
    %61 = vector.shape_cast %60 : vector<16x128xf32> to vector<1x4x4x128xf32>
    %62 = arith.truncf %61 : vector<1x4x4x128xf32> to vector<1x4x4x128xbf16>
    %c0_67 = arith.constant 0 : index
    %c0_68 = arith.constant 0 : index
    %c0_69 = arith.constant 0 : index
    %c0_70 = arith.constant 0 : index
    %63 = vector.load %arg4[%c0_67, %c0_68, %c0_69, %c0_70] : memref<1x4x4x128xbf16, #tpu.memory_space<vmem>>, vector<1x4x4x128xbf16>
    tpu.vector_store %arg4[%c0_67, %c0_68, %c0_69, %c0_70], %62 {strides = array<i32>} : memref<1x4x4x128xbf16, #tpu.memory_space<vmem>>, vector<1x4x4x128xbf16>,
    return
  }
  func.func @transform_0(%arg0: i32) -> (i32, i32, i32, i32) {
    %c0_i32 = arith.constant 0 : i32
    %c0_i32_0 = arith.constant 0 : i32
    %c0_i32_1 = arith.constant 0 : i32
    %c0_i32_2 = arith.constant 0 : i32
    return %arg0, %c0_i32, %c0_i32_0, %c0_i32_1 : i32, i32, i32, i32
  }
  func.func @transform_1(%arg0: i32) -> (i32, i32, i32) {
    %c0_i32 = arith.constant 0 : i32
    %c0_i32_0 = arith.constant 0 : i32
    %c0_i32_1 = arith.constant 0 : i32
    %c0_i32_2 = arith.constant 0 : i32
    return %c0_i32, %c0_i32_0, %c0_i32_1 : i32, i32, i32
  }
  func.func @transform_2(%arg0: i32) -> (i32, i32, i32) {
    %c0_i32 = arith.constant 0 : i32
    %c0_i32_0 = arith.constant 0 : i32
    %c0_i32_1 = arith.constant 0 : i32
    %c0_i32_2 = arith.constant 0 : i32
    return %c0_i32, %c0_i32_0, %c0_i32_1 : i32, i32, i32
  }
  func.func @transform_3(%arg0: i32) -> (i32, i32, i32, i32) {
    %c0_i32 = arith.constant 0 : i32
    %c0_i32_0 = arith.constant 0 : i32
    %c0_i32_1 = arith.constant 0 : i32
    %c0_i32_2 = arith.constant 0 : i32
    return %arg0, %c0_i32, %c0_i32_0, %c0_i32_1 : i32, i32, i32, i32
  }
}

module attributes {stable_mosaic.version = 11 : i64} {
  func.func @kernel(%arg0: i32, %arg1: memref<1x4x4x128xbf16, #tpu.memory_space<vmem>>, %arg2: memref<256x16xf32, #tpu.memory_space<vmem>>, %arg3: memref<1x16x16x128xf32, #tpu.memory_space<vmem>>) attributes {dimension_semantics = [#tpu.dimension_semantics<parallel>], iteration_bounds = array<i64: 2>, scalar_prefetch = 0 : i64, scratch_operands = 0 : i64, tpu.core_type = #tpu.core_type<tc>, window_params = [{transform_indices = @transform_0, window_bounds = array<i64: 1, 4, 4, 128>}, {pipeline_mode = #tpu.pipeline_mode<synchronous>, transform_indices = @transform_1, window_bounds = array<i64: 256, 16>}, {transform_indices = @transform_2, window_bounds = array<i64: 1, 16, 16, 128>}]} {
    %c0 = arith.constant 0 : index
    %c0_0 = arith.constant 0 : index
    %c0_1 = arith.constant 0 : index
    %c0_2 = arith.constant 0 : index
    %0 = vector.load %arg1[%c0, %c0_0, %c0_1, %c0_2] : memref<1x4x4x128xbf16, #tpu.memory_space<vmem>>, vector<1x4x4x128xbf16>
    %1 = arith.extf %0 : vector<1x4x4x128xbf16> to vector<1x4x4x128xf32>
    %2 = vector.shape_cast %1 : vector<1x4x4x128xf32> to vector<16x128xf32>
    %c0_3 = arith.constant 0 : index
    %c0_4 = arith.constant 0 : index
    %3 = vector.load %arg2[%c0_3, %c0_4] : memref<256x16xf32, #tpu.memory_space<vmem>>, vector<256x16xf32>
    %cst = arith.constant dense<0.000000e+00> : vector<256x128xf32>
    %4 = tpu.matmul %3, %2, %cst {dimension_numbers = #tpu.dot_dimension_numbers<[1], [0], [0], [1], [0, 0, 1, 1], [], []>} : vector<256x16xf32>, vector<16x128xf32>, vector<256x128xf32> -> vector<256x128xf32>
    %5 = vector.shape_cast %4 : vector<256x128xf32> to vector<1x16x16x128xf32>
    %c0_5 = arith.constant 0 : index
    %c0_6 = arith.constant 0 : index
    %c0_7 = arith.constant 0 : index
    %c0_8 = arith.constant 0 : index
    %6 = vector.load %arg3[%c0_5, %c0_6, %c0_7, %c0_8] : memref<1x16x16x128xf32, #tpu.memory_space<vmem>>, vector<1x16x16x128xf32>
    tpu.vector_store %arg3[%c0_5, %c0_6, %c0_7, %c0_8], %5 {strides = array<i32>} : memref<1x16x16x128xf32, #tpu.memory_space<vmem>>, vector<1x16x16x128xf32>,
    return
  }
  func.func @transform_0(%arg0: i32) -> (i32, i32, i32, i32) {
    %c0_i32 = arith.constant 0 : i32
    %c0_i32_0 = arith.constant 0 : i32
    %c0_i32_1 = arith.constant 0 : i32
    %c0_i32_2 = arith.constant 0 : i32
    return %arg0, %c0_i32, %c0_i32_0, %c0_i32_1 : i32, i32, i32, i32
  }
  func.func @transform_1(%arg0: i32) -> (i32, i32) {
    %c0_i32 = arith.constant 0 : i32
    %c0_i32_0 = arith.constant 0 : i32
    %c0_i32_1 = arith.constant 0 : i32
    return %c0_i32, %c0_i32_0 : i32, i32
  }
  func.func @transform_2(%arg0: i32) -> (i32, i32, i32, i32) {
    %c0_i32 = arith.constant 0 : i32
    %c0_i32_0 = arith.constant 0 : i32
    %c0_i32_1 = arith.constant 0 : i32
    %c0_i32_2 = arith.constant 0 : i32
    return %arg0, %c0_i32, %c0_i32_0, %c0_i32_1 : i32, i32, i32, i32
  }
}

</mosaic_0001>

<bundles_post_ra>
// kernel: deeplabv3_forward.17
= control target key start
LH: loop header
LB: loop body
LE: loop exit
PB: predicated region body
PF: predicated region fallthrough
CT: control target
= control target key end

     0   :  { %8 = vsyncpa [#allocation3], 0  ;;  %s2615_s0 = inlined_call_operand.vmem [shape: bf16[2,8,8,128], index: 0, kind: input, shape index: {}]   ;;  %s2616_s1 = inlined_call_operand.hbm [shape: bf16[9,128,128], index: 1, kind: input, shape index: {}]   ;;  %s2617_s2 = inlined_call_operand.hbm [shape: f32[1,1,128], index: 2, kind: input, shape index: {}]   ;;  %s2618_s3 = inlined_call_operand.vmem [shape: bf16[2,4,4,128], index: 3, kind: output, shape index: {}]  }
   0x1   :  { %9 = vsyncpa [#allocation5], 0  ;;  %s2382_s12 = smov 0  }
   0x2 LB: > { %s2388_s13 = sadd.s32 4294967295, %s2353_s12   ;;  %p1754_p0 = scmp.ge.s32.totalorder %s2353_s12, 1  ;;  %s2353_s12 = sphi %s2382_s12, %s15_s12  }
   0x3   : > { %p114_p1 = scmp.lt.s32.totalorder %s2353_s12, 3  ;;  %s2355_s14 = smov [#allocation2]  }
   0x4   : > { %s126_s15 = sshll.u32 %s2355_s14, 4  ;;  %p2184_p3 = scmp.eq.s32.totalorder %s2388_s13, 0  ;;  %s127_s15 = int_to_ptr.vmem [resolvable:$true] %s126_s15 }
   0x5   : > { %p2392_p2 = pnand %p1754_p0, %p114_p1  ;;  %s2356_s17 = smov [#allocation4]  }
   0x6   : > { %s140_s18 = sshll.u32 %s2356_s17, 4  ;;  %s2298_s20 = scalar_lea.vmem %s127_s15, 9216  ;;  %s141_s18 = int_to_ptr.vmem [resolvable:$true] %s140_s18 }
   0x7   : > { %p2177_p4 = pneg %p2392_p2  ;;  %p2299_p7 = scmp.ne.s32.totalorder %s127_s15, %s2298_s20 }
   0x8   : > { %p2306_p10 = scmp.lt.s32.totalorder %s127_s15, %s127_s15  ;;  %p2307_p11 = scmp.lt.s32.totalorder %s2298_s20, %s2298_s20 }
   0x9   : > { %p2401_p5 = pnand %p2184_p3, %p2177_p4 }
   0xa   : > { %p2308_p12 = por %p2307_p11, %p2306_p10 }
   0xb   : > { %p2289_p6 = pneg %p2401_p5 }
   0xd   : > { %p2301_p8 = pnand %p2299_p7, %p2289_p6 }
   0xf   : > { %p2302_p9 = pneg %p2301_p8 }
  0x11   : > { %p2309_p13 = pnand %p2308_p12, %p2302_p9 }
  0x13   : > { %2312 = shalt.err (!%p2309_p13)
}
  0x14   : > { %s2357_s21 = smov 64   ;;  %s2358_s22 = smov 4  }
  0x15   : > { %2180 = dma.hbm_to_vmem [thread:$0]  (!%p2401_p5), %s2616_s1, 9216, %s127_s15, [#allocation3], %s2357_s21, %s2357_s21, %s2358_s22  }
  0x16   : > { %s2324_s25 = scalar_lea.vmem %s141_s18, 16  ;;  %s2331_s26 = scalar_lea.vmem %s141_s18, 32 }
  0x17   : > { %p2325_p0 = scmp.ne.s32.totalorder %s141_s18, %s2324_s25  ;;  %p2332_p7 = scmp.lt.s32.totalorder %s141_s18, %s141_s18 }
  0x18   : > { %p2333_p8 = scmp.lt.s32.totalorder %s2331_s26, %s2324_s25 }
  0x19   : > { %p2327_p1 = pnand %p2325_p0, %p2289_p6 }
  0x1a   : > { %p2334_p9 = por %p2333_p8, %p2332_p7 }
  0x1b   : > { %p2328_p4 = pneg %p2327_p1 }
  0x1d   : > { %p2335_p10 = pnand %p2334_p9, %p2328_p4 }
  0x1f   : > { %2338 = shalt.err (!%p2335_p10)
}
  0x20   : > { %2183 = dma.hbm_to_vmem [thread:$0]  (!%p2401_p5), %s2617_s2, 16, %s141_s18, [#allocation5]  }
  0x21   : > { %161 = sbr.rel (%p2392_p2) target bundleno = 411 (0x19b), region = 32 }
  0x26   : > { %2344 = dma.done.wait (%p2184_p3), [#allocation3], 9216  }
  0x27   : > { %2346 = vsyncadd (%p2184_p3), [#allocation3], 4294958080 }
  0x28   : > { %2348 = dma.done.wait (%p2184_p3), [#allocation5], 16  }
  0x29   : > { %2350 = vsyncadd (%p2184_p3), [#allocation5], 4294967280  ;;  %v2359_v0 = vmov 0.0   ;;  %vm2360_vm0 = vmmov 0   ;;  %v2203_v1 = vld [vmem:[#allocation2 + $0x78] sm:$0xff]   ;;  %v2205_v3 = vld [vmem:[#allocation2 + $0x70] sm:$0xff]   ;;  %v305_v9 = vlaneseq }
  0x2a   : > { %1989 = vmatprep.subr.bf16.mxu0 %v2359_v0  ;;  %2009 = vmatprep.subr.bf16.mxu1 %v2359_v0  ;;  %v2204_v2 = vld [vmem:[#allocation2 + $0x38] sm:$0xff]   ;;  %p189_p2 = scmp.lt.s32.totalorder %s2388_s13, 1  ;;  %v2206_v4 = vld [vmem:[#allocation2 + $0x30] sm:$0xff]   ;;  %vm260_vm1 = vcmask 1040384   ;;  %vm261_vm2 = vcmask 1042434   ;;  %v2207_v5 = vld [vmem:[#allocation2 + $0x68] sm:$0xff]  }
  0x2b   : > { %2005 = vmatprep.mubr.msk.bf16.mxu0 %vm2360_vm0, %v2359_v0  ;;  %2025 = vmatprep.mubr.msk.bf16.mxu1 %vm2360_vm0, %v2359_v0  ;;  %v2208_v6 = vld [vmem:[#allocation2 + $0x28] sm:$0xff]   ;;  %vm263_vm3 = vcmask 1044484   ;;  %vm262_vm4 = vmor %vm260_vm1, %vm261_vm2  ;;  %v2209_v7 = vld [vmem:[#allocation2 + $0x60] sm:$0xff]   ;;  %v2361_v11 = vmov 1983009808   ;;  %vm265_vm6 = vcmask 1046534  }
  0x2c   : > { %1990 = vmatpush3.bf16.msra.mxu0 %v2203_v1  ;;  %2010 = vmatpush3.bf16.msra.mxu1 %v2204_v2  ;;  %s2626_s13 = smov (!%p189_p2, %s2388_s13), 1  ;;  %v2210_v8 = vld [vmem:[#allocation2 + $0x20] sm:$0xff]   ;;  %vm2455_vm5 = vmor %vm262_vm4, %vm263_vm3  ;;  %v303_v12 = vunpack.c.l.s4 %v2361_v11  ;;  %v2211_v13 = vld [vmem:[#allocation2 + $0x58] sm:$0xff]   ;;  %v306_v15 = vshrl.u32 %v305_v9, 7 }
  0x2d   : > { %1991 = vmatprep.subr.bf16.mxu0 %v2359_v0  ;;  %2011 = vmatprep.subr.bf16.mxu1 %v2359_v0  ;;  %s1906_s29 = sshll.u32 %s2626_s13, 5  ;;  %v2212_v14 = vld [vmem:[#allocation2 + $0x18] sm:$0xff]   ;;  %v2213_v17 = vld [vmem:[#allocation2 + $0x50] sm:$0xff]   ;;  %vm2467_vm7 = vmor %vm2455_vm5, %vm265_vm6  ;;  %s1907_s6 = sshll.u32 %s2626_s13, 3 }
  0x2e   : > { %s2453_s5 = scalar_lea.vmem %s2615_s0, %s1906_s29  ;;  %v304_v21 = vunpack.c.0.s8 %v303_v12  ;;  %v2214_v22 = vld [vmem:[#allocation2 + $0x10] sm:$0xff]   ;;  %v2215_v34 = vld [vmem:[#allocation2 + $0x48] sm:$0xff]   ;;  %v2217_v48 = vld [vmem:[#allocation2 + $0x40] sm:$0xff]   ;;  %s198_s9 = scalar_lea.vmem %s2618_s3, %s1907_s6 }
  0x2f   : > { %v1765_v16 = vld.sshfl [vmem:[%s2453_s5] sm:$0x12 pattern:$0x76325410]  ;;  %v2216_v39 = vld [vmem:[#allocation2 + $0x8] sm:$0xff]   ;;  %v2221_v53 = vld [vmem:[#allocation2 + $0xb8] sm:$0xff]  }
  0x30   : > { %1992 = vmatpush3.bf16.msra.mxu0 %v2205_v3  ;;  %2012 = vmatpush3.bf16.msra.mxu1 %v2206_v4  ;;  %v1766_v18 = vld.sshfl [vmem:[%s2453_s5 + $0x4] sm:$0x12 pattern:$0x76325410]  ;;  %v235_v19 = vcombine.high %v1765_v16, %v1765_v16  ;;  %v1769_v20 = vrot.slane %v1765_v16, 9  ;;  %v2476_v37 = vsub.s32 %v304_v21, %v306_v15  ;;  %v2222_v54 = vld [vmem:[#allocation2 + $0xf8] sm:$0xff]  }
  0x31   : > { %1993 = vmatprep.subr.bf16.mxu0 %v2359_v0  ;;  %2013 = vmatprep.subr.bf16.mxu1 %v2359_v0  ;;  %v1767_v23 = vld.sshfl [vmem:[%s2453_s5 + $0x8] sm:$0x12 pattern:$0x76325410]  ;;  %v243_v24 = vcombine.high %v1766_v18, %v1766_v18  ;;  %v1770_v26 = vrot.slane %v1766_v18, 9  ;;  %v2218_v49 = vld [vmem:[#allocation2] sm:$0xff]  }
  0x32   : > { %v1768_v27 = vld.sshfl [vmem:[%s2453_s5 + $0xc] sm:$0x12 pattern:$0x76325410]  ;;  %v251_v28 = vcombine.high %v1767_v23, %v1767_v23  ;;  %v269_v29 = vrot.slane %v235_v19, 7  ;;  %v1771_v30 = vrot.slane %v1767_v23, 9 }
  0x33   : > { %v259_v31 = vcombine.high %v1768_v27, %v1768_v27  ;;  %v273_v32 = vrot.slane %v243_v24, 7  ;;  %v1772_v33 = vrot.slane %v1768_v27, 9  ;;  %v2281_v38 = vld.sshfl [vmem:[%s2453_s5] sm:$0xf pattern:$0x76325410] }
  0x34   : > { %1994 = vmatpush3.bf16.msra.mxu0 %v2207_v5  ;;  %2014 = vmatpush3.bf16.msra.mxu1 %v2208_v6  ;;  %v270_v35 = vsel %vm2467_vm7, %v1769_v20, %v269_v29  ;;  %v277_v36 = vrot.slane %v251_v28, 7  ;;  %v2282_v42 = vld.sshfl [vmem:[%s2453_s5 + $0x8] sm:$0xf pattern:$0x76325410]  ;;  %v2223_v55 = vld [vmem:[#allocation2 + $0xb0] sm:$0xff]  }
  0x35   : > { %1995 = vmatprep.subr.bf16.mxu0 %v2359_v0  ;;  %2015 = vmatprep.subr.bf16.mxu1 %v2359_v0  ;;  %v274_v40 = vsel %vm2467_vm7, %v1770_v26, %v273_v32  ;;  %v281_v41 = vrot.slane %v259_v31, 7  ;;  %v427_v52 = vcombine.low %v2281_v38, %v2282_v42  ;;  %v2224_v56 = vld [vmem:[#allocation2 + $0xf0] sm:$0xff]   ;;  %v2225_v57 = vld [vmem:[#allocation2 + $0xa8] sm:$0xff]   ;;  %v2227_v59 = vld [vmem:[#allocation2 + $0xa0] sm:$0xff]  }
  0x36   : > { %v278_v43 = vsel %vm2467_vm7, %v1771_v30, %v277_v36  ;;  %v300_v44 = vcombine.low %v270_v35, %v274_v40  ;;  %v2226_v58 = vld [vmem:[#allocation2 + $0xe8] sm:$0xff]   ;;  %v2228_v60 = vld [vmem:[#allocation2 + $0xe0] sm:$0xff]   ;;  %v2229_v61 = vld [vmem:[#allocation2 + $0x98] sm:$0xff]  }
  0x37   : > { %v282_v45 = vsel %vm2467_vm7, %v1772_v33, %v281_v41  ;;  %v2230_v62 = vld [vmem:[#allocation2 + $0xd8] sm:$0xff]   ;;  %v1789_v63 = vld.sshfl [vmem:[%s2453_s5] sm:$0x30 pattern:$0x76325410]  ;;  %v2231_v4 = vld [vmem:[#allocation2 + $0x90] sm:$0xff]  }
  0x38   : > { %1996 = vmatpush3.bf16.msra.mxu0 %v2209_v7  ;;  %2016 = vmatpush3.bf16.msra.mxu1 %v2210_v8  ;;  %v301_v46 = vcombine.low %v278_v43, %v282_v45  ;;  %v308_v47 = vrot.slane %v300_v44, %v2476_v37  ;;  %v1790_v1 = vld.sshfl [vmem:[%s2453_s5 + $0x4] sm:$0x30 pattern:$0x76325410]  ;;  %v2232_v5 = vld [vmem:[#allocation2 + $0xd0] sm:$0xff]   ;;  %v2233_v6 = vld [vmem:[#allocation2 + $0x88] sm:$0xff]  }
  0x39   : > { %1997 = vmatprep.subr.bf16.mxu0 %v2359_v0  ;;  %2017 = vmatprep.subr.bf16.mxu1 %v2359_v0  ;;  %v1791_v2 = vld.sshfl [vmem:[%s2453_s5 + $0x8] sm:$0x30 pattern:$0x76325410]  ;;  %v1793_v7 = vcombine.high %v1789_v63, %v1790_v1  ;;  %v2235_v12 = vld [vmem:[#allocation2 + $0x80] sm:$0xff]   ;;  %v2237_v23 = vld [vmem:[#allocation2 + $0x138] sm:$0xff]  }
  0x3a   : > { %v2491_v50 = vrot.slane %v301_v46, %v2476_v37  ;;  %v1792_v3 = vld.sshfl [vmem:[%s2453_s5 + $0xc] sm:$0x30 pattern:$0x76325410]  ;;  %v2236_v16 = vld [vmem:[#allocation2 + $0xc0] sm:$0xff]   ;;  %v2240_v27 = vld [vmem:[#allocation2 + $0x178] sm:$0xff]  }
  0x3b   : > { %v1794_v8 = vcombine.high %v1791_v2, %v1792_v3  ;;  %v2283_v9 = vld.sshfl [vmem:[%s2453_s5 + $0x8] sm:$0xf pattern:$0x76325410]  ;;  %v2241_v32 = vld [vmem:[#allocation2 + $0x130] sm:$0xff]   ;;  %v2246_v40 = vld [vmem:[#allocation2 + $0x160] sm:$0xff]  }
  0x3c   : > { %1998 = vmatpush3.bf16.msra.mxu0 %v2211_v13  ;;  %2018 = vmatpush3.bf16.msra.mxu1 %v2212_v14  ;;  %v316_v51 = vcombine.low %v308_v47, %v2491_v50  ;;  %v2284_v10 = vld.sshfl [vmem:[%s2453_s5 + $0x10] sm:$0xf pattern:$0x76325410]  ;;  %v2234_v11 = vld [vmem:[#allocation2 + $0xc8] sm:$0xff]   ;;  %v583_v13 = vrot.slane %v1793_v7, %v2476_v37  ;;  %v2247_v41 = vld [vmem:[#allocation2 + $0x118] sm:$0xff]  }
  0x3d   : > { %1999 = vmatprep.subr.bf16.mxu0 %v2359_v0  ;;  %2019 = vmatprep.subr.bf16.mxu1 %v2359_v0  ;;  %v2521_v14 = vrot.slane %v1794_v8, %v2476_v37  ;;  %v1821_v15 = vld.sshfl [vmem:[%s2453_s5 + $0x10] sm:$0x12 pattern:$0x76325410]  ;;  %v726_v26 = vcombine.low %v2283_v9, %v2284_v10  ;;  %v2243_v36 = vld [vmem:[#allocation2 + $0x128] sm:$0xff]   ;;  %v2248_v42 = vld [vmem:[#allocation2 + $0x158] sm:$0xff]  }
  0x3e   : > { %v850_v18 = vcombine.high %v1821_v15, %v1821_v15  ;;  %v1825_v19 = vrot.slane %v1821_v15, 9  ;;  %v2242_v33 = vld [vmem:[#allocation2 + $0x170] sm:$0xff]   ;;  %v2244_v38 = vld [vmem:[#allocation2 + $0x168] sm:$0xff]   ;;  %v2262_v63 = vld [vmem:[#allocation2 + $0x1e0] sm:$0xff]  }
  0x3f   : > { %v1841_v43 = vld.sshfl [vmem:[%s2453_s5 + $0x10] sm:$0x30 pattern:$0x76325410]  ;;  %v2251_v47 = vld [vmem:[#allocation2 + $0x108] sm:$0xff]   ;;  %v2263_v3 = vld [vmem:[#allocation2 + $0x198] sm:$0xff]  }
  0x40   : > { %2000 = vmatpush3.bf16.msra.mxu0 %v2213_v17  ;;  %2020 = vmatpush3.bf16.msra.mxu1 %v2214_v22  ;;  %v1822_v17 = vld.sshfl [vmem:[%s2453_s5 + $0x14] sm:$0x12 pattern:$0x76325410]  ;;  %v591_v22 = vcombine.low %v583_v13, %v2521_v14  ;;  %v869_v24 = vrot.slane %v850_v18, 7  ;;  %v2267_v15 = vld [vmem:[#allocation2 + $0x188] sm:$0xff]  }
  0x41   : > { %2001 = vmatprep.subr.bf16.mxu0 %v2359_v0  ;;  %2021 = vmatprep.subr.bf16.mxu1 %v2359_v0  ;;  %v858_v20 = vcombine.high %v1822_v17, %v1822_v17  ;;  %v1826_v21 = vrot.slane %v1822_v17, 9  ;;  %v1842_v44 = vld.sshfl [vmem:[%s2453_s5 + $0x14] sm:$0x30 pattern:$0x76325410]  ;;  %v2268_v17 = vld [vmem:[#allocation2 + $0x1c8] sm:$0xff]  }
  0x42   : > { %v870_v29 = vsel %vm2467_vm7, %v1825_v19, %v869_v24  ;;  %v2249_v45 = vld [vmem:[#allocation2 + $0x110] sm:$0xff]   ;;  %v2269_v18 = vld [vmem:[#allocation2 + $0x180] sm:$0xff]   ;;  %v2275_v24 = vld [vmem:[#allocation2 + $0x228] sm:$0xff]  }
  0x43   : > { %v873_v28 = vrot.slane %v858_v20, 7  ;;  %v2250_v46 = vld [vmem:[#allocation2 + $0x150] sm:$0xff]   ;;  %v2270_v25 = vld [vmem:[#allocation2 + $0x1c0] sm:$0xff]  }
  0x44   : > { %2002 = vmatpush3.bf16.msra.mxu0 %v2215_v34  ;;  %2022 = vmatpush3.bf16.msra.mxu1 %v2216_v39  ;;  %v2245_v39 = vld [vmem:[#allocation2 + $0x120] sm:$0xff]   ;;  %v2265_v9 = vld [vmem:[#allocation2 + $0x190] sm:$0xff]  }
  0x45   : > { %2003 = vmatprep.subr.bf16.mxu0 %v2359_v0  ;;  %2023 = vmatprep.subr.bf16.mxu1 %v2359_v0  ;;  %v874_v30 = vsel %vm2467_vm7, %v1826_v21, %v873_v28  ;;  %v2266_v10 = vld [vmem:[#allocation2 + $0x1d0] sm:$0xff]   ;;  %v2273_v21 = vld [vmem:[#allocation2 + $0x238] sm:$0xff]  }
  0x46   : > { %v893_v31 = vcombine.low %v870_v29, %v874_v30  ;;  %v2285_v13 = vld.sshfl [vmem:[%s2453_s5 + $0x10] sm:$0xf pattern:$0x76325410] }
  0x47   : > { %v1891_v28 = vld.sshfl [vmem:[%s2453_s5 + $0x18] sm:$0x30 pattern:$0x76325410]  ;;  %v2278_v29 = vld [vmem:[#allocation2 + $0x210] sm:$0xff]  }
  0x48   : > { %2004 = vmatpush3.bf16.msra.mxu0 %v2217_v48  ;;  %2024 = vmatpush3.bf16.msra.mxu1 %v2218_v49  ;;  %v2536_v34 = vrot.slane %v893_v31, %v2476_v37  ;;  %v1844_v48 = vcombine.high %v1841_v43, %v1842_v44  ;;  %v2252_v49 = vld [vmem:[#allocation2 + $0x148] sm:$0xff]   ;;  %v1892_v30 = vld.sshfl [vmem:[%s2453_s5 + $0x1c] sm:$0x30 pattern:$0x76325410] }
  0x49   : > { %2029 = vmatprep.subr.bf16.mxu0 %v2359_v0  ;;  %2049 = vmatprep.subr.bf16.mxu1 %v2359_v0  ;;  %v1894_v31 = vcombine.high %v1891_v28, %v1892_v30 }
  0x4a   : > { %v908_v35 = vcombine.low %v2491_v50, %v2536_v34  ;;  %v2253_v50 = vld [vmem:[#allocation2 + $0x100] sm:$0xff]  }
  0x4b   : > { %2006 = vmatmul.mubr.bf16.vlgmr.msra.gmra.mxu0 %v316_v51  ;;  %2026 = vmatmul.mubr.bf16.vlgmr.msra.gmra.mxu1 %v427_v52  ;;  %v2558_v51 = vrot.slane %v1844_v48, %v2476_v37  ;;  %v2254_v52 = vld [vmem:[#allocation2 + $0x140] sm:$0xff]  }
  0x4c   : > { %2030 = vmatpush3.bf16.msra.mxu0 %v2221_v53  ;;  %2050 = vmatpush3.bf16.msra.mxu1 %v2222_v54  ;;  %v2255_v53 = vld [vmem:[#allocation2 + $0x1b8] sm:$0xff]  }
  0x4d   : > { %2031 = vmatprep.subr.bf16.mxu0 %v2359_v0  ;;  %2051 = vmatprep.subr.bf16.mxu1 %v2359_v0  ;;  %v1074_v54 = vcombine.low %v2521_v14, %v2558_v51  ;;  %v2286_v14 = vld.sshfl [vmem:[%s2453_s5 + $0x18] sm:$0xf pattern:$0x76325410] }
  0x4e   : > { %2045 = vmatprep.mubr.msk.bf16.mxu0 %vm2360_vm0, %v2359_v0  ;;  %2065 = vmatprep.mubr.msk.bf16.mxu1 %vm2360_vm0, %v2359_v0  ;;  %v1209_v20 = vcombine.low %v2285_v13, %v2286_v14 }
  0x50   : > { %2032 = vmatpush3.bf16.msra.mxu0 %v2223_v55  ;;  %2052 = vmatpush3.bf16.msra.mxu1 %v2224_v56  ;;  %v2256_v55 = vld [vmem:[#allocation2 + $0x1f8] sm:$0xff]   ;;  %v2257_v56 = vld [vmem:[#allocation2 + $0x1b0] sm:$0xff]  }
  0x51   : > { %2033 = vmatprep.subr.bf16.mxu0 %v2359_v0  ;;  %2053 = vmatprep.subr.bf16.mxu1 %v2359_v0 }
  0x54   : > { %2034 = vmatpush3.bf16.msra.mxu0 %v2225_v57  ;;  %2054 = vmatpush3.bf16.msra.mxu1 %v2226_v58  ;;  %v2258_v57 = vld [vmem:[#allocation2 + $0x1f0] sm:$0xff]   ;;  %v2259_v58 = vld [vmem:[#allocation2 + $0x1a8] sm:$0xff]  }
  0x55   : > { %2035 = vmatprep.subr.bf16.mxu0 %v2359_v0  ;;  %2055 = vmatprep.subr.bf16.mxu1 %v2359_v0 }
  0x58   : > { %2036 = vmatpush3.bf16.msra.mxu0 %v2227_v59  ;;  %2056 = vmatpush3.bf16.msra.mxu1 %v2228_v60  ;;  %v2260_v59 = vld [vmem:[#allocation2 + $0x1e8] sm:$0xff]   ;;  %v1871_v60 = vld.sshfl [vmem:[%s2453_s5 + $0x18] sm:$0x12 pattern:$0x76325410] }
  0x59   : > { %2037 = vmatprep.subr.bf16.mxu0 %v2359_v0  ;;  %2057 = vmatprep.subr.bf16.mxu1 %v2359_v0  ;;  %v1333_v1 = vcombine.high %v1871_v60, %v1871_v60 }
  0x5c   : > { %2038 = vmatpush3.bf16.msra.mxu0 %v2229_v61  ;;  %2058 = vmatpush3.bf16.msra.mxu1 %v2230_v62  ;;  %v1872_v61 = vld.sshfl [vmem:[%s2453_s5 + $0x1c] sm:$0x12 pattern:$0x76325410]  ;;  %v2261_v62 = vld [vmem:[#allocation2 + $0x1a0] sm:$0xff]  }
  0x5d   : > { %2039 = vmatprep.subr.bf16.mxu0 %v2359_v0  ;;  %2059 = vmatprep.subr.bf16.mxu1 %v2359_v0  ;;  %v1341_v2 = vcombine.high %v1872_v61, %v1872_v61  ;;  %v1876_v7 = vrot.slane %v1872_v61, 9 }
  0x5f   : > { %v1356_v8 = vrot.slane %v1341_v2, 7 }
  0x60   : > { %2040 = vmatpush3.bf16.msra.mxu0 %v2231_v4  ;;  %2060 = vmatpush3.bf16.msra.mxu1 %v2232_v5  ;;  %v2264_v4 = vld [vmem:[#allocation2 + $0x1d8] sm:$0xff]   ;;  %v1875_v5 = vrot.slane %v1871_v60, 9 }
  0x61   : > { %2041 = vmatprep.subr.bf16.mxu0 %v2359_v0  ;;  %2061 = vmatprep.subr.bf16.mxu1 %v2359_v0 }
  0x64   : > { %2042 = vmatpush3.bf16.msra.mxu0 %v2233_v6  ;;  %2062 = vmatpush3.bf16.msra.mxu1 %v2234_v11  ;;  %v1352_v6 = vrot.slane %v1333_v1, 7 }
  0x65   : > { %2043 = vmatprep.subr.bf16.mxu0 %v2359_v0  ;;  %2063 = vmatprep.subr.bf16.mxu1 %v2359_v0 }
  0x66   : > { %v1353_v11 = vsel %vm2467_vm7, %v1875_v5, %v1352_v6 }
  0x68   : > { %2044 = vmatpush3.bf16.msra.mxu0 %v2235_v12  ;;  %2064 = vmatpush3.bf16.msra.mxu1 %v2236_v16  ;;  %v1357_v12 = vsel %vm2467_vm7, %v1876_v7, %v1356_v8 }
  0x69   : > { %2069 = vmatprep.subr.bf16.mxu0 %v2359_v0  ;;  %2089 = vmatprep.subr.bf16.mxu1 %v2359_v0  ;;  %v1376_v16 = vcombine.low %v1353_v11, %v1357_v12 }
  0x6b   : > { %2046 = vmatmul.mubr.bf16.vlgmr.msra.gmra.mxu0 %v591_v22  ;;  %2066 = vmatmul.mubr.bf16.vlgmr.msra.gmra.mxu1 %v726_v26  ;;  %v1390_v19 = vrot.slane %v1376_v16, %v2476_v37  ;;  %v2276_v26 = vld [vmem:[#allocation2 + $0x220] sm:$0xff]  }
  0x6c   : > { %2070 = vmatpush3.bf16.msra.mxu0 %v2237_v23  ;;  %2090 = vmatpush3.bf16.msra.mxu1 %v2240_v27  ;;  %v2274_v23 = vld [vmem:[#allocation2 + $0x230] sm:$0xff]   ;;  %v2277_v27 = vld [vmem:[#allocation2 + $0x218] sm:$0xff]  }
  0x6d   : > { %2071 = vmatprep.subr.bf16.mxu0 %v2359_v0  ;;  %2091 = vmatprep.subr.bf16.mxu1 %v2359_v0  ;;  %v1391_v22 = vcombine.low %v2536_v34, %v1390_v19  ;;  %v2280_v34 = vld [vmem:[#allocation2 + $0x200] sm:$0xff]  }
  0x6e   : > { %2085 = vmatprep.mubr.msk.bf16.mxu0 %vm2360_vm0, %v2359_v0  ;;  %2105 = vmatprep.mubr.msk.bf16.mxu1 %vm2360_vm0, %v2359_v0 }
  0x70   : > { %2072 = vmatpush3.bf16.msra.mxu0 %v2241_v32  ;;  %2092 = vmatpush3.bf16.msra.mxu1 %v2242_v33  ;;  %v2279_v32 = vld [vmem:[#allocation2 + $0x208] sm:$0xff]   ;;  %v1556_v33 = vrot.slane %v1894_v31, %v2476_v37 }
  0x71   : > { %2073 = vmatprep.subr.bf16.mxu0 %v2359_v0  ;;  %2093 = vmatprep.subr.bf16.mxu1 %v2359_v0 }
  0x74   : > { %2074 = vmatpush3.bf16.msra.mxu0 %v2243_v36  ;;  %2094 = vmatpush3.bf16.msra.mxu1 %v2244_v38 }
  0x75   : > { %2075 = vmatprep.subr.bf16.mxu0 %v2359_v0  ;;  %2095 = vmatprep.subr.bf16.mxu1 %v2359_v0 }
  0x78   : > { %2076 = vmatpush3.bf16.msra.mxu0 %v2245_v39  ;;  %2096 = vmatpush3.bf16.msra.mxu1 %v2246_v40 }
  0x79   : > { %2077 = vmatprep.subr.bf16.mxu0 %v2359_v0  ;;  %2097 = vmatprep.subr.bf16.mxu1 %v2359_v0 }
  0x7c   : > { %2078 = vmatpush3.bf16.msra.mxu0 %v2247_v41  ;;  %2098 = vmatpush3.bf16.msra.mxu1 %v2248_v42 }
  0x7d   : > { %2079 = vmatprep.subr.bf16.mxu0 %v2359_v0  ;;  %2099 = vmatprep.subr.bf16.mxu1 %v2359_v0 }
  0x80   : > { %2080 = vmatpush3.bf16.msra.mxu0 %v2249_v45  ;;  %2100 = vmatpush3.bf16.msra.mxu1 %v2250_v46 }
  0x81   : > { %2081 = vmatprep.subr.bf16.mxu0 %v2359_v0  ;;  %2101 = vmatprep.subr.bf16.mxu1 %v2359_v0 }
  0x84   : > { %2082 = vmatpush3.bf16.msra.mxu0 %v2251_v47  ;;  %2102 = vmatpush3.bf16.msra.mxu1 %v2252_v49 }
  0x85   : > { %2083 = vmatprep.subr.bf16.mxu0 %v2359_v0  ;;  %2103 = vmatprep.subr.bf16.mxu1 %v2359_v0 }
  0x88   : > { %2084 = vmatpush3.bf16.msra.mxu0 %v2253_v50  ;;  %2104 = vmatpush3.bf16.msra.mxu1 %v2254_v52 }
  0x89   : > { %2109 = vmatprep.subr.bf16.mxu0 %v2359_v0  ;;  %2129 = vmatprep.subr.bf16.mxu1 %v2359_v0 }
  0x8b   : > { %2086 = vmatmul.mubr.bf16.vlgmr.msra.gmra.mxu0 %v908_v35  ;;  %2106 = vmatmul.mubr.bf16.vlgmr.msra.gmra.mxu1 %v1074_v54  ;;  %v1557_v35 = vcombine.low %v2558_v51, %v1556_v33 }
  0x8c   : > { %2110 = vmatpush3.bf16.msra.mxu0 %v2255_v53  ;;  %2130 = vmatpush3.bf16.msra.mxu1 %v2256_v55 }
  0x8d   : > { %2111 = vmatprep.subr.bf16.mxu0 %v2359_v0  ;;  %2131 = vmatprep.subr.bf16.mxu1 %v2359_v0 }
  0x8e   : > { %2125 = vmatprep.mubr.msk.bf16.mxu0 %vm2360_vm0, %v2359_v0  ;;  %2145 = vmatprep.mubr.msk.bf16.mxu1 %vm2360_vm0, %v2359_v0 }
  0x90   : > { %2112 = vmatpush3.bf16.msra.mxu0 %v2257_v56  ;;  %2132 = vmatpush3.bf16.msra.mxu1 %v2258_v57 }
  0x91   : > { %2113 = vmatprep.subr.bf16.mxu0 %v2359_v0  ;;  %2133 = vmatprep.subr.bf16.mxu1 %v2359_v0 }
  0x94   : > { %2114 = vmatpush3.bf16.msra.mxu0 %v2259_v58  ;;  %2134 = vmatpush3.bf16.msra.mxu1 %v2260_v59 }
  0x95   : > { %2115 = vmatprep.subr.bf16.mxu0 %v2359_v0  ;;  %2135 = vmatprep.subr.bf16.mxu1 %v2359_v0 }
  0x98   : > { %2116 = vmatpush3.bf16.msra.mxu0 %v2261_v62  ;;  %2136 = vmatpush3.bf16.msra.mxu1 %v2262_v63 }
  0x99   : > { %2117 = vmatprep.subr.bf16.mxu0 %v2359_v0  ;;  %2137 = vmatprep.subr.bf16.mxu1 %v2359_v0 }
  0x9c   : > { %2118 = vmatpush3.bf16.msra.mxu0 %v2263_v3  ;;  %2138 = vmatpush3.bf16.msra.mxu1 %v2264_v4 }
  0x9d   : > { %2119 = vmatprep.subr.bf16.mxu0 %v2359_v0  ;;  %2139 = vmatprep.subr.bf16.mxu1 %v2359_v0 }
  0xa0   : > { %2120 = vmatpush3.bf16.msra.mxu0 %v2265_v9  ;;  %2140 = vmatpush3.bf16.msra.mxu1 %v2266_v10 }
  0xa1   : > { %2121 = vmatprep.subr.bf16.mxu0 %v2359_v0  ;;  %2141 = vmatprep.subr.bf16.mxu1 %v2359_v0 }
  0xa4   : > { %2122 = vmatpush3.bf16.msra.mxu0 %v2267_v15  ;;  %2142 = vmatpush3.bf16.msra.mxu1 %v2268_v17 }
  0xa5   : > { %2123 = vmatprep.subr.bf16.mxu0 %v2359_v0  ;;  %2143 = vmatprep.subr.bf16.mxu1 %v2359_v0 }
  0xa8   : > { %2124 = vmatpush3.bf16.msra.mxu0 %v2269_v18  ;;  %2144 = vmatpush3.bf16.msra.mxu1 %v2270_v25  ;;  %v1903_v18 = vld [vmem:[#allocation4] ss:$0 sm:$0xff] }
  0xa9   : > { %2149 = vmatprep.subr.bf16.mxu0 %v2359_v0 }
  0xab   : > { %2126 = vmatmul.mubr.bf16.vlgmr.msra.gmra.mxu0 %v1209_v20  ;;  %2146 = vmatmul.mubr.bf16.vlgmr.msra.gmra.mxu1 %v1391_v22 }
  0xac   : > { %2150 = vmatpush3.bf16.msra.mxu0 %v2273_v21  ;;  %2165 = vmatprep.mubr.msk.bf16.mxu0 %vm2360_vm0, %v2359_v0 }
  0xad   : > { %2151 = vmatprep.subr.bf16.mxu0 %v2359_v0 }
  0xb0   : > { %2152 = vmatpush3.bf16.msra.mxu0 %v2274_v23 }
  0xb1   : > { %2153 = vmatprep.subr.bf16.mxu0 %v2359_v0 }
  0xb4   : > { %2154 = vmatpush3.bf16.msra.mxu0 %v2275_v24 }
  0xb5   : > { %2155 = vmatprep.subr.bf16.mxu0 %v2359_v0 }
  0xb8   : > { %2156 = vmatpush3.bf16.msra.mxu0 %v2276_v26 }
  0xb9   : > { %2157 = vmatprep.subr.bf16.mxu0 %v2359_v0 }
  0xbc   : > { %2158 = vmatpush3.bf16.msra.mxu0 %v2277_v27 }
  0xbd   : > { %2159 = vmatprep.subr.bf16.mxu0 %v2359_v0 }
  0xc0   : > { %2160 = vmatpush3.bf16.msra.mxu0 %v2278_v29 }
  0xc1   : > { %2161 = vmatprep.subr.bf16.mxu0 %v2359_v0 }
  0xc4   : > { %2162 = vmatpush3.bf16.msra.mxu0 %v2279_v32 }
  0xc5   : > { %2163 = vmatprep.subr.bf16.mxu0 %v2359_v0 }
  0xc8   : > { %2164 = vmatpush3.bf16.msra.mxu0 %v2280_v34 }
  0xcb   : > { %2166 = vmatmul.mubr.bf16.vlgmr.msra.gmra.mxu0 %v1557_v35 }
 0x10b   : > { %v400_v36 = vpop.f32.mrf.mxu0  ;;  %v511_v38 = vpop.f32.mrf.mxu1 }
 0x10c   : > { %v512_v39 = vadd.f32 %v511_v38, %v400_v36 }
 0x10d   : > { %v2007_v40 = vpop.f32.mrf.mxu0  ;;  %v2027_v41 = vpop.f32.mrf.mxu1 }
 0x10f   : > { %v403_v42 = vpop.f32.mrf.mxu0  ;;  %v514_v43 = vpop.f32.mrf.mxu1 }
 0x110   : > { %v515_v44 = vadd.f32 %v514_v43, %v403_v42 }
 0x111   : > { %v2008_v45 = vpop.f32.mrf.mxu0  ;;  %v2028_v46 = vpop.f32.mrf.mxu1 }
 0x12b   : > { %v675_v47 = vpop.f32.mrf.mxu0  ;;  %v810_v48 = vpop.f32.mrf.mxu1 }
 0x12c   : > { %v682_v37 = vadd.f32 %v675_v47, %v512_v39 }
 0x12d   : > { %v2047_v49 = vpop.f32.mrf.mxu0  ;;  %v2067_v0 = vpop.f32.mrf.mxu1 }
 0x12e   : > { %v817_v50 = vadd.f32 %v810_v48, %v682_v37 }
 0x12f   : > { %v678_v52 = vpop.f32.mrf.mxu0  ;;  %v813_v53 = vpop.f32.mrf.mxu1 }
 0x130   : > { %v683_v51 = vadd.f32 %v678_v52, %v515_v44 }
 0x131   : > { %v2048_v54 = vpop.f32.mrf.mxu0  ;;  %v2068_v56 = vpop.f32.mrf.mxu1 }
 0x132   : > { %v818_v55 = vadd.f32 %v813_v53, %v683_v51 }
 0x14b   : > { %v992_v57 = vpop.f32.mrf.mxu0  ;;  %v1158_v58 = vpop.f32.mrf.mxu1 }
 0x14c   : > { %v999_v10 = vadd.f32 %v992_v57, %v817_v50 }
 0x14d   : > { %v2087_v59 = vpop.f32.mrf.mxu0  ;;  %v2107_v60 = vpop.f32.mrf.mxu1 }
 0x14e   : > { %v1165_v11 = vadd.f32 %v1158_v58, %v999_v10 }
 0x14f   : > { %v995_v61 = vpop.f32.mrf.mxu0  ;;  %v1161_v62 = vpop.f32.mrf.mxu1 }
 0x150   : > { %v1000_v12 = vadd.f32 %v995_v61, %v818_v55 }
 0x151   : > { %v2088_v63 = vpop.f32.mrf.mxu0  ;;  %v2108_v1 = vpop.f32.mrf.mxu1 }
 0x152   : > { %v1166_v14 = vadd.f32 %v1161_v62, %v1000_v12 }
 0x16b   : > { %v1293_v2 = vpop.f32.mrf.mxu0  ;;  %v1475_v3 = vpop.f32.mrf.mxu1 }
 0x16c   : > { %v1300_v13 = vadd.f32 %v1293_v2, %v1165_v11 }
 0x16d   : > { %v2127_v4 = vpop.f32.mrf.mxu0  ;;  %v2147_v5 = vpop.f32.mrf.mxu1 }
 0x16e   : > { %v1482_v15 = vadd.f32 %v1475_v3, %v1300_v13 }
 0x16f   : > { %v1296_v6 = vpop.f32.mrf.mxu0  ;;  %v1478_v7 = vpop.f32.mrf.mxu1 }
 0x170   : > { %v1301_v16 = vadd.f32 %v1296_v6, %v1166_v14 }
 0x171   : > { %v2128_v8 = vpop.f32.mrf.mxu0  ;;  %v2148_v9 = vpop.f32.mrf.mxu1 }
 0x172   : > { %v1483_v20 = vadd.f32 %v1478_v7, %v1301_v16 }
 0x18b   : > { %v1641_v17 = vpop.f32.mrf.mxu0 }
 0x18c   : > { %v1648_v19 = vadd.f32 %v1641_v17, %v1482_v15 }
 0x18d   : > { %v2167_v25 = vpop.f32.mrf.mxu0 }
 0x18e   : > { %v1657_v21 = vadd.f32 %v1903_v18, %v1648_v19 }
 0x18f   : > { %v1644_v22 = vpop.f32.mrf.mxu0 }
 0x190   : > { %v1659_v23 = vmax.f32 %v1657_v21, 0.0  ;;  %v1649_v24 = vadd.f32 %v1644_v22, %v1483_v20 }
 0x191   : > { %v2168_v26 = vpop.f32.mrf.mxu0 }
 0x192   : > { %v1663_v27 = vcombine.high %v1659_v23, %v1659_v23  ;;  %v1667_v28 = vpack.c.bf16 %v1659_v23, %v1659_v23  ;;  %v1658_v29 = vadd.f32 %v1903_v18, %v1649_v24 }
 0x194   : > { %v1668_v30 = vpack.c.bf16 %v1663_v27, %v1663_v27  ;;  %1671 = vst [vmem:[%s198_s9] sm:$0x3] %v1667_v28  ;;  %v1660_v31 = vmax.f32 %v1658_v29, 0.0 }
 0x196   : > { %1672 = vst [vmem:[%s198_s9 + $0x2] sm:$0x3] %v1668_v30  ;;  %v1664_v32 = vcombine.high %v1660_v31, %v1660_v31  ;;  %v1669_v33 = vpack.c.bf16 %v1660_v31, %v1660_v31 }
 0x198   : > { %v1670_v34 = vpack.c.bf16 %v1664_v32, %v1664_v32  ;;  %1673 = vst [vmem:[%s198_s9 + $0x4] sm:$0x3] %v1669_v33 }
 0x19a   : > { %1674 = vst [vmem:[%s198_s9 + $0x6] sm:$0x3] %v1670_v34 }
 0x19b PF: > { %s15_s12 = sadd.s32 1, %s2353_s12  }
 0x19c   : > { %p12_p3 = scmp.ge.s32.totalorder %s15_s12, 4  }
 0x19e   :  { %14 = sbr.rel (!%p12_p3) target bundleno = 2 (0x2), region = 81 }
 0x1a3   :  { %1696 = vsyncpa [#allocation3], 1 }
 0x1a4   :  { %1698 = vsyncpa [#allocation3 + $0x1], 1 }
 0x1a5   :  { %1699 = vsyncpa [#allocation5], 1 }

// kernel: deeplabv3_forward.16
= control target key start
LH: loop header
LB: loop body
LE: loop exit
PB: predicated region body
PF: predicated region fallthrough
CT: control target
= control target key end

     0   :  { %11 = vsyncpa [#allocation3], 0  ;;  %s2834_s0 = inlined_call_operand.vmem [shape: bf16[2,5,5,128], index: 0, kind: input, shape index: {}]   ;;  %s2835_s1 = inlined_call_operand.vmem [shape: bf16[2,5,5,128], index: 1, kind: input, shape index: {}]   ;;  %s2836_s2 = inlined_call_operand.vmem [shape: bf16[2,5,5,128], index: 2, kind: input, shape index: {}]   ;;  %s2837_s3 = inlined_call_operand.vmem [shape: bf16[2,5,5,128], index: 3, kind: input, shape index: {}]   ;;  %s2838_s4 = inlined_call_operand.hbm [shape: bf16[9,128,128], index: 4, kind: input, shape index: {}]   ;;  %s2839_s5 = inlined_call_operand.hbm [shape: f32[1,1,128], index: 5, kind: input, shape index: {}]   ;;  %s2840_s6 = inlined_call_operand.vmem [shape: bf16[2,4,4,128], index: 6, kind: output, shape index: {}]  }
   0x1   :  { %12 = vsyncpa [#allocation5], 0  ;;  %s2570_s21 = smov 0  }
   0x2 LB: > { %s2576_s22 = sadd.s32 4294967295, %s2526_s21   ;;  %p1955_p0 = scmp.ge.s32.totalorder %s2526_s21, 1  ;;  %s2526_s21 = sphi %s2570_s21, %s18_s21  }
   0x3   : > { %p195_p1 = scmp.lt.s32.totalorder %s2526_s21, 3  ;;  %s2528_s23 = smov [#allocation2]  }
   0x4   : > { %s207_s24 = sshll.u32 %s2528_s23, 4  ;;  %p2345_p3 = scmp.eq.s32.totalorder %s2576_s22, 0  ;;  %s208_s24 = int_to_ptr.vmem [resolvable:$true] %s207_s24 }
   0x5   : > { %p2580_p2 = pnand %p1955_p0, %p195_p1  ;;  %s2529_s26 = smov [#allocation4]  }
   0x6   : > { %s221_s27 = sshll.u32 %s2529_s26, 4  ;;  %s2471_s29 = scalar_lea.vmem %s208_s24, 9216  ;;  %s222_s27 = int_to_ptr.vmem [resolvable:$true] %s221_s27 }
   0x7   : > { %p2338_p4 = pneg %p2580_p2  ;;  %p2472_p7 = scmp.ne.s32.totalorder %s208_s24, %s2471_s29 }
   0x8   : > { %p2479_p10 = scmp.lt.s32.totalorder %s208_s24, %s208_s24  ;;  %p2480_p11 = scmp.lt.s32.totalorder %s2471_s29, %s2471_s29 }
   0x9   : > { %p2589_p5 = pnand %p2345_p3, %p2338_p4 }
   0xa   : > { %p2481_p12 = por %p2480_p11, %p2479_p10 }
   0xb   : > { %p2462_p6 = pneg %p2589_p5 }
   0xd   : > { %p2474_p8 = pnand %p2472_p7, %p2462_p6 }
   0xf   : > { %p2475_p9 = pneg %p2474_p8 }
  0x11   : > { %p2482_p13 = pnand %p2481_p12, %p2475_p9 }
  0x13   : > { %2485 = shalt.err (!%p2482_p13)
}
  0x14   : > { %s2530_s30 = smov 64   ;;  %s2531_s7 = smov 4  }
  0x15   : > { %2341 = dma.hbm_to_vmem [thread:$0]  (!%p2589_p5), %s2838_s4, 9216, %s208_s24, [#allocation3], %s2530_s30, %s2530_s30, %s2531_s7  }
  0x16   : > { %s2497_s10 = scalar_lea.vmem %s222_s27, 16  ;;  %s2504_s11 = scalar_lea.vmem %s222_s27, 32 }
  0x17   : > { %p2498_p0 = scmp.ne.s32.totalorder %s222_s27, %s2497_s10  ;;  %p2505_p7 = scmp.lt.s32.totalorder %s222_s27, %s222_s27 }
  0x18   : > { %p2506_p8 = scmp.lt.s32.totalorder %s2504_s11, %s2497_s10 }
  0x19   : > { %p2500_p1 = pnand %p2498_p0, %p2462_p6 }
  0x1a   : > { %p2507_p9 = por %p2506_p8, %p2505_p7 }
  0x1b   : > { %p2501_p4 = pneg %p2500_p1 }
  0x1d   : > { %p2508_p10 = pnand %p2507_p9, %p2501_p4 }
  0x1f   : > { %2511 = shalt.err (!%p2508_p10)
}
  0x20   : > { %2344 = dma.hbm_to_vmem [thread:$0]  (!%p2589_p5), %s2839_s5, 16, %s222_s27, [#allocation5]  }
  0x21   : > { %266 = sbr.rel (%p2580_p2) target bundleno = 411 (0x19b), region = 44 }
  0x26   : > { %2517 = dma.done.wait (%p2345_p3), [#allocation3], 9216  }
  0x27   : > { %2519 = vsyncadd (%p2345_p3), [#allocation3], 4294958080 }
  0x28   : > { %2521 = dma.done.wait (%p2345_p3), [#allocation5], 16  }
  0x29   : > { %2523 = vsyncadd (%p2345_p3), [#allocation5], 4294967280  ;;  %v2532_v0 = vmov 0.0   ;;  %vm2533_vm0 = vmmov 0   ;;  %v2364_v1 = vld [vmem:[#allocation2 + $0x78] sm:$0xff]   ;;  %v2366_v3 = vld [vmem:[#allocation2 + $0x70] sm:$0xff]   ;;  %v391_v11 = vlaneseq }
  0x2a   : > { %2149 = vmatprep.subr.bf16.mxu0 %v2532_v0  ;;  %2169 = vmatprep.subr.bf16.mxu1 %v2532_v0  ;;  %v2365_v2 = vld [vmem:[#allocation2 + $0x38] sm:$0xff]   ;;  %v2367_v4 = vld [vmem:[#allocation2 + $0x30] sm:$0xff]   ;;  %p315_p2 = scmp.lt.s32.totalorder %s2576_s22, 1  ;;  %v2368_v5 = vld [vmem:[#allocation2 + $0x68] sm:$0xff]   ;;  %v2534_v9 = vmov 1983009808  }
  0x2b   : > { %2165 = vmatprep.mubr.msk.bf16.mxu0 %vm2533_vm0, %v2532_v0  ;;  %2185 = vmatprep.mubr.msk.bf16.mxu1 %vm2533_vm0, %v2532_v0  ;;  %v2369_v6 = vld [vmem:[#allocation2 + $0x28] sm:$0xff]   ;;  %v2370_v7 = vld [vmem:[#allocation2 + $0x60] sm:$0xff]   ;;  %v389_v10 = vunpack.c.l.s4 %v2534_v9  ;;  %v2372_v12 = vld [vmem:[#allocation2 + $0x58] sm:$0xff]   ;;  %v392_v16 = vshrl.u32 %v391_v11, 7  ;;  %vm644_vm1 = vsmask.f32 1280 }
  0x2c   : > { %2150 = vmatpush3.bf16.msra.mxu0 %v2364_v1  ;;  %2170 = vmatpush3.bf16.msra.mxu1 %v2365_v2  ;;  %s2850_s22 = smov (!%p315_p2, %s2576_s22), 1  ;;  %v2371_v8 = vld [vmem:[#allocation2 + $0x20] sm:$0xff]   ;;  %v2373_v13 = vld [vmem:[#allocation2 + $0x18] sm:$0xff]   ;;  %v2374_v14 = vld [vmem:[#allocation2 + $0x50] sm:$0xff]   ;;  %vm645_vm2 = vsmask.f32 3336 }
  0x2d   : > { %2151 = vmatprep.subr.bf16.mxu0 %v2532_v0  ;;  %2171 = vmatprep.subr.bf16.mxu1 %v2532_v0  ;;  %s2637_s14 = smul.u32 20, %s2850_s22  ;;  %v390_v15 = vunpack.c.0.s8 %v389_v10  ;;  %v2375_v17 = vld [vmem:[#allocation2 + $0x10] sm:$0xff]   ;;  %v2376_v19 = vld [vmem:[#allocation2 + $0x48] sm:$0xff]   ;;  %v2378_v25 = vld [vmem:[#allocation2 + $0x40] sm:$0xff]   ;;  %vm647_vm3 = vsmask.f32 5392 }
  0x2e   : > { %v2377_v24 = vld [vmem:[#allocation2 + $0x8] sm:$0xff]   ;;  %v2379_v26 = vld [vmem:[#allocation2] sm:$0xff]   ;;  %v2384_v29 = vld [vmem:[#allocation2 + $0xb8] sm:$0xff]   ;;  %vm649_vm4 = vsmask.f32 7448  ;;  %s2067_s29 = sshll.u32 %s2850_s22, 3 }
  0x2f   : > { %s2645_s17 = scalar_lea.vmem %s2835_s1, %s2637_s14  ;;  %s2652_s20 = scalar_lea.vmem %s2834_s0, %s2637_s14  ;;  %v2658_v21 = vsub.s32 %v390_v15, %v392_v16  ;;  %v2385_v30 = vld [vmem:[#allocation2 + $0xf8] sm:$0xff]   ;;  %v2386_v31 = vld [vmem:[#allocation2 + $0xb0] sm:$0xff]   ;;  %v2388_v33 = vld [vmem:[#allocation2 + $0xa8] sm:$0xff]  }
  0x30   : > { %2152 = vmatpush3.bf16.msra.mxu0 %v2366_v3  ;;  %2172 = vmatpush3.bf16.msra.mxu1 %v2367_v4  ;;  %v2448_v18 = vld.sshfl [vmem:[%s2645_s17] sm:$0xf pattern:$0x76325410]  ;;  %v2387_v32 = vld [vmem:[#allocation2 + $0xf0] sm:$0xff]   ;;  %v2389_v35 = vld [vmem:[#allocation2 + $0xe8] sm:$0xff]   ;;  %s2690_s25 = scalar_lea.vmem %s2836_s2, %s2637_s14  ;;  %s2742_s28 = scalar_lea.vmem %s2837_s3, %s2637_s14 }
  0x31   : > { %2153 = vmatprep.subr.bf16.mxu0 %v2532_v0  ;;  %2173 = vmatprep.subr.bf16.mxu1 %v2532_v0  ;;  %v2449_v20 = vld.sshfl [vmem:[%s2645_s17 + $0x8] sm:$0xf pattern:$0x76325410]  ;;  %vm2682_vm5 = vmor %vm644_vm1, %vm645_vm2  ;;  %v2390_v56 = vld [vmem:[#allocation2 + $0xa0] sm:$0xff]   ;;  %s339_s8 = scalar_lea.vmem %s2840_s6, %s2067_s29 }
  0x32   : > { %v2450_v22 = vld.sshfl [vmem:[%s2652_s20] sm:$0xf pattern:$0x76325410]  ;;  %v402_v27 = vcombine.low %v2448_v18, %v2449_v20  ;;  %vm2696_vm6 = vmor %vm2682_vm5, %vm647_vm3  ;;  %v2394_v20 = vld [vmem:[#allocation2 + $0x90] sm:$0xff]  }
  0x33   : > { %v2451_v23 = vld.sshfl [vmem:[%s2652_s20 + $0x8] sm:$0xf pattern:$0x76325410]  ;;  %v2391_v61 = vld [vmem:[#allocation2 + $0xe0] sm:$0xff]   ;;  %vm2704_vm7 = vmor %vm2696_vm6, %vm649_vm4 }
  0x34   : > { %2154 = vmatpush3.bf16.msra.mxu0 %v2368_v5  ;;  %2174 = vmatpush3.bf16.msra.mxu1 %v2369_v6  ;;  %v513_v28 = vcombine.low %v2450_v22, %v2451_v23  ;;  %v1984_v34 = vld.sshfl [vmem:[%s2652_s20] sm:$0x13 pattern:$0x76325410]  ;;  %v2392_v6 = vld [vmem:[#allocation2 + $0x98] sm:$0xff]   ;;  %v2404_v48 = vld [vmem:[#allocation2 + $0x130] sm:$0xff]  }
  0x35   : > { %2155 = vmatprep.subr.bf16.mxu0 %v2532_v0  ;;  %2175 = vmatprep.subr.bf16.mxu1 %v2532_v0  ;;  %v1985_v36 = vld.sshfl [vmem:[%s2652_s20 + $0x4] sm:$0x13 pattern:$0x76325410]  ;;  %v619_v37 = vcombine.high %v1984_v34, %v1984_v34  ;;  %v652_v38 = vshrl.u32 %v1984_v34, 16  ;;  %v655_v39 = vshll.u32 %v1984_v34, 16 }
  0x36   : > { %v1986_v40 = vld.sshfl [vmem:[%s2652_s20 + $0x8] sm:$0x13 pattern:$0x76325410]  ;;  %v627_v41 = vcombine.high %v1985_v36, %v1985_v36  ;;  %v666_v42 = vshrl.u32 %v1985_v36, 16  ;;  %v669_v43 = vshll.u32 %v1985_v36, 16 }
  0x37   : > { %v1987_v44 = vld.sshfl [vmem:[%s2652_s20 + $0xc] sm:$0x13 pattern:$0x76325410]  ;;  %v635_v45 = vcombine.high %v1986_v40, %v1986_v40  ;;  %v654_v46 = vrot.slane %v652_v38, 6  ;;  %v657_v47 = vrot.slane %v655_v39, 7 }
  0x38   : > { %2156 = vmatpush3.bf16.msra.mxu0 %v2370_v7  ;;  %2176 = vmatpush3.bf16.msra.mxu1 %v2371_v8  ;;  %v661_v49 = vshll.u32 %v619_v37, 16  ;;  %v668_v50 = vrot.slane %v666_v42, 6  ;;  %v671_v51 = vrot.slane %v669_v43, 7  ;;  %v643_v52 = vcombine.high %v1987_v44, %v1987_v44  ;;  %v2393_v7 = vld [vmem:[#allocation2 + $0xd8] sm:$0xff]   ;;  %v2399_v36 = vld [vmem:[#allocation2 + $0xc0] sm:$0xff]  }
  0x39   : > { %2157 = vmatprep.subr.bf16.mxu0 %v2532_v0  ;;  %2177 = vmatprep.subr.bf16.mxu1 %v2532_v0  ;;  %v675_v53 = vshll.u32 %v627_v41, 16  ;;  %v680_v54 = vshrl.u32 %v1986_v40, 16  ;;  %v683_v55 = vshll.u32 %v1986_v40, 16  ;;  %v658_v57 = vor.u32 %v657_v47, %v654_v46  ;;  %v2400_v38 = vld [vmem:[#allocation2 + $0x138] sm:$0xff]  }
  0x3a   : > { %v672_v58 = vor.u32 %v671_v51, %v668_v50  ;;  %v689_v59 = vshll.u32 %v635_v45, 16  ;;  %v694_v60 = vshrl.u32 %v1987_v44, 16  ;;  %v663_v2 = vrot.slane %v661_v49, 7  ;;  %v2403_v40 = vld [vmem:[#allocation2 + $0x178] sm:$0xff]   ;;  %v2405_v50 = vld [vmem:[#allocation2 + $0x170] sm:$0xff]  }
  0x3b   : > { %v682_v63 = vrot.slane %v680_v54, 6  ;;  %v685_v1 = vrot.slane %v683_v55, 7  ;;  %v677_v3 = vrot.slane %v675_v53, 7  ;;  %v697_v5 = vshll.u32 %v1987_v44, 16 }
  0x3c   : > { %2158 = vmatpush3.bf16.msra.mxu0 %v2372_v12  ;;  %2178 = vmatpush3.bf16.msra.mxu1 %v2373_v13  ;;  %v696_v4 = vrot.slane %v694_v60, 6  ;;  %v673_v8 = vrot.slane %v672_v58, 2  ;;  %v691_v10 = vrot.slane %v689_v59, 7  ;;  %v703_v11 = vshll.u32 %v643_v52, 16  ;;  %v2406_v60 = vld [vmem:[#allocation2 + $0x128] sm:$0xff]  }
  0x3d   : > { %2159 = vmatprep.subr.bf16.mxu0 %v2532_v0  ;;  %2179 = vmatprep.subr.bf16.mxu1 %v2532_v0  ;;  %v686_v9 = vor.u32 %v685_v1, %v682_v63  ;;  %v659_v13 = vrot.slane %v658_v57, 2  ;;  %v2012_v41 = vld.sshfl [vmem:[%s2690_s25] sm:$0x13 pattern:$0x76325410] }
  0x3e   : > { %v705_v16 = vrot.slane %v703_v11, 7  ;;  %v2712_v18 = vsel %vm2704_vm7, %v673_v8, %v677_v3  ;;  %v2013_v42 = vld.sshfl [vmem:[%s2690_s25 + $0x4] sm:$0x13 pattern:$0x76325410]  ;;  %v1142_v43 = vshrl.u32 %v2012_v41, 16  ;;  %v1116_v51 = vcombine.high %v2012_v41, %v2012_v41 }
  0x3f   : > { %v687_v15 = vrot.slane %v686_v9, 2  ;;  %v664_v22 = vsel %vm2704_vm7, %v659_v13, %v663_v2  ;;  %v1145_v44 = vshll.u32 %v2012_v41, 16  ;;  %v2014_v45 = vld.sshfl [vmem:[%s2690_s25 + $0x8] sm:$0x13 pattern:$0x76325410] }
  0x40   : > { %2160 = vmatpush3.bf16.msra.mxu0 %v2374_v14  ;;  %2180 = vmatpush3.bf16.msra.mxu1 %v2375_v17  ;;  %v699_v14 = vrot.slane %v697_v5, 7  ;;  %v1156_v46 = vshrl.u32 %v2013_v42, 16  ;;  %v1159_v47 = vshll.u32 %v2013_v42, 16  ;;  %v1144_v52 = vrot.slane %v1142_v43, 6  ;;  %v2407_v2 = vld [vmem:[#allocation2 + $0x168] sm:$0xff]   ;;  %v2408_v5 = vld [vmem:[#allocation2 + $0x120] sm:$0xff]  }
  0x41   : > { %2161 = vmatprep.subr.bf16.mxu0 %v2532_v0  ;;  %2181 = vmatprep.subr.bf16.mxu1 %v2532_v0  ;;  %v2015_v49 = vld.sshfl [vmem:[%s2690_s25 + $0xc] sm:$0x13 pattern:$0x76325410]  ;;  %v1147_v53 = vrot.slane %v1145_v44, 7  ;;  %v1170_v54 = vshrl.u32 %v2014_v45, 16 }
  0x42   : > { %v700_v17 = vor.u32 %v699_v14, %v696_v4  ;;  %v1173_v55 = vshll.u32 %v2014_v45, 16  ;;  %v1158_v57 = vrot.slane %v1156_v46, 6  ;;  %v1161_v58 = vrot.slane %v1159_v47, 7  ;;  %v2409_v8 = vld [vmem:[#allocation2 + $0x160] sm:$0xff]   ;;  %v2415_v43 = vld [vmem:[#allocation2 + $0x148] sm:$0xff]  }
  0x43   : > { %v1184_v59 = vshrl.u32 %v2015_v49, 16  ;;  %v1140_v62 = vcombine.high %v2015_v49, %v2015_v49  ;;  %v1172_v63 = vrot.slane %v1170_v54, 6  ;;  %v1187_v4 = vshll.u32 %v2015_v49, 16  ;;  %v2416_v44 = vld [vmem:[#allocation2 + $0x100] sm:$0xff]   ;;  %v2420_v49 = vld [vmem:[#allocation2 + $0x1b8] sm:$0xff]  }
  0x44   : > { %2162 = vmatpush3.bf16.msra.mxu0 %v2376_v19  ;;  %2182 = vmatpush3.bf16.msra.mxu1 %v2377_v24  ;;  %v2716_v19 = vsel %vm2704_vm7, %v687_v15, %v691_v10  ;;  %v701_v23 = vrot.slane %v700_v17, 2  ;;  %v1175_v1 = vrot.slane %v1173_v55, 7  ;;  %v1162_v9 = vor.u32 %v1161_v58, %v1158_v57  ;;  %v2410_v17 = vld [vmem:[#allocation2 + $0x118] sm:$0xff]   ;;  %v2417_v47 = vld [vmem:[#allocation2 + $0x140] sm:$0xff]   ;;  %v2423_v57 = vld [vmem:[#allocation2 + $0x1f0] sm:$0xff]  }
  0x45   : > { %2163 = vmatprep.subr.bf16.mxu0 %v2532_v0  ;;  %2183 = vmatprep.subr.bf16.mxu1 %v2532_v0  ;;  %v1706_v24 = vcombine.low %v2712_v18, %v2716_v19  ;;  %v1186_v3 = vrot.slane %v1184_v59, 6  ;;  %v1189_v11 = vrot.slane %v1187_v4, 7  ;;  %v1193_v15 = vshll.u32 %v1140_v62, 16  ;;  %v2426_v4 = vld [vmem:[#allocation2 + $0x1a0] sm:$0xff]  }
  0x46   : > { %v1176_v13 = vor.u32 %v1175_v1, %v1172_v63  ;;  %v2424_v63 = vld [vmem:[#allocation2 + $0x1a8] sm:$0xff]  }
  0x47   : > { %v2425_v1 = vld [vmem:[#allocation2 + $0x1e8] sm:$0xff]  }
  0x48   : > { %2164 = vmatpush3.bf16.msra.mxu0 %v2378_v25  ;;  %2184 = vmatpush3.bf16.msra.mxu1 %v2379_v26  ;;  %v2395_v25 = vld [vmem:[#allocation2 + $0xd0] sm:$0xff]   ;;  %v2396_v26 = vld [vmem:[#allocation2 + $0x88] sm:$0xff]  }
  0x49   : > { %2189 = vmatprep.subr.bf16.mxu0 %v2532_v0  ;;  %2209 = vmatprep.subr.bf16.mxu1 %v2532_v0 }
  0x4b   : > { %2166 = vmatmul.mubr.bf16.vlgmr.msra.gmra.mxu0 %v402_v27  ;;  %2186 = vmatmul.mubr.bf16.vlgmr.msra.gmra.mxu1 %v513_v28  ;;  %v2726_v27 = vsel %vm2704_vm7, %v701_v23, %v705_v16  ;;  %v724_v28 = vcombine.low %v664_v22, %v2712_v18  ;;  %v1190_v16 = vor.u32 %v1189_v11, %v1186_v3  ;;  %v2411_v23 = vld [vmem:[#allocation2 + $0x158] sm:$0xff]   ;;  %v2458_v11 = vld.sshfl [vmem:[%s2645_s17 + $0x4] sm:$0xf pattern:$0x76325410] }
  0x4c   : > { %2190 = vmatpush3.bf16.msra.mxu0 %v2384_v29  ;;  %2210 = vmatpush3.bf16.msra.mxu1 %v2385_v30  ;;  %v725_v29 = vcombine.low %v2716_v19, %v2726_v27  ;;  %v2452_v30 = vld.sshfl [vmem:[%s2690_s25] sm:$0xf pattern:$0x76325410]  ;;  %v2429_v18 = vld [vmem:[#allocation2 + $0x1d8] sm:$0xff]   ;;  %v2430_v19 = vld [vmem:[#allocation2 + $0x190] sm:$0xff]  }
  0x4d   : > { %2191 = vmatprep.subr.bf16.mxu0 %v2532_v0  ;;  %2211 = vmatprep.subr.bf16.mxu1 %v2532_v0 }
  0x4e   : > { %2205 = vmatprep.mubr.msk.bf16.mxu0 %vm2533_vm0, %v2532_v0  ;;  %2225 = vmatprep.mubr.msk.bf16.mxu1 %vm2533_vm0, %v2532_v0  ;;  %v739_v34 = vrot.slane %v725_v29, %v2658_v21 }
  0x50   : > { %2192 = vmatpush3.bf16.msra.mxu0 %v2386_v31  ;;  %2212 = vmatpush3.bf16.msra.mxu1 %v2387_v32  ;;  %v2453_v31 = vld.sshfl [vmem:[%s2690_s25 + $0x8] sm:$0xf pattern:$0x76325410] }
  0x51   : > { %2193 = vmatprep.subr.bf16.mxu0 %v2532_v0  ;;  %2213 = vmatprep.subr.bf16.mxu1 %v2532_v0  ;;  %v2397_v32 = vld [vmem:[#allocation2 + $0xc8] sm:$0xff]   ;;  %v874_v39 = vcombine.low %v2452_v30, %v2453_v31  ;;  %v1191_v30 = vrot.slane %v1190_v16, 2  ;;  %v1195_v31 = vrot.slane %v1193_v15, 7  ;;  %v2434_v15 = vld [vmem:[#allocation2 + $0x180] sm:$0xff]  }
  0x52   : > { %v2435_v16 = vld [vmem:[#allocation2 + $0x1c0] sm:$0xff]  }
  0x54   : > { %2194 = vmatpush3.bf16.msra.mxu0 %v2388_v33  ;;  %2214 = vmatpush3.bf16.msra.mxu1 %v2389_v35  ;;  %v732_v33 = vrot.slane %v724_v28, %v2658_v21  ;;  %v2398_v35 = vld [vmem:[#allocation2 + $0x80] sm:$0xff]   ;;  %v1177_v28 = vrot.slane %v1176_v13, 2  ;;  %v2459_v13 = vld.sshfl [vmem:[%s2645_s17 + $0xc] sm:$0xf pattern:$0x76325410] }
  0x55   : > { %2195 = vmatprep.subr.bf16.mxu0 %v2532_v0  ;;  %2215 = vmatprep.subr.bf16.mxu1 %v2532_v0 }
  0x56   : > { %v740_v37 = vcombine.low %v732_v33, %v739_v34  ;;  %v2413_v34 = vld [vmem:[#allocation2 + $0x150] sm:$0xff]  }
  0x58   : > { %2196 = vmatpush3.bf16.msra.mxu0 %v2390_v56  ;;  %2216 = vmatpush3.bf16.msra.mxu1 %v2391_v61  ;;  %v1124_v56 = vcombine.high %v2013_v42, %v2013_v42  ;;  %v1132_v61 = vcombine.high %v2014_v45, %v2014_v45 }
  0x59   : > { %2197 = vmatprep.subr.bf16.mxu0 %v2532_v0  ;;  %2217 = vmatprep.subr.bf16.mxu1 %v2532_v0 }
  0x5a   : > { %v1165_v10 = vshll.u32 %v1124_v56, 16  ;;  %v1179_v14 = vshll.u32 %v1132_v61, 16  ;;  %v2422_v56 = vld [vmem:[#allocation2 + $0x1b0] sm:$0xff]  }
  0x5c   : > { %2198 = vmatpush3.bf16.msra.mxu0 %v2392_v6  ;;  %2218 = vmatpush3.bf16.msra.mxu1 %v2393_v7  ;;  %v1148_v6 = vor.u32 %v1147_v53, %v1144_v52  ;;  %v1151_v7 = vshll.u32 %v1116_v51, 16  ;;  %v1181_v29 = vrot.slane %v1179_v14, 7  ;;  %v2421_v51 = vld [vmem:[#allocation2 + $0x1f8] sm:$0xff]   ;;  %v2433_v14 = vld [vmem:[#allocation2 + $0x1c8] sm:$0xff]  }
  0x5d   : > { %2199 = vmatprep.subr.bf16.mxu0 %v2532_v0  ;;  %2219 = vmatprep.subr.bf16.mxu1 %v2532_v0  ;;  %v2055_v52 = vld.sshfl [vmem:[%s2652_s20 + $0x10] sm:$0x13 pattern:$0x76325410] }
  0x5e   : > { %v1153_v22 = vrot.slane %v1151_v7, 7  ;;  %v1632_v53 = vcombine.high %v2055_v52, %v2055_v52  ;;  %v1676_v54 = vshrl.u32 %v2055_v52, 16  ;;  %v1679_v55 = vshll.u32 %v2055_v52, 16  ;;  %v2427_v7 = vld [vmem:[#allocation2 + $0x1e0] sm:$0xff]  }
  0x60   : > { %2200 = vmatpush3.bf16.msra.mxu0 %v2394_v20  ;;  %2220 = vmatpush3.bf16.msra.mxu1 %v2395_v25  ;;  %v1149_v20 = vrot.slane %v1148_v6, 2  ;;  %v1163_v25 = vrot.slane %v1162_v9, 2  ;;  %v1678_v58 = vrot.slane %v1676_v54, 6  ;;  %v1681_v59 = vrot.slane %v1679_v55, 7 }
  0x61   : > { %2201 = vmatprep.subr.bf16.mxu0 %v2532_v0  ;;  %2221 = vmatprep.subr.bf16.mxu1 %v2532_v0  ;;  %v2799_v6 = vrot.slane %v1706_v24, %v2658_v21  ;;  %v2431_v24 = vld [vmem:[#allocation2 + $0x1d0] sm:$0xff]  }
  0x62   : > { %v1154_v33 = vsel %vm2704_vm7, %v1149_v20, %v1153_v22  ;;  %v1682_v61 = vor.u32 %v1681_v59, %v1678_v58  ;;  %v2457_v9 = vld.sshfl [vmem:[%s2652_s20 + $0xc] sm:$0xf pattern:$0x76325410]  ;;  %v2438_v20 = vld [vmem:[#allocation2 + $0x238] sm:$0xff]   ;;  %v1500_v22 = vcombine.low %v2458_v11, %v2459_v13 }
  0x64   : > { %2202 = vmatpush3.bf16.msra.mxu0 %v2396_v26  ;;  %2222 = vmatpush3.bf16.msra.mxu1 %v2397_v32  ;;  %v1167_v26 = vrot.slane %v1165_v10, 7  ;;  %v2412_v32 = vld [vmem:[#allocation2 + $0x110] sm:$0xff]   ;;  %v2432_v10 = vld [vmem:[#allocation2 + $0x188] sm:$0xff]  }
  0x65   : > { %2203 = vmatprep.subr.bf16.mxu0 %v2532_v0  ;;  %2223 = vmatprep.subr.bf16.mxu1 %v2532_v0 }
  0x68   : > { %2204 = vmatpush3.bf16.msra.mxu0 %v2398_v35  ;;  %2224 = vmatpush3.bf16.msra.mxu1 %v2399_v36  ;;  %v1168_v35 = vsel %vm2704_vm7, %v1163_v25, %v1167_v26  ;;  %v1182_v36 = vsel %vm2704_vm7, %v1177_v28, %v1181_v29  ;;  %v2442_v25 = vld [vmem:[#allocation2 + $0x228] sm:$0xff]   ;;  %v2443_v26 = vld [vmem:[#allocation2 + $0x220] sm:$0xff]   ;;  %v2444_v28 = vld [vmem:[#allocation2 + $0x218] sm:$0xff]  }
  0x69   : > { %2229 = vmatprep.subr.bf16.mxu0 %v2532_v0  ;;  %2249 = vmatprep.subr.bf16.mxu1 %v2532_v0  ;;  %v1214_v41 = vcombine.low %v1154_v33, %v1168_v35  ;;  %v2445_v29 = vld [vmem:[#allocation2 + $0x210] sm:$0xff]  }
  0x6b   : > { %2206 = vmatmul.mubr.bf16.vlgmr.msra.gmra.mxu0 %v740_v37  ;;  %2226 = vmatmul.mubr.bf16.vlgmr.msra.gmra.mxu1 %v874_v39  ;;  %v1196_v37 = vsel %vm2704_vm7, %v1191_v30, %v1195_v31  ;;  %v2455_v39 = vld.sshfl [vmem:[%s2742_s28 + $0x8] sm:$0xf pattern:$0x76325410]  ;;  %v1222_v45 = vrot.slane %v1214_v41, %v2658_v21  ;;  %v2447_v31 = vld [vmem:[#allocation2 + $0x200] sm:$0xff]  }
  0x6c   : > { %2230 = vmatpush3.bf16.msra.mxu0 %v2400_v38  ;;  %2250 = vmatpush3.bf16.msra.mxu1 %v2403_v40  ;;  %v2454_v38 = vld.sshfl [vmem:[%s2742_s28] sm:$0xf pattern:$0x76325410]  ;;  %v2414_v40 = vld [vmem:[#allocation2 + $0x108] sm:$0xff]   ;;  %v1215_v42 = vcombine.low %v1182_v36, %v1196_v37 }
  0x6d   : > { %2231 = vmatprep.subr.bf16.mxu0 %v2532_v0  ;;  %2251 = vmatprep.subr.bf16.mxu1 %v2532_v0  ;;  %v2446_v30 = vld [vmem:[#allocation2 + $0x208] sm:$0xff]  }
  0x6e   : > { %2245 = vmatprep.mubr.msk.bf16.mxu0 %vm2533_vm0, %v2532_v0  ;;  %2265 = vmatprep.mubr.msk.bf16.mxu1 %vm2533_vm0, %v2532_v0  ;;  %v1229_v46 = vrot.slane %v1215_v42, %v2658_v21 }
  0x70   : > { %2232 = vmatpush3.bf16.msra.mxu0 %v2404_v48  ;;  %2252 = vmatpush3.bf16.msra.mxu1 %v2405_v50  ;;  %v1008_v48 = vcombine.low %v2454_v38, %v2455_v39  ;;  %v1230_v50 = vcombine.low %v1222_v45, %v1229_v46 }
  0x71   : > { %2233 = vmatprep.subr.bf16.mxu0 %v2532_v0  ;;  %2253 = vmatprep.subr.bf16.mxu1 %v2532_v0 }
  0x74   : > { %2234 = vmatpush3.bf16.msra.mxu0 %v2406_v60  ;;  %2254 = vmatpush3.bf16.msra.mxu1 %v2407_v2  ;;  %v1685_v60 = vshll.u32 %v1632_v53, 16  ;;  %v1683_v2 = vrot.slane %v1682_v61, 2 }
  0x75   : > { %2235 = vmatprep.subr.bf16.mxu0 %v2532_v0  ;;  %2255 = vmatprep.subr.bf16.mxu1 %v2532_v0 }
  0x76   : > { %v1687_v62 = vrot.slane %v1685_v60, 7 }
  0x78   : > { %2236 = vmatpush3.bf16.msra.mxu0 %v2408_v5  ;;  %2256 = vmatpush3.bf16.msra.mxu1 %v2409_v8  ;;  %v1688_v3 = vsel %vm2704_vm7, %v1683_v2, %v1687_v62  ;;  %v2428_v8 = vld [vmem:[#allocation2 + $0x198] sm:$0xff]  }
  0x79   : > { %2237 = vmatprep.subr.bf16.mxu0 %v2532_v0  ;;  %2257 = vmatprep.subr.bf16.mxu1 %v2532_v0  ;;  %v1707_v5 = vcombine.low %v2726_v27, %v1688_v3 }
  0x7b   : > { %v1721_v12 = vrot.slane %v1707_v5, %v2658_v21  ;;  %v2456_v21 = vld.sshfl [vmem:[%s2652_s20 + $0x4] sm:$0xf pattern:$0x76325410] }
  0x7c   : > { %2238 = vmatpush3.bf16.msra.mxu0 %v2410_v17  ;;  %2258 = vmatpush3.bf16.msra.mxu1 %v2411_v23  ;;  %v1365_v17 = vcombine.low %v2456_v21, %v2457_v9  ;;  %v2441_v23 = vld [vmem:[#allocation2 + $0x230] sm:$0xff]   ;;  %v2064_v21 = vld [vmem:[#allocation4] ss:$0 sm:$0xff] }
  0x7d   : > { %2239 = vmatprep.subr.bf16.mxu0 %v2532_v0  ;;  %2259 = vmatprep.subr.bf16.mxu1 %v2532_v0  ;;  %v1722_v27 = vcombine.low %v2799_v6, %v1721_v12 }
  0x80   : > { %2240 = vmatpush3.bf16.msra.mxu0 %v2412_v32  ;;  %2260 = vmatpush3.bf16.msra.mxu1 %v2413_v34 }
  0x81   : > { %2241 = vmatprep.subr.bf16.mxu0 %v2532_v0  ;;  %2261 = vmatprep.subr.bf16.mxu1 %v2532_v0 }
  0x84   : > { %2242 = vmatpush3.bf16.msra.mxu0 %v2414_v40  ;;  %2262 = vmatpush3.bf16.msra.mxu1 %v2415_v43 }
  0x85   : > { %2243 = vmatprep.subr.bf16.mxu0 %v2532_v0  ;;  %2263 = vmatprep.subr.bf16.mxu1 %v2532_v0 }
  0x88   : > { %2244 = vmatpush3.bf16.msra.mxu0 %v2416_v44  ;;  %2264 = vmatpush3.bf16.msra.mxu1 %v2417_v47 }
  0x89   : > { %2269 = vmatprep.subr.bf16.mxu0 %v2532_v0  ;;  %2289 = vmatprep.subr.bf16.mxu1 %v2532_v0 }
  0x8b   : > { %2246 = vmatmul.mubr.bf16.vlgmr.msra.gmra.mxu0 %v1008_v48  ;;  %2266 = vmatmul.mubr.bf16.vlgmr.msra.gmra.mxu1 %v1230_v50 }
  0x8c   : > { %2270 = vmatpush3.bf16.msra.mxu0 %v2420_v49  ;;  %2290 = vmatpush3.bf16.msra.mxu1 %v2421_v51 }
  0x8d   : > { %2271 = vmatprep.subr.bf16.mxu0 %v2532_v0  ;;  %2291 = vmatprep.subr.bf16.mxu1 %v2532_v0 }
  0x8e   : > { %2285 = vmatprep.mubr.msk.bf16.mxu0 %vm2533_vm0, %v2532_v0  ;;  %2305 = vmatprep.mubr.msk.bf16.mxu1 %vm2533_vm0, %v2532_v0 }
  0x90   : > { %2272 = vmatpush3.bf16.msra.mxu0 %v2422_v56  ;;  %2292 = vmatpush3.bf16.msra.mxu1 %v2423_v57 }
  0x91   : > { %2273 = vmatprep.subr.bf16.mxu0 %v2532_v0  ;;  %2293 = vmatprep.subr.bf16.mxu1 %v2532_v0 }
  0x94   : > { %2274 = vmatpush3.bf16.msra.mxu0 %v2424_v63  ;;  %2294 = vmatpush3.bf16.msra.mxu1 %v2425_v1 }
  0x95   : > { %2275 = vmatprep.subr.bf16.mxu0 %v2532_v0  ;;  %2295 = vmatprep.subr.bf16.mxu1 %v2532_v0 }
  0x98   : > { %2276 = vmatpush3.bf16.msra.mxu0 %v2426_v4  ;;  %2296 = vmatpush3.bf16.msra.mxu1 %v2427_v7 }
  0x99   : > { %2277 = vmatprep.subr.bf16.mxu0 %v2532_v0  ;;  %2297 = vmatprep.subr.bf16.mxu1 %v2532_v0 }
  0x9c   : > { %2278 = vmatpush3.bf16.msra.mxu0 %v2428_v8  ;;  %2298 = vmatpush3.bf16.msra.mxu1 %v2429_v18 }
  0x9d   : > { %2279 = vmatprep.subr.bf16.mxu0 %v2532_v0  ;;  %2299 = vmatprep.subr.bf16.mxu1 %v2532_v0 }
  0xa0   : > { %2280 = vmatpush3.bf16.msra.mxu0 %v2430_v19  ;;  %2300 = vmatpush3.bf16.msra.mxu1 %v2431_v24 }
  0xa1   : > { %2281 = vmatprep.subr.bf16.mxu0 %v2532_v0  ;;  %2301 = vmatprep.subr.bf16.mxu1 %v2532_v0 }
  0xa4   : > { %2282 = vmatpush3.bf16.msra.mxu0 %v2432_v10  ;;  %2302 = vmatpush3.bf16.msra.mxu1 %v2433_v14 }
  0xa5   : > { %2283 = vmatprep.subr.bf16.mxu0 %v2532_v0  ;;  %2303 = vmatprep.subr.bf16.mxu1 %v2532_v0 }
  0xa8   : > { %2284 = vmatpush3.bf16.msra.mxu0 %v2434_v15  ;;  %2304 = vmatpush3.bf16.msra.mxu1 %v2435_v16 }
  0xa9   : > { %2309 = vmatprep.subr.bf16.mxu0 %v2532_v0 }
  0xab   : > { %2286 = vmatmul.mubr.bf16.vlgmr.msra.gmra.mxu0 %v1365_v17  ;;  %2306 = vmatmul.mubr.bf16.vlgmr.msra.gmra.mxu1 %v1500_v22 }
  0xac   : > { %2310 = vmatpush3.bf16.msra.mxu0 %v2438_v20  ;;  %2325 = vmatprep.mubr.msk.bf16.mxu0 %vm2533_vm0, %v2532_v0 }
  0xad   : > { %2311 = vmatprep.subr.bf16.mxu0 %v2532_v0 }
  0xb0   : > { %2312 = vmatpush3.bf16.msra.mxu0 %v2441_v23 }
  0xb1   : > { %2313 = vmatprep.subr.bf16.mxu0 %v2532_v0 }
  0xb4   : > { %2314 = vmatpush3.bf16.msra.mxu0 %v2442_v25 }
  0xb5   : > { %2315 = vmatprep.subr.bf16.mxu0 %v2532_v0 }
  0xb8   : > { %2316 = vmatpush3.bf16.msra.mxu0 %v2443_v26 }
  0xb9   : > { %2317 = vmatprep.subr.bf16.mxu0 %v2532_v0 }
  0xbc   : > { %2318 = vmatpush3.bf16.msra.mxu0 %v2444_v28 }
  0xbd   : > { %2319 = vmatprep.subr.bf16.mxu0 %v2532_v0 }
  0xc0   : > { %2320 = vmatpush3.bf16.msra.mxu0 %v2445_v29 }
  0xc1   : > { %2321 = vmatprep.subr.bf16.mxu0 %v2532_v0 }
  0xc4   : > { %2322 = vmatpush3.bf16.msra.mxu0 %v2446_v30 }
  0xc5   : > { %2323 = vmatprep.subr.bf16.mxu0 %v2532_v0 }
  0xc8   : > { %2324 = vmatpush3.bf16.msra.mxu0 %v2447_v31 }
  0xcb   : > { %2326 = vmatmul.mubr.bf16.vlgmr.msra.gmra.mxu0 %v1722_v27 }
 0x10b   : > { %v486_v32 = vpop.f32.mrf.mxu0  ;;  %v597_v33 = vpop.f32.mrf.mxu1 }
 0x10c   : > { %v598_v34 = vadd.f32 %v597_v33, %v486_v32 }
 0x10d   : > { %v2167_v35 = vpop.f32.mrf.mxu0  ;;  %v2187_v36 = vpop.f32.mrf.mxu1 }
 0x10f   : > { %v489_v37 = vpop.f32.mrf.mxu0  ;;  %v600_v38 = vpop.f32.mrf.mxu1 }
 0x110   : > { %v601_v39 = vadd.f32 %v600_v38, %v489_v37 }
 0x111   : > { %v2168_v40 = vpop.f32.mrf.mxu0  ;;  %v2188_v41 = vpop.f32.mrf.mxu1 }
 0x12b   : > { %v824_v42 = vpop.f32.mrf.mxu0  ;;  %v958_v44 = vpop.f32.mrf.mxu1 }
 0x12c   : > { %v831_v43 = vadd.f32 %v824_v42, %v598_v34 }
 0x12d   : > { %v2207_v45 = vpop.f32.mrf.mxu0  ;;  %v2227_v47 = vpop.f32.mrf.mxu1 }
 0x12e   : > { %v965_v46 = vadd.f32 %v958_v44, %v831_v43 }
 0x12f   : > { %v827_v48 = vpop.f32.mrf.mxu0  ;;  %v961_v49 = vpop.f32.mrf.mxu1 }
 0x130   : > { %v832_v0 = vadd.f32 %v827_v48, %v601_v39 }
 0x131   : > { %v2208_v50 = vpop.f32.mrf.mxu0  ;;  %v2228_v52 = vpop.f32.mrf.mxu1 }
 0x132   : > { %v966_v51 = vadd.f32 %v961_v49, %v832_v0 }
 0x14b   : > { %v1092_v53 = vpop.f32.mrf.mxu0  ;;  %v1314_v54 = vpop.f32.mrf.mxu1 }
 0x14c   : > { %v1099_v6 = vadd.f32 %v1092_v53, %v965_v46 }
 0x14d   : > { %v2247_v55 = vpop.f32.mrf.mxu0  ;;  %v2267_v56 = vpop.f32.mrf.mxu1 }
 0x14e   : > { %v1321_v7 = vadd.f32 %v1314_v54, %v1099_v6 }
 0x14f   : > { %v1095_v57 = vpop.f32.mrf.mxu0  ;;  %v1317_v58 = vpop.f32.mrf.mxu1 }
 0x150   : > { %v1100_v12 = vadd.f32 %v1095_v57, %v966_v51 }
 0x151   : > { %v2248_v59 = vpop.f32.mrf.mxu0  ;;  %v2268_v60 = vpop.f32.mrf.mxu1 }
 0x152   : > { %v1322_v27 = vadd.f32 %v1317_v58, %v1100_v12 }
 0x16b   : > { %v1449_v61 = vpop.f32.mrf.mxu0  ;;  %v1584_v62 = vpop.f32.mrf.mxu1 }
 0x16c   : > { %v1456_v8 = vadd.f32 %v1449_v61, %v1321_v7 }
 0x16d   : > { %v2287_v63 = vpop.f32.mrf.mxu0  ;;  %v2307_v1 = vpop.f32.mrf.mxu1 }
 0x16e   : > { %v1591_v18 = vadd.f32 %v1584_v62, %v1456_v8 }
 0x16f   : > { %v1452_v2 = vpop.f32.mrf.mxu0  ;;  %v1587_v3 = vpop.f32.mrf.mxu1 }
 0x170   : > { %v1457_v19 = vadd.f32 %v1452_v2, %v1322_v27 }
 0x171   : > { %v2288_v4 = vpop.f32.mrf.mxu0  ;;  %v2308_v5 = vpop.f32.mrf.mxu1 }
 0x172   : > { %v1592_v11 = vadd.f32 %v1587_v3, %v1457_v19 }
 0x18b   : > { %v1806_v24 = vpop.f32.mrf.mxu0 }
 0x18c   : > { %v1813_v9 = vadd.f32 %v1806_v24, %v1591_v18 }
 0x18d   : > { %v2327_v10 = vpop.f32.mrf.mxu0 }
 0x18e   : > { %v1822_v13 = vadd.f32 %v2064_v21, %v1813_v9 }
 0x18f   : > { %v1809_v14 = vpop.f32.mrf.mxu0 }
 0x190   : > { %v1824_v15 = vmax.f32 %v1822_v13, 0.0  ;;  %v1814_v16 = vadd.f32 %v1809_v14, %v1592_v11 }
 0x191   : > { %v2328_v17 = vpop.f32.mrf.mxu0 }
 0x192   : > { %v1828_v20 = vcombine.high %v1824_v15, %v1824_v15  ;;  %v1832_v22 = vpack.c.bf16 %v1824_v15, %v1824_v15  ;;  %v1823_v23 = vadd.f32 %v2064_v21, %v1814_v16 }
 0x194   : > { %v1833_v25 = vpack.c.bf16 %v1828_v20, %v1828_v20  ;;  %1836 = vst [vmem:[%s339_s8] sm:$0x3] %v1832_v22  ;;  %v1825_v26 = vmax.f32 %v1823_v23, 0.0 }
 0x196   : > { %1837 = vst [vmem:[%s339_s8 + $0x2] sm:$0x3] %v1833_v25  ;;  %v1829_v28 = vcombine.high %v1825_v26, %v1825_v26  ;;  %v1834_v29 = vpack.c.bf16 %v1825_v26, %v1825_v26 }
 0x198   : > { %v1835_v30 = vpack.c.bf16 %v1829_v28, %v1829_v28  ;;  %1838 = vst [vmem:[%s339_s8 + $0x4] sm:$0x3] %v1834_v29 }
 0x19a   : > { %1839 = vst [vmem:[%s339_s8 + $0x6] sm:$0x3] %v1835_v30 }
 0x19b PF: > { %s18_s21 = sadd.s32 1, %s2526_s21  }
 0x19c   : > { %p15_p3 = scmp.ge.s32.totalorder %s18_s21, 4  }
 0x19e   :  { %17 = sbr.rel (!%p15_p3) target bundleno = 2 (0x2), region = 102 }
 0x1a3   :  { %1861 = vsyncpa [#allocation3], 1 }
 0x1a4   :  { %1863 = vsyncpa [#allocation3 + $0x1], 1 }
 0x1a5   :  { %1864 = vsyncpa [#allocation5], 1 }

// kernel: deeplabv3_forward.18
= control target key start
LH: loop header
LB: loop body
LE: loop exit
PB: predicated region body
PF: predicated region fallthrough
CT: control target
= control target key end

     0   :  { %9 = vsyncpa [#allocation3], 0  ;;  %s2523_s15 = smov 0   ;;  %s2956_s0 = inlined_call_operand.vmem [shape: bf16[2,8,8,128], index: 0, kind: input, shape index: {}]   ;;  %s2957_s1 = inlined_call_operand.vmem [shape: bf16[9,128,128], index: 1, kind: input, shape index: {}]   ;;  %s2958_s2 = inlined_call_operand.hbm [shape: f32[1,1,128], index: 2, kind: input, shape index: {}]   ;;  %s2959_s3 = inlined_call_operand.vmem [shape: bf16[2,4,4,128], index: 3, kind: input, shape index: {}]   ;;  %s2960_s4 = inlined_call_operand.vmem [shape: bf16[2,4,4,128], index: 4, kind: output, shape index: {}]  }
   0x1 LB: > { %s2529_s16 = sadd.s32 4294967295, %s2492_s15   ;;  %p1806_p0 = scmp.ge.s32.totalorder %s2492_s15, 1  ;;  %s2492_s15 = sphi %s2523_s15, %s15_s15  }
   0x2   : > { %p140_p1 = scmp.lt.s32.totalorder %s2492_s15, 3  ;;  %p2358_p3 = scmp.eq.s32.totalorder %s2529_s16, 0 }
   0x3   : > { %s2494_s18 = smov [#allocation2]  }
   0x4   : > { %p2533_p2 = pnand %p1806_p0, %p140_p1  ;;  %s156_s19 = sshll.u32 %s2494_s18, 4  ;;  %s157_s19 = int_to_ptr.vmem [resolvable:$true] %s156_s19 }
   0x5   : > { %s2467_s20 = scalar_lea.vmem %s157_s19, 16  ;;  %s2474_s21 = scalar_lea.vmem %s157_s19, 32 }
   0x6   : > { %p2354_p4 = pneg %p2533_p2  ;;  %p2468_p7 = scmp.ne.s32.totalorder %s157_s19, %s2467_s20 }
   0x7   : > { %p2475_p10 = scmp.lt.s32.totalorder %s157_s19, %s157_s19  ;;  %p2476_p11 = scmp.lt.s32.totalorder %s2474_s21, %s2467_s20 }
   0x8   : > { %p2355_p5 = pnand %p2358_p3, %p2354_p4 }
   0x9   : > { %p2477_p12 = por %p2476_p11, %p2475_p10 }
   0xa   : > { %p2458_p6 = pneg %p2355_p5 }
   0xc   : > { %p2470_p8 = pnand %p2468_p7, %p2458_p6 }
   0xe   : > { %p2471_p9 = pneg %p2470_p8 }
  0x10   : > { %p2478_p13 = pnand %p2477_p12, %p2471_p9 }
  0x12   : > { %2481 = shalt.err (!%p2478_p13)
}
  0x13   : > { %2357 = dma.hbm_to_vmem [thread:$0]  (!%p2355_p5), %s2958_s2, 16, %s157_s19, [#allocation3]  }
  0x14   : > { %185 = sbr.rel (%p2533_p2) target bundleno = 398 (0x18e), region = 36 }
  0x19   : > { %2487 = dma.done.wait (%p2358_p3), [#allocation3], 16  }
  0x1a   : > { %2489 = vsyncadd (%p2358_p3), [#allocation3], 4294967280  ;;  %v2495_v0 = vmov 0.0   ;;  %vm2496_vm0 = vmmov 0   ;;  %v2372_v1 = vld [vmem:[%s2957_s1 + $0x78] sm:$0xff]   ;;  %v2374_v3 = vld [vmem:[%s2957_s1 + $0x70] sm:$0xff]   ;;  %v337_v9 = vlaneseq }
  0x1b   : > { %2170 = vmatprep.subr.bf16.mxu0 %v2495_v0  ;;  %2190 = vmatprep.subr.bf16.mxu1 %v2495_v0  ;;  %v2373_v2 = vld [vmem:[%s2957_s1 + $0x38] sm:$0xff]   ;;  %p216_p0 = scmp.lt.s32.totalorder %s2529_s16, 1  ;;  %v2375_v4 = vld [vmem:[%s2957_s1 + $0x30] sm:$0xff]   ;;  %vm292_vm1 = vcmask 1040384   ;;  %vm293_vm2 = vcmask 1042434   ;;  %v2376_v5 = vld [vmem:[%s2957_s1 + $0x68] sm:$0xff]  }
  0x1c   : > { %2186 = vmatprep.mubr.msk.bf16.mxu0 %vm2496_vm0, %v2495_v0  ;;  %2206 = vmatprep.mubr.msk.bf16.mxu1 %vm2496_vm0, %v2495_v0  ;;  %v2377_v6 = vld [vmem:[%s2957_s1 + $0x28] sm:$0xff]   ;;  %vm295_vm3 = vcmask 1044484   ;;  %vm294_vm4 = vmor %vm292_vm1, %vm293_vm2  ;;  %v2378_v7 = vld [vmem:[%s2957_s1 + $0x60] sm:$0xff]   ;;  %v2497_v11 = vmov 1983009808   ;;  %vm297_vm6 = vcmask 1046534  }
  0x1d   : > { %2171 = vmatpush3.bf16.msra.mxu0 %v2372_v1  ;;  %2191 = vmatpush3.bf16.msra.mxu1 %v2373_v2  ;;  %s2967_s16 = smov (!%p216_p0, %s2529_s16), 1  ;;  %v2379_v8 = vld [vmem:[%s2957_s1 + $0x20] sm:$0xff]   ;;  %vm2597_vm5 = vmor %vm294_vm4, %vm295_vm3  ;;  %v335_v12 = vunpack.c.l.s4 %v2497_v11  ;;  %v2380_v13 = vld [vmem:[%s2957_s1 + $0x58] sm:$0xff]   ;;  %v338_v15 = vshrl.u32 %v337_v9, 7 }
  0x1e   : > { %2172 = vmatprep.subr.bf16.mxu0 %v2495_v0  ;;  %2192 = vmatprep.subr.bf16.mxu1 %v2495_v0  ;;  %s2086_s12 = sshll.u32 %s2967_s16, 5  ;;  %v2381_v14 = vld [vmem:[%s2957_s1 + $0x18] sm:$0xff]   ;;  %v2382_v17 = vld [vmem:[%s2957_s1 + $0x50] sm:$0xff]   ;;  %vm2621_vm7 = vmor %vm2597_vm5, %vm297_vm6 }
  0x1f   : > { %s2595_s19 = scalar_lea.vmem %s2956_s0, %s2086_s12  ;;  %v336_v21 = vunpack.c.0.s8 %v335_v12  ;;  %v2383_v22 = vld [vmem:[%s2957_s1 + $0x10] sm:$0xff]   ;;  %v2384_v34 = vld [vmem:[%s2957_s1 + $0x48] sm:$0xff]   ;;  %v2386_v48 = vld [vmem:[%s2957_s1 + $0x40] sm:$0xff]  }
  0x20   : > { %v1817_v16 = vld.sshfl [vmem:[%s2595_s19] sm:$0x12 pattern:$0x76325410]  ;;  %v2385_v39 = vld [vmem:[%s2957_s1 + $0x8] sm:$0xff]   ;;  %v2390_v53 = vld [vmem:[%s2957_s1 + $0xb8] sm:$0xff]  }
  0x21   : > { %2173 = vmatpush3.bf16.msra.mxu0 %v2374_v3  ;;  %2193 = vmatpush3.bf16.msra.mxu1 %v2375_v4  ;;  %v1818_v18 = vld.sshfl [vmem:[%s2595_s19 + $0x4] sm:$0x12 pattern:$0x76325410]  ;;  %v267_v19 = vcombine.high %v1817_v16, %v1817_v16  ;;  %v1821_v20 = vrot.slane %v1817_v16, 9  ;;  %v2633_v37 = vsub.s32 %v336_v21, %v338_v15  ;;  %v2391_v54 = vld [vmem:[%s2957_s1 + $0xf8] sm:$0xff]  }
  0x22   : > { %2174 = vmatprep.subr.bf16.mxu0 %v2495_v0  ;;  %2194 = vmatprep.subr.bf16.mxu1 %v2495_v0  ;;  %v1819_v23 = vld.sshfl [vmem:[%s2595_s19 + $0x8] sm:$0x12 pattern:$0x76325410]  ;;  %v275_v24 = vcombine.high %v1818_v18, %v1818_v18  ;;  %v1822_v26 = vrot.slane %v1818_v18, 9  ;;  %v2387_v49 = vld [vmem:[%s2957_s1] sm:$0xff]  }
  0x23   : > { %v1820_v27 = vld.sshfl [vmem:[%s2595_s19 + $0xc] sm:$0x12 pattern:$0x76325410]  ;;  %v283_v28 = vcombine.high %v1819_v23, %v1819_v23  ;;  %v301_v29 = vrot.slane %v267_v19, 7  ;;  %v1823_v30 = vrot.slane %v1819_v23, 9 }
  0x24   : > { %v291_v31 = vcombine.high %v1820_v27, %v1820_v27  ;;  %v305_v32 = vrot.slane %v275_v24, 7  ;;  %v1824_v33 = vrot.slane %v1820_v27, 9  ;;  %v2450_v38 = vld.sshfl [vmem:[%s2595_s19] sm:$0xf pattern:$0x76325410] }
  0x25   : > { %2175 = vmatpush3.bf16.msra.mxu0 %v2376_v5  ;;  %2195 = vmatpush3.bf16.msra.mxu1 %v2377_v6  ;;  %v302_v35 = vsel %vm2621_vm7, %v1821_v20, %v301_v29  ;;  %v309_v36 = vrot.slane %v283_v28, 7  ;;  %v2451_v42 = vld.sshfl [vmem:[%s2595_s19 + $0x8] sm:$0xf pattern:$0x76325410]  ;;  %v2392_v55 = vld [vmem:[%s2957_s1 + $0xb0] sm:$0xff]  }
  0x26   : > { %2176 = vmatprep.subr.bf16.mxu0 %v2495_v0  ;;  %2196 = vmatprep.subr.bf16.mxu1 %v2495_v0  ;;  %v306_v40 = vsel %vm2621_vm7, %v1822_v26, %v305_v32  ;;  %v313_v41 = vrot.slane %v291_v31, 7  ;;  %v459_v52 = vcombine.low %v2450_v38, %v2451_v42  ;;  %v2393_v56 = vld [vmem:[%s2957_s1 + $0xf0] sm:$0xff]   ;;  %v2394_v57 = vld [vmem:[%s2957_s1 + $0xa8] sm:$0xff]   ;;  %v2396_v59 = vld [vmem:[%s2957_s1 + $0xa0] sm:$0xff]  }
  0x27   : > { %v310_v43 = vsel %vm2621_vm7, %v1823_v30, %v309_v36  ;;  %v332_v44 = vcombine.low %v302_v35, %v306_v40  ;;  %v2395_v58 = vld [vmem:[%s2957_s1 + $0xe8] sm:$0xff]   ;;  %v2397_v60 = vld [vmem:[%s2957_s1 + $0xe0] sm:$0xff]   ;;  %v2398_v61 = vld [vmem:[%s2957_s1 + $0x98] sm:$0xff]  }
  0x28   : > { %v314_v45 = vsel %vm2621_vm7, %v1824_v33, %v313_v41  ;;  %v2399_v62 = vld [vmem:[%s2957_s1 + $0xd8] sm:$0xff]   ;;  %v1857_v63 = vld.sshfl [vmem:[%s2595_s19] sm:$0x30 pattern:$0x76325410]  ;;  %v2400_v4 = vld [vmem:[%s2957_s1 + $0x90] sm:$0xff]  }
  0x29   : > { %2177 = vmatpush3.bf16.msra.mxu0 %v2378_v7  ;;  %2197 = vmatpush3.bf16.msra.mxu1 %v2379_v8  ;;  %v333_v46 = vcombine.low %v310_v43, %v314_v45  ;;  %v340_v47 = vrot.slane %v332_v44, %v2633_v37  ;;  %v1858_v1 = vld.sshfl [vmem:[%s2595_s19 + $0x4] sm:$0x30 pattern:$0x76325410]  ;;  %v2401_v5 = vld [vmem:[%s2957_s1 + $0xd0] sm:$0xff]   ;;  %v2402_v6 = vld [vmem:[%s2957_s1 + $0x88] sm:$0xff]  }
  0x2a   : > { %2178 = vmatprep.subr.bf16.mxu0 %v2495_v0  ;;  %2198 = vmatprep.subr.bf16.mxu1 %v2495_v0  ;;  %v1859_v2 = vld.sshfl [vmem:[%s2595_s19 + $0x8] sm:$0x30 pattern:$0x76325410]  ;;  %v1877_v7 = vcombine.high %v1857_v63, %v1858_v1  ;;  %v2404_v12 = vld [vmem:[%s2957_s1 + $0x80] sm:$0xff]   ;;  %v2406_v23 = vld [vmem:[%s2957_s1 + $0x138] sm:$0xff]  }
  0x2b   : > { %v2657_v50 = vrot.slane %v333_v46, %v2633_v37  ;;  %v1860_v3 = vld.sshfl [vmem:[%s2595_s19 + $0xc] sm:$0x30 pattern:$0x76325410]  ;;  %v2405_v16 = vld [vmem:[%s2957_s1 + $0xc0] sm:$0xff]   ;;  %v2409_v27 = vld [vmem:[%s2957_s1 + $0x178] sm:$0xff]  }
  0x2c   : > { %v1878_v8 = vcombine.high %v1859_v2, %v1860_v3  ;;  %v2452_v9 = vld.sshfl [vmem:[%s2595_s19 + $0x8] sm:$0xf pattern:$0x76325410]  ;;  %v2410_v32 = vld [vmem:[%s2957_s1 + $0x130] sm:$0xff]   ;;  %v2415_v40 = vld [vmem:[%s2957_s1 + $0x160] sm:$0xff]  }
  0x2d   : > { %2179 = vmatpush3.bf16.msra.mxu0 %v2380_v13  ;;  %2199 = vmatpush3.bf16.msra.mxu1 %v2381_v14  ;;  %v348_v51 = vcombine.low %v340_v47, %v2657_v50  ;;  %v2453_v10 = vld.sshfl [vmem:[%s2595_s19 + $0x10] sm:$0xf pattern:$0x76325410]  ;;  %v2403_v11 = vld [vmem:[%s2957_s1 + $0xc8] sm:$0xff]   ;;  %v615_v13 = vrot.slane %v1877_v7, %v2633_v37  ;;  %v2416_v41 = vld [vmem:[%s2957_s1 + $0x118] sm:$0xff]  }
  0x2e   : > { %2180 = vmatprep.subr.bf16.mxu0 %v2495_v0  ;;  %2200 = vmatprep.subr.bf16.mxu1 %v2495_v0  ;;  %v2732_v14 = vrot.slane %v1878_v8, %v2633_v37  ;;  %v1921_v15 = vld.sshfl [vmem:[%s2595_s19 + $0x10] sm:$0x12 pattern:$0x76325410]  ;;  %v758_v26 = vcombine.low %v2452_v9, %v2453_v10  ;;  %v2412_v36 = vld [vmem:[%s2957_s1 + $0x128] sm:$0xff]   ;;  %v2417_v42 = vld [vmem:[%s2957_s1 + $0x158] sm:$0xff]  }
  0x2f   : > { %v882_v18 = vcombine.high %v1921_v15, %v1921_v15  ;;  %v1925_v19 = vrot.slane %v1921_v15, 9  ;;  %v2411_v33 = vld [vmem:[%s2957_s1 + $0x170] sm:$0xff]   ;;  %v2413_v38 = vld [vmem:[%s2957_s1 + $0x168] sm:$0xff]   ;;  %v2431_v63 = vld [vmem:[%s2957_s1 + $0x1e0] sm:$0xff]  }
  0x30   : > { %v1957_v43 = vld.sshfl [vmem:[%s2595_s19 + $0x10] sm:$0x30 pattern:$0x76325410]  ;;  %v2420_v47 = vld [vmem:[%s2957_s1 + $0x108] sm:$0xff]   ;;  %v2432_v3 = vld [vmem:[%s2957_s1 + $0x198] sm:$0xff]  }
  0x31   : > { %2181 = vmatpush3.bf16.msra.mxu0 %v2382_v17  ;;  %2201 = vmatpush3.bf16.msra.mxu1 %v2383_v22  ;;  %v1922_v17 = vld.sshfl [vmem:[%s2595_s19 + $0x14] sm:$0x12 pattern:$0x76325410]  ;;  %v623_v22 = vcombine.low %v615_v13, %v2732_v14  ;;  %v901_v24 = vrot.slane %v882_v18, 7  ;;  %v2436_v15 = vld [vmem:[%s2957_s1 + $0x188] sm:$0xff]  }
  0x32   : > { %2182 = vmatprep.subr.bf16.mxu0 %v2495_v0  ;;  %2202 = vmatprep.subr.bf16.mxu1 %v2495_v0  ;;  %v890_v20 = vcombine.high %v1922_v17, %v1922_v17  ;;  %v1926_v21 = vrot.slane %v1922_v17, 9  ;;  %v1958_v44 = vld.sshfl [vmem:[%s2595_s19 + $0x14] sm:$0x30 pattern:$0x76325410]  ;;  %v2437_v17 = vld [vmem:[%s2957_s1 + $0x1c8] sm:$0xff]  }
  0x33   : > { %v902_v29 = vsel %vm2621_vm7, %v1925_v19, %v901_v24  ;;  %v2418_v45 = vld [vmem:[%s2957_s1 + $0x110] sm:$0xff]   ;;  %v2438_v25 = vld [vmem:[%s2957_s1 + $0x180] sm:$0xff]   ;;  %v2444_v24 = vld [vmem:[%s2957_s1 + $0x228] sm:$0xff]  }
  0x34   : > { %v905_v28 = vrot.slane %v890_v20, 7  ;;  %v2419_v46 = vld [vmem:[%s2957_s1 + $0x150] sm:$0xff]   ;;  %v2439_v19 = vld [vmem:[%s2957_s1 + $0x1c0] sm:$0xff]  }
  0x35   : > { %2183 = vmatpush3.bf16.msra.mxu0 %v2384_v34  ;;  %2203 = vmatpush3.bf16.msra.mxu1 %v2385_v39  ;;  %v2414_v39 = vld [vmem:[%s2957_s1 + $0x120] sm:$0xff]   ;;  %v2434_v9 = vld [vmem:[%s2957_s1 + $0x190] sm:$0xff]  }
  0x36   : > { %2184 = vmatprep.subr.bf16.mxu0 %v2495_v0  ;;  %2204 = vmatprep.subr.bf16.mxu1 %v2495_v0  ;;  %v906_v30 = vsel %vm2621_vm7, %v1926_v21, %v905_v28  ;;  %v2435_v10 = vld [vmem:[%s2957_s1 + $0x1d0] sm:$0xff]   ;;  %v2442_v21 = vld [vmem:[%s2957_s1 + $0x238] sm:$0xff]  }
  0x37   : > { %v925_v31 = vcombine.low %v902_v29, %v906_v30  ;;  %v2454_v13 = vld.sshfl [vmem:[%s2595_s19 + $0x10] sm:$0xf pattern:$0x76325410] }
  0x38   : > { %v2055_v28 = vld.sshfl [vmem:[%s2595_s19 + $0x18] sm:$0x30 pattern:$0x76325410]  ;;  %v2447_v29 = vld [vmem:[%s2957_s1 + $0x210] sm:$0xff]  }
  0x39   : > { %2185 = vmatpush3.bf16.msra.mxu0 %v2386_v48  ;;  %2205 = vmatpush3.bf16.msra.mxu1 %v2387_v49  ;;  %v2762_v34 = vrot.slane %v925_v31, %v2633_v37  ;;  %v1976_v48 = vcombine.high %v1957_v43, %v1958_v44  ;;  %v2421_v49 = vld [vmem:[%s2957_s1 + $0x148] sm:$0xff]   ;;  %v2056_v30 = vld.sshfl [vmem:[%s2595_s19 + $0x1c] sm:$0x30 pattern:$0x76325410] }
  0x3a   : > { %2210 = vmatprep.subr.bf16.mxu0 %v2495_v0  ;;  %2230 = vmatprep.subr.bf16.mxu1 %v2495_v0  ;;  %v2074_v31 = vcombine.high %v2055_v28, %v2056_v30 }
  0x3b   : > { %v940_v35 = vcombine.low %v2657_v50, %v2762_v34  ;;  %v2422_v50 = vld [vmem:[%s2957_s1 + $0x100] sm:$0xff]  }
  0x3c   : > { %2187 = vmatmul.mubr.bf16.vlgmr.msra.gmra.mxu0 %v348_v51  ;;  %2207 = vmatmul.mubr.bf16.vlgmr.msra.gmra.mxu1 %v459_v52  ;;  %v2817_v51 = vrot.slane %v1976_v48, %v2633_v37  ;;  %v2423_v52 = vld [vmem:[%s2957_s1 + $0x140] sm:$0xff]  }
  0x3d   : > { %2211 = vmatpush3.bf16.msra.mxu0 %v2390_v53  ;;  %2231 = vmatpush3.bf16.msra.mxu1 %v2391_v54  ;;  %v2424_v53 = vld [vmem:[%s2957_s1 + $0x1b8] sm:$0xff]  }
  0x3e   : > { %2212 = vmatprep.subr.bf16.mxu0 %v2495_v0  ;;  %2232 = vmatprep.subr.bf16.mxu1 %v2495_v0  ;;  %v1106_v54 = vcombine.low %v2732_v14, %v2817_v51  ;;  %v2455_v14 = vld.sshfl [vmem:[%s2595_s19 + $0x18] sm:$0xf pattern:$0x76325410] }
  0x3f   : > { %2226 = vmatprep.mubr.msk.bf16.mxu0 %vm2496_vm0, %v2495_v0  ;;  %2246 = vmatprep.mubr.msk.bf16.mxu1 %vm2496_vm0, %v2495_v0  ;;  %v1241_v20 = vcombine.low %v2454_v13, %v2455_v14 }
  0x41   : > { %2213 = vmatpush3.bf16.msra.mxu0 %v2392_v55  ;;  %2233 = vmatpush3.bf16.msra.mxu1 %v2393_v56  ;;  %v2425_v55 = vld [vmem:[%s2957_s1 + $0x1f8] sm:$0xff]   ;;  %v2426_v56 = vld [vmem:[%s2957_s1 + $0x1b0] sm:$0xff]  }
  0x42   : > { %2214 = vmatprep.subr.bf16.mxu0 %v2495_v0  ;;  %2234 = vmatprep.subr.bf16.mxu1 %v2495_v0 }
  0x45   : > { %2215 = vmatpush3.bf16.msra.mxu0 %v2394_v57  ;;  %2235 = vmatpush3.bf16.msra.mxu1 %v2395_v58  ;;  %v2427_v57 = vld [vmem:[%s2957_s1 + $0x1f0] sm:$0xff]   ;;  %v2428_v58 = vld [vmem:[%s2957_s1 + $0x1a8] sm:$0xff]  }
  0x46   : > { %2216 = vmatprep.subr.bf16.mxu0 %v2495_v0  ;;  %2236 = vmatprep.subr.bf16.mxu1 %v2495_v0 }
  0x49   : > { %2217 = vmatpush3.bf16.msra.mxu0 %v2396_v59  ;;  %2237 = vmatpush3.bf16.msra.mxu1 %v2397_v60  ;;  %v2429_v59 = vld [vmem:[%s2957_s1 + $0x1e8] sm:$0xff]   ;;  %v2019_v60 = vld.sshfl [vmem:[%s2595_s19 + $0x18] sm:$0x12 pattern:$0x76325410] }
  0x4a   : > { %2218 = vmatprep.subr.bf16.mxu0 %v2495_v0  ;;  %2238 = vmatprep.subr.bf16.mxu1 %v2495_v0  ;;  %v1365_v1 = vcombine.high %v2019_v60, %v2019_v60 }
  0x4d   : > { %2219 = vmatpush3.bf16.msra.mxu0 %v2398_v61  ;;  %2239 = vmatpush3.bf16.msra.mxu1 %v2399_v62  ;;  %v2020_v61 = vld.sshfl [vmem:[%s2595_s19 + $0x1c] sm:$0x12 pattern:$0x76325410]  ;;  %v2430_v62 = vld [vmem:[%s2957_s1 + $0x1a0] sm:$0xff]   ;;  %s2087_s19 = sshll.u32 %s2967_s16, 3 }
  0x4e   : > { %2220 = vmatprep.subr.bf16.mxu0 %v2495_v0  ;;  %2240 = vmatprep.subr.bf16.mxu1 %v2495_v0  ;;  %v1373_v2 = vcombine.high %v2020_v61, %v2020_v61  ;;  %v2024_v7 = vrot.slane %v2020_v61, 9  ;;  %s225_s9 = scalar_lea.vmem %s2959_s3, %s2087_s19  ;;  %s230_s12 = scalar_lea.vmem %s2960_s4, %s2087_s19 }
  0x4f   : > { %v1691_v13 = vld [vmem:[%s225_s9] sm:$0x3]  ;;  %v1692_v14 = vld [vmem:[%s225_s9 + $0x2] sm:$0x3] }
  0x50   : > { %v1388_v8 = vrot.slane %v1373_v2, 7 }
  0x51   : > { %2221 = vmatpush3.bf16.msra.mxu0 %v2400_v4  ;;  %2241 = vmatpush3.bf16.msra.mxu1 %v2401_v5  ;;  %v2433_v4 = vld [vmem:[%s2957_s1 + $0x1d8] sm:$0xff]   ;;  %v2023_v5 = vrot.slane %v2019_v60, 9 }
  0x52   : > { %2222 = vmatprep.subr.bf16.mxu0 %v2495_v0  ;;  %2242 = vmatprep.subr.bf16.mxu1 %v2495_v0 }
  0x55   : > { %2223 = vmatpush3.bf16.msra.mxu0 %v2402_v6  ;;  %2243 = vmatpush3.bf16.msra.mxu1 %v2403_v11  ;;  %v1384_v6 = vrot.slane %v1365_v1, 7 }
  0x56   : > { %2224 = vmatprep.subr.bf16.mxu0 %v2495_v0  ;;  %2244 = vmatprep.subr.bf16.mxu1 %v2495_v0 }
  0x57   : > { %v1385_v11 = vsel %vm2621_vm7, %v2023_v5, %v1384_v6 }
  0x59   : > { %2225 = vmatpush3.bf16.msra.mxu0 %v2404_v12  ;;  %2245 = vmatpush3.bf16.msra.mxu1 %v2405_v16  ;;  %v1389_v12 = vsel %vm2621_vm7, %v2024_v7, %v1388_v8 }
  0x5a   : > { %2250 = vmatprep.subr.bf16.mxu0 %v2495_v0  ;;  %2270 = vmatprep.subr.bf16.mxu1 %v2495_v0  ;;  %v1408_v16 = vcombine.low %v1385_v11, %v1389_v12 }
  0x5c   : > { %2227 = vmatmul.mubr.bf16.vlgmr.msra.gmra.mxu0 %v623_v22  ;;  %2247 = vmatmul.mubr.bf16.vlgmr.msra.gmra.mxu1 %v758_v26  ;;  %v1422_v18 = vrot.slane %v1408_v16, %v2633_v37  ;;  %v2445_v26 = vld [vmem:[%s2957_s1 + $0x220] sm:$0xff]  }
  0x5d   : > { %2251 = vmatpush3.bf16.msra.mxu0 %v2406_v23  ;;  %2271 = vmatpush3.bf16.msra.mxu1 %v2409_v27  ;;  %v2443_v23 = vld [vmem:[%s2957_s1 + $0x230] sm:$0xff]   ;;  %v2446_v27 = vld [vmem:[%s2957_s1 + $0x218] sm:$0xff]  }
  0x5e   : > { %2252 = vmatprep.subr.bf16.mxu0 %v2495_v0  ;;  %2272 = vmatprep.subr.bf16.mxu1 %v2495_v0  ;;  %v1423_v22 = vcombine.low %v2762_v34, %v1422_v18  ;;  %v2449_v34 = vld [vmem:[%s2957_s1 + $0x200] sm:$0xff]  }
  0x5f   : > { %2266 = vmatprep.mubr.msk.bf16.mxu0 %vm2496_vm0, %v2495_v0  ;;  %2286 = vmatprep.mubr.msk.bf16.mxu1 %vm2496_vm0, %v2495_v0  ;;  %v1693_v18 = vld [vmem:[%s225_s9 + $0x4] sm:$0x3] }
  0x61   : > { %2253 = vmatpush3.bf16.msra.mxu0 %v2410_v32  ;;  %2273 = vmatpush3.bf16.msra.mxu1 %v2411_v33  ;;  %v2448_v32 = vld [vmem:[%s2957_s1 + $0x208] sm:$0xff]   ;;  %v1588_v33 = vrot.slane %v2074_v31, %v2633_v37 }
  0x62   : > { %2254 = vmatprep.subr.bf16.mxu0 %v2495_v0  ;;  %2274 = vmatprep.subr.bf16.mxu1 %v2495_v0 }
  0x65   : > { %2255 = vmatpush3.bf16.msra.mxu0 %v2412_v36  ;;  %2275 = vmatpush3.bf16.msra.mxu1 %v2413_v38 }
  0x66   : > { %2256 = vmatprep.subr.bf16.mxu0 %v2495_v0  ;;  %2276 = vmatprep.subr.bf16.mxu1 %v2495_v0 }
  0x69   : > { %2257 = vmatpush3.bf16.msra.mxu0 %v2414_v39  ;;  %2277 = vmatpush3.bf16.msra.mxu1 %v2415_v40 }
  0x6a   : > { %2258 = vmatprep.subr.bf16.mxu0 %v2495_v0  ;;  %2278 = vmatprep.subr.bf16.mxu1 %v2495_v0 }
  0x6d   : > { %2259 = vmatpush3.bf16.msra.mxu0 %v2416_v41  ;;  %2279 = vmatpush3.bf16.msra.mxu1 %v2417_v42 }
  0x6e   : > { %2260 = vmatprep.subr.bf16.mxu0 %v2495_v0  ;;  %2280 = vmatprep.subr.bf16.mxu1 %v2495_v0 }
  0x71   : > { %2261 = vmatpush3.bf16.msra.mxu0 %v2418_v45  ;;  %2281 = vmatpush3.bf16.msra.mxu1 %v2419_v46 }
  0x72   : > { %2262 = vmatprep.subr.bf16.mxu0 %v2495_v0  ;;  %2282 = vmatprep.subr.bf16.mxu1 %v2495_v0 }
  0x75   : > { %2263 = vmatpush3.bf16.msra.mxu0 %v2420_v47  ;;  %2283 = vmatpush3.bf16.msra.mxu1 %v2421_v49 }
  0x76   : > { %2264 = vmatprep.subr.bf16.mxu0 %v2495_v0  ;;  %2284 = vmatprep.subr.bf16.mxu1 %v2495_v0 }
  0x79   : > { %2265 = vmatpush3.bf16.msra.mxu0 %v2422_v50  ;;  %2285 = vmatpush3.bf16.msra.mxu1 %v2423_v52 }
  0x7a   : > { %2290 = vmatprep.subr.bf16.mxu0 %v2495_v0  ;;  %2310 = vmatprep.subr.bf16.mxu1 %v2495_v0 }
  0x7c   : > { %2267 = vmatmul.mubr.bf16.vlgmr.msra.gmra.mxu0 %v940_v35  ;;  %2287 = vmatmul.mubr.bf16.vlgmr.msra.gmra.mxu1 %v1106_v54  ;;  %v1589_v35 = vcombine.low %v2817_v51, %v1588_v33 }
  0x7d   : > { %2291 = vmatpush3.bf16.msra.mxu0 %v2424_v53  ;;  %2311 = vmatpush3.bf16.msra.mxu1 %v2425_v55 }
  0x7e   : > { %2292 = vmatprep.subr.bf16.mxu0 %v2495_v0  ;;  %2312 = vmatprep.subr.bf16.mxu1 %v2495_v0 }
  0x7f   : > { %2306 = vmatprep.mubr.msk.bf16.mxu0 %vm2496_vm0, %v2495_v0  ;;  %2326 = vmatprep.mubr.msk.bf16.mxu1 %vm2496_vm0, %v2495_v0 }
  0x81   : > { %2293 = vmatpush3.bf16.msra.mxu0 %v2426_v56  ;;  %2313 = vmatpush3.bf16.msra.mxu1 %v2427_v57 }
  0x82   : > { %2294 = vmatprep.subr.bf16.mxu0 %v2495_v0  ;;  %2314 = vmatprep.subr.bf16.mxu1 %v2495_v0 }
  0x85   : > { %2295 = vmatpush3.bf16.msra.mxu0 %v2428_v58  ;;  %2315 = vmatpush3.bf16.msra.mxu1 %v2429_v59 }
  0x86   : > { %2296 = vmatprep.subr.bf16.mxu0 %v2495_v0  ;;  %2316 = vmatprep.subr.bf16.mxu1 %v2495_v0 }
  0x89   : > { %2297 = vmatpush3.bf16.msra.mxu0 %v2430_v62  ;;  %2317 = vmatpush3.bf16.msra.mxu1 %v2431_v63 }
  0x8a   : > { %2298 = vmatprep.subr.bf16.mxu0 %v2495_v0  ;;  %2318 = vmatprep.subr.bf16.mxu1 %v2495_v0 }
  0x8d   : > { %2299 = vmatpush3.bf16.msra.mxu0 %v2432_v3  ;;  %2319 = vmatpush3.bf16.msra.mxu1 %v2433_v4 }
  0x8e   : > { %2300 = vmatprep.subr.bf16.mxu0 %v2495_v0  ;;  %2320 = vmatprep.subr.bf16.mxu1 %v2495_v0 }
  0x91   : > { %2301 = vmatpush3.bf16.msra.mxu0 %v2434_v9  ;;  %2321 = vmatpush3.bf16.msra.mxu1 %v2435_v10 }
  0x92   : > { %2302 = vmatprep.subr.bf16.mxu0 %v2495_v0  ;;  %2322 = vmatprep.subr.bf16.mxu1 %v2495_v0 }
  0x95   : > { %2303 = vmatpush3.bf16.msra.mxu0 %v2436_v15  ;;  %2323 = vmatpush3.bf16.msra.mxu1 %v2437_v17  ;;  %v1695_v17 = vunpack.c.l.bf16 %v1691_v13 }
  0x96   : > { %2304 = vmatprep.subr.bf16.mxu0 %v2495_v0  ;;  %2324 = vmatprep.subr.bf16.mxu1 %v2495_v0 }
  0x99   : > { %2305 = vmatpush3.bf16.msra.mxu0 %v2438_v25  ;;  %2325 = vmatpush3.bf16.msra.mxu1 %v2439_v19  ;;  %v1696_v25 = vunpack.c.l.bf16 %v1692_v14  ;;  %v1694_v19 = vld [vmem:[%s225_s9 + $0x6] sm:$0x3] }
  0x9a   : > { %2330 = vmatprep.subr.bf16.mxu0 %v2495_v0  ;;  %v1698_v28 = vunpack.c.l.bf16 %v1694_v19 }
  0x9c   : > { %2307 = vmatmul.mubr.bf16.vlgmr.msra.gmra.mxu0 %v1241_v20  ;;  %2327 = vmatmul.mubr.bf16.vlgmr.msra.gmra.mxu1 %v1423_v22 }
  0x9d   : > { %2331 = vmatpush3.bf16.msra.mxu0 %v2442_v21  ;;  %2346 = vmatprep.mubr.msk.bf16.mxu0 %vm2496_vm0, %v2495_v0 }
  0x9e   : > { %2332 = vmatprep.subr.bf16.mxu0 %v2495_v0 }
  0xa1   : > { %2333 = vmatpush3.bf16.msra.mxu0 %v2443_v23  ;;  %v2083_v23 = vld [vmem:[#allocation2] ss:$0 sm:$0xff] }
  0xa2   : > { %2334 = vmatprep.subr.bf16.mxu0 %v2495_v0 }
  0xa5   : > { %2335 = vmatpush3.bf16.msra.mxu0 %v2444_v24 }
  0xa6   : > { %2336 = vmatprep.subr.bf16.mxu0 %v2495_v0 }
  0xa9   : > { %2337 = vmatpush3.bf16.msra.mxu0 %v2445_v26  ;;  %v1703_v26 = vcombine.low %v1695_v17, %v1696_v25 }
  0xaa   : > { %2338 = vmatprep.subr.bf16.mxu0 %v2495_v0 }
  0xad   : > { %2339 = vmatpush3.bf16.msra.mxu0 %v2446_v27  ;;  %v1697_v27 = vunpack.c.l.bf16 %v1693_v18 }
  0xae   : > { %2340 = vmatprep.subr.bf16.mxu0 %v2495_v0 }
  0xb1   : > { %2341 = vmatpush3.bf16.msra.mxu0 %v2447_v29 }
  0xb2   : > { %2342 = vmatprep.subr.bf16.mxu0 %v2495_v0 }
  0xb5   : > { %2343 = vmatpush3.bf16.msra.mxu0 %v2448_v32 }
  0xb6   : > { %2344 = vmatprep.subr.bf16.mxu0 %v2495_v0 }
  0xb9   : > { %2345 = vmatpush3.bf16.msra.mxu0 %v2449_v34 }
  0xbc   : > { %2347 = vmatmul.mubr.bf16.vlgmr.msra.gmra.mxu0 %v1589_v35  ;;  %v1704_v35 = vcombine.low %v1697_v27, %v1698_v28 }
  0xfc   : > { %v432_v36 = vpop.f32.mrf.mxu0  ;;  %v543_v38 = vpop.f32.mrf.mxu1 }
  0xfd   : > { %v544_v39 = vadd.f32 %v543_v38, %v432_v36 }
  0xfe   : > { %v2188_v40 = vpop.f32.mrf.mxu0  ;;  %v2208_v41 = vpop.f32.mrf.mxu1 }
 0x100   : > { %v435_v42 = vpop.f32.mrf.mxu0  ;;  %v546_v43 = vpop.f32.mrf.mxu1 }
 0x101   : > { %v547_v44 = vadd.f32 %v546_v43, %v435_v42 }
 0x102   : > { %v2189_v37 = vpop.f32.mrf.mxu0  ;;  %v2209_v45 = vpop.f32.mrf.mxu1 }
 0x11c   : > { %v707_v46 = vpop.f32.mrf.mxu0  ;;  %v842_v48 = vpop.f32.mrf.mxu1 }
 0x11d   : > { %v714_v47 = vadd.f32 %v707_v46, %v544_v39 }
 0x11e   : > { %v2228_v49 = vpop.f32.mrf.mxu0  ;;  %v2248_v0 = vpop.f32.mrf.mxu1 }
 0x11f   : > { %v849_v50 = vadd.f32 %v842_v48, %v714_v47 }
 0x120   : > { %v710_v52 = vpop.f32.mrf.mxu0  ;;  %v845_v53 = vpop.f32.mrf.mxu1 }
 0x121   : > { %v715_v51 = vadd.f32 %v710_v52, %v547_v44 }
 0x122   : > { %v2229_v54 = vpop.f32.mrf.mxu0  ;;  %v2249_v56 = vpop.f32.mrf.mxu1 }
 0x123   : > { %v850_v55 = vadd.f32 %v845_v53, %v715_v51 }
 0x13c   : > { %v1024_v57 = vpop.f32.mrf.mxu0  ;;  %v1190_v58 = vpop.f32.mrf.mxu1 }
 0x13d   : > { %v1031_v10 = vadd.f32 %v1024_v57, %v849_v50 }
 0x13e   : > { %v2268_v59 = vpop.f32.mrf.mxu0  ;;  %v2288_v60 = vpop.f32.mrf.mxu1 }
 0x13f   : > { %v1197_v11 = vadd.f32 %v1190_v58, %v1031_v10 }
 0x140   : > { %v1027_v61 = vpop.f32.mrf.mxu0  ;;  %v1193_v62 = vpop.f32.mrf.mxu1 }
 0x141   : > { %v1032_v12 = vadd.f32 %v1027_v61, %v850_v55 }
 0x142   : > { %v2269_v63 = vpop.f32.mrf.mxu0  ;;  %v2289_v1 = vpop.f32.mrf.mxu1 }
 0x143   : > { %v1198_v16 = vadd.f32 %v1193_v62, %v1032_v12 }
 0x15c   : > { %v1325_v2 = vpop.f32.mrf.mxu0  ;;  %v1507_v3 = vpop.f32.mrf.mxu1 }
 0x15d   : > { %v1332_v15 = vadd.f32 %v1325_v2, %v1197_v11 }
 0x15e   : > { %v2308_v4 = vpop.f32.mrf.mxu0  ;;  %v2328_v5 = vpop.f32.mrf.mxu1 }
 0x15f   : > { %v1514_v20 = vadd.f32 %v1507_v3, %v1332_v15 }
 0x160   : > { %v1328_v6 = vpop.f32.mrf.mxu0  ;;  %v1510_v7 = vpop.f32.mrf.mxu1 }
 0x161   : > { %v1333_v21 = vadd.f32 %v1328_v6, %v1198_v16 }
 0x162   : > { %v2309_v8 = vpop.f32.mrf.mxu0  ;;  %v2329_v9 = vpop.f32.mrf.mxu1 }
 0x163   : > { %v1515_v30 = vadd.f32 %v1510_v7, %v1333_v21 }
 0x17c   : > { %v1673_v22 = vpop.f32.mrf.mxu0 }
 0x17d   : > { %v1680_v24 = vadd.f32 %v1673_v22, %v1514_v20 }
 0x17e   : > { %v2348_v29 = vpop.f32.mrf.mxu0 }
 0x17f   : > { %v1689_v31 = vadd.f32 %v2083_v23, %v1680_v24 }
 0x180   : > { %v1676_v32 = vpop.f32.mrf.mxu0 }
 0x181   : > { %v1707_v33 = vadd.f32 %v1703_v26, %v1689_v31  ;;  %v1681_v34 = vadd.f32 %v1676_v32, %v1515_v30 }
 0x182   : > { %v2349_v36 = vpop.f32.mrf.mxu0 }
 0x183   : > { %v1709_v38 = vmax.f32 %v1707_v33, 0.0  ;;  %v1690_v39 = vadd.f32 %v2083_v23, %v1681_v34 }
 0x185   : > { %v1713_v40 = vcombine.high %v1709_v38, %v1709_v38  ;;  %v1717_v41 = vpack.c.bf16 %v1709_v38, %v1709_v38  ;;  %v1708_v42 = vadd.f32 %v1704_v35, %v1690_v39 }
 0x187   : > { %v1718_v43 = vpack.c.bf16 %v1713_v40, %v1713_v40  ;;  %1721 = vst [vmem:[%s230_s12] sm:$0x3] %v1717_v41  ;;  %v1710_v44 = vmax.f32 %v1708_v42, 0.0 }
 0x189   : > { %1722 = vst [vmem:[%s230_s12 + $0x2] sm:$0x3] %v1718_v43  ;;  %v1714_v37 = vcombine.high %v1710_v44, %v1710_v44  ;;  %v1719_v45 = vpack.c.bf16 %v1710_v44, %v1710_v44 }
 0x18b   : > { %v1720_v46 = vpack.c.bf16 %v1714_v37, %v1714_v37  ;;  %1723 = vst [vmem:[%s230_s12 + $0x4] sm:$0x3] %v1719_v45 }
 0x18d   : > { %1724 = vst [vmem:[%s230_s12 + $0x6] sm:$0x3] %v1720_v46 }
 0x18e PF: > { %s15_s15 = sadd.s32 1, %s2492_s15  }
 0x18f   : > { %p12_p1 = scmp.ge.s32.totalorder %s15_s15, 4  }
 0x191   :  { %14 = sbr.rel (!%p12_p1) target bundleno = 1 (0x1), region = 84 }
 0x196   :  { %1746 = vsyncpa [#allocation3], 1 }
 0x197   :  { %1748 = vsyncpa [#allocation3 + $0x1], 1 }

// kernel: deeplabv3_forward.15
= control target key start
LH: loop header
LB: loop body
LE: loop exit
PB: predicated region body
PF: predicated region fallthrough
CT: control target
= control target key end

     0   :  { %11 = vsyncpa [#allocation3], 0  ;;  %s3331_s0 = inlined_call_operand.vmem [shape: bf16[2,9,9,128], index: 0, kind: input, shape index: {}]   ;;  %s3332_s1 = inlined_call_operand.vmem [shape: bf16[2,9,9,128], index: 1, kind: input, shape index: {}]   ;;  %s3333_s2 = inlined_call_operand.vmem [shape: bf16[2,9,9,128], index: 2, kind: input, shape index: {}]   ;;  %s3334_s3 = inlined_call_operand.vmem [shape: bf16[2,9,9,128], index: 3, kind: input, shape index: {}]   ;;  %s3335_s4 = inlined_call_operand.hbm [shape: bf16[9,128,128], index: 4, kind: input, shape index: {}]   ;;  %s3336_s5 = inlined_call_operand.hbm [shape: f32[1,1,128], index: 5, kind: input, shape index: {}]   ;;  %s3337_s6 = inlined_call_operand.vmem [shape: bf16[2,8,8,128], index: 6, kind: output, shape index: {}]  }
   0x1   :  { %12 = vsyncpa [#allocation5], 0  ;;  %s3104_s21 = smov 0  }
   0x2 LB: > { %s3110_s22 = sadd.s32 4294967295, %s3063_s21   ;;  %p2349_p0 = scmp.ge.s32.totalorder %s3063_s21, 1  ;;  %s3063_s21 = sphi %s3104_s21, %s18_s21  }
   0x3   : > { %p195_p1 = scmp.lt.s32.totalorder %s3063_s21, 3  ;;  %s3065_s23 = smov [#allocation2]  }
   0x4   : > { %s207_s24 = sshll.u32 %s3065_s23, 4  ;;  %p2885_p3 = scmp.eq.s32.totalorder %s3110_s22, 0  ;;  %s208_s24 = int_to_ptr.vmem [resolvable:$true] %s207_s24 }
   0x5   : > { %p3114_p2 = pnand %p2349_p0, %p195_p1  ;;  %s3066_s26 = smov [#allocation4]  }
   0x6   : > { %s221_s27 = sshll.u32 %s3066_s26, 4  ;;  %s3008_s29 = scalar_lea.vmem %s208_s24, 9216  ;;  %s222_s27 = int_to_ptr.vmem [resolvable:$true] %s221_s27 }
   0x7   : > { %p2878_p4 = pneg %p3114_p2  ;;  %p3009_p7 = scmp.ne.s32.totalorder %s208_s24, %s3008_s29 }
   0x8   : > { %p3016_p10 = scmp.lt.s32.totalorder %s208_s24, %s208_s24  ;;  %p3017_p11 = scmp.lt.s32.totalorder %s3008_s29, %s3008_s29 }
   0x9   : > { %p3123_p5 = pnand %p2885_p3, %p2878_p4 }
   0xa   : > { %p3018_p12 = por %p3017_p11, %p3016_p10 }
   0xb   : > { %p2999_p6 = pneg %p3123_p5 }
   0xd   : > { %p3011_p8 = pnand %p3009_p7, %p2999_p6 }
   0xf   : > { %p3012_p9 = pneg %p3011_p8 }
  0x11   : > { %p3019_p13 = pnand %p3018_p12, %p3012_p9 }
  0x13   : > { %3022 = shalt.err (!%p3019_p13)
}
  0x14   : > { %s3067_s30 = smov 64   ;;  %s3068_s7 = smov 4  }
  0x15   : > { %2881 = dma.hbm_to_vmem [thread:$0]  (!%p3123_p5), %s3335_s4, 9216, %s208_s24, [#allocation3], %s3067_s30, %s3067_s30, %s3068_s7  }
  0x16   : > { %s3034_s10 = scalar_lea.vmem %s222_s27, 16  ;;  %s3041_s11 = scalar_lea.vmem %s222_s27, 32 }
  0x17   : > { %p3035_p0 = scmp.ne.s32.totalorder %s222_s27, %s3034_s10  ;;  %p3042_p7 = scmp.lt.s32.totalorder %s222_s27, %s222_s27 }
  0x18   : > { %p3043_p8 = scmp.lt.s32.totalorder %s3041_s11, %s3034_s10 }
  0x19   : > { %p3037_p1 = pnand %p3035_p0, %p2999_p6 }
  0x1a   : > { %p3044_p9 = por %p3043_p8, %p3042_p7 }
  0x1b   : > { %p3038_p4 = pneg %p3037_p1 }
  0x1d   : > { %p3045_p10 = pnand %p3044_p9, %p3038_p4 }
  0x1f   : > { %3048 = shalt.err (!%p3045_p10)
}
  0x20   : > { %2884 = dma.hbm_to_vmem [thread:$0]  (!%p3123_p5), %s3336_s5, 16, %s222_s27, [#allocation5]  }
  0x21   : > { %266 = sbr.rel (%p3114_p2) target bundleno = 411 (0x19b), region = 44 }
  0x26   : > { %3054 = dma.done.wait (%p2885_p3), [#allocation3], 9216  }
  0x27   : > { %3056 = vsyncadd (%p2885_p3), [#allocation3], 4294958080 }
  0x28   : > { %3058 = dma.done.wait (%p2885_p3), [#allocation5], 16  }
  0x29   : > { %3060 = vsyncadd (%p2885_p3), [#allocation5], 4294967280  ;;  %v2901_v0 = vld [vmem:[#allocation2 + $0x78] sm:$0xff]   ;;  %p315_p5 = scmp.lt.s32.totalorder %s3110_s22, 1  ;;  %v2903_v2 = vld [vmem:[#allocation2 + $0x70] sm:$0xff]  }
  0x2a   : > { %v2902_v1 = vld [vmem:[#allocation2 + $0x38] sm:$0xff]   ;;  %2637 = vmatprep.subr.bf16.mxu0 %v2901_v0  ;;  %v2904_v3 = vld [vmem:[#allocation2 + $0x30] sm:$0xff]   ;;  %v2905_v4 = vld [vmem:[#allocation2 + $0x68] sm:$0xff]   ;;  %vm680_vm0 = vsmask.f32 3328 }
  0x2b   : > { %2661 = vmatprep.subr.bf16.mxu1 %v2902_v1  ;;  %2638 = vmatpush3.bf16.msra.mxu0 %v2901_v0  ;;  %v2906_v5 = vld [vmem:[#allocation2 + $0x28] sm:$0xff]   ;;  %s3349_s22 = smov (!%p315_p5, %s3110_s22), 1  ;;  %v2907_v6 = vld [vmem:[#allocation2 + $0x60] sm:$0xff]   ;;  %v2909_v8 = vld [vmem:[#allocation2 + $0x58] sm:$0xff]   ;;  %vm681_vm1 = vsmask.f32 7440 }
  0x2c   : > { %2662 = vmatpush3.bf16.msra.mxu1 %v2902_v1  ;;  %2639 = vmatprep.subr.bf16.mxu0 %v2903_v2  ;;  %v2908_v7 = vld [vmem:[#allocation2 + $0x20] sm:$0xff]   ;;  %s3160_s14 = smul.u32 72, %s3349_s22  ;;  %v2910_v9 = vld [vmem:[#allocation2 + $0x18] sm:$0xff]   ;;  %v2911_v10 = vld [vmem:[#allocation2 + $0x50] sm:$0xff]   ;;  %s2505_s29 = sshll.u32 %s3349_s22, 5 }
  0x2d   : > { %2663 = vmatprep.subr.bf16.mxu1 %v2904_v3  ;;  %v2912_v11 = vld [vmem:[#allocation2 + $0x10] sm:$0xff]   ;;  %v2913_v14 = vld [vmem:[#allocation2 + $0x48] sm:$0xff]   ;;  %v2915_v16 = vld [vmem:[#allocation2 + $0x40] sm:$0xff]   ;;  %s339_s8 = scalar_lea.vmem %s3337_s6, %s2505_s29 }
  0x2e   : > { %s3166_s17 = scalar_lea.vmem %s3332_s1, %s3160_s14  ;;  %s3172_s20 = scalar_lea.vmem %s3331_s0, %s3160_s14  ;;  %v2914_v15 = vld [vmem:[#allocation2 + $0x8] sm:$0xff]   ;;  %v2916_v17 = vld [vmem:[#allocation2] sm:$0xff]   ;;  %v2921_v19 = vld [vmem:[#allocation2 + $0xb8] sm:$0xff]  }
  0x2f   : > { %2640 = vmatpush3.bf16.msra.mxu0 %v2903_v2  ;;  %v2917_v12 = vld [vmem:[%s3166_s17] ss:$8 sps:$4 sm:$0xff]   ;;  %v2919_v18 = vld [vmem:[%s3166_s17 + $0x10] ss:$8 sps:$4 sm:$0xff]   ;;  %s3186_s25 = scalar_lea.vmem %s3333_s2, %s3160_s14  ;;  %v665_v33 = vld [vmem:[%s3172_s20 + $0x4] sm:$0x1]  ;;  %s3236_s28 = scalar_lea.vmem %s3334_s3, %s3160_s14 }
  0x30   : > { %2664 = vmatpush3.bf16.msra.mxu1 %v2904_v3  ;;  %2641 = vmatprep.subr.bf16.mxu0 %v2905_v4  ;;  %v2918_v13 = vld [vmem:[%s3172_s20] ss:$8 sps:$4 sm:$0xff]   ;;  %v2922_v20 = vld [vmem:[#allocation2 + $0xf8] sm:$0xff]   ;;  %v2923_v22 = vld [vmem:[#allocation2 + $0xb0] sm:$0xff]   ;;  %v693_v38 = vshll.u32 %v665_v33, 16 }
  0x31   : > { %2665 = vmatprep.subr.bf16.mxu1 %v2906_v5  ;;  %2653 = vmatprep.mubr.bf16.mxu0 %v2917_v12  ;;  %v2920_v21 = vld [vmem:[%s3172_s20 + $0x10] ss:$8 sps:$4 sm:$0xff]   ;;  %v2931_v24 = vld [vmem:[%s3166_s17 + $0x20] ss:$8 sps:$4 sm:$0xff]   ;;  %v667_v35 = vld [vmem:[%s3172_s20 + $0xc] sm:$0x1] }
  0x32   : > { %2677 = vmatprep.mubr.bf16.mxu1 %v2918_v13  ;;  %v2924_v23 = vld [vmem:[#allocation2 + $0xf0] sm:$0xff]   ;;  %v2932_v25 = vld [vmem:[%s3172_s20 + $0x20] ss:$8 sps:$4 sm:$0xff]   ;;  %v2929_v40 = vld [vmem:[#allocation2 + $0x98] sm:$0xff]   ;;  %v707_v42 = vshll.u32 %v667_v35, 16  ;;  %v695_v46 = vrot.slane %v693_v38, 5 }
  0x33   : > { %2642 = vmatpush3.bf16.msra.mxu0 %v2905_v4  ;;  %v2925_v26 = vld [vmem:[#allocation2 + $0xa8] sm:$0xff]   ;;  %v2927_v28 = vld [vmem:[#allocation2 + $0xa0] sm:$0xff]   ;;  %v2933_v29 = vld [vmem:[%s3166_s17 + $0x30] ss:$8 sps:$4 sm:$0xff]  }
  0x34   : > { %2666 = vmatpush3.bf16.msra.mxu1 %v2906_v5  ;;  %2643 = vmatprep.subr.bf16.mxu0 %v2907_v6  ;;  %v2926_v27 = vld [vmem:[#allocation2 + $0xe8] sm:$0xff]   ;;  %v2928_v30 = vld [vmem:[#allocation2 + $0xe0] sm:$0xff]   ;;  %v2934_v31 = vld [vmem:[%s3172_s20 + $0x30] ss:$8 sps:$4 sm:$0xff]   ;;  %v709_v50 = vrot.slane %v707_v42, 5 }
  0x35   : > { %2667 = vmatprep.subr.bf16.mxu1 %v2908_v7  ;;  %v664_v32 = vld [vmem:[%s3172_s20] sm:$0xf]  ;;  %v666_v34 = vld [vmem:[%s3172_s20 + $0x8] sm:$0xf]  ;;  %v2930_v43 = vld [vmem:[#allocation2 + $0xd8] sm:$0xff]  }
  0x36   : > { %v684_v36 = vshrl.u32 %v664_v32, 16  ;;  %v687_v37 = vshll.u32 %v664_v32, 16  ;;  %v698_v39 = vshrl.u32 %v666_v34, 16  ;;  %v701_v41 = vshll.u32 %v666_v34, 16  ;;  %v2941_v48 = vld [vmem:[%s3186_s25] ss:$8 sps:$4 sm:$0xff]   ;;  %vm3199_vm2 = vmor %vm680_vm0, %vm681_vm1 }
  0x37   : > { %2644 = vmatpush3.bf16.msra.mxu0 %v2907_v6  ;;  %v668_v51 = vld [vmem:[%s3172_s20 + $0x10] sm:$0xf]  ;;  %v669_v52 = vld [vmem:[%s3172_s20 + $0x14] sm:$0x1]  ;;  %v670_v54 = vld [vmem:[%s3172_s20 + $0x18] sm:$0xf] }
  0x38   : > { %2668 = vmatpush3.bf16.msra.mxu1 %v2908_v7  ;;  %2645 = vmatprep.subr.bf16.mxu0 %v2909_v8  ;;  %v686_v44 = vrot.slane %v684_v36, 4  ;;  %v689_v45 = vrot.slane %v687_v37, 5  ;;  %v700_v47 = vrot.slane %v698_v39, 4  ;;  %v703_v49 = vrot.slane %v701_v41, 5  ;;  %v671_v55 = vld [vmem:[%s3172_s20 + $0x1c] sm:$0x1] }
  0x39   : > { %2669 = vmatprep.subr.bf16.mxu1 %v2910_v9  ;;  %v712_v56 = vshrl.u32 %v668_v51, 16  ;;  %v715_v57 = vshll.u32 %v668_v51, 16  ;;  %v721_v60 = vshll.u32 %v669_v52, 16  ;;  %v726_v61 = vshrl.u32 %v670_v54, 16  ;;  %v2935_v3 = vld [vmem:[#allocation2 + $0x90] sm:$0xff]  }
  0x3a   : > { %v690_v53 = vor.u32 %v689_v45, %v686_v44  ;;  %v704_v59 = vor.u32 %v703_v49, %v700_v47  ;;  %v729_v62 = vshll.u32 %v670_v54, 16  ;;  %v735_v2 = vshll.u32 %v671_v55, 16  ;;  %v2936_v7 = vld [vmem:[#allocation2 + $0xd0] sm:$0xff]   ;;  %v678_v38 = vld [vmem:[%s3172_s20 + $0x38] sm:$0xf] }
  0x3b   : > { %2646 = vmatpush3.bf16.msra.mxu0 %v2909_v8  ;;  %v714_v0 = vrot.slane %v712_v56, 4  ;;  %v717_v1 = vrot.slane %v715_v57, 5  ;;  %v728_v5 = vrot.slane %v726_v61, 4  ;;  %v677_v34 = vld [vmem:[%s3172_s20 + $0x34] sm:$0x1]  ;;  %v785_v51 = vshll.u32 %v678_v38, 16 }
  0x3c   : > { %2670 = vmatpush3.bf16.msra.mxu1 %v2910_v9  ;;  %2647 = vmatprep.subr.bf16.mxu0 %v2911_v10  ;;  %v691_v63 = vrot.slane %v690_v53, 4  ;;  %v705_v4 = vrot.slane %v704_v59, 4  ;;  %v731_v6 = vrot.slane %v729_v62, 5  ;;  %v777_v47 = vshll.u32 %v677_v34, 16  ;;  %v2943_v53 = vld [vmem:[#allocation2 + $0x138] sm:$0xff]  }
  0x3d   : > { %2671 = vmatprep.subr.bf16.mxu1 %v2912_v11  ;;  %v718_v9 = vor.u32 %v717_v1, %v714_v0  ;;  %v2942_v56 = vld [vmem:[%s3186_s25 + $0x10] ss:$8 sps:$4 sm:$0xff]   ;;  %v787_v61 = vrot.slane %v785_v51, 5 }
  0x3e   : > { %v696_v8 = vsel %vm3199_vm2, %v691_v63, %v695_v46  ;;  %v710_v12 = vsel %vm3199_vm2, %v705_v4, %v709_v50  ;;  %v732_v13 = vor.u32 %v731_v6, %v728_v5  ;;  %v2944_v57 = vld [vmem:[#allocation2 + $0x178] sm:$0xff]   ;;  %v2945_v63 = vld [vmem:[#allocation2 + $0x130] sm:$0xff]   ;;  %v779_v1 = vrot.slane %v777_v47, 5  ;;  %v2949_v6 = vld [vmem:[%s3186_s25 + $0x20] ss:$8 sps:$4 sm:$0xff]  }
  0x3f   : > { %2648 = vmatpush3.bf16.msra.mxu0 %v2911_v10  ;;  %v3205_v10 = vrot.slane %v721_v60, 5  ;;  %v1293_v34 = vld [vmem:[%s3186_s25 + $0x10] sm:$0xf] }
  0x40   : > { %2672 = vmatpush3.bf16.msra.mxu1 %v2912_v11  ;;  %2649 = vmatprep.subr.bf16.mxu0 %v2913_v14  ;;  %v2937_v11 = vld [vmem:[#allocation2 + $0x88] sm:$0xff]  }
  0x41   : > { %2673 = vmatprep.subr.bf16.mxu1 %v2914_v15 }
  0x43   : > { %2650 = vmatpush3.bf16.msra.mxu0 %v2913_v14  ;;  %v2386_v14 = vcombine.low %v696_v8, %v710_v12 }
  0x44   : > { %2674 = vmatpush3.bf16.msra.mxu1 %v2914_v15  ;;  %2651 = vmatprep.subr.bf16.mxu0 %v2915_v16  ;;  %v719_v15 = vrot.slane %v718_v9, 4 }
  0x45   : > { %2675 = vmatprep.subr.bf16.mxu1 %v2916_v17 }
  0x47   : > { %2652 = vmatpush3.bf16.msra.mxu0 %v2915_v16  ;;  %v737_v16 = vrot.slane %v735_v2, 5 }
  0x48   : > { %2676 = vmatpush3.bf16.msra.mxu1 %v2916_v17  ;;  %2685 = vmatprep.subr.bf16.mxu0 %v2921_v19  ;;  %v2938_v17 = vld [vmem:[#allocation2 + $0xc8] sm:$0xff]  }
  0x49   : > { %2709 = vmatprep.subr.bf16.mxu1 %v2922_v20 }
  0x4a   : > { %2654 = vmatmul.mubr.bf16.vlgmr.msra.gmra.mxu0 %v2919_v18  ;;  %v733_v18 = vrot.slane %v732_v13, 4  ;;  %v2948_v13 = vld [vmem:[#allocation2 + $0x168] sm:$0xff]  }
  0x4b   : > { %2678 = vmatmul.mubr.bf16.vlgmr.msra.gmra.mxu1 %v2920_v21  ;;  %2686 = vmatpush3.bf16.msra.mxu0 %v2921_v19  ;;  %v672_v19 = vld [vmem:[%s3172_s20 + $0x20] sm:$0xf]  ;;  %v674_v21 = vld [vmem:[%s3172_s20 + $0x28] sm:$0xf] }
  0x4c   : > { %2710 = vmatpush3.bf16.msra.mxu1 %v2922_v20  ;;  %2687 = vmatprep.subr.bf16.mxu0 %v2923_v22  ;;  %v673_v20 = vld [vmem:[%s3172_s20 + $0x24] sm:$0x1]  ;;  %v757_v32 = vshll.u32 %v674_v21, 16 }
  0x4d   : > { %2711 = vmatprep.subr.bf16.mxu1 %v2924_v23  ;;  %2657 = vmatprep.mubr.bf16.mxu0 %v2931_v24  ;;  %v724_v24 = vsel %vm3199_vm2, %v719_v15, %v3205_v10  ;;  %v2947_v10 = vld [vmem:[#allocation2 + $0x128] sm:$0xff]   ;;  %v2951_v15 = vld [vmem:[#allocation2 + $0x120] sm:$0xff]  }
  0x4e   : > { %2681 = vmatprep.mubr.bf16.mxu1 %v2932_v25  ;;  %v740_v25 = vshrl.u32 %v672_v19, 16  ;;  %v759_v41 = vrot.slane %v757_v32, 5 }
  0x4f   : > { %2688 = vmatpush3.bf16.msra.mxu0 %v2923_v22  ;;  %v675_v22 = vld [vmem:[%s3172_s20 + $0x2c] sm:$0x1] }
  0x50   : > { %2712 = vmatpush3.bf16.msra.mxu1 %v2924_v23  ;;  %2689 = vmatprep.subr.bf16.mxu0 %v2925_v26  ;;  %v2939_v23 = vld [vmem:[#allocation2 + $0x80] sm:$0xff]   ;;  %v763_v33 = vshll.u32 %v675_v22, 16  ;;  %v742_v35 = vrot.slane %v740_v25, 4  ;;  %v1292_v22 = vld [vmem:[%s3186_s25 + $0xc] sm:$0x1] }
  0x51   : > { %2713 = vmatprep.subr.bf16.mxu1 %v2926_v27 }
  0x52   : > { %2658 = vmatmul.mubr.bf16.gmra.mxu0 %v2933_v29  ;;  %v2940_v29 = vld [vmem:[#allocation2 + $0xc0] sm:$0xff]   ;;  %v765_v42 = vrot.slane %v763_v33, 5 }
  0x53   : > { %2690 = vmatpush3.bf16.msra.mxu0 %v2925_v26  ;;  %2682 = vmatmul.mubr.bf16.gmra.mxu1 %v2934_v31  ;;  %v743_v26 = vshll.u32 %v672_v19, 16  ;;  %v754_v31 = vshrl.u32 %v674_v21, 16  ;;  %v1289_v19 = vld [vmem:[%s3186_s25] sm:$0xf]  ;;  %v1291_v21 = vld [vmem:[%s3186_s25 + $0x8] sm:$0xf] }
  0x54   : > { %2714 = vmatpush3.bf16.msra.mxu1 %v2926_v27  ;;  %2691 = vmatprep.subr.bf16.mxu0 %v2927_v28  ;;  %v749_v27 = vshll.u32 %v673_v20, 16  ;;  %v1290_v20 = vld [vmem:[%s3186_s25 + $0x4] sm:$0x1] }
  0x55   : > { %2715 = vmatprep.subr.bf16.mxu1 %v2928_v30  ;;  %2725 = vmatprep.mubr.bf16.mxu1 %v2941_v48  ;;  %v745_v36 = vrot.slane %v743_v26, 5  ;;  %v782_v48 = vshrl.u32 %v678_v38, 16  ;;  %v1315_v25 = vshll.u32 %v1290_v20, 16  ;;  %v1320_v26 = vshrl.u32 %v1291_v21, 16  ;;  %v1295_v38 = vld [vmem:[%s3186_s25 + $0x18] sm:$0xf] }
  0x56   : > { %2701 = vmatprep.mubr.bf16.mxu0 %v2386_v14  ;;  %v751_v37 = vrot.slane %v749_v27, 5  ;;  %v2953_v27 = vld [vmem:[#allocation2 + $0x118] sm:$0xff]  }
  0x57   : > { %2692 = vmatpush3.bf16.msra.mxu0 %v2927_v28  ;;  %v676_v28 = vld [vmem:[%s3172_s20 + $0x30] sm:$0xf]  ;;  %v746_v45 = vor.u32 %v745_v36, %v742_v35  ;;  %v784_v55 = vrot.slane %v782_v48, 4  ;;  %v1322_v33 = vrot.slane %v1320_v26, 4  ;;  %v1317_v35 = vrot.slane %v1315_v25, 5 }
  0x58   : > { %2716 = vmatpush3.bf16.msra.mxu1 %v2928_v30  ;;  %2693 = vmatprep.subr.bf16.mxu0 %v2929_v40  ;;  %v738_v30 = vsel %vm3199_vm2, %v733_v18, %v737_v16  ;;  %v768_v39 = vshrl.u32 %v676_v28, 16  ;;  %v771_v44 = vshll.u32 %v676_v28, 16  ;;  %v2950_v16 = vld [vmem:[%s3186_s25 + $0x30] ss:$8 sps:$4 sm:$0xff]   ;;  %v2961_v18 = vld [vmem:[%s3236_s28] ss:$8 sps:$4 sm:$0xff]  }
  0x59   : > { %2717 = vmatprep.subr.bf16.mxu1 %v2930_v43  ;;  %v747_v54 = vrot.slane %v746_v45, 4  ;;  %v2387_v62 = vcombine.low %v724_v24, %v738_v30  ;;  %v788_v4 = vor.u32 %v787_v61, %v784_v55  ;;  %v1309_v24 = vshll.u32 %v1289_v19, 16  ;;  %v2954_v30 = vld [vmem:[#allocation2 + $0x158] sm:$0xff]   ;;  %v2956_v45 = vld [vmem:[#allocation2 + $0x150] sm:$0xff]   ;;  %v2958_v61 = vld [vmem:[#allocation2 + $0x148] sm:$0xff]  }
  0x5a   : > { %v770_v46 = vrot.slane %v768_v39, 4  ;;  %v773_v50 = vrot.slane %v771_v44, 5  ;;  %v1323_v28 = vshll.u32 %v1291_v21, 16  ;;  %v2955_v39 = vld [vmem:[#allocation2 + $0x110] sm:$0xff]   ;;  %v1337_v44 = vshll.u32 %v1293_v34, 16 }
  0x5b   : > { %2694 = vmatpush3.bf16.msra.mxu0 %v2929_v40  ;;  %v756_v40 = vrot.slane %v754_v31, 4  ;;  %v752_v0 = vsel %vm3199_vm2, %v747_v54, %v751_v37  ;;  %v789_v9 = vrot.slane %v788_v4, 4  ;;  %v1311_v32 = vrot.slane %v1309_v24, 5  ;;  %v1294_v37 = vld [vmem:[%s3186_s25 + $0x14] sm:$0x1]  ;;  %v2957_v54 = vld [vmem:[#allocation2 + $0x108] sm:$0xff]  }
  0x5c   : > { %2718 = vmatpush3.bf16.msra.mxu1 %v2930_v43  ;;  %2695 = vmatprep.subr.bf16.mxu0 %v2935_v3  ;;  %v679_v43 = vld [vmem:[%s3172_s20 + $0x3c] sm:$0x1]  ;;  %v774_v60 = vor.u32 %v773_v50, %v770_v46  ;;  %v1325_v36 = vrot.slane %v1323_v28, 5  ;;  %v1343_v47 = vshll.u32 %v1294_v37, 16  ;;  %v1348_v48 = vshrl.u32 %v1295_v38, 16 }
  0x5d   : > { %2719 = vmatprep.subr.bf16.mxu1 %v2936_v7  ;;  %v760_v49 = vor.u32 %v759_v41, %v756_v40  ;;  %v791_v52 = vshll.u32 %v679_v43, 16  ;;  %v1334_v43 = vshrl.u32 %v1293_v34, 16  ;;  %v1301_v21 = vld [vmem:[%s3186_s25 + $0x30] sm:$0xf]  ;;  %v1302_v26 = vld [vmem:[%s3186_s25 + $0x34] sm:$0x1] }
  0x5e   : > { %v1326_v46 = vor.u32 %v1325_v36, %v1322_v33  ;;  %v1390_v34 = vshrl.u32 %v1301_v21, 16  ;;  %v1399_v36 = vshll.u32 %v1302_v26, 16  ;;  %v2967_v37 = vld [vmem:[%s3236_s28 + $0x20] ss:$8 sps:$4 sm:$0xff]  }
  0x5f   : > { %2696 = vmatpush3.bf16.msra.mxu0 %v2935_v3  ;;  %v761_v59 = vrot.slane %v760_v49, 4  ;;  %v775_v3 = vrot.slane %v774_v60, 4  ;;  %v793_v5 = vrot.slane %v791_v52, 5  ;;  %v1351_v49 = vshll.u32 %v1295_v38, 16 }
  0x60   : > { %2720 = vmatpush3.bf16.msra.mxu1 %v2936_v7  ;;  %2697 = vmatprep.subr.bf16.mxu0 %v2937_v11  ;;  %v2946_v7 = vld [vmem:[#allocation2 + $0x170] sm:$0xff]   ;;  %v1336_v51 = vrot.slane %v1334_v43, 4  ;;  %v1339_v52 = vrot.slane %v1337_v44, 5  ;;  %v1327_v55 = vrot.slane %v1326_v46, 4  ;;  %v1392_v44 = vrot.slane %v1390_v34, 4 }
  0x61   : > { %2721 = vmatprep.subr.bf16.mxu1 %v2938_v17  ;;  %v766_v2 = vsel %vm3199_vm2, %v761_v59, %v765_v42  ;;  %v794_v12 = vsel %vm3199_vm2, %v789_v9, %v793_v5  ;;  %v1296_v42 = vld [vmem:[%s3186_s25 + $0x1c] sm:$0x1]  ;;  %v2959_v5 = vld [vmem:[#allocation2 + $0x100] sm:$0xff]   ;;  %v2966_v46 = vld [vmem:[#allocation2 + $0x1f0] sm:$0xff]  }
  0x62   : > { %v2388_v8 = vcombine.low %v752_v0, %v766_v2  ;;  %v1340_v60 = vor.u32 %v1339_v52, %v1336_v51  ;;  %v1297_v9 = vld [vmem:[%s3186_s25 + $0x20] sm:$0xf]  ;;  %v1401_v52 = vrot.slane %v1399_v36, 5 }
  0x63   : > { %2698 = vmatpush3.bf16.msra.mxu0 %v2937_v11  ;;  %v780_v11 = vsel %vm3199_vm2, %v775_v3, %v779_v1  ;;  %v2984_v36 = vld [vmem:[%s3166_s17 + $0x18] ss:$8 sps:$4 sm:$0xff]  }
  0x64   : > { %2722 = vmatpush3.bf16.msra.mxu1 %v2938_v17  ;;  %2699 = vmatprep.subr.bf16.mxu0 %v2939_v23  ;;  %v2389_v14 = vcombine.low %v780_v11, %v794_v12  ;;  %v2952_v17 = vld [vmem:[#allocation2 + $0x160] sm:$0xff]   ;;  %v1341_v2 = vrot.slane %v1340_v60, 4  ;;  %v2963_v11 = vld [vmem:[#allocation2 + $0x1b8] sm:$0xff]   ;;  %v1299_v12 = vld [vmem:[%s3186_s25 + $0x28] sm:$0xf] }
  0x65   : > { %2723 = vmatprep.subr.bf16.mxu1 %v2940_v29  ;;  %v2970_v60 = vld [vmem:[#allocation2 + $0x1e8] sm:$0xff]  }
  0x67   : > { %2700 = vmatpush3.bf16.msra.mxu0 %v2939_v23  ;;  %v1306_v23 = vshrl.u32 %v1289_v19, 16  ;;  %v1379_v19 = vshll.u32 %v1299_v12, 16 }
  0x68   : > { %2724 = vmatpush3.bf16.msra.mxu1 %v2940_v29  ;;  %2733 = vmatprep.subr.bf16.mxu0 %v2943_v53  ;;  %v1329_v29 = vshll.u32 %v1292_v22, 16  ;;  %v2962_v22 = vld [vmem:[%s3236_s28 + $0x10] ss:$8 sps:$4 sm:$0xff]  }
  0x69   : > { %2757 = vmatprep.subr.bf16.mxu1 %v2944_v57  ;;  %v1308_v31 = vrot.slane %v1306_v23, 4 }
  0x6a   : > { %2702 = vmatmul.mubr.bf16.vlgmr.msra.gmra.mxu0 %v2387_v62  ;;  %v1331_v41 = vrot.slane %v1329_v29, 5 }
  0x6b   : > { %2726 = vmatmul.mubr.bf16.vlgmr.msra.gmra.mxu1 %v2942_v56  ;;  %2734 = vmatpush3.bf16.msra.mxu0 %v2943_v53  ;;  %v1312_v40 = vor.u32 %v1311_v32, %v1308_v31  ;;  %v1357_v53 = vshll.u32 %v1296_v42, 16  ;;  %v1350_v56 = vrot.slane %v1348_v48, 4  ;;  %v1304_v32 = vld [vmem:[%s3186_s25 + $0x3c] sm:$0x1]  ;;  %v2965_v42 = vld [vmem:[#allocation2 + $0x1b0] sm:$0xff]  }
  0x6c   : > { %2758 = vmatpush3.bf16.msra.mxu1 %v2944_v57  ;;  %2735 = vmatprep.subr.bf16.mxu0 %v2945_v63  ;;  %v1353_v57 = vrot.slane %v1351_v49, 5  ;;  %v1332_v62 = vsel %vm3199_vm2, %v1327_v55, %v1331_v41  ;;  %v1413_v41 = vshll.u32 %v1304_v32, 16 }
  0x6d   : > { %2759 = vmatprep.subr.bf16.mxu1 %v2946_v7  ;;  %2705 = vmatprep.mubr.bf16.mxu0 %v2388_v8  ;;  %v1313_v50 = vrot.slane %v1312_v40, 4  ;;  %v1359_v3 = vrot.slane %v1357_v53, 5 }
  0x6e   : > { %2729 = vmatprep.mubr.bf16.mxu1 %v2949_v6  ;;  %v1354_v0 = vor.u32 %v1353_v57, %v1350_v56  ;;  %v2960_v6 = vld [vmem:[#allocation2 + $0x140] sm:$0xff]   ;;  %v1415_v55 = vrot.slane %v1413_v41, 5  ;;  %v2969_v56 = vld [vmem:[#allocation2 + $0x1a8] sm:$0xff]   ;;  %v2986_v41 = vld [vmem:[#allocation2 + $0x230] sm:$0xff]  }
  0x6f   : > { %2736 = vmatpush3.bf16.msra.mxu0 %v2945_v63  ;;  %v1318_v59 = vsel %vm3199_vm2, %v1313_v50, %v1317_v35  ;;  %v1345_v63 = vrot.slane %v1343_v47, 5  ;;  %v1393_v35 = vshll.u32 %v1301_v21, 16  ;;  %v2983_v21 = vld [vmem:[%s3172_s20 + $0x18] ss:$8 sps:$4 sm:$0xff]  }
  0x70   : > { %2760 = vmatpush3.bf16.msra.mxu1 %v2946_v7  ;;  %2737 = vmatprep.subr.bf16.mxu0 %v2947_v10  ;;  %v2422_v1 = vcombine.low %v1318_v59, %v1332_v62  ;;  %v1355_v4 = vrot.slane %v1354_v0, 4  ;;  %v2968_v62 = vld [vmem:[%s3236_s28 + $0x30] ss:$8 sps:$4 sm:$0xff]  }
  0x71   : > { %2761 = vmatprep.subr.bf16.mxu1 %v2948_v13  ;;  %v1346_v7 = vsel %vm3199_vm2, %v1341_v2, %v1345_v63  ;;  %v2971_v2 = vld [vmem:[#allocation2 + $0x1a0] sm:$0xff]  }
  0x72   : > { %2706 = vmatmul.mubr.bf16.gmra.mxu0 %v2389_v14  ;;  %v1360_v8 = vsel %vm3199_vm2, %v1355_v4, %v1359_v3  ;;  %v1362_v14 = vshrl.u32 %v1297_v9, 16  ;;  %v2972_v3 = vld [vmem:[#allocation2 + $0x1e0] sm:$0xff]   ;;  %v2981_v4 = vld [vmem:[%s3172_s20 + $0x8] ss:$8 sps:$4 sm:$0xff]  }
  0x73   : > { %2738 = vmatpush3.bf16.msra.mxu0 %v2947_v10  ;;  %2730 = vmatmul.mubr.bf16.gmra.mxu1 %v2950_v16  ;;  %v1298_v10 = vld [vmem:[%s3186_s25 + $0x24] sm:$0x1]  ;;  %v2964_v16 = vld [vmem:[#allocation2 + $0x1f8] sm:$0xff]   ;;  %v2423_v23 = vcombine.low %v1346_v7, %v1360_v8  ;;  %v2975_v8 = vld [vmem:[#allocation2 + $0x190] sm:$0xff]  }
  0x74   : > { %2762 = vmatpush3.bf16.msra.mxu1 %v2948_v13  ;;  %2739 = vmatprep.subr.bf16.mxu0 %v2951_v15  ;;  %v1300_v13 = vld [vmem:[%s3186_s25 + $0x2c] sm:$0x1]  ;;  %v1364_v24 = vrot.slane %v1362_v14, 4  ;;  %v2974_v7 = vld [vmem:[#allocation2 + $0x1d8] sm:$0xff]   ;;  %v2474_v14 = vld [vmem:[%s3172_s20 + $0x8] sm:$0xf] }
  0x75   : > { %2763 = vmatprep.subr.bf16.mxu1 %v2952_v17  ;;  %2749 = vmatprep.mubr.bf16.mxu0 %v2961_v18  ;;  %v1376_v18 = vshrl.u32 %v1299_v12, 16  ;;  %v1385_v20 = vshll.u32 %v1300_v13, 16  ;;  %v2979_v12 = vld [vmem:[#allocation2 + $0x180] sm:$0xff]  }
  0x76   : > { %2773 = vmatprep.mubr.bf16.mxu1 %v2422_v1  ;;  %v2980_v13 = vld [vmem:[#allocation2 + $0x1c0] sm:$0xff]  }
  0x77   : > { %2740 = vmatpush3.bf16.msra.mxu0 %v2951_v15  ;;  %v1365_v15 = vshll.u32 %v1297_v9, 16  ;;  %v1378_v29 = vrot.slane %v1376_v18, 4  ;;  %v1387_v31 = vrot.slane %v1385_v20, 5  ;;  %v2976_v9 = vld [vmem:[#allocation2 + $0x1d0] sm:$0xff]   ;;  %v1930_v18 = vshrl.u32 %v2474_v14, 16 }
  0x78   : > { %2764 = vmatpush3.bf16.msra.mxu1 %v2952_v17  ;;  %2741 = vmatprep.subr.bf16.mxu0 %v2953_v27  ;;  %v1371_v17 = vshll.u32 %v1298_v10, 16  ;;  %v2977_v10 = vld [vmem:[#allocation2 + $0x188] sm:$0xff]  }
  0x79   : > { %2765 = vmatprep.subr.bf16.mxu1 %v2954_v30  ;;  %v1367_v25 = vrot.slane %v1365_v15, 5  ;;  %v2475_v15 = vld [vmem:[%s3172_s20 + $0xc] sm:$0x1]  ;;  %v1932_v26 = vrot.slane %v1930_v18, 4 }
  0x7a   : > { %v1373_v28 = vrot.slane %v1371_v17, 5  ;;  %v2477_v17 = vld [vmem:[%s3172_s20 + $0x14] sm:$0x1] }
  0x7b   : > { %2742 = vmatpush3.bf16.msra.mxu0 %v2953_v27  ;;  %v1303_v27 = vld [vmem:[%s3186_s25 + $0x38] sm:$0xf]  ;;  %v1368_v33 = vor.u32 %v1367_v25, %v1364_v24  ;;  %v2482_v24 = vld [vmem:[%s3172_s20 + $0x28] sm:$0xf]  ;;  %v2483_v25 = vld [vmem:[%s3172_s20 + $0x2c] sm:$0x1] }
  0x7c   : > { %2766 = vmatpush3.bf16.msra.mxu1 %v2954_v30  ;;  %2743 = vmatprep.subr.bf16.mxu0 %v2955_v39  ;;  %v1381_v30 = vrot.slane %v1379_v19, 5  ;;  %v1407_v40 = vshll.u32 %v1303_v27, 16  ;;  %v1933_v19 = vshll.u32 %v2474_v14, 16  ;;  %v1953_v32 = vshll.u32 %v2477_v17, 16 }
  0x7d   : > { %2767 = vmatprep.subr.bf16.mxu1 %v2956_v45  ;;  %v1369_v43 = vrot.slane %v1368_v33, 4  ;;  %v2485_v33 = vld [vmem:[%s3172_s20 + $0x34] sm:$0x1]  ;;  %v1986_v34 = vshrl.u32 %v2482_v24, 16 }
  0x7e   : > { %v1382_v38 = vor.u32 %v1381_v30, %v1378_v29  ;;  %v1409_v49 = vrot.slane %v1407_v40, 5  ;;  %v2484_v30 = vld [vmem:[%s3172_s20 + $0x30] sm:$0xf] }
  0x7f   : > { %2744 = vmatpush3.bf16.msra.mxu0 %v2955_v39  ;;  %v1404_v39 = vshrl.u32 %v1303_v27, 16  ;;  %v1374_v50 = vsel %vm3199_vm2, %v1369_v43, %v1373_v28  ;;  %v1935_v27 = vrot.slane %v1933_v19, 5  ;;  %v1939_v28 = vshll.u32 %v2475_v15, 16  ;;  %v2993_v15 = vld [vmem:[#allocation2 + $0x218] sm:$0xff]  }
  0x80   : > { %2768 = vmatpush3.bf16.msra.mxu1 %v2956_v45  ;;  %2745 = vmatprep.subr.bf16.mxu0 %v2957_v54  ;;  %v1395_v45 = vrot.slane %v1393_v35, 5  ;;  %v1383_v47 = vrot.slane %v1382_v38, 4  ;;  %v1989_v35 = vshll.u32 %v2482_v24, 16  ;;  %v1995_v38 = vshll.u32 %v2483_v25, 16 }
  0x81   : > { %2769 = vmatprep.subr.bf16.mxu1 %v2958_v61  ;;  %v1406_v48 = vrot.slane %v1404_v39, 4  ;;  %v2000_v39 = vshrl.u32 %v2484_v30, 16  ;;  %v2003_v40 = vshll.u32 %v2484_v30, 16  ;;  %v1988_v43 = vrot.slane %v1986_v34, 4 }
  0x82   : > { %v1396_v51 = vor.u32 %v1395_v45, %v1392_v44  ;;  %v1388_v53 = vsel %vm3199_vm2, %v1383_v47, %v1387_v31  ;;  %v1991_v44 = vrot.slane %v1989_v35, 5  ;;  %v2009_v45 = vshll.u32 %v2485_v33, 16 }
  0x83   : > { %2746 = vmatpush3.bf16.msra.mxu0 %v2957_v54  ;;  %v1410_v54 = vor.u32 %v1409_v49, %v1406_v48  ;;  %v2424_v57 = vcombine.low %v1374_v50, %v1388_v53  ;;  %v1941_v47 = vrot.slane %v1939_v28, 5  ;;  %v2002_v48 = vrot.slane %v2000_v39, 4  ;;  %v2990_v50 = vld [vmem:[%s3166_s17 + $0x28] ss:$8 sps:$4 sm:$0xff]  }
  0x84   : > { %2770 = vmatpush3.bf16.msra.mxu1 %v2958_v61  ;;  %2747 = vmatprep.subr.bf16.mxu0 %v2959_v5  ;;  %v1397_v59 = vrot.slane %v1396_v51, 4  ;;  %v2005_v49 = vrot.slane %v2003_v40, 5  ;;  %v1955_v53 = vrot.slane %v1953_v32, 5  ;;  %v2489_v32 = vld [vmem:[%s3172_s20 + $0x44] sm:$0x1] }
  0x85   : > { %2771 = vmatprep.subr.bf16.mxu1 %v2960_v6  ;;  %v1411_v61 = vrot.slane %v1410_v54, 4  ;;  %v1992_v54 = vor.u32 %v1991_v44, %v1988_v43 }
  0x86   : > { %v1402_v63 = vsel %vm3199_vm2, %v1397_v59, %v1401_v52  ;;  %v2989_v59 = vld [vmem:[#allocation2 + $0x228] sm:$0xff]  }
  0x87   : > { %2748 = vmatpush3.bf16.msra.mxu0 %v2959_v5  ;;  %v1416_v0 = vsel %vm3199_vm2, %v1411_v61, %v1415_v55  ;;  %v2982_v5 = vld [vmem:[%s3166_s17 + $0x8] ss:$8 sps:$4 sm:$0xff]   ;;  %v1997_v55 = vrot.slane %v1995_v38, 5 }
  0x88   : > { %2772 = vmatpush3.bf16.msra.mxu1 %v2960_v6  ;;  %2781 = vmatprep.subr.bf16.mxu0 %v2963_v11  ;;  %v2425_v1 = vcombine.low %v1402_v63, %v1416_v0  ;;  %v2973_v6 = vld [vmem:[#allocation2 + $0x198] sm:$0xff]  }
  0x89   : > { %2805 = vmatprep.subr.bf16.mxu1 %v2964_v16 }
  0x8a   : > { %2750 = vmatmul.mubr.bf16.vlgmr.msra.gmra.mxu0 %v2962_v22  ;;  %v2985_v22 = vld [vmem:[#allocation2 + $0x238] sm:$0xff]  }
  0x8b   : > { %2774 = vmatmul.mubr.bf16.vlgmr.msra.gmra.mxu1 %v2423_v23  ;;  %2782 = vmatpush3.bf16.msra.mxu0 %v2963_v11  ;;  %v2978_v11 = vld [vmem:[#allocation2 + $0x1c8] sm:$0xff]  }
  0x8c   : > { %2806 = vmatpush3.bf16.msra.mxu1 %v2964_v16  ;;  %2783 = vmatprep.subr.bf16.mxu0 %v2965_v42  ;;  %v2476_v16 = vld [vmem:[%s3172_s20 + $0x10] sm:$0xf] }
  0x8d   : > { %2807 = vmatprep.subr.bf16.mxu1 %v2966_v46  ;;  %2753 = vmatprep.mubr.bf16.mxu0 %v2967_v37  ;;  %v1944_v20 = vshrl.u32 %v2476_v16, 16  ;;  %v1947_v23 = vshll.u32 %v2476_v16, 16  ;;  %v1936_v37 = vor.u32 %v1935_v27, %v1932_v26  ;;  %v2481_v26 = vld [vmem:[%s3172_s20 + $0x24] sm:$0x1] }
  0x8e   : > { %2777 = vmatprep.mubr.bf16.mxu1 %v2424_v57  ;;  %v2011_v57 = vrot.slane %v2009_v45, 5 }
  0x8f   : > { %2784 = vmatpush3.bf16.msra.mxu0 %v2965_v42  ;;  %v1946_v29 = vrot.slane %v1944_v20, 4  ;;  %v1949_v31 = vrot.slane %v1947_v23, 5  ;;  %v1937_v51 = vrot.slane %v1936_v37, 4  ;;  %v2994_v20 = vld [vmem:[#allocation2 + $0x210] sm:$0xff]   ;;  %v2995_v37 = vld [vmem:[#allocation2 + $0x208] sm:$0xff]  }
  0x90   : > { %2808 = vmatpush3.bf16.msra.mxu1 %v2966_v46  ;;  %2785 = vmatprep.subr.bf16.mxu0 %v2969_v56  ;;  %v2987_v46 = vld [vmem:[%s3172_s20 + $0x28] ss:$8 sps:$4 sm:$0xff]  }
  0x91   : > { %2809 = vmatprep.subr.bf16.mxu1 %v2970_v60  ;;  %v1950_v42 = vor.u32 %v1949_v31, %v1946_v29  ;;  %v1942_v63 = vsel %vm3199_vm2, %v1937_v51, %v1941_v47  ;;  %v2487_v31 = vld [vmem:[%s3172_s20 + $0x3c] sm:$0x1] }
  0x92   : > { %2754 = vmatmul.mubr.bf16.gmra.mxu0 %v2968_v62  ;;  %v2988_v62 = vld [vmem:[%s3172_s20 + $0x38] ss:$8 sps:$4 sm:$0xff]   ;;  %v2023_v39 = vshll.u32 %v2487_v31, 16 }
  0x93   : > { %2786 = vmatpush3.bf16.msra.mxu0 %v2969_v56  ;;  %2778 = vmatmul.mubr.bf16.gmra.mxu1 %v2425_v1  ;;  %v1951_v52 = vrot.slane %v1950_v42, 4  ;;  %v2006_v56 = vor.u32 %v2005_v49, %v2002_v48  ;;  %v2991_v1 = vld [vmem:[%s3166_s17 + $0x38] ss:$8 sps:$4 sm:$0xff]  }
  0x94   : > { %2810 = vmatpush3.bf16.msra.mxu1 %v2970_v60  ;;  %2787 = vmatprep.subr.bf16.mxu0 %v2971_v2  ;;  %v1993_v60 = vrot.slane %v1992_v54, 4  ;;  %v2025_v48 = vrot.slane %v2023_v39, 5 }
  0x95   : > { %2811 = vmatprep.subr.bf16.mxu1 %v2972_v3  ;;  %2797 = vmatprep.mubr.bf16.mxu0 %v2981_v4  ;;  %v2007_v61 = vrot.slane %v2006_v56, 4  ;;  %v1956_v0 = vsel %vm3199_vm2, %v1951_v52, %v1955_v53  ;;  %v2992_v4 = vld [vmem:[#allocation2 + $0x220] sm:$0xff]  }
  0x96   : > { %2821 = vmatprep.mubr.bf16.mxu1 %v2982_v5  ;;  %v2478_v5 = vld [vmem:[%s3172_s20 + $0x18] sm:$0xf] }
  0x97   : > { %2788 = vmatpush3.bf16.msra.mxu0 %v2971_v2  ;;  %v1998_v2 = vsel %vm3199_vm2, %v1993_v60, %v1997_v55 }
  0x98   : > { %2812 = vmatpush3.bf16.msra.mxu1 %v2972_v3  ;;  %2789 = vmatprep.subr.bf16.mxu0 %v2973_v6  ;;  %v2012_v3 = vsel %vm3199_vm2, %v2007_v61, %v2011_v57 }
  0x99   : > { %2813 = vmatprep.subr.bf16.mxu1 %v2974_v7 }
  0x9b   : > { %2790 = vmatpush3.bf16.msra.mxu0 %v2973_v6  ;;  %v2480_v6 = vld [vmem:[%s3172_s20 + $0x20] sm:$0xf] }
  0x9c   : > { %2814 = vmatpush3.bf16.msra.mxu1 %v2974_v7  ;;  %2791 = vmatprep.subr.bf16.mxu0 %v2975_v8  ;;  %v2490_v7 = vcombine.low %v1942_v63, %v1956_v0  ;;  %v1975_v14 = vshll.u32 %v2480_v6, 16 }
  0x9d   : > { %2815 = vmatprep.subr.bf16.mxu1 %v2976_v9 }
  0x9e   : > { %v1977_v25 = vrot.slane %v1975_v14, 5 }
  0x9f   : > { %2792 = vmatpush3.bf16.msra.mxu0 %v2975_v8  ;;  %v2486_v8 = vld [vmem:[%s3172_s20 + $0x38] sm:$0xf] }
  0xa0   : > { %2816 = vmatpush3.bf16.msra.mxu1 %v2976_v9  ;;  %2793 = vmatprep.subr.bf16.mxu0 %v2977_v10  ;;  %v2488_v9 = vld [vmem:[%s3172_s20 + $0x40] sm:$0xf]  ;;  %v2014_v16 = vshrl.u32 %v2486_v8, 16  ;;  %v2017_v17 = vshll.u32 %v2486_v8, 16 }
  0xa1   : > { %2817 = vmatprep.subr.bf16.mxu1 %v2978_v11  ;;  %v2028_v18 = vshrl.u32 %v2488_v9, 16  ;;  %v2031_v19 = vshll.u32 %v2488_v9, 16 }
  0xa2   : > { %v2016_v27 = vrot.slane %v2014_v16, 4  ;;  %v2019_v28 = vrot.slane %v2017_v17, 5 }
  0xa3   : > { %2794 = vmatpush3.bf16.msra.mxu0 %v2977_v10  ;;  %v2492_v10 = vcombine.low %v1998_v2, %v2012_v3  ;;  %v2030_v29 = vrot.slane %v2028_v18, 4  ;;  %v2033_v30 = vrot.slane %v2031_v19, 5 }
  0xa4   : > { %2818 = vmatpush3.bf16.msra.mxu1 %v2978_v11  ;;  %2795 = vmatprep.subr.bf16.mxu0 %v2979_v12  ;;  %v1958_v11 = vshrl.u32 %v2478_v5, 16  ;;  %v2020_v38 = vor.u32 %v2019_v28, %v2016_v27 }
  0xa5   : > { %2819 = vmatprep.subr.bf16.mxu1 %v2980_v13  ;;  %v2034_v40 = vor.u32 %v2033_v30, %v2030_v29 }
  0xa6   : > { %v2021_v47 = vrot.slane %v2020_v38, 4 }
  0xa7   : > { %2796 = vmatpush3.bf16.msra.mxu0 %v2979_v12  ;;  %v1961_v12 = vshll.u32 %v2478_v5, 16  ;;  %v2035_v49 = vrot.slane %v2034_v40, 4 }
  0xa8   : > { %2820 = vmatpush3.bf16.msra.mxu1 %v2980_v13  ;;  %2829 = vmatprep.subr.bf16.mxu0 %v2985_v22  ;;  %v1972_v13 = vshrl.u32 %v2480_v6, 16  ;;  %v2026_v53 = vsel %vm3199_vm2, %v2021_v47, %v2025_v48 }
  0xa9   : > { %2853 = vmatprep.subr.bf16.mxu1 %v2985_v22  ;;  %v1963_v23 = vrot.slane %v1961_v12, 5 }
  0xaa   : > { %2798 = vmatmul.mubr.bf16.vlgmr.msra.gmra.mxu0 %v2983_v21  ;;  %v2479_v21 = vld [vmem:[%s3172_s20 + $0x1c] sm:$0x1]  ;;  %v1974_v24 = vrot.slane %v1972_v13, 4 }
  0xab   : > { %2822 = vmatmul.mubr.bf16.vlgmr.msra.gmra.mxu1 %v2984_v36  ;;  %2830 = vmatpush3.bf16.msra.mxu0 %v2985_v22  ;;  %v1967_v34 = vshll.u32 %v2479_v21, 16  ;;  %v1981_v36 = vshll.u32 %v2481_v26, 16 }
  0xac   : > { %2861 = vmatpush3.bf16.msra.mxu1 %v2985_v22  ;;  %2831 = vmatprep.subr.bf16.mxu0 %v2986_v41  ;;  %v1960_v22 = vrot.slane %v1958_v11, 4  ;;  %v1978_v35 = vor.u32 %v1977_v25, %v1974_v24 }
  0xad   : > { %2854 = vmatprep.subr.bf16.mxu1 %v2986_v41  ;;  %2801 = vmatprep.mubr.bf16.mxu0 %v2987_v46  ;;  %v1969_v43 = vrot.slane %v1967_v34, 5  ;;  %v1983_v45 = vrot.slane %v1981_v36, 5  ;;  %v2996_v46 = vld [vmem:[#allocation2 + $0x200] sm:$0xff]  }
  0xae   : > { %2825 = vmatprep.mubr.bf16.mxu1 %v2990_v50  ;;  %v1964_v33 = vor.u32 %v1963_v23, %v1960_v22  ;;  %v1979_v44 = vrot.slane %v1978_v35, 4 }
  0xaf   : > { %2832 = vmatpush3.bf16.msra.mxu0 %v2986_v41 }
  0xb0   : > { %2862 = vmatpush3.bf16.msra.mxu1 %v2986_v41  ;;  %2833 = vmatprep.subr.bf16.mxu0 %v2989_v59  ;;  %v2037_v41 = vshll.u32 %v2489_v32, 16  ;;  %v1965_v42 = vrot.slane %v1964_v33, 4  ;;  %v1984_v52 = vsel %vm3199_vm2, %v1979_v44, %v1983_v45 }
  0xb1   : > { %2855 = vmatprep.subr.bf16.mxu1 %v2989_v59 }
  0xb2   : > { %2802 = vmatmul.mubr.bf16.gmra.mxu0 %v2988_v62  ;;  %v2039_v50 = vrot.slane %v2037_v41, 5  ;;  %v1970_v51 = vsel %vm3199_vm2, %v1965_v42, %v1969_v43 }
  0xb3   : > { %2834 = vmatpush3.bf16.msra.mxu0 %v2989_v59  ;;  %2826 = vmatmul.mubr.bf16.gmra.mxu1 %v2991_v1  ;;  %v2491_v55 = vcombine.low %v1970_v51, %v1984_v52 }
  0xb4   : > { %2863 = vmatpush3.bf16.msra.mxu1 %v2989_v59  ;;  %2835 = vmatprep.subr.bf16.mxu0 %v2992_v4  ;;  %v2040_v54 = vsel %vm3199_vm2, %v2035_v49, %v2039_v50 }
  0xb5   : > { %2856 = vmatprep.subr.bf16.mxu1 %v2992_v4  ;;  %2845 = vmatprep.mubr.bf16.mxu0 %v2490_v7  ;;  %v2493_v56 = vcombine.low %v2026_v53, %v2040_v54 }
  0xb6   : > { %2849 = vmatprep.mubr.bf16.mxu1 %v2492_v10 }
  0xb7   : > { %2836 = vmatpush3.bf16.msra.mxu0 %v2992_v4 }
  0xb8   : > { %2864 = vmatpush3.bf16.msra.mxu1 %v2992_v4  ;;  %2837 = vmatprep.subr.bf16.mxu0 %v2993_v15 }
  0xb9   : > { %2857 = vmatprep.subr.bf16.mxu1 %v2993_v15 }
  0xbb   : > { %2838 = vmatpush3.bf16.msra.mxu0 %v2993_v15 }
  0xbc   : > { %2865 = vmatpush3.bf16.msra.mxu1 %v2993_v15  ;;  %2839 = vmatprep.subr.bf16.mxu0 %v2994_v20 }
  0xbd   : > { %2858 = vmatprep.subr.bf16.mxu1 %v2994_v20 }
  0xbf   : > { %2840 = vmatpush3.bf16.msra.mxu0 %v2994_v20 }
  0xc0   : > { %2866 = vmatpush3.bf16.msra.mxu1 %v2994_v20  ;;  %2841 = vmatprep.subr.bf16.mxu0 %v2995_v37 }
  0xc1   : > { %2859 = vmatprep.subr.bf16.mxu1 %v2995_v37 }
  0xc3   : > { %2842 = vmatpush3.bf16.msra.mxu0 %v2995_v37 }
  0xc4   : > { %2867 = vmatpush3.bf16.msra.mxu1 %v2995_v37  ;;  %2843 = vmatprep.subr.bf16.mxu0 %v2996_v46 }
  0xc5   : > { %2860 = vmatprep.subr.bf16.mxu1 %v2996_v46 }
  0xc7   : > { %2844 = vmatpush3.bf16.msra.mxu0 %v2996_v46 }
  0xc8   : > { %2868 = vmatpush3.bf16.msra.mxu1 %v2996_v46 }
  0xca   : > { %2846 = vmatmul.mubr.bf16.vlgmr.msra.gmra.mxu0 %v2491_v55 }
  0xcb   : > { %2850 = vmatmul.mubr.bf16.vlgmr.msra.gmra.mxu1 %v2493_v56 }
 0x10a   : > { %v2655_v57 = vpop.f32.mrf.mxu0 }
 0x10b   : > { %v2679_v60 = vpop.f32.mrf.mxu1 }
 0x10c   : > { %v496_v59 = vpop.f32.mrf.mxu0  ;;  %v642_v46 = vadd.f32 %v2679_v60, %v2655_v57 }
 0x10d   : > { %v633_v62 = vpop.f32.mrf.mxu1 }
 0x10e   : > { %v2656_v61 = vpop.f32.mrf.mxu0  ;;  %v634_v50 = vadd.f32 %v633_v62, %v496_v59 }
 0x10f   : > { %v2680_v1 = vpop.f32.mrf.mxu1 }
 0x110   : > { %v499_v63 = vpop.f32.mrf.mxu0  ;;  %v645_v54 = vadd.f32 %v2680_v1, %v2656_v61 }
 0x111   : > { %v636_v3 = vpop.f32.mrf.mxu1 }
 0x112   : > { %v2659_v0 = vpop.f32.mrf.mxu0 }
 0x113   : > { %v2683_v4 = vpop.f32.mrf.mxu1 }
 0x114   : > { %v512_v2 = vpop.f32.mrf.mxu0  ;;  %v658_v48 = vadd.f32 %v2683_v4, %v2659_v0 }
 0x115   : > { %v649_v5 = vpop.f32.mrf.mxu1 }
 0x116   : > { %v2660_v58 = vpop.f32.mrf.mxu0  ;;  %v650_v52 = vadd.f32 %v649_v5, %v512_v2 }
 0x117   : > { %v2684_v8 = vpop.f32.mrf.mxu1 }
 0x118   : > { %v515_v6 = vpop.f32.mrf.mxu0 }
 0x119   : > { %v652_v10 = vpop.f32.mrf.mxu1 }
 0x11a   : > { %v653_v62 = vadd.f32 %v652_v10, %v515_v6 }
 0x12a   : > { %v2703_v7 = vpop.f32.mrf.mxu0 }
 0x12b   : > { %v2727_v11 = vpop.f32.mrf.mxu1  ;;  %v943_v51 = vadd.f32 %v2703_v7, %v642_v46 }
 0x12c   : > { %v910_v9 = vpop.f32.mrf.mxu0 }
 0x12d   : > { %v1080_v13 = vpop.f32.mrf.mxu1  ;;  %v941_v55 = vadd.f32 %v910_v9, %v634_v50  ;;  %v1113_v0 = vadd.f32 %v2727_v11, %v943_v51 }
 0x12e   : > { %v2704_v12 = vpop.f32.mrf.mxu0 }
 0x12f   : > { %v2728_v15 = vpop.f32.mrf.mxu1  ;;  %v944_v4 = vadd.f32 %v2704_v12, %v645_v54  ;;  %v1111_v2 = vadd.f32 %v1080_v13, %v941_v55 }
 0x130   : > { %v913_v14 = vpop.f32.mrf.mxu0 }
 0x131   : > { %v1083_v17 = vpop.f32.mrf.mxu1  ;;  %v1114_v50 = vadd.f32 %v2728_v15, %v944_v4 }
 0x132   : > { %v2707_v16 = vpop.f32.mrf.mxu0 }
 0x133   : > { %v2731_v19 = vpop.f32.mrf.mxu1  ;;  %v947_v53 = vadd.f32 %v2707_v16, %v658_v48 }
 0x134   : > { %v926_v18 = vpop.f32.mrf.mxu0 }
 0x135   : > { %v1096_v21 = vpop.f32.mrf.mxu1  ;;  %v945_v57 = vadd.f32 %v926_v18, %v650_v52  ;;  %v1117_v7 = vadd.f32 %v2731_v19, %v947_v53 }
 0x136   : > { %v2708_v20 = vpop.f32.mrf.mxu0 }
 0x137   : > { %v2732_v23 = vpop.f32.mrf.mxu1  ;;  %v1115_v48 = vadd.f32 %v1096_v21, %v945_v57 }
 0x138   : > { %v929_v22 = vpop.f32.mrf.mxu0 }
 0x139   : > { %v1099_v25 = vpop.f32.mrf.mxu1  ;;  %v946_v1 = vadd.f32 %v929_v22, %v653_v62 }
 0x13b   : > { %v1116_v11 = vadd.f32 %v1099_v25, %v946_v1 }
 0x14a   : > { %v2751_v24 = vpop.f32.mrf.mxu0 }
 0x14b   : > { %v2775_v27 = vpop.f32.mrf.mxu1  ;;  %v1283_v16 = vadd.f32 %v2751_v24, %v1113_v0 }
 0x14c   : > { %v1250_v26 = vpop.f32.mrf.mxu0 }
 0x14d   : > { %v1532_v29 = vpop.f32.mrf.mxu1 }
 0x14e   : > { %v2752_v28 = vpop.f32.mrf.mxu0 }
 0x14f   : > { %v2776_v31 = vpop.f32.mrf.mxu1 }
 0x150   : > { %v1253_v30 = vpop.f32.mrf.mxu0 }
 0x151   : > { %v3315_v33 = vpop.f32.mrf.mxu1 }
 0x152   : > { %v2755_v32 = vpop.f32.mrf.mxu0  ;;  %3342 = vst [vmem:[#allocation8_spill] sm:$0xff] %v3315_v33  ;;  %v661_v33 = vadd.f32 %v2684_v8, %v2660_v58 }
 0x153   : > { %v2779_v34 = vpop.f32.mrf.mxu1  ;;  %v1287_v61 = vadd.f32 %v2755_v32, %v1117_v7 }
 0x154   : > { %v1266_v35 = vpop.f32.mrf.mxu0  ;;  %v948_v46 = vadd.f32 %v2708_v20, %v661_v33 }
 0x155   : > { %v1548_v36 = vpop.f32.mrf.mxu1  ;;  %v1285_v18 = vadd.f32 %v1266_v35, %v1115_v48  ;;  %v1569_v12 = vadd.f32 %v2779_v34, %v1287_v61 }
 0x156   : > { %v2756_v37 = vpop.f32.mrf.mxu0  ;;  %v1118_v58 = vadd.f32 %v2732_v23, %v948_v46 }
 0x157   : > { %v2780_v38 = vpop.f32.mrf.mxu1  ;;  %v1567_v21 = vadd.f32 %v1548_v36, %v1285_v18 }
 0x158   : > { %v1269_v39 = vpop.f32.mrf.mxu0  ;;  %v1288_v6 = vadd.f32 %v2756_v37, %v1118_v58 }
 0x159   : > { %v1551_v41 = vpop.f32.mrf.mxu1  ;;  %v1286_v22 = vadd.f32 %v1269_v39, %v1116_v11  ;;  %v3345_v35 = vld [vmem:[#allocation8_spill] sm:$0xff] }
 0x15b   : > { %v1568_v34 = vadd.f32 %v1551_v41, %v1286_v22 }
 0x16a   : > { %v2799_v40 = vpop.f32.mrf.mxu0 }
 0x16b   : > { %v2823_v42 = vpop.f32.mrf.mxu1 }
 0x16c   : > { %v1703_v43 = vpop.f32.mrf.mxu0 }
 0x16d   : > { %v1874_v44 = vpop.f32.mrf.mxu1 }
 0x16e   : > { %v2800_v45 = vpop.f32.mrf.mxu0 }
 0x16f   : > { %v3317_v47 = vpop.f32.mrf.mxu1 }
 0x170   : > { %3343 = vst [vmem:[#allocation9_spill] sm:$0xff] %v3317_v47  ;;  %v1706_v49 = vpop.f32.mrf.mxu0  ;;  %v637_v47 = vadd.f32 %v636_v3, %v499_v63  ;;  %v1565_v63 = vadd.f32 %v2775_v27, %v1283_v16  ;;  %v1284_v3 = vadd.f32 %v2752_v28, %v1114_v50 }
 0x171   : > { %v3319_v56 = vpop.f32.mrf.mxu1 }
 0x172   : > { %3344 = vst [vmem:[#allocation10_spill] sm:$0xff] %v3319_v56  ;;  %v2803_v60 = vpop.f32.mrf.mxu0  ;;  %v942_v5 = vadd.f32 %v913_v14, %v637_v47  ;;  %v1281_v56 = vadd.f32 %v1250_v26, %v1111_v2  ;;  %v1736_v14 = vadd.f32 %v2799_v40, %v1565_v63  ;;  %v1566_v32 = vadd.f32 %v2776_v31, %v1284_v3  ;;  %v2502_v31 = vld [vmem:[#allocation4] ss:$0 sm:$0xff] }
 0x173   : > { %v2827_v59 = vpop.f32.mrf.mxu1  ;;  %v1740_v24 = vadd.f32 %v2803_v60, %v1569_v12  ;;  %v1570_v26 = vadd.f32 %v2780_v38, %v1288_v6 }
 0x174   : > { %v1719_v9 = vpop.f32.mrf.mxu0  ;;  %v1112_v52 = vadd.f32 %v1083_v17, %v942_v5  ;;  %v1563_v19 = vadd.f32 %v1532_v29, %v1281_v56  ;;  %v1907_v27 = vadd.f32 %v2823_v42, %v1736_v14  ;;  %v1737_v28 = vadd.f32 %v2800_v45, %v1566_v32 }
 0x175   : > { %v1890_v8 = vpop.f32.mrf.mxu1  ;;  %v1738_v33 = vadd.f32 %v1719_v9, %v1567_v21  ;;  %v1911_v37 = vadd.f32 %v2827_v59, %v1740_v24 }
 0x176   : > { %v2804_v10 = vpop.f32.mrf.mxu0  ;;  %v1282_v13 = vadd.f32 %v1253_v30, %v1112_v52  ;;  %v1734_v15 = vadd.f32 %v1703_v43, %v1563_v19 }
 0x177   : > { %v2828_v20 = vpop.f32.mrf.mxu1  ;;  %v1741_v47 = vadd.f32 %v2804_v10, %v1570_v26  ;;  %v1909_v39 = vadd.f32 %v1890_v8, %v1738_v33  ;;  %v3346_v54 = vld [vmem:[#allocation9_spill] sm:$0xff] }
 0x178   : > { %v1722_v23 = vpop.f32.mrf.mxu0  ;;  %v1564_v17 = vadd.f32 %v3345_v35, %v1282_v13  ;;  %v1905_v30 = vadd.f32 %v1874_v44, %v1734_v15  ;;  %v1908_v55 = vadd.f32 %v3346_v54, %v1737_v28 }
 0x179   : > { %v1893_v25 = vpop.f32.mrf.mxu1  ;;  %v1739_v53 = vadd.f32 %v1722_v23, %v1568_v34  ;;  %v1912_v45 = vadd.f32 %v2828_v20, %v1741_v47  ;;  %v3347_v60 = vld [vmem:[#allocation10_spill] sm:$0xff] }
 0x17a   : > { %v1735_v40 = vadd.f32 %v1706_v49, %v1564_v17 }
 0x17b   : > { %v1910_v59 = vadd.f32 %v1893_v25, %v1739_v53 }
 0x17c   : > { %v1906_v0 = vadd.f32 %v3347_v60, %v1735_v40 }
 0x18a   : > { %v2847_v29 = vpop.f32.mrf.mxu0 }
 0x18b   : > { %v2189_v51 = vadd.f32 %v2847_v29, %v1907_v27  ;;  %v2851_v36 = vpop.f32.mrf.mxu1 }
 0x18c   : > { %v2193_v43 = vadd.f32 %v2851_v36, %v1911_v37  ;;  %v2156_v38 = vpop.f32.mrf.mxu0 }
 0x18d   : > { %v2187_v56 = vadd.f32 %v2156_v38, %v1905_v30  ;;  %v2172_v42 = vpop.f32.mrf.mxu1  ;;  %v2204_v4 = vadd.f32 %v2502_v31, %v2189_v51 }
 0x18e   : > { %v2191_v57 = vadd.f32 %v2172_v42, %v1909_v39  ;;  %v2848_v41 = vpop.f32.mrf.mxu0  ;;  %v2208_v62 = vadd.f32 %v2502_v31, %v2193_v43 }
 0x18f   : > { %v2190_v44 = vadd.f32 %v2848_v41, %v1908_v55  ;;  %v2852_v49 = vpop.f32.mrf.mxu1  ;;  %v2202_v2 = vadd.f32 %v2502_v31, %v2187_v56  ;;  %v2212_v50 = vmax.f32 %v2204_v4, 0.0 }
 0x190   : > { %v2194_v7 = vadd.f32 %v2852_v49, %v1912_v45  ;;  %v2159_v46 = vpop.f32.mrf.mxu0  ;;  %v2206_v1 = vadd.f32 %v2502_v31, %v2191_v57  ;;  %v2216_v18 = vmax.f32 %v2208_v62, 0.0 }
 0x191   : > { %v2205_v5 = vadd.f32 %v2502_v31, %v2190_v44  ;;  %v2188_v16 = vadd.f32 %v2159_v46, %v1906_v0  ;;  %v2175_v48 = vpop.f32.mrf.mxu1  ;;  %v2210_v3 = vmax.f32 %v2202_v2, 0.0 }
 0x192   : > { %v2209_v61 = vadd.f32 %v2502_v31, %v2194_v7  ;;  %v2192_v9 = vadd.f32 %v2175_v48, %v1910_v59  ;;  %v2214_v6 = vmax.f32 %v2206_v1, 0.0 }
 0x193   : > { %v2213_v8 = vmax.f32 %v2205_v5, 0.0  ;;  %v2203_v58 = vadd.f32 %v2502_v31, %v2188_v16 }
 0x194   : > { %v2217_v52 = vmax.f32 %v2209_v61, 0.0  ;;  %v2207_v63 = vadd.f32 %v2502_v31, %v2192_v9 }
 0x195   : > { %v2514_v11 = vpack.c.bf16 %v2213_v8, %v2212_v50  ;;  %v2211_v12 = vmax.f32 %v2203_v58, 0.0 }
 0x196   : > { %v2524_v10 = vpack.c.bf16 %v2217_v52, %v2216_v18  ;;  %v2215_v19 = vmax.f32 %v2207_v63, 0.0 }
 0x197   : > { %2526 = vst [vmem:[%s339_s8 + $0x8] sm:$0xff] %v2514_v11   ;;  %v2509_v13 = vpack.c.bf16 %v2211_v12, %v2210_v3 }
 0x198   : > { %2528 = vst [vmem:[%s339_s8 + $0x18] sm:$0xff] %v2524_v10   ;;  %v2519_v14 = vpack.c.bf16 %v2215_v19, %v2214_v6 }
 0x199   : > { %2510 = vst [vmem:[%s339_s8] sm:$0xff] %v2509_v13  }
 0x19a   : > { %2527 = vst [vmem:[%s339_s8 + $0x10] sm:$0xff] %v2519_v14  }
 0x19b PF: > { %s18_s21 = sadd.s32 1, %s3063_s21  }
 0x19c   : > { %p15_p2 = scmp.ge.s32.totalorder %s18_s21, 4  }
 0x19e   :  { %17 = sbr.rel (!%p15_p2) target bundleno = 2 (0x2), region = 102 }
 0x1a3   :  { %2255 = vsyncpa [#allocation3], 1 }
 0x1a4   :  { %2257 = vsyncpa [#allocation3 + $0x1], 1 }
 0x1a5   :  { %2258 = vsyncpa [#allocation5], 1 }

// kernel: deeplabv3_forward.22
= control target key start
LH: loop header
LB: loop body
LE: loop exit
PB: predicated region body
PF: predicated region fallthrough
CT: control target
= control target key end

     0   :  { %s2193_s12 = smov 0   ;;  %s2569_s0 = inlined_call_operand.vmem [shape: bf16[2,76,76,128], index: 0, kind: input, shape index: {}]   ;;  %s2570_s1 = inlined_call_operand.vmem [shape: bf16[9,128,128], index: 1, kind: input, shape index: {}]   ;;  %s2571_s2 = inlined_call_operand.vmem [shape: f32[1,1,128], index: 2, kind: input, shape index: {}]   ;;  %s2572_s3 = inlined_call_operand.vmem [shape: bf16[2,4,4,128], index: 3, kind: output, shape index: {}]  }
   0x1 LB: > { %s1551_s13 = sadd.s32 4294967295, %s2168_s12   ;;  %p1555_p0 = scmp.ge.s32.totalorder %s2168_s12, 1  ;;  %s2168_s12 = sphi %s2193_s12, %s13_s12  }
   0x2   : > { %p137_p1 = scmp.lt.s32.totalorder %s2168_s12, 3 }
   0x4   : > { %p138_p2 = pnand %p1555_p0, %p137_p1 }
   0x5   : > { %p161_p3 = scmp.lt.s32.totalorder (!%p138_p2), %s1551_s13, 1 }
   0x6   : > { %141 = sbr.rel (%p138_p2) target bundleno = 380 (0x17c), region = 32 }
   0xb   : > { %v2078_v0 = vld [vmem:[%s2570_s1 + $0x78] sm:$0xff]   ;;  %v2170_v1 = vmov 0.0   ;;  %v2080_v3 = vld [vmem:[%s2570_s1 + $0x70] sm:$0xff]   ;;  %vm2171_vm0 = vmmov 0   ;;  %s2574_s13 = smov (!%p161_p3, %s1551_s13), 1  ;;  %v2082_v5 = vld [vmem:[%s2570_s1 + $0x68] sm:$0xff]   ;;  %v254_v9 = vlaneseq }
   0xc   : > { %1886 = vmatprep.subr.bf16.mxu0 %v2170_v1  ;;  %1906 = vmatprep.subr.bf16.mxu1 %v2170_v1  ;;  %v2079_v2 = vld [vmem:[%s2570_s1 + $0x38] sm:$0xff]   ;;  %v2081_v4 = vld [vmem:[%s2570_s1 + $0x30] sm:$0xff]   ;;  %v2083_v6 = vld [vmem:[%s2570_s1 + $0x28] sm:$0xff]   ;;  %s2066_s26 = smul.u32 3040, %s2574_s13  ;;  %v2172_v17 = vmov 1983009808  }
   0xd   : > { %1887 = vmatpush3.bf16.msra.mxu0 %v2078_v0  ;;  %1902 = vmatprep.mubr.msk.bf16.mxu0 %vm2171_vm0, %v2170_v1  ;;  %v2084_v7 = vld [vmem:[%s2570_s1 + $0x60] sm:$0xff]   ;;  %v2086_v10 = vld [vmem:[%s2570_s1 + $0x58] sm:$0xff]   ;;  %v255_v12 = vshrl.u32 %v254_v9, 7  ;;  %v2088_v13 = vld [vmem:[%s2570_s1 + $0x50] sm:$0xff]   ;;  %v252_v18 = vunpack.c.l.s4 %v2172_v17  ;;  %s1804_s18 = sshll.u32 %s2574_s13, 3 }
   0xe   : > { %1907 = vmatpush3.bf16.msra.mxu1 %v2079_v2  ;;  %1888 = vmatprep.subr.bf16.mxu0 %v2170_v1  ;;  %v2085_v8 = vld [vmem:[%s2570_s1 + $0x20] sm:$0xff]   ;;  %s2243_s6 = scalar_lea.vmem %s2569_s0, %s2066_s26  ;;  %v2087_v11 = vld [vmem:[%s2570_s1 + $0x18] sm:$0xff]   ;;  %v2089_v15 = vld [vmem:[%s2570_s1 + $0x10] sm:$0xff]   ;;  %s170_s21 = scalar_lea.vmem %s2572_s3, %s1804_s18 }
   0xf   : > { %1908 = vmatprep.subr.bf16.mxu1 %v2170_v1  ;;  %1922 = vmatprep.mubr.msk.bf16.mxu1 %vm2171_vm0, %v2170_v1  ;;  %v1559_v14 = vld.sshfl [vmem:[%s2243_s6 + $0x10] sm:$0x30 pattern:$0x76325410]  ;;  %v253_v21 = vunpack.c.0.s8 %v252_v18  ;;  %v2090_v23 = vld [vmem:[%s2570_s1 + $0x48] sm:$0xff]   ;;  %v2092_v31 = vld [vmem:[%s2570_s1 + $0x40] sm:$0xff]  }
  0x10   : > { %v1560_v16 = vld.sshfl [vmem:[%s2243_s6 + $0x38] sm:$0x30 pattern:$0x76325410]  ;;  %v2091_v28 = vld [vmem:[%s2570_s1 + $0x8] sm:$0xff]   ;;  %v2093_v34 = vld [vmem:[%s2570_s1] sm:$0xff]  }
  0x11   : > { %1889 = vmatpush3.bf16.msra.mxu0 %v2080_v3  ;;  %v1561_v19 = vld.sshfl [vmem:[%s2243_s6 + $0x60] sm:$0x30 pattern:$0x76325410]  ;;  %v1579_v24 = vcombine.high %v1559_v14, %v1560_v16  ;;  %v2269_v26 = vsub.s32 %v253_v21, %v255_v12  ;;  %v2096_v37 = vld [vmem:[%s2570_s1 + $0xb8] sm:$0xff]   ;;  %v2098_v39 = vld [vmem:[%s2570_s1 + $0xb0] sm:$0xff]  }
  0x12   : > { %1909 = vmatpush3.bf16.msra.mxu1 %v2081_v4  ;;  %1890 = vmatprep.subr.bf16.mxu0 %v2170_v1  ;;  %v1562_v20 = vld.sshfl [vmem:[%s2243_s6 + $0x88] sm:$0x30 pattern:$0x76325410]  ;;  %v2097_v38 = vld [vmem:[%s2570_s1 + $0xf8] sm:$0xff]   ;;  %v2099_v40 = vld [vmem:[%s2570_s1 + $0xf0] sm:$0xff]  }
  0x13   : > { %1910 = vmatprep.subr.bf16.mxu1 %v2170_v1  ;;  %v2094_v22 = vld [vmem:[%s2243_s6] ss:$40 sps:$4 sm:$0x33]   ;;  %v1580_v25 = vcombine.high %v1561_v19, %v1562_v20  ;;  %v2095_v27 = vld [vmem:[%s2243_s6 + $0x50] ss:$40 sps:$4 sm:$0x33]   ;;  %v257_v29 = vrot.slane %v1579_v24, %v2269_v26 }
  0x14   : > { %v368_v32 = vrot.slane %v2094_v22, %v2269_v26  ;;  %v375_v33 = vrot.slane %v2095_v27, %v2269_v26  ;;  %v2100_v41 = vld [vmem:[%s2570_s1 + $0xa8] sm:$0xff]   ;;  %v2102_v43 = vld [vmem:[%s2570_s1 + $0xa0] sm:$0xff]   ;;  %v2104_v45 = vld [vmem:[%s2570_s1 + $0x98] sm:$0xff]  }
  0x15   : > { %1891 = vmatpush3.bf16.msra.mxu0 %v2082_v5  ;;  %v264_v30 = vrot.slane %v1580_v25, %v2269_v26  ;;  %v2101_v42 = vld [vmem:[%s2570_s1 + $0xe8] sm:$0xff]   ;;  %v2103_v44 = vld [vmem:[%s2570_s1 + $0xe0] sm:$0xff]   ;;  %v2105_v46 = vld [vmem:[%s2570_s1 + $0xd8] sm:$0xff]  }
  0x16   : > { %1911 = vmatpush3.bf16.msra.mxu1 %v2083_v6  ;;  %1892 = vmatprep.subr.bf16.mxu0 %v2170_v1  ;;  %v376_v36 = vcombine.low %v368_v32, %v375_v33  ;;  %v2106_v47 = vld [vmem:[%s2570_s1 + $0x90] sm:$0xff]   ;;  %v2112_v49 = vld [vmem:[%s2243_s6 + $0x24] ss:$40 sps:$4 sm:$0x33]   ;;  %v2114_v62 = vld [vmem:[%s2570_s1 + $0x138] sm:$0xff]  }
  0x17   : > { %1912 = vmatprep.subr.bf16.mxu1 %v2170_v1  ;;  %v265_v35 = vcombine.low %v257_v29, %v264_v30  ;;  %v2107_v48 = vld [vmem:[%s2570_s1 + $0xd0] sm:$0xff]   ;;  %v2115_v51 = vld [vmem:[%s2243_s6 + $0x5a0] ss:$40 sps:$4 sm:$0x33]   ;;  %v500_v55 = vrot.slane %v2112_v49, %v2269_v26  ;;  %v2117_v0 = vld [vmem:[%s2570_s1 + $0x178] sm:$0xff]  }
  0x18   : > { %v2113_v50 = vld [vmem:[%s2243_s6 + $0x74] ss:$40 sps:$4 sm:$0x33]   ;;  %v2116_v52 = vld [vmem:[%s2243_s6 + $0x5f0] ss:$40 sps:$4 sm:$0x33]   ;;  %v635_v58 = vrot.slane %v2115_v51, %v2269_v26 }
  0x19   : > { %1893 = vmatpush3.bf16.msra.mxu0 %v2084_v7  ;;  %v2108_v53 = vld [vmem:[%s2570_s1 + $0x88] sm:$0xff]   ;;  %v507_v56 = vrot.slane %v2113_v50, %v2269_v26  ;;  %v2110_v57 = vld [vmem:[%s2570_s1 + $0x80] sm:$0xff]   ;;  %v642_v59 = vrot.slane %v2116_v52, %v2269_v26  ;;  %v2118_v2 = vld [vmem:[%s2570_s1 + $0x130] sm:$0xff]  }
  0x1a   : > { %1913 = vmatpush3.bf16.msra.mxu1 %v2085_v8  ;;  %1894 = vmatprep.subr.bf16.mxu0 %v2170_v1  ;;  %v2109_v54 = vld [vmem:[%s2570_s1 + $0xc8] sm:$0xff]   ;;  %v2111_v60 = vld [vmem:[%s2570_s1 + $0xc0] sm:$0xff]   ;;  %v2119_v3 = vld [vmem:[%s2570_s1 + $0x170] sm:$0xff]  }
  0x1b   : > { %1914 = vmatprep.subr.bf16.mxu1 %v2170_v1  ;;  %v508_v61 = vcombine.low %v500_v55, %v507_v56  ;;  %v643_v63 = vcombine.low %v635_v58, %v642_v59  ;;  %v2120_v4 = vld [vmem:[%s2570_s1 + $0x128] sm:$0xff]   ;;  %v2122_v6 = vld [vmem:[%s2570_s1 + $0x120] sm:$0xff]   ;;  %v2124_v8 = vld [vmem:[%s2570_s1 + $0x118] sm:$0xff]  }
  0x1c   : > { %v2121_v5 = vld [vmem:[%s2570_s1 + $0x168] sm:$0xff]   ;;  %v2123_v7 = vld [vmem:[%s2570_s1 + $0x160] sm:$0xff]   ;;  %v2125_v9 = vld [vmem:[%s2570_s1 + $0x158] sm:$0xff]  }
  0x1d   : > { %1895 = vmatpush3.bf16.msra.mxu0 %v2086_v10  ;;  %v2126_v10 = vld [vmem:[%s2570_s1 + $0x110] sm:$0xff]   ;;  %v1654_v12 = vld.sshfl [vmem:[%s2243_s6 + $0x5d8] sm:$0x30 pattern:$0x76325410]  ;;  %v2128_v20 = vld [vmem:[%s2570_s1 + $0x108] sm:$0xff]  }
  0x1e   : > { %1915 = vmatpush3.bf16.msra.mxu1 %v2087_v11  ;;  %1896 = vmatprep.subr.bf16.mxu0 %v2170_v1  ;;  %v1653_v11 = vld.sshfl [vmem:[%s2243_s6 + $0x5b0] sm:$0x30 pattern:$0x76325410]  ;;  %v2129_v21 = vld [vmem:[%s2570_s1 + $0x148] sm:$0xff]   ;;  %v2130_v22 = vld [vmem:[%s2570_s1 + $0x100] sm:$0xff]  }
  0x1f   : > { %1916 = vmatprep.subr.bf16.mxu1 %v2170_v1  ;;  %v1656_v14 = vld.sshfl [vmem:[%s2243_s6 + $0x628] sm:$0x30 pattern:$0x76325410]  ;;  %v1673_v18 = vcombine.high %v1653_v11, %v1654_v12  ;;  %v2131_v25 = vld [vmem:[%s2570_s1 + $0x140] sm:$0xff]   ;;  %v2132_v30 = vld [vmem:[%s2570_s1 + $0x1b8] sm:$0xff]  }
  0x20   : > { %v2133_v16 = vld [vmem:[%s2243_s6 + $0x5c4] ss:$40 sps:$4 sm:$0x33]   ;;  %v2134_v17 = vld [vmem:[%s2243_s6 + $0x614] ss:$40 sps:$4 sm:$0x33]  }
  0x21   : > { %1897 = vmatpush3.bf16.msra.mxu0 %v2088_v13  ;;  %v1655_v13 = vld.sshfl [vmem:[%s2243_s6 + $0x600] sm:$0x30 pattern:$0x76325410]  ;;  %v935_v27 = vrot.slane %v2133_v16, %v2269_v26  ;;  %v2135_v32 = vld [vmem:[%s2570_s1 + $0x1f8] sm:$0xff]   ;;  %v2136_v33 = vld [vmem:[%s2570_s1 + $0x1b0] sm:$0xff]  }
  0x22   : > { %1917 = vmatpush3.bf16.msra.mxu1 %v2089_v15  ;;  %1898 = vmatprep.subr.bf16.mxu0 %v2170_v1  ;;  %v2127_v15 = vld [vmem:[%s2570_s1 + $0x150] sm:$0xff]   ;;  %v1674_v19 = vcombine.high %v1655_v13, %v1656_v14  ;;  %v2146_v49 = vld [vmem:[%s2570_s1 + $0x188] sm:$0xff]   ;;  %v2148_v55 = vld [vmem:[%s2570_s1 + $0x180] sm:$0xff]  }
  0x23   : > { %1918 = vmatprep.subr.bf16.mxu1 %v2170_v1  ;;  %v2147_v52 = vld [vmem:[%s2570_s1 + $0x1c8] sm:$0xff]   ;;  %v2149_v58 = vld [vmem:[%s2570_s1 + $0x1c0] sm:$0xff]  }
  0x24   : > { %v808_v24 = vrot.slane %v1674_v19, %v2269_v26 }
  0x25   : > { %1899 = vmatpush3.bf16.msra.mxu0 %v2090_v23  ;;  %v801_v23 = vrot.slane %v1673_v18, %v2269_v26 }
  0x26   : > { %1919 = vmatpush3.bf16.msra.mxu1 %v2091_v28  ;;  %1900 = vmatprep.subr.bf16.mxu0 %v2170_v1  ;;  %v942_v28 = vrot.slane %v2134_v17, %v2269_v26 }
  0x27   : > { %1920 = vmatprep.subr.bf16.mxu1 %v2170_v1  ;;  %v809_v29 = vcombine.low %v801_v23, %v808_v24 }
  0x29   : > { %1901 = vmatpush3.bf16.msra.mxu0 %v2092_v31  ;;  %v943_v31 = vcombine.low %v935_v27, %v942_v28 }
  0x2a   : > { %1921 = vmatpush3.bf16.msra.mxu1 %v2093_v34  ;;  %1926 = vmatprep.subr.bf16.mxu0 %v2170_v1  ;;  %v2137_v34 = vld [vmem:[%s2570_s1 + $0x1f0] sm:$0xff]  }
  0x2b   : > { %1946 = vmatprep.subr.bf16.mxu1 %v2170_v1 }
  0x2c   : > { %1903 = vmatmul.mubr.bf16.vlgmr.msra.gmra.mxu0 %v265_v35  ;;  %v2138_v35 = vld [vmem:[%s2570_s1 + $0x1a8] sm:$0xff]  }
  0x2d   : > { %1923 = vmatmul.mubr.bf16.vlgmr.msra.gmra.mxu1 %v376_v36  ;;  %1927 = vmatpush3.bf16.msra.mxu0 %v2096_v37  ;;  %v2139_v36 = vld [vmem:[%s2570_s1 + $0x1e8] sm:$0xff]   ;;  %v2140_v37 = vld [vmem:[%s2570_s1 + $0x1a0] sm:$0xff]  }
  0x2e   : > { %1947 = vmatpush3.bf16.msra.mxu1 %v2097_v38  ;;  %1928 = vmatprep.subr.bf16.mxu0 %v2170_v1  ;;  %v2141_v38 = vld [vmem:[%s2570_s1 + $0x1e0] sm:$0xff]  }
  0x2f   : > { %1948 = vmatprep.subr.bf16.mxu1 %v2170_v1  ;;  %1942 = vmatprep.mubr.msk.bf16.mxu0 %vm2171_vm0, %v2170_v1 }
  0x30   : > { %1962 = vmatprep.mubr.msk.bf16.mxu1 %vm2171_vm0, %v2170_v1 }
  0x31   : > { %1929 = vmatpush3.bf16.msra.mxu0 %v2098_v39  ;;  %v2142_v39 = vld [vmem:[%s2570_s1 + $0x198] sm:$0xff]  }
  0x32   : > { %1949 = vmatpush3.bf16.msra.mxu1 %v2099_v40  ;;  %1930 = vmatprep.subr.bf16.mxu0 %v2170_v1  ;;  %v2143_v40 = vld [vmem:[%s2570_s1 + $0x1d8] sm:$0xff]  }
  0x33   : > { %1950 = vmatprep.subr.bf16.mxu1 %v2170_v1 }
  0x35   : > { %1931 = vmatpush3.bf16.msra.mxu0 %v2100_v41  ;;  %v1743_v41 = vld.sshfl [vmem:[%s2243_s6 + $0xb50] sm:$0x30 pattern:$0x76325410] }
  0x36   : > { %1951 = vmatpush3.bf16.msra.mxu1 %v2101_v42  ;;  %1932 = vmatprep.subr.bf16.mxu0 %v2170_v1  ;;  %v1744_v42 = vld.sshfl [vmem:[%s2243_s6 + $0xb78] sm:$0x30 pattern:$0x76325410] }
  0x37   : > { %1952 = vmatprep.subr.bf16.mxu1 %v2170_v1  ;;  %v1763_v50 = vcombine.high %v1743_v41, %v1744_v42 }
  0x39   : > { %1933 = vmatpush3.bf16.msra.mxu0 %v2102_v43  ;;  %v2144_v43 = vld [vmem:[%s2570_s1 + $0x190] sm:$0xff]   ;;  %v1236_v56 = vrot.slane %v1763_v50, %v2269_v26 }
  0x3a   : > { %1953 = vmatpush3.bf16.msra.mxu1 %v2103_v44  ;;  %1934 = vmatprep.subr.bf16.mxu0 %v2170_v1  ;;  %v1745_v44 = vld.sshfl [vmem:[%s2243_s6 + $0xba0] sm:$0x30 pattern:$0x76325410] }
  0x3b   : > { %1954 = vmatprep.subr.bf16.mxu1 %v2170_v1 }
  0x3d   : > { %1935 = vmatpush3.bf16.msra.mxu0 %v2104_v45  ;;  %v2145_v45 = vld [vmem:[%s2570_s1 + $0x1d0] sm:$0xff]  }
  0x3e   : > { %1955 = vmatpush3.bf16.msra.mxu1 %v2105_v46  ;;  %1936 = vmatprep.subr.bf16.mxu0 %v2170_v1  ;;  %v1746_v46 = vld.sshfl [vmem:[%s2243_s6 + $0xbc8] sm:$0x30 pattern:$0x76325410] }
  0x3f   : > { %1956 = vmatprep.subr.bf16.mxu1 %v2170_v1  ;;  %v1764_v51 = vcombine.high %v1745_v44, %v1746_v46 }
  0x41   : > { %1937 = vmatpush3.bf16.msra.mxu0 %v2106_v47  ;;  %v2150_v47 = vld [vmem:[%s2243_s6 + $0xb40] ss:$40 sps:$4 sm:$0x33]  }
  0x42   : > { %1957 = vmatpush3.bf16.msra.mxu1 %v2107_v48  ;;  %1938 = vmatprep.subr.bf16.mxu0 %v2170_v1  ;;  %v2151_v48 = vld [vmem:[%s2243_s6 + $0xb90] ss:$40 sps:$4 sm:$0x33]  }
  0x43   : > { %1958 = vmatprep.subr.bf16.mxu1 %v2170_v1 }
  0x45   : > { %1939 = vmatpush3.bf16.msra.mxu0 %v2108_v53  ;;  %v1070_v53 = vrot.slane %v2150_v47, %v2269_v26 }
  0x46   : > { %1959 = vmatpush3.bf16.msra.mxu1 %v2109_v54  ;;  %1940 = vmatprep.subr.bf16.mxu0 %v2170_v1  ;;  %v1077_v54 = vrot.slane %v2151_v48, %v2269_v26 }
  0x47   : > { %1960 = vmatprep.subr.bf16.mxu1 %v2170_v1 }
  0x48   : > { %v1078_v59 = vcombine.low %v1070_v53, %v1077_v54 }
  0x49   : > { %1941 = vmatpush3.bf16.msra.mxu0 %v2110_v57  ;;  %v1243_v57 = vrot.slane %v1764_v51, %v2269_v26 }
  0x4a   : > { %1961 = vmatpush3.bf16.msra.mxu1 %v2111_v60  ;;  %1966 = vmatprep.subr.bf16.mxu0 %v2170_v1  ;;  %v2152_v60 = vld [vmem:[%s2570_s1 + $0x238] sm:$0xff]  }
  0x4b   : > { %1986 = vmatprep.subr.bf16.mxu1 %v2170_v1 }
  0x4c   : > { %1943 = vmatmul.mubr.bf16.vlgmr.msra.gmra.mxu0 %v508_v61  ;;  %v1244_v61 = vcombine.low %v1236_v56, %v1243_v57  ;;  %v1801_v56 = vld [vmem:[%s2571_s2] ss:$0 sm:$0xff] }
  0x4d   : > { %1967 = vmatpush3.bf16.msra.mxu0 %v2114_v62  ;;  %1963 = vmatmul.mubr.bf16.vlgmr.msra.gmra.mxu1 %v643_v63  ;;  %v2153_v62 = vld [vmem:[%s2570_s1 + $0x230] sm:$0xff]   ;;  %v2154_v63 = vld [vmem:[%s2570_s1 + $0x228] sm:$0xff]  }
  0x4e   : > { %1987 = vmatpush3.bf16.msra.mxu1 %v2117_v0  ;;  %1968 = vmatprep.subr.bf16.mxu0 %v2170_v1  ;;  %v2155_v0 = vld [vmem:[%s2570_s1 + $0x220] sm:$0xff]  }
  0x4f   : > { %1988 = vmatprep.subr.bf16.mxu1 %v2170_v1  ;;  %1982 = vmatprep.mubr.msk.bf16.mxu0 %vm2171_vm0, %v2170_v1 }
  0x50   : > { %2002 = vmatprep.mubr.msk.bf16.mxu1 %vm2171_vm0, %v2170_v1 }
  0x51   : > { %1969 = vmatpush3.bf16.msra.mxu0 %v2118_v2  ;;  %v2156_v2 = vld [vmem:[%s2570_s1 + $0x218] sm:$0xff]  }
  0x52   : > { %1989 = vmatpush3.bf16.msra.mxu1 %v2119_v3  ;;  %1970 = vmatprep.subr.bf16.mxu0 %v2170_v1  ;;  %v2157_v3 = vld [vmem:[%s2570_s1 + $0x210] sm:$0xff]  }
  0x53   : > { %1990 = vmatprep.subr.bf16.mxu1 %v2170_v1 }
  0x55   : > { %1971 = vmatpush3.bf16.msra.mxu0 %v2120_v4  ;;  %v2160_v4 = vld [vmem:[%s2243_s6 + $0xb64] ss:$40 sps:$4 sm:$0x33]  }
  0x56   : > { %1991 = vmatpush3.bf16.msra.mxu1 %v2121_v5  ;;  %1972 = vmatprep.subr.bf16.mxu0 %v2170_v1  ;;  %v2161_v5 = vld [vmem:[%s2243_s6 + $0xbb4] ss:$40 sps:$4 sm:$0x33]  }
  0x57   : > { %1992 = vmatprep.subr.bf16.mxu1 %v2170_v1 }
  0x59   : > { %1973 = vmatpush3.bf16.msra.mxu0 %v2122_v6  ;;  %v2158_v6 = vld [vmem:[%s2570_s1 + $0x208] sm:$0xff]  }
  0x5a   : > { %1993 = vmatpush3.bf16.msra.mxu1 %v2123_v7  ;;  %1974 = vmatprep.subr.bf16.mxu0 %v2170_v1  ;;  %v1370_v7 = vrot.slane %v2160_v4, %v2269_v26 }
  0x5b   : > { %1994 = vmatprep.subr.bf16.mxu1 %v2170_v1 }
  0x5d   : > { %1975 = vmatpush3.bf16.msra.mxu0 %v2124_v8  ;;  %v1377_v8 = vrot.slane %v2161_v5, %v2269_v26 }
  0x5e   : > { %1995 = vmatpush3.bf16.msra.mxu1 %v2125_v9  ;;  %1976 = vmatprep.subr.bf16.mxu0 %v2170_v1  ;;  %v2159_v9 = vld [vmem:[%s2570_s1 + $0x200] sm:$0xff]  }
  0x5f   : > { %1996 = vmatprep.subr.bf16.mxu1 %v2170_v1 }
  0x61   : > { %1977 = vmatpush3.bf16.msra.mxu0 %v2126_v10  ;;  %v1378_v10 = vcombine.low %v1370_v7, %v1377_v8 }
  0x62   : > { %1997 = vmatpush3.bf16.msra.mxu1 %v2127_v15  ;;  %1978 = vmatprep.subr.bf16.mxu0 %v2170_v1 }
  0x63   : > { %1998 = vmatprep.subr.bf16.mxu1 %v2170_v1 }
  0x65   : > { %1979 = vmatpush3.bf16.msra.mxu0 %v2128_v20 }
  0x66   : > { %1999 = vmatpush3.bf16.msra.mxu1 %v2129_v21  ;;  %1980 = vmatprep.subr.bf16.mxu0 %v2170_v1 }
  0x67   : > { %2000 = vmatprep.subr.bf16.mxu1 %v2170_v1 }
  0x69   : > { %1981 = vmatpush3.bf16.msra.mxu0 %v2130_v22 }
  0x6a   : > { %2001 = vmatpush3.bf16.msra.mxu1 %v2131_v25  ;;  %2006 = vmatprep.subr.bf16.mxu0 %v2170_v1 }
  0x6b   : > { %2026 = vmatprep.subr.bf16.mxu1 %v2170_v1 }
  0x6c   : > { %1983 = vmatmul.mubr.bf16.vlgmr.msra.gmra.mxu0 %v809_v29 }
  0x6d   : > { %2007 = vmatpush3.bf16.msra.mxu0 %v2132_v30  ;;  %2003 = vmatmul.mubr.bf16.vlgmr.msra.gmra.mxu1 %v943_v31 }
  0x6e   : > { %2027 = vmatpush3.bf16.msra.mxu1 %v2135_v32  ;;  %2008 = vmatprep.subr.bf16.mxu0 %v2170_v1 }
  0x6f   : > { %2028 = vmatprep.subr.bf16.mxu1 %v2170_v1  ;;  %2022 = vmatprep.mubr.msk.bf16.mxu0 %vm2171_vm0, %v2170_v1 }
  0x70   : > { %2042 = vmatprep.mubr.msk.bf16.mxu1 %vm2171_vm0, %v2170_v1 }
  0x71   : > { %2009 = vmatpush3.bf16.msra.mxu0 %v2136_v33 }
  0x72   : > { %2029 = vmatpush3.bf16.msra.mxu1 %v2137_v34  ;;  %2010 = vmatprep.subr.bf16.mxu0 %v2170_v1 }
  0x73   : > { %2030 = vmatprep.subr.bf16.mxu1 %v2170_v1 }
  0x75   : > { %2011 = vmatpush3.bf16.msra.mxu0 %v2138_v35 }
  0x76   : > { %2031 = vmatpush3.bf16.msra.mxu1 %v2139_v36  ;;  %2012 = vmatprep.subr.bf16.mxu0 %v2170_v1 }
  0x77   : > { %2032 = vmatprep.subr.bf16.mxu1 %v2170_v1 }
  0x79   : > { %2013 = vmatpush3.bf16.msra.mxu0 %v2140_v37 }
  0x7a   : > { %2033 = vmatpush3.bf16.msra.mxu1 %v2141_v38  ;;  %2014 = vmatprep.subr.bf16.mxu0 %v2170_v1 }
  0x7b   : > { %2034 = vmatprep.subr.bf16.mxu1 %v2170_v1 }
  0x7d   : > { %2015 = vmatpush3.bf16.msra.mxu0 %v2142_v39 }
  0x7e   : > { %2035 = vmatpush3.bf16.msra.mxu1 %v2143_v40  ;;  %2016 = vmatprep.subr.bf16.mxu0 %v2170_v1 }
  0x7f   : > { %2036 = vmatprep.subr.bf16.mxu1 %v2170_v1 }
  0x81   : > { %2017 = vmatpush3.bf16.msra.mxu0 %v2144_v43 }
  0x82   : > { %2037 = vmatpush3.bf16.msra.mxu1 %v2145_v45  ;;  %2018 = vmatprep.subr.bf16.mxu0 %v2170_v1 }
  0x83   : > { %2038 = vmatprep.subr.bf16.mxu1 %v2170_v1 }
  0x85   : > { %2019 = vmatpush3.bf16.msra.mxu0 %v2146_v49 }
  0x86   : > { %2039 = vmatpush3.bf16.msra.mxu1 %v2147_v52  ;;  %2020 = vmatprep.subr.bf16.mxu0 %v2170_v1 }
  0x87   : > { %2040 = vmatprep.subr.bf16.mxu1 %v2170_v1 }
  0x89   : > { %2021 = vmatpush3.bf16.msra.mxu0 %v2148_v55 }
  0x8a   : > { %2041 = vmatpush3.bf16.msra.mxu1 %v2149_v58  ;;  %2046 = vmatprep.subr.bf16.mxu0 %v2170_v1 }
  0x8c   : > { %2023 = vmatmul.mubr.bf16.vlgmr.msra.gmra.mxu0 %v1078_v59 }
  0x8d   : > { %2047 = vmatpush3.bf16.msra.mxu0 %v2152_v60  ;;  %2043 = vmatmul.mubr.bf16.vlgmr.msra.gmra.mxu1 %v1244_v61 }
  0x8e   : > { %2048 = vmatprep.subr.bf16.mxu0 %v2170_v1  ;;  %2062 = vmatprep.mubr.msk.bf16.mxu0 %vm2171_vm0, %v2170_v1 }
  0x91   : > { %2049 = vmatpush3.bf16.msra.mxu0 %v2153_v62 }
  0x92   : > { %2050 = vmatprep.subr.bf16.mxu0 %v2170_v1 }
  0x95   : > { %2051 = vmatpush3.bf16.msra.mxu0 %v2154_v63 }
  0x96   : > { %2052 = vmatprep.subr.bf16.mxu0 %v2170_v1 }
  0x99   : > { %2053 = vmatpush3.bf16.msra.mxu0 %v2155_v0 }
  0x9a   : > { %2054 = vmatprep.subr.bf16.mxu0 %v2170_v1 }
  0x9d   : > { %2055 = vmatpush3.bf16.msra.mxu0 %v2156_v2 }
  0x9e   : > { %2056 = vmatprep.subr.bf16.mxu0 %v2170_v1 }
  0xa1   : > { %2057 = vmatpush3.bf16.msra.mxu0 %v2157_v3 }
  0xa2   : > { %2058 = vmatprep.subr.bf16.mxu0 %v2170_v1 }
  0xa5   : > { %2059 = vmatpush3.bf16.msra.mxu0 %v2158_v6 }
  0xa6   : > { %2060 = vmatprep.subr.bf16.mxu0 %v2170_v1 }
  0xa9   : > { %2061 = vmatpush3.bf16.msra.mxu0 %v2159_v9 }
  0xac   : > { %2063 = vmatmul.mubr.bf16.vlgmr.msra.gmra.mxu0 %v1378_v10 }
  0xec   : > { %v349_v11 = vpop.f32.mrf.mxu0 }
  0xed   : > { %v460_v12 = vpop.f32.mrf.mxu1 }
  0xee   : > { %v461_v13 = vadd.f32 %v460_v12, %v349_v11  ;;  %v1904_v14 = vpop.f32.mrf.mxu0 }
  0xef   : > { %v1924_v15 = vpop.f32.mrf.mxu1 }
  0xf0   : > { %v352_v16 = vpop.f32.mrf.mxu0 }
  0xf1   : > { %v463_v17 = vpop.f32.mrf.mxu1 }
  0xf2   : > { %v464_v18 = vadd.f32 %v463_v17, %v352_v16  ;;  %v1905_v19 = vpop.f32.mrf.mxu0 }
  0xf3   : > { %v1925_v26 = vpop.f32.mrf.mxu1 }
 0x10c   : > { %v592_v20 = vpop.f32.mrf.mxu0 }
 0x10d   : > { %v599_v21 = vadd.f32 %v592_v20, %v461_v13  ;;  %v727_v22 = vpop.f32.mrf.mxu1 }
 0x10e   : > { %v1944_v23 = vpop.f32.mrf.mxu0 }
 0x10f   : > { %v734_v24 = vadd.f32 %v727_v22, %v599_v21  ;;  %v1964_v25 = vpop.f32.mrf.mxu1 }
 0x110   : > { %v595_v1 = vpop.f32.mrf.mxu0 }
 0x111   : > { %v600_v27 = vadd.f32 %v595_v1, %v464_v18  ;;  %v730_v28 = vpop.f32.mrf.mxu1 }
 0x112   : > { %v1945_v29 = vpop.f32.mrf.mxu0 }
 0x113   : > { %v735_v30 = vadd.f32 %v730_v28, %v600_v27  ;;  %v1965_v31 = vpop.f32.mrf.mxu1 }
 0x12c   : > { %v893_v32 = vpop.f32.mrf.mxu0 }
 0x12d   : > { %v1027_v33 = vpop.f32.mrf.mxu1  ;;  %v900_v48 = vadd.f32 %v893_v32, %v734_v24 }
 0x12e   : > { %v1984_v34 = vpop.f32.mrf.mxu0 }
 0x12f   : > { %v2004_v35 = vpop.f32.mrf.mxu1  ;;  %v1034_v49 = vadd.f32 %v1027_v33, %v900_v48 }
 0x130   : > { %v896_v36 = vpop.f32.mrf.mxu0 }
 0x131   : > { %v1030_v37 = vpop.f32.mrf.mxu1  ;;  %v901_v50 = vadd.f32 %v896_v36, %v735_v30 }
 0x132   : > { %v1985_v38 = vpop.f32.mrf.mxu0 }
 0x133   : > { %v2005_v39 = vpop.f32.mrf.mxu1  ;;  %v1035_v52 = vadd.f32 %v1030_v37, %v901_v50 }
 0x14c   : > { %v1162_v40 = vpop.f32.mrf.mxu0 }
 0x14d   : > { %v1328_v41 = vpop.f32.mrf.mxu1  ;;  %v1169_v51 = vadd.f32 %v1162_v40, %v1034_v49 }
 0x14e   : > { %v2024_v42 = vpop.f32.mrf.mxu0 }
 0x14f   : > { %v2044_v43 = vpop.f32.mrf.mxu1  ;;  %v1335_v53 = vadd.f32 %v1328_v41, %v1169_v51 }
 0x150   : > { %v1165_v44 = vpop.f32.mrf.mxu0 }
 0x151   : > { %v1331_v45 = vpop.f32.mrf.mxu1  ;;  %v1170_v54 = vadd.f32 %v1165_v44, %v1035_v52 }
 0x152   : > { %v2025_v46 = vpop.f32.mrf.mxu0 }
 0x153   : > { %v2045_v47 = vpop.f32.mrf.mxu1  ;;  %v1336_v59 = vadd.f32 %v1331_v45, %v1170_v54 }
 0x16c   : > { %v1462_v55 = vpop.f32.mrf.mxu0 }
 0x16d   : > { %v1469_v57 = vadd.f32 %v1462_v55, %v1335_v53 }
 0x16e   : > { %v2064_v58 = vpop.f32.mrf.mxu0 }
 0x16f   : > { %v1478_v60 = vadd.f32 %v1801_v56, %v1469_v57 }
 0x170   : > { %v1465_v61 = vpop.f32.mrf.mxu0 }
 0x171   : > { %v1480_v62 = vmax.f32 %v1478_v60, 0.0  ;;  %v1470_v63 = vadd.f32 %v1465_v61, %v1336_v59 }
 0x172   : > { %v2065_v0 = vpop.f32.mrf.mxu0 }
 0x173   : > { %v1484_v2 = vcombine.high %v1480_v62, %v1480_v62  ;;  %v1488_v3 = vpack.c.bf16 %v1480_v62, %v1480_v62  ;;  %v1479_v4 = vadd.f32 %v1801_v56, %v1470_v63 }
 0x175   : > { %v1489_v5 = vpack.c.bf16 %v1484_v2, %v1484_v2  ;;  %1492 = vst [vmem:[%s170_s21] sm:$0x3] %v1488_v3  ;;  %v1481_v6 = vmax.f32 %v1479_v4, 0.0 }
 0x177   : > { %1493 = vst [vmem:[%s170_s21 + $0x2] sm:$0x3] %v1489_v5  ;;  %v1485_v7 = vcombine.high %v1481_v6, %v1481_v6  ;;  %v1490_v8 = vpack.c.bf16 %v1481_v6, %v1481_v6 }
 0x179   : > { %v1491_v9 = vpack.c.bf16 %v1485_v7, %v1485_v7  ;;  %1494 = vst [vmem:[%s170_s21 + $0x4] sm:$0x3] %v1490_v8 }
 0x17b   : > { %1495 = vst [vmem:[%s170_s21 + $0x6] sm:$0x3] %v1491_v9 }
 0x17c PF: > { %s13_s12 = sadd.s32 1, %s2168_s12  }
 0x17d   : > { %p10_p4 = scmp.ge.s32.totalorder %s13_s12, 4  }
 0x17f   :  { %12 = sbr.rel (!%p10_p4) target bundleno = 1 (0x1), region = 72 }

// kernel: deeplabv3_forward.21
= control target key start
LH: loop header
LB: loop body
LE: loop exit
PB: predicated region body
PF: predicated region fallthrough
CT: control target
= control target key end

     0   :  { %s2085_s12 = smov 0   ;;  %s2455_s0 = inlined_call_operand.vmem [shape: bf16[2,52,52,128], index: 0, kind: input, shape index: {}]   ;;  %s2456_s1 = inlined_call_operand.vmem [shape: bf16[9,128,128], index: 1, kind: input, shape index: {}]   ;;  %s2457_s2 = inlined_call_operand.vmem [shape: f32[1,1,128], index: 2, kind: input, shape index: {}]   ;;  %s2458_s3 = inlined_call_operand.vmem [shape: bf16[2,4,4,128], index: 3, kind: output, shape index: {}]  }
   0x1 LB: > { %s1455_s13 = sadd.s32 4294967295, %s2060_s12   ;;  %p1459_p0 = scmp.ge.s32.totalorder %s2060_s12, 1  ;;  %s2060_s12 = sphi %s2085_s12, %s13_s12  }
   0x2   : > { %p137_p1 = scmp.lt.s32.totalorder %s2060_s12, 3 }
   0x4   : > { %p138_p2 = pnand %p1459_p0, %p137_p1 }
   0x5   : > { %p161_p3 = scmp.lt.s32.totalorder (!%p138_p2), %s1455_s13, 1 }
   0x6   : > { %141 = sbr.rel (%p138_p2) target bundleno = 380 (0x17c), region = 32 }
   0xb   : > { %v1964_v0 = vld [vmem:[%s2456_s1 + $0x78] sm:$0xff]   ;;  %v2062_v1 = vmov 0.0   ;;  %v1966_v3 = vld [vmem:[%s2456_s1 + $0x70] sm:$0xff]   ;;  %vm2063_vm0 = vmmov 0   ;;  %v1968_v5 = vld [vmem:[%s2456_s1 + $0x68] sm:$0xff]   ;;  %s2460_s13 = smov (!%p161_p3, %s1455_s13), 1  ;;  %v222_v10 = vlaneseq }
   0xc   : > { %1772 = vmatprep.subr.bf16.mxu0 %v2062_v1  ;;  %1792 = vmatprep.subr.bf16.mxu1 %v2062_v1  ;;  %v1965_v2 = vld [vmem:[%s2456_s1 + $0x38] sm:$0xff]   ;;  %v1967_v4 = vld [vmem:[%s2456_s1 + $0x30] sm:$0xff]   ;;  %v1969_v6 = vld [vmem:[%s2456_s1 + $0x28] sm:$0xff]   ;;  %s1952_s30 = smul.u32 1456, %s2460_s13  ;;  %v2064_v17 = vmov 1983009808  }
   0xd   : > { %1773 = vmatpush3.bf16.msra.mxu0 %v1964_v0  ;;  %1788 = vmatprep.mubr.msk.bf16.mxu0 %vm2063_vm0, %v2062_v1  ;;  %v1970_v7 = vld [vmem:[%s2456_s1 + $0x60] sm:$0xff]   ;;  %v1972_v9 = vld [vmem:[%s2456_s1 + $0x58] sm:$0xff]   ;;  %v1974_v12 = vld [vmem:[%s2456_s1 + $0x50] sm:$0xff]   ;;  %v223_v14 = vshrl.u32 %v222_v10, 7  ;;  %v220_v18 = vunpack.c.l.s4 %v2064_v17  ;;  %s1690_s18 = sshll.u32 %s2460_s13, 3 }
   0xe   : > { %1793 = vmatpush3.bf16.msra.mxu1 %v1965_v2  ;;  %1774 = vmatprep.subr.bf16.mxu0 %v2062_v1  ;;  %v1971_v8 = vld [vmem:[%s2456_s1 + $0x20] sm:$0xff]   ;;  %v1973_v11 = vld [vmem:[%s2456_s1 + $0x18] sm:$0xff]   ;;  %s2142_s10 = scalar_lea.vmem %s2455_s0, %s1952_s30  ;;  %v1975_v13 = vld [vmem:[%s2456_s1 + $0x10] sm:$0xff]   ;;  %s170_s21 = scalar_lea.vmem %s2458_s3, %s1690_s18 }
   0xf   : > { %1794 = vmatprep.subr.bf16.mxu1 %v2062_v1  ;;  %1808 = vmatprep.mubr.msk.bf16.mxu1 %vm2063_vm0, %v2062_v1  ;;  %v1980_v15 = vld [vmem:[%s2142_s10 + $0xc] ss:$28 sps:$4 sm:$0x33]   ;;  %v1981_v16 = vld [vmem:[%s2142_s10 + $0x44] ss:$28 sps:$4 sm:$0x33]   ;;  %v221_v22 = vunpack.c.0.s8 %v220_v18 }
  0x10   : > { %v1976_v19 = vld [vmem:[%s2456_s1 + $0x48] sm:$0xff]   ;;  %v1982_v20 = vld [vmem:[%s2142_s10] ss:$28 sps:$4 sm:$0x33]   ;;  %v1986_v35 = vld [vmem:[%s2456_s1 + $0xb0] sm:$0xff]  }
  0x11   : > { %1775 = vmatpush3.bf16.msra.mxu0 %v1966_v3  ;;  %v1977_v21 = vld [vmem:[%s2456_s1 + $0x8] sm:$0xff]   ;;  %v1983_v23 = vld [vmem:[%s2142_s10 + $0x38] ss:$28 sps:$4 sm:$0x33]   ;;  %v2164_v24 = vsub.s32 %v221_v22, %v223_v14  ;;  %v1978_v27 = vld [vmem:[%s2456_s1 + $0x40] sm:$0xff]  }
  0x12   : > { %1795 = vmatpush3.bf16.msra.mxu1 %v1967_v4  ;;  %1776 = vmatprep.subr.bf16.mxu0 %v2062_v1  ;;  %v1979_v30 = vld [vmem:[%s2456_s1] sm:$0xff]   ;;  %v1984_v33 = vld [vmem:[%s2456_s1 + $0xb8] sm:$0xff]   ;;  %v1987_v36 = vld [vmem:[%s2456_s1 + $0xf0] sm:$0xff]  }
  0x13   : > { %1796 = vmatprep.subr.bf16.mxu1 %v2062_v1  ;;  %v225_v25 = vrot.slane %v1980_v15, %v2164_v24  ;;  %v232_v26 = vrot.slane %v1981_v16, %v2164_v24  ;;  %v336_v28 = vrot.slane %v1982_v20, %v2164_v24  ;;  %v343_v29 = vrot.slane %v1983_v23, %v2164_v24  ;;  %v1985_v34 = vld [vmem:[%s2456_s1 + $0xf8] sm:$0xff]   ;;  %v1988_v37 = vld [vmem:[%s2456_s1 + $0xa8] sm:$0xff]   ;;  %v1990_v39 = vld [vmem:[%s2456_s1 + $0xa0] sm:$0xff]  }
  0x14   : > { %v1989_v38 = vld [vmem:[%s2456_s1 + $0xe8] sm:$0xff]   ;;  %v1991_v40 = vld [vmem:[%s2456_s1 + $0xe0] sm:$0xff]   ;;  %v1992_v41 = vld [vmem:[%s2456_s1 + $0x98] sm:$0xff]  }
  0x15   : > { %1777 = vmatpush3.bf16.msra.mxu0 %v1968_v5  ;;  %v233_v31 = vcombine.low %v225_v25, %v232_v26  ;;  %v344_v32 = vcombine.low %v336_v28, %v343_v29  ;;  %v1993_v42 = vld [vmem:[%s2456_s1 + $0xd8] sm:$0xff]   ;;  %v1994_v43 = vld [vmem:[%s2456_s1 + $0x90] sm:$0xff]   ;;  %v1996_v49 = vld [vmem:[%s2456_s1 + $0x88] sm:$0xff]  }
  0x16   : > { %1797 = vmatpush3.bf16.msra.mxu1 %v1969_v6  ;;  %1778 = vmatprep.subr.bf16.mxu0 %v2062_v1  ;;  %v1995_v44 = vld [vmem:[%s2456_s1 + $0xd0] sm:$0xff]   ;;  %v2003_v47 = vld [vmem:[%s2142_s10 + $0x2a0] ss:$28 sps:$4 sm:$0x33]   ;;  %v1997_v50 = vld [vmem:[%s2456_s1 + $0xc8] sm:$0xff]  }
  0x17   : > { %1798 = vmatprep.subr.bf16.mxu1 %v2062_v1  ;;  %v2000_v45 = vld [vmem:[%s2142_s10 + $0x18] ss:$28 sps:$4 sm:$0x33]   ;;  %v2001_v46 = vld [vmem:[%s2142_s10 + $0x50] ss:$28 sps:$4 sm:$0x33]   ;;  %v603_v54 = vrot.slane %v2003_v47, %v2164_v24 }
  0x18   : > { %v2004_v48 = vld [vmem:[%s2142_s10 + $0x2d8] ss:$28 sps:$4 sm:$0x33]   ;;  %v468_v51 = vrot.slane %v2000_v45, %v2164_v24  ;;  %v475_v52 = vrot.slane %v2001_v46, %v2164_v24  ;;  %v1998_v53 = vld [vmem:[%s2456_s1 + $0x80] sm:$0xff]   ;;  %v2008_v63 = vld [vmem:[%s2456_s1 + $0x128] sm:$0xff]  }
  0x19   : > { %1779 = vmatpush3.bf16.msra.mxu0 %v1970_v7  ;;  %v610_v55 = vrot.slane %v2004_v48, %v2164_v24  ;;  %v1999_v56 = vld [vmem:[%s2456_s1 + $0xc0] sm:$0xff]   ;;  %v2002_v58 = vld [vmem:[%s2456_s1 + $0x138] sm:$0xff]   ;;  %v2006_v61 = vld [vmem:[%s2456_s1 + $0x130] sm:$0xff]  }
  0x1a   : > { %1799 = vmatpush3.bf16.msra.mxu1 %v1971_v8  ;;  %1780 = vmatprep.subr.bf16.mxu0 %v2062_v1  ;;  %v476_v57 = vcombine.low %v468_v51, %v475_v52  ;;  %v2005_v60 = vld [vmem:[%s2456_s1 + $0x178] sm:$0xff]   ;;  %v2007_v62 = vld [vmem:[%s2456_s1 + $0x170] sm:$0xff]   ;;  %v2009_v0 = vld [vmem:[%s2456_s1 + $0x168] sm:$0xff]  }
  0x1b   : > { %1800 = vmatprep.subr.bf16.mxu1 %v2062_v1  ;;  %v611_v59 = vcombine.low %v603_v54, %v610_v55  ;;  %v2010_v2 = vld [vmem:[%s2456_s1 + $0x120] sm:$0xff]   ;;  %v2012_v4 = vld [vmem:[%s2456_s1 + $0x118] sm:$0xff]   ;;  %v2014_v6 = vld [vmem:[%s2456_s1 + $0x110] sm:$0xff]  }
  0x1c   : > { %v2011_v3 = vld [vmem:[%s2456_s1 + $0x160] sm:$0xff]   ;;  %v2013_v5 = vld [vmem:[%s2456_s1 + $0x158] sm:$0xff]   ;;  %v2015_v7 = vld [vmem:[%s2456_s1 + $0x150] sm:$0xff]  }
  0x1d   : > { %1781 = vmatpush3.bf16.msra.mxu0 %v1972_v9  ;;  %v2020_v8 = vld [vmem:[%s2142_s10 + $0x2ac] ss:$28 sps:$4 sm:$0x33]   ;;  %v2021_v9 = vld [vmem:[%s2142_s10 + $0x2e4] ss:$28 sps:$4 sm:$0x33]  }
  0x1e   : > { %1801 = vmatpush3.bf16.msra.mxu1 %v1973_v11  ;;  %1782 = vmatprep.subr.bf16.mxu0 %v2062_v1  ;;  %v2023_v10 = vld [vmem:[%s2142_s10 + $0x2b8] ss:$28 sps:$4 sm:$0x33]   ;;  %v2024_v11 = vld [vmem:[%s2142_s10 + $0x2f0] ss:$28 sps:$4 sm:$0x33]   ;;  %v737_v15 = vrot.slane %v2020_v8, %v2164_v24  ;;  %v744_v16 = vrot.slane %v2021_v9, %v2164_v24 }
  0x1f   : > { %1802 = vmatprep.subr.bf16.mxu1 %v2062_v1  ;;  %v2018_v14 = vld [vmem:[%s2456_s1 + $0x100] sm:$0xff]   ;;  %v871_v17 = vrot.slane %v2023_v10, %v2164_v24  ;;  %v878_v18 = vrot.slane %v2024_v11, %v2164_v24  ;;  %v2025_v23 = vld [vmem:[%s2456_s1 + $0x1f8] sm:$0xff]   ;;  %v2026_v25 = vld [vmem:[%s2456_s1 + $0x1b0] sm:$0xff]  }
  0x20   : > { %v745_v20 = vcombine.low %v737_v15, %v744_v16  ;;  %v2027_v26 = vld [vmem:[%s2456_s1 + $0x1f0] sm:$0xff]   ;;  %v2029_v28 = vld [vmem:[%s2456_s1 + $0x1e8] sm:$0xff]   ;;  %v2030_v29 = vld [vmem:[%s2456_s1 + $0x1a0] sm:$0xff]  }
  0x21   : > { %1783 = vmatpush3.bf16.msra.mxu0 %v1974_v12  ;;  %v2016_v12 = vld [vmem:[%s2456_s1 + $0x108] sm:$0xff]   ;;  %v879_v22 = vcombine.low %v871_v17, %v878_v18  ;;  %v2039_v46 = vld [vmem:[%s2456_s1 + $0x1c0] sm:$0xff]   ;;  %v2042_v48 = vld [vmem:[%s2456_s1 + $0x238] sm:$0xff]  }
  0x22   : > { %1803 = vmatpush3.bf16.msra.mxu1 %v1975_v13  ;;  %1784 = vmatprep.subr.bf16.mxu0 %v2062_v1  ;;  %v2017_v13 = vld [vmem:[%s2456_s1 + $0x148] sm:$0xff]   ;;  %v2047_v52 = vld [vmem:[%s2456_s1 + $0x220] sm:$0xff]   ;;  %v2049_v54 = vld [vmem:[%s2456_s1 + $0x210] sm:$0xff]  }
  0x23   : > { %1804 = vmatprep.subr.bf16.mxu1 %v2062_v1  ;;  %v2046_v51 = vld [vmem:[%s2456_s1 + $0x228] sm:$0xff]   ;;  %v2052_v55 = vld [vmem:[%s2142_s10 + $0x558] ss:$28 sps:$4 sm:$0x33]  }
  0x25   : > { %1785 = vmatpush3.bf16.msra.mxu0 %v1976_v19  ;;  %v2019_v19 = vld [vmem:[%s2456_s1 + $0x140] sm:$0xff]  }
  0x26   : > { %1805 = vmatpush3.bf16.msra.mxu1 %v1977_v21  ;;  %1786 = vmatprep.subr.bf16.mxu0 %v2062_v1  ;;  %v2022_v21 = vld [vmem:[%s2456_s1 + $0x1b8] sm:$0xff]  }
  0x27   : > { %1806 = vmatprep.subr.bf16.mxu1 %v2062_v1 }
  0x29   : > { %1787 = vmatpush3.bf16.msra.mxu0 %v1978_v27  ;;  %v2028_v27 = vld [vmem:[%s2456_s1 + $0x1a8] sm:$0xff]  }
  0x2a   : > { %1807 = vmatpush3.bf16.msra.mxu1 %v1979_v30  ;;  %1812 = vmatprep.subr.bf16.mxu0 %v2062_v1  ;;  %v2031_v30 = vld [vmem:[%s2456_s1 + $0x1e0] sm:$0xff]  }
  0x2b   : > { %1832 = vmatprep.subr.bf16.mxu1 %v2062_v1 }
  0x2c   : > { %1789 = vmatmul.mubr.bf16.vlgmr.msra.gmra.mxu0 %v233_v31  ;;  %v2032_v31 = vld [vmem:[%s2456_s1 + $0x198] sm:$0xff]  }
  0x2d   : > { %1809 = vmatmul.mubr.bf16.vlgmr.msra.gmra.mxu1 %v344_v32  ;;  %1813 = vmatpush3.bf16.msra.mxu0 %v1984_v33  ;;  %v2033_v32 = vld [vmem:[%s2456_s1 + $0x1d8] sm:$0xff]   ;;  %v2034_v33 = vld [vmem:[%s2456_s1 + $0x190] sm:$0xff]  }
  0x2e   : > { %1833 = vmatpush3.bf16.msra.mxu1 %v1985_v34  ;;  %1814 = vmatprep.subr.bf16.mxu0 %v2062_v1  ;;  %v2035_v34 = vld [vmem:[%s2456_s1 + $0x1d0] sm:$0xff]  }
  0x2f   : > { %1834 = vmatprep.subr.bf16.mxu1 %v2062_v1  ;;  %1828 = vmatprep.mubr.msk.bf16.mxu0 %vm2063_vm0, %v2062_v1 }
  0x30   : > { %1848 = vmatprep.mubr.msk.bf16.mxu1 %vm2063_vm0, %v2062_v1 }
  0x31   : > { %1815 = vmatpush3.bf16.msra.mxu0 %v1986_v35  ;;  %v2036_v35 = vld [vmem:[%s2456_s1 + $0x188] sm:$0xff]  }
  0x32   : > { %1835 = vmatpush3.bf16.msra.mxu1 %v1987_v36  ;;  %1816 = vmatprep.subr.bf16.mxu0 %v2062_v1  ;;  %v2040_v36 = vld [vmem:[%s2142_s10 + $0x540] ss:$28 sps:$4 sm:$0x33]  }
  0x33   : > { %1836 = vmatprep.subr.bf16.mxu1 %v2062_v1 }
  0x35   : > { %1817 = vmatpush3.bf16.msra.mxu0 %v1988_v37  ;;  %v2041_v37 = vld [vmem:[%s2142_s10 + $0x578] ss:$28 sps:$4 sm:$0x33]  }
  0x36   : > { %1837 = vmatpush3.bf16.msra.mxu1 %v1989_v38  ;;  %1818 = vmatprep.subr.bf16.mxu0 %v2062_v1  ;;  %v2043_v38 = vld [vmem:[%s2142_s10 + $0x54c] ss:$28 sps:$4 sm:$0x33]  }
  0x37   : > { %1838 = vmatprep.subr.bf16.mxu1 %v2062_v1 }
  0x39   : > { %1819 = vmatpush3.bf16.msra.mxu0 %v1990_v39  ;;  %v2044_v39 = vld [vmem:[%s2142_s10 + $0x584] ss:$28 sps:$4 sm:$0x33]  }
  0x3a   : > { %1839 = vmatpush3.bf16.msra.mxu1 %v1991_v40  ;;  %1820 = vmatprep.subr.bf16.mxu0 %v2062_v1  ;;  %v2037_v40 = vld [vmem:[%s2456_s1 + $0x1c8] sm:$0xff]   ;;  %v1147_v45 = vrot.slane %v2044_v39, %v2164_v24 }
  0x3b   : > { %1840 = vmatprep.subr.bf16.mxu1 %v2062_v1 }
  0x3d   : > { %1821 = vmatpush3.bf16.msra.mxu0 %v1992_v41  ;;  %v1006_v41 = vrot.slane %v2040_v36, %v2164_v24 }
  0x3e   : > { %1841 = vmatpush3.bf16.msra.mxu1 %v1993_v42  ;;  %1822 = vmatprep.subr.bf16.mxu0 %v2062_v1  ;;  %v1013_v42 = vrot.slane %v2041_v37, %v2164_v24 }
  0x3f   : > { %1842 = vmatprep.subr.bf16.mxu1 %v2062_v1 }
  0x40   : > { %v1014_v47 = vcombine.low %v1006_v41, %v1013_v42 }
  0x41   : > { %1823 = vmatpush3.bf16.msra.mxu0 %v1994_v43  ;;  %v2038_v43 = vld [vmem:[%s2456_s1 + $0x180] sm:$0xff]  }
  0x42   : > { %1843 = vmatpush3.bf16.msra.mxu1 %v1995_v44  ;;  %1824 = vmatprep.subr.bf16.mxu0 %v2062_v1  ;;  %v1140_v44 = vrot.slane %v2043_v38, %v2164_v24 }
  0x43   : > { %1844 = vmatprep.subr.bf16.mxu1 %v2062_v1 }
  0x45   : > { %1825 = vmatpush3.bf16.msra.mxu0 %v1996_v49  ;;  %v1148_v49 = vcombine.low %v1140_v44, %v1147_v45  ;;  %v1687_v44 = vld [vmem:[%s2457_s2] ss:$0 sm:$0xff] }
  0x46   : > { %1845 = vmatpush3.bf16.msra.mxu1 %v1997_v50  ;;  %1826 = vmatprep.subr.bf16.mxu0 %v2062_v1  ;;  %v2045_v50 = vld [vmem:[%s2456_s1 + $0x230] sm:$0xff]  }
  0x47   : > { %1846 = vmatprep.subr.bf16.mxu1 %v2062_v1 }
  0x49   : > { %1827 = vmatpush3.bf16.msra.mxu0 %v1998_v53  ;;  %v2048_v53 = vld [vmem:[%s2456_s1 + $0x218] sm:$0xff]  }
  0x4a   : > { %1847 = vmatpush3.bf16.msra.mxu1 %v1999_v56  ;;  %1852 = vmatprep.subr.bf16.mxu0 %v2062_v1  ;;  %v2053_v56 = vld [vmem:[%s2142_s10 + $0x590] ss:$28 sps:$4 sm:$0x33]  }
  0x4b   : > { %1872 = vmatprep.subr.bf16.mxu1 %v2062_v1 }
  0x4c   : > { %1829 = vmatmul.mubr.bf16.vlgmr.msra.gmra.mxu0 %v476_v57  ;;  %v2050_v57 = vld [vmem:[%s2456_s1 + $0x208] sm:$0xff]  }
  0x4d   : > { %1853 = vmatpush3.bf16.msra.mxu0 %v2002_v58  ;;  %1849 = vmatmul.mubr.bf16.vlgmr.msra.gmra.mxu1 %v611_v59  ;;  %v1274_v58 = vrot.slane %v2052_v55, %v2164_v24  ;;  %v1281_v59 = vrot.slane %v2053_v56, %v2164_v24 }
  0x4e   : > { %1873 = vmatpush3.bf16.msra.mxu1 %v2005_v60  ;;  %1854 = vmatprep.subr.bf16.mxu0 %v2062_v1  ;;  %v2051_v60 = vld [vmem:[%s2456_s1 + $0x200] sm:$0xff]  }
  0x4f   : > { %1874 = vmatprep.subr.bf16.mxu1 %v2062_v1  ;;  %1868 = vmatprep.mubr.msk.bf16.mxu0 %vm2063_vm0, %v2062_v1 }
  0x50   : > { %1888 = vmatprep.mubr.msk.bf16.mxu1 %vm2063_vm0, %v2062_v1 }
  0x51   : > { %1855 = vmatpush3.bf16.msra.mxu0 %v2006_v61  ;;  %v1282_v61 = vcombine.low %v1274_v58, %v1281_v59 }
  0x52   : > { %1875 = vmatpush3.bf16.msra.mxu1 %v2007_v62  ;;  %1856 = vmatprep.subr.bf16.mxu0 %v2062_v1 }
  0x53   : > { %1876 = vmatprep.subr.bf16.mxu1 %v2062_v1 }
  0x55   : > { %1857 = vmatpush3.bf16.msra.mxu0 %v2008_v63 }
  0x56   : > { %1877 = vmatpush3.bf16.msra.mxu1 %v2009_v0  ;;  %1858 = vmatprep.subr.bf16.mxu0 %v2062_v1 }
  0x57   : > { %1878 = vmatprep.subr.bf16.mxu1 %v2062_v1 }
  0x59   : > { %1859 = vmatpush3.bf16.msra.mxu0 %v2010_v2 }
  0x5a   : > { %1879 = vmatpush3.bf16.msra.mxu1 %v2011_v3  ;;  %1860 = vmatprep.subr.bf16.mxu0 %v2062_v1 }
  0x5b   : > { %1880 = vmatprep.subr.bf16.mxu1 %v2062_v1 }
  0x5d   : > { %1861 = vmatpush3.bf16.msra.mxu0 %v2012_v4 }
  0x5e   : > { %1881 = vmatpush3.bf16.msra.mxu1 %v2013_v5  ;;  %1862 = vmatprep.subr.bf16.mxu0 %v2062_v1 }
  0x5f   : > { %1882 = vmatprep.subr.bf16.mxu1 %v2062_v1 }
  0x61   : > { %1863 = vmatpush3.bf16.msra.mxu0 %v2014_v6 }
  0x62   : > { %1883 = vmatpush3.bf16.msra.mxu1 %v2015_v7  ;;  %1864 = vmatprep.subr.bf16.mxu0 %v2062_v1 }
  0x63   : > { %1884 = vmatprep.subr.bf16.mxu1 %v2062_v1 }
  0x65   : > { %1865 = vmatpush3.bf16.msra.mxu0 %v2016_v12 }
  0x66   : > { %1885 = vmatpush3.bf16.msra.mxu1 %v2017_v13  ;;  %1866 = vmatprep.subr.bf16.mxu0 %v2062_v1 }
  0x67   : > { %1886 = vmatprep.subr.bf16.mxu1 %v2062_v1 }
  0x69   : > { %1867 = vmatpush3.bf16.msra.mxu0 %v2018_v14 }
  0x6a   : > { %1887 = vmatpush3.bf16.msra.mxu1 %v2019_v19  ;;  %1892 = vmatprep.subr.bf16.mxu0 %v2062_v1 }
  0x6b   : > { %1912 = vmatprep.subr.bf16.mxu1 %v2062_v1 }
  0x6c   : > { %1869 = vmatmul.mubr.bf16.vlgmr.msra.gmra.mxu0 %v745_v20 }
  0x6d   : > { %1893 = vmatpush3.bf16.msra.mxu0 %v2022_v21  ;;  %1889 = vmatmul.mubr.bf16.vlgmr.msra.gmra.mxu1 %v879_v22 }
  0x6e   : > { %1913 = vmatpush3.bf16.msra.mxu1 %v2025_v23  ;;  %1894 = vmatprep.subr.bf16.mxu0 %v2062_v1 }
  0x6f   : > { %1914 = vmatprep.subr.bf16.mxu1 %v2062_v1  ;;  %1908 = vmatprep.mubr.msk.bf16.mxu0 %vm2063_vm0, %v2062_v1 }
  0x70   : > { %1928 = vmatprep.mubr.msk.bf16.mxu1 %vm2063_vm0, %v2062_v1 }
  0x71   : > { %1895 = vmatpush3.bf16.msra.mxu0 %v2026_v25 }
  0x72   : > { %1915 = vmatpush3.bf16.msra.mxu1 %v2027_v26  ;;  %1896 = vmatprep.subr.bf16.mxu0 %v2062_v1 }
  0x73   : > { %1916 = vmatprep.subr.bf16.mxu1 %v2062_v1 }
  0x75   : > { %1897 = vmatpush3.bf16.msra.mxu0 %v2028_v27 }
  0x76   : > { %1917 = vmatpush3.bf16.msra.mxu1 %v2029_v28  ;;  %1898 = vmatprep.subr.bf16.mxu0 %v2062_v1 }
  0x77   : > { %1918 = vmatprep.subr.bf16.mxu1 %v2062_v1 }
  0x79   : > { %1899 = vmatpush3.bf16.msra.mxu0 %v2030_v29 }
  0x7a   : > { %1919 = vmatpush3.bf16.msra.mxu1 %v2031_v30  ;;  %1900 = vmatprep.subr.bf16.mxu0 %v2062_v1 }
  0x7b   : > { %1920 = vmatprep.subr.bf16.mxu1 %v2062_v1 }
  0x7d   : > { %1901 = vmatpush3.bf16.msra.mxu0 %v2032_v31 }
  0x7e   : > { %1921 = vmatpush3.bf16.msra.mxu1 %v2033_v32  ;;  %1902 = vmatprep.subr.bf16.mxu0 %v2062_v1 }
  0x7f   : > { %1922 = vmatprep.subr.bf16.mxu1 %v2062_v1 }
  0x81   : > { %1903 = vmatpush3.bf16.msra.mxu0 %v2034_v33 }
  0x82   : > { %1923 = vmatpush3.bf16.msra.mxu1 %v2035_v34  ;;  %1904 = vmatprep.subr.bf16.mxu0 %v2062_v1 }
  0x83   : > { %1924 = vmatprep.subr.bf16.mxu1 %v2062_v1 }
  0x85   : > { %1905 = vmatpush3.bf16.msra.mxu0 %v2036_v35 }
  0x86   : > { %1925 = vmatpush3.bf16.msra.mxu1 %v2037_v40  ;;  %1906 = vmatprep.subr.bf16.mxu0 %v2062_v1 }
  0x87   : > { %1926 = vmatprep.subr.bf16.mxu1 %v2062_v1 }
  0x89   : > { %1907 = vmatpush3.bf16.msra.mxu0 %v2038_v43 }
  0x8a   : > { %1927 = vmatpush3.bf16.msra.mxu1 %v2039_v46  ;;  %1932 = vmatprep.subr.bf16.mxu0 %v2062_v1 }
  0x8c   : > { %1909 = vmatmul.mubr.bf16.vlgmr.msra.gmra.mxu0 %v1014_v47 }
  0x8d   : > { %1933 = vmatpush3.bf16.msra.mxu0 %v2042_v48  ;;  %1929 = vmatmul.mubr.bf16.vlgmr.msra.gmra.mxu1 %v1148_v49 }
  0x8e   : > { %1934 = vmatprep.subr.bf16.mxu0 %v2062_v1  ;;  %1948 = vmatprep.mubr.msk.bf16.mxu0 %vm2063_vm0, %v2062_v1 }
  0x91   : > { %1935 = vmatpush3.bf16.msra.mxu0 %v2045_v50 }
  0x92   : > { %1936 = vmatprep.subr.bf16.mxu0 %v2062_v1 }
  0x95   : > { %1937 = vmatpush3.bf16.msra.mxu0 %v2046_v51 }
  0x96   : > { %1938 = vmatprep.subr.bf16.mxu0 %v2062_v1 }
  0x99   : > { %1939 = vmatpush3.bf16.msra.mxu0 %v2047_v52 }
  0x9a   : > { %1940 = vmatprep.subr.bf16.mxu0 %v2062_v1 }
  0x9d   : > { %1941 = vmatpush3.bf16.msra.mxu0 %v2048_v53 }
  0x9e   : > { %1942 = vmatprep.subr.bf16.mxu0 %v2062_v1 }
  0xa1   : > { %1943 = vmatpush3.bf16.msra.mxu0 %v2049_v54 }
  0xa2   : > { %1944 = vmatprep.subr.bf16.mxu0 %v2062_v1 }
  0xa5   : > { %1945 = vmatpush3.bf16.msra.mxu0 %v2050_v57 }
  0xa6   : > { %1946 = vmatprep.subr.bf16.mxu0 %v2062_v1 }
  0xa9   : > { %1947 = vmatpush3.bf16.msra.mxu0 %v2051_v60 }
  0xac   : > { %1949 = vmatmul.mubr.bf16.vlgmr.msra.gmra.mxu0 %v1282_v61 }
  0xec   : > { %v317_v62 = vpop.f32.mrf.mxu0 }
  0xed   : > { %v428_v63 = vpop.f32.mrf.mxu1 }
  0xee   : > { %v429_v0 = vadd.f32 %v428_v63, %v317_v62  ;;  %v1790_v2 = vpop.f32.mrf.mxu0 }
  0xef   : > { %v1810_v3 = vpop.f32.mrf.mxu1 }
  0xf0   : > { %v320_v4 = vpop.f32.mrf.mxu0 }
  0xf1   : > { %v431_v5 = vpop.f32.mrf.mxu1 }
  0xf2   : > { %v432_v6 = vadd.f32 %v431_v5, %v320_v4  ;;  %v1791_v7 = vpop.f32.mrf.mxu0 }
  0xf3   : > { %v1811_v24 = vpop.f32.mrf.mxu1 }
 0x10c   : > { %v560_v8 = vpop.f32.mrf.mxu0 }
 0x10d   : > { %v567_v9 = vadd.f32 %v560_v8, %v429_v0  ;;  %v695_v10 = vpop.f32.mrf.mxu1 }
 0x10e   : > { %v1830_v11 = vpop.f32.mrf.mxu0 }
 0x10f   : > { %v702_v12 = vadd.f32 %v695_v10, %v567_v9  ;;  %v1850_v13 = vpop.f32.mrf.mxu1 }
 0x110   : > { %v563_v1 = vpop.f32.mrf.mxu0 }
 0x111   : > { %v568_v14 = vadd.f32 %v563_v1, %v432_v6  ;;  %v698_v15 = vpop.f32.mrf.mxu1 }
 0x112   : > { %v1831_v16 = vpop.f32.mrf.mxu0 }
 0x113   : > { %v703_v17 = vadd.f32 %v698_v15, %v568_v14  ;;  %v1851_v18 = vpop.f32.mrf.mxu1 }
 0x12c   : > { %v829_v19 = vpop.f32.mrf.mxu0 }
 0x12d   : > { %v963_v20 = vpop.f32.mrf.mxu1  ;;  %v836_v36 = vadd.f32 %v829_v19, %v702_v12 }
 0x12e   : > { %v1870_v21 = vpop.f32.mrf.mxu0 }
 0x12f   : > { %v1890_v22 = vpop.f32.mrf.mxu1  ;;  %v970_v37 = vadd.f32 %v963_v20, %v836_v36 }
 0x130   : > { %v832_v23 = vpop.f32.mrf.mxu0 }
 0x131   : > { %v966_v25 = vpop.f32.mrf.mxu1  ;;  %v837_v38 = vadd.f32 %v832_v23, %v703_v17 }
 0x132   : > { %v1871_v26 = vpop.f32.mrf.mxu0 }
 0x133   : > { %v1891_v27 = vpop.f32.mrf.mxu1  ;;  %v971_v40 = vadd.f32 %v966_v25, %v837_v38 }
 0x14c   : > { %v1098_v28 = vpop.f32.mrf.mxu0 }
 0x14d   : > { %v1232_v29 = vpop.f32.mrf.mxu1  ;;  %v1105_v39 = vadd.f32 %v1098_v28, %v970_v37 }
 0x14e   : > { %v1910_v30 = vpop.f32.mrf.mxu0 }
 0x14f   : > { %v1930_v31 = vpop.f32.mrf.mxu1  ;;  %v1239_v41 = vadd.f32 %v1232_v29, %v1105_v39 }
 0x150   : > { %v1101_v32 = vpop.f32.mrf.mxu0 }
 0x151   : > { %v1235_v33 = vpop.f32.mrf.mxu1  ;;  %v1106_v42 = vadd.f32 %v1101_v32, %v971_v40 }
 0x152   : > { %v1911_v34 = vpop.f32.mrf.mxu0 }
 0x153   : > { %v1931_v35 = vpop.f32.mrf.mxu1  ;;  %v1240_v47 = vadd.f32 %v1235_v33, %v1106_v42 }
 0x16c   : > { %v1366_v43 = vpop.f32.mrf.mxu0 }
 0x16d   : > { %v1373_v45 = vadd.f32 %v1366_v43, %v1239_v41 }
 0x16e   : > { %v1950_v46 = vpop.f32.mrf.mxu0 }
 0x16f   : > { %v1382_v48 = vadd.f32 %v1687_v44, %v1373_v45 }
 0x170   : > { %v1369_v49 = vpop.f32.mrf.mxu0 }
 0x171   : > { %v1384_v50 = vmax.f32 %v1382_v48, 0.0  ;;  %v1374_v51 = vadd.f32 %v1369_v49, %v1240_v47 }
 0x172   : > { %v1951_v52 = vpop.f32.mrf.mxu0 }
 0x173   : > { %v1388_v53 = vcombine.high %v1384_v50, %v1384_v50  ;;  %v1392_v54 = vpack.c.bf16 %v1384_v50, %v1384_v50  ;;  %v1383_v55 = vadd.f32 %v1687_v44, %v1374_v51 }
 0x175   : > { %v1393_v56 = vpack.c.bf16 %v1388_v53, %v1388_v53  ;;  %1396 = vst [vmem:[%s170_s21] sm:$0x3] %v1392_v54  ;;  %v1385_v57 = vmax.f32 %v1383_v55, 0.0 }
 0x177   : > { %1397 = vst [vmem:[%s170_s21 + $0x2] sm:$0x3] %v1393_v56  ;;  %v1389_v58 = vcombine.high %v1385_v57, %v1385_v57  ;;  %v1394_v59 = vpack.c.bf16 %v1385_v57, %v1385_v57 }
 0x179   : > { %v1395_v60 = vpack.c.bf16 %v1389_v58, %v1389_v58  ;;  %1398 = vst [vmem:[%s170_s21 + $0x4] sm:$0x3] %v1394_v59 }
 0x17b   : > { %1399 = vst [vmem:[%s170_s21 + $0x6] sm:$0x3] %v1395_v60 }
 0x17c PF: > { %s13_s12 = sadd.s32 1, %s2060_s12  }
 0x17d   : > { %p10_p4 = scmp.ge.s32.totalorder %s13_s12, 4  }
 0x17f   :  { %12 = sbr.rel (!%p10_p4) target bundleno = 1 (0x1), region = 72 }

// kernel: deeplabv3_forward.19
= control target key start
LH: loop header
LB: loop body
LE: loop exit
PB: predicated region body
PF: predicated region fallthrough
CT: control target
= control target key end

     0   :  { %s482_s12 = smov 0   ;;  %s533_s0 = inlined_call_operand.vmem [shape: bf16[2,4,4,128], index: 0, kind: input, shape index: {}]   ;;  %s534_s1 = inlined_call_operand.vmem [shape: bf16[1,128,128], index: 1, kind: input, shape index: {}]   ;;  %s535_s2 = inlined_call_operand.vmem [shape: f32[1,1,128], index: 2, kind: input, shape index: {}]   ;;  %s536_s3 = inlined_call_operand.vmem [shape: bf16[2,4,4,128], index: 3, kind: output, shape index: {}]  }
   0x1 LB: > { %s381_s13 = sadd.s32 4294967295, %s457_s12   ;;  %p385_p0 = scmp.ge.s32.totalorder %s457_s12, 1  ;;  %s457_s12 = sphi %s482_s12, %s13_s12  }
   0x2   : > { %p137_p1 = scmp.lt.s32.totalorder %s457_s12, 3 }
   0x4   : > { %p138_p2 = pnand %p385_p0, %p137_p1 }
   0x5   : > { %p161_p3 = scmp.lt.s32.totalorder (!%p138_p2), %s381_s13, 1 }
   0x6   : > { %141 = sbr.rel (%p138_p2) target bundleno = 250 (0xfa), region = 32 }
   0xb   : > { %v443_v0 = vld [vmem:[%s534_s1 + $0x38] sm:$0xff]   ;;  %v459_v1 = vmov 0.0   ;;  %v444_v2 = vld [vmem:[%s534_s1 + $0x30] sm:$0xff]   ;;  %vm460_vm0 = vmmov 0   ;;  %v445_v3 = vld [vmem:[%s534_s1 + $0x28] sm:$0xff]   ;;  %s538_s13 = smov (!%p161_p3, %s381_s13), 1  ;;  %v208_v7 = vlaneseq }
   0xc   : > { %412 = vmatprep.subr.bf16.mxu0 %v459_v1  ;;  %428 = vmatprep.mubr.msk.bf16.mxu0 %vm460_vm0, %v459_v1  ;;  %v446_v4 = vld [vmem:[%s534_s1 + $0x20] sm:$0xff]   ;;  %s401_s22 = sshll.u32 %s538_s13, 3  ;;  %v461_v5 = vmov 1983009808   ;;  %v447_v8 = vld [vmem:[%s534_s1 + $0x18] sm:$0xff]   ;;  %v448_v9 = vld [vmem:[%s534_s1 + $0x10] sm:$0xff]  }
   0xd   : > { %413 = vmatpush3.bf16.msra.mxu0 %v443_v0  ;;  %v206_v6 = vunpack.c.l.s4 %v461_v5  ;;  %s165_s27 = scalar_lea.vmem %s533_s0, %s401_s22  ;;  %v209_v12 = vshrl.u32 %v208_v7, 7  ;;  %v449_v19 = vld [vmem:[%s534_s1 + $0x8] sm:$0xff]   ;;  %v450_v22 = vld [vmem:[%s534_s1] sm:$0xff]   ;;  %s170_s11 = scalar_lea.vmem %s536_s3, %s401_s22 }
   0xe   : > { %414 = vmatprep.subr.bf16.mxu0 %v459_v1  ;;  %v172_v10 = vld [vmem:[%s165_s27] sm:$0x3]  ;;  %v173_v13 = vld [vmem:[%s165_s27 + $0x2] sm:$0x3]  ;;  %v174_v14 = vld [vmem:[%s165_s27 + $0x4] sm:$0x3] }
   0xf   : > { %v207_v11 = vunpack.c.0.s8 %v206_v6  ;;  %v175_v15 = vld [vmem:[%s165_s27 + $0x6] sm:$0x3]  ;;  %v203_v16 = vcombine.low %v172_v10, %v173_v13  ;;  %v390_v24 = vld [vmem:[%s535_s2] ss:$0 sm:$0xff] }
  0x10   : > { %v204_v17 = vcombine.low %v174_v14, %v175_v15 }
  0x11   : > { %415 = vmatpush3.bf16.msra.mxu0 %v444_v2  ;;  %v210_v18 = vsub.s32 %v207_v11, %v209_v12 }
  0x12   : > { %416 = vmatprep.subr.bf16.mxu0 %v459_v1 }
  0x13   : > { %v211_v20 = vrot.slane %v203_v16, %v210_v18  ;;  %v218_v21 = vrot.slane %v204_v17, %v210_v18 }
  0x15   : > { %417 = vmatpush3.bf16.msra.mxu0 %v445_v3  ;;  %v219_v23 = vcombine.low %v211_v20, %v218_v21 }
  0x16   : > { %418 = vmatprep.subr.bf16.mxu0 %v459_v1 }
  0x19   : > { %419 = vmatpush3.bf16.msra.mxu0 %v446_v4 }
  0x1a   : > { %420 = vmatprep.subr.bf16.mxu0 %v459_v1 }
  0x1d   : > { %421 = vmatpush3.bf16.msra.mxu0 %v447_v8 }
  0x1e   : > { %422 = vmatprep.subr.bf16.mxu0 %v459_v1 }
  0x21   : > { %423 = vmatpush3.bf16.msra.mxu0 %v448_v9 }
  0x22   : > { %424 = vmatprep.subr.bf16.mxu0 %v459_v1 }
  0x25   : > { %425 = vmatpush3.bf16.msra.mxu0 %v449_v19 }
  0x26   : > { %426 = vmatprep.subr.bf16.mxu0 %v459_v1 }
  0x29   : > { %427 = vmatpush3.bf16.msra.mxu0 %v450_v22 }
  0x2c   : > { %429 = vmatmul.mubr.bf16.vlgmr.msra.gmra.mxu0 %v219_v23 }
  0xec   : > { %v303_v25 = vpop.f32.mrf.mxu0 }
  0xed   : > { %v304_v26 = vadd.f32 %v390_v24, %v303_v25 }
  0xee   : > { %v430_v27 = vpop.f32.mrf.mxu0 }
  0xef   : > { %v310_v28 = vmax.f32 %v304_v26, 0.0 }
  0xf0   : > { %v306_v29 = vpop.f32.mrf.mxu0 }
  0xf1   : > { %v314_v30 = vcombine.high %v310_v28, %v310_v28  ;;  %v318_v31 = vpack.c.bf16 %v310_v28, %v310_v28  ;;  %v307_v32 = vadd.f32 %v390_v24, %v306_v29 }
  0xf2   : > { %v431_v33 = vpop.f32.mrf.mxu0 }
  0xf3   : > { %v319_v34 = vpack.c.bf16 %v314_v30, %v314_v30  ;;  %322 = vst [vmem:[%s170_s11] sm:$0x3] %v318_v31  ;;  %v311_v35 = vmax.f32 %v307_v32, 0.0 }
  0xf5   : > { %323 = vst [vmem:[%s170_s11 + $0x2] sm:$0x3] %v319_v34  ;;  %v315_v36 = vcombine.high %v311_v35, %v311_v35  ;;  %v320_v37 = vpack.c.bf16 %v311_v35, %v311_v35 }
  0xf7   : > { %v321_v38 = vpack.c.bf16 %v315_v36, %v315_v36  ;;  %324 = vst [vmem:[%s170_s11 + $0x4] sm:$0x3] %v320_v37 }
  0xf9   : > { %325 = vst [vmem:[%s170_s11 + $0x6] sm:$0x3] %v321_v38 }
  0xfa PF: > { %s13_s12 = sadd.s32 1, %s457_s12  }
  0xfb   : > { %p10_p4 = scmp.ge.s32.totalorder %s13_s12, 4  }
  0xfd   :  { %12 = sbr.rel (!%p10_p4) target bundleno = 1 (0x1), region = 62 }

// kernel: deeplabv3_forward.23
= control target key start
LH: loop header
LB: loop body
LE: loop exit
PB: predicated region body
PF: predicated region fallthrough
CT: control target
= control target key end

     0   :  { %s228_s6 = smov 0   ;;  %s245_s0 = inlined_call_operand.vmem [shape: bf16[2,4,4,128], index: 0, kind: input, shape index: {}]   ;;  %s246_s1 = inlined_call_operand.vmem [shape: bf16[2,1,1,128], index: 1, kind: output, shape index: {}]  }
   0x1 LB: > { %s192_s7 = sadd.s32 4294967295, %s216_s6   ;;  %p196_p0 = scmp.ge.s32.totalorder %s216_s6, 1  ;;  %s216_s6 = sphi %s228_s6, %s11_s6  }
   0x2   : > { %p87_p1 = scmp.lt.s32.totalorder %s216_s6, 3 }
   0x4   : > { %p88_p2 = pnand %p196_p0, %p87_p1 }
   0x5   : > { %p105_p3 = scmp.lt.s32.totalorder (!%p88_p2), %s192_s7, 1 }
   0x6   : > { %91 = sbr.rel (%p88_p2) target bundleno = 40 (0x28), region = 24 }
   0xb   : > { %s248_s7 = smov (!%p105_p3, %s192_s7), 1  ;;  %vm139_vm0 = vcmask 1040384   ;;  %vm140_vm1 = vsmask.f32 256 }
   0xc   : > { %s201_s8 = sshll.u32 %s248_s7, 3  ;;  %s112_s14 = scalar_lea.vmem %s246_s1, %s248_s7  ;;  %vm141_vm2 = vmand %vm139_vm0, %vm140_vm1 }
   0xd   : > { %s109_s11 = scalar_lea.vmem %s245_s0, %s201_s8  ;;  %v142_v18 = vld [vmem:[%s112_s14] sm:$0x1] }
   0xe   : > { %v113_v0 = vld [vmem:[%s109_s11] sm:$0x3]  ;;  %v114_v1 = vld [vmem:[%s109_s11 + $0x2] sm:$0x3]  ;;  %v115_v2 = vld [vmem:[%s109_s11 + $0x4] sm:$0x3] }
   0xf   : > { %v116_v3 = vld [vmem:[%s109_s11 + $0x6] sm:$0x3]  ;;  %v117_v4 = vunpack.c.l.bf16 %v113_v0  ;;  %v118_v5 = vunpack.c.l.bf16 %v114_v1  ;;  %v119_v6 = vunpack.c.l.bf16 %v115_v2 }
  0x10   : > { %v120_v7 = vunpack.c.l.bf16 %v116_v3 }
  0x11   : > { %v125_v8 = vcombine.low %v117_v4, %v118_v5 }
  0x12   : > { %v126_v9 = vcombine.low %v119_v6, %v120_v7 }
  0x14   : > { %v129_v10 = vadd.f32 %v126_v9, %v125_v8 }
  0x16   : > { %v130_v11 = vrot.slane %v129_v10, 4 }
  0x18   : > { %v131_v12 = vadd.f32 %v130_v11, %v129_v10 }
  0x1a   : > { %v132_v13 = vrot.slane %v131_v12, 2 }
  0x1c   : > { %v133_v14 = vadd.f32 %v132_v13, %v131_v12 }
  0x1e   : > { %v134_v15 = vrot.slane %v133_v14, 1 }
  0x20   : > { %v135_v16 = vadd.f32 %v134_v15, %v133_v14 }
  0x22   : > { %v137_v17 = vmul.f32 0.0625, %v135_v16 }
  0x24   : > { %v138_v19 = vpack.c.bf16 %v137_v17, %v137_v17 }
  0x26   : > { %v143_v20 = vsel %vm141_vm2, %v138_v19, %v142_v18 }
  0x27   : > { %144 = vst [vmem:[%s112_s14] sm:$0x1] %v143_v20 }
  0x28 PF: > { %s11_s6 = sadd.s32 1, %s216_s6  }
  0x29   : > { %p8_p4 = scmp.ge.s32.totalorder %s11_s6, 4  }
  0x2b   :  { %10 = sbr.rel (!%p8_p4) target bundleno = 1 (0x1), region = 54 }

// kernel: deeplabv3_forward.25
= control target key start
LH: loop header
LB: loop body
LE: loop exit
PB: predicated region body
PF: predicated region fallthrough
CT: control target
= control target key end

     0   :  { %s405_s12 = smov 0   ;;  %s449_s0 = inlined_call_operand.vmem [shape: bf16[2,1,1,128], index: 0, kind: input, shape index: {}]   ;;  %s450_s1 = inlined_call_operand.vmem [shape: bf16[1,128,128], index: 1, kind: input, shape index: {}]   ;;  %s451_s2 = inlined_call_operand.vmem [shape: f32[1,1,128], index: 2, kind: input, shape index: {}]   ;;  %s452_s3 = inlined_call_operand.vmem [shape: f32[2,1,1,128], index: 3, kind: output, shape index: {}]  }
   0x1 LB: > { %s313_s13 = sadd.s32 4294967295, %s381_s12   ;;  %p317_p0 = scmp.ge.s32.totalorder %s381_s12, 1  ;;  %s381_s12 = sphi %s405_s12, %s13_s12  }
   0x2   : > { %p135_p1 = scmp.lt.s32.totalorder %s381_s12, 3 }
   0x4   : > { %p136_p2 = pnand %p317_p0, %p135_p1 }
   0x5   : > { %p155_p3 = scmp.lt.s32.totalorder (!%p136_p2), %s313_s13, 1 }
   0x6   : > { %139 = sbr.rel (%p136_p2) target bundleno = 243 (0xf3), region = 32 }
   0xb   : > { %v367_v0 = vld [vmem:[%s450_s1 + $0x38] sm:$0xff]   ;;  %v383_v1 = vmov 0.0   ;;  %v368_v2 = vld [vmem:[%s450_s1 + $0x30] sm:$0xff]   ;;  %vm384_vm0 = vmmov 0   ;;  %v369_v3 = vld [vmem:[%s450_s1 + $0x28] sm:$0xff]   ;;  %s454_s13 = smov (!%p155_p3, %s313_s13), 1 }
   0xc   : > { %337 = vmatprep.subr.bf16.mxu0 %v383_v1  ;;  %353 = vmatprep.mubr.msk.bf16.mxu0 %vm384_vm0, %v383_v1  ;;  %v370_v4 = vld [vmem:[%s450_s1 + $0x20] sm:$0xff]   ;;  %v371_v5 = vld [vmem:[%s450_s1 + $0x18] sm:$0xff]   ;;  %v372_v6 = vld [vmem:[%s450_s1 + $0x10] sm:$0xff]   ;;  %s157_s5 = scalar_lea.vmem %s449_s0, %s454_s13  ;;  %s160_s10 = scalar_lea.vmem %s452_s3, %s454_s13 }
   0xd   : > { %338 = vmatpush3.bf16.msra.mxu0 %v367_v0  ;;  %v373_v7 = vld [vmem:[%s450_s1 + $0x8] sm:$0xff]   ;;  %v374_v8 = vld [vmem:[%s450_s1] sm:$0xff]  }
   0xe   : > { %339 = vmatprep.subr.bf16.mxu0 %v383_v1  ;;  %v162_v9 = vld [vmem:[%s157_s5] sm:$0x1] }
   0xf   : > { %v179_v10 = vld [vmem:[%s451_s2] sm:$0x1] }
  0x11   : > { %340 = vmatpush3.bf16.msra.mxu0 %v368_v2 }
  0x12   : > { %341 = vmatprep.subr.bf16.mxu0 %v383_v1 }
  0x15   : > { %342 = vmatpush3.bf16.msra.mxu0 %v369_v3 }
  0x16   : > { %343 = vmatprep.subr.bf16.mxu0 %v383_v1 }
  0x19   : > { %344 = vmatpush3.bf16.msra.mxu0 %v370_v4 }
  0x1a   : > { %345 = vmatprep.subr.bf16.mxu0 %v383_v1 }
  0x1d   : > { %346 = vmatpush3.bf16.msra.mxu0 %v371_v5 }
  0x1e   : > { %347 = vmatprep.subr.bf16.mxu0 %v383_v1 }
  0x21   : > { %348 = vmatpush3.bf16.msra.mxu0 %v372_v6 }
  0x22   : > { %349 = vmatprep.subr.bf16.mxu0 %v383_v1 }
  0x25   : > { %350 = vmatpush3.bf16.msra.mxu0 %v373_v7 }
  0x26   : > { %351 = vmatprep.subr.bf16.mxu0 %v383_v1 }
  0x29   : > { %352 = vmatpush3.bf16.msra.mxu0 %v374_v8 }
  0x2c   : > { %354 = vmatmul.mubr.bf16.vlgmr.msra.gmra.mxu0 %v162_v9 }
  0xec   : > { %v262_v11 = vpop.f32.mrf.mxu0 }
  0xed   : > { %v263_v12 = vadd.f32 %v262_v11, %v179_v10 }
  0xee   : > { %v355_v13 = vpop.f32.mrf.mxu0 }
  0xef   : > { %268 = vst [vmem:[%s160_s10] sm:$0x1] %v263_v12 }
  0xf0   : > { %v265_v14 = vpop.f32.mrf.mxu0 }
  0xf2   : > { %v356_v15 = vpop.f32.mrf.mxu0 }
  0xf3 PF: > { %s13_s12 = sadd.s32 1, %s381_s12  }
  0xf4   : > { %p10_p4 = scmp.ge.s32.totalorder %s13_s12, 4  }
  0xf6   :  { %12 = sbr.rel (!%p10_p4) target bundleno = 1 (0x1), region = 62 }

// kernel: deeplabv3_forward.24
= control target key start
LH: loop header
LB: loop body
LE: loop exit
PB: predicated region body
PF: predicated region fallthrough
CT: control target
= control target key end

     0   :  { %s412_s12 = smov 0   ;;  %s456_s0 = inlined_call_operand.vmem [shape: bf16[2,1,1,128], index: 0, kind: input, shape index: {}]   ;;  %s457_s1 = inlined_call_operand.vmem [shape: bf16[1,128,128], index: 1, kind: input, shape index: {}]   ;;  %s458_s2 = inlined_call_operand.vmem [shape: f32[1,1,128], index: 2, kind: input, shape index: {}]   ;;  %s459_s3 = inlined_call_operand.vmem [shape: bf16[2,1,1,128], index: 3, kind: output, shape index: {}]  }
   0x1 LB: > { %s320_s13 = sadd.s32 4294967295, %s388_s12   ;;  %p324_p0 = scmp.ge.s32.totalorder %s388_s12, 1  ;;  %s388_s12 = sphi %s412_s12, %s13_s12  }
   0x2   : > { %p135_p1 = scmp.lt.s32.totalorder %s388_s12, 3 }
   0x4   : > { %p136_p2 = pnand %p324_p0, %p135_p1 }
   0x5   : > { %p155_p3 = scmp.lt.s32.totalorder (!%p136_p2), %s320_s13, 1 }
   0x6   : > { %139 = sbr.rel (%p136_p2) target bundleno = 245 (0xf5), region = 32 }
   0xb   : > { %v374_v0 = vld [vmem:[%s457_s1 + $0x38] sm:$0xff]   ;;  %v390_v1 = vmov 0.0   ;;  %v375_v2 = vld [vmem:[%s457_s1 + $0x30] sm:$0xff]   ;;  %vm391_vm0 = vmmov 0   ;;  %v376_v3 = vld [vmem:[%s457_s1 + $0x28] sm:$0xff]   ;;  %s461_s13 = smov (!%p155_p3, %s320_s13), 1 }
   0xc   : > { %344 = vmatprep.subr.bf16.mxu0 %v390_v1  ;;  %360 = vmatprep.mubr.msk.bf16.mxu0 %vm391_vm0, %v390_v1  ;;  %v377_v4 = vld [vmem:[%s457_s1 + $0x20] sm:$0xff]   ;;  %v378_v5 = vld [vmem:[%s457_s1 + $0x18] sm:$0xff]   ;;  %v379_v6 = vld [vmem:[%s457_s1 + $0x10] sm:$0xff]   ;;  %s157_s5 = scalar_lea.vmem %s456_s0, %s461_s13  ;;  %s160_s10 = scalar_lea.vmem %s459_s3, %s461_s13  ;;  %vm270_vm1 = vcmask 1040384   ;;  %vm271_vm2 = vsmask.f32 256 }
   0xd   : > { %345 = vmatpush3.bf16.msra.mxu0 %v374_v0  ;;  %v380_v7 = vld [vmem:[%s457_s1 + $0x8] sm:$0xff]   ;;  %v381_v8 = vld [vmem:[%s457_s1] sm:$0xff]   ;;  %vm272_vm3 = vmand %vm270_vm1, %vm271_vm2 }
   0xe   : > { %346 = vmatprep.subr.bf16.mxu0 %v390_v1  ;;  %v162_v9 = vld [vmem:[%s157_s5] sm:$0x1] }
   0xf   : > { %v179_v10 = vld [vmem:[%s458_s2] sm:$0x1] }
  0x10   : > { %v273_v15 = vld [vmem:[%s160_s10] sm:$0x1] }
  0x11   : > { %347 = vmatpush3.bf16.msra.mxu0 %v375_v2 }
  0x12   : > { %348 = vmatprep.subr.bf16.mxu0 %v390_v1 }
  0x15   : > { %349 = vmatpush3.bf16.msra.mxu0 %v376_v3 }
  0x16   : > { %350 = vmatprep.subr.bf16.mxu0 %v390_v1 }
  0x19   : > { %351 = vmatpush3.bf16.msra.mxu0 %v377_v4 }
  0x1a   : > { %352 = vmatprep.subr.bf16.mxu0 %v390_v1 }
  0x1d   : > { %353 = vmatpush3.bf16.msra.mxu0 %v378_v5 }
  0x1e   : > { %354 = vmatprep.subr.bf16.mxu0 %v390_v1 }
  0x21   : > { %355 = vmatpush3.bf16.msra.mxu0 %v379_v6 }
  0x22   : > { %356 = vmatprep.subr.bf16.mxu0 %v390_v1 }
  0x25   : > { %357 = vmatpush3.bf16.msra.mxu0 %v380_v7 }
  0x26   : > { %358 = vmatprep.subr.bf16.mxu0 %v390_v1 }
  0x29   : > { %359 = vmatpush3.bf16.msra.mxu0 %v381_v8 }
  0x2c   : > { %361 = vmatmul.mubr.bf16.vlgmr.msra.gmra.mxu0 %v162_v9 }
  0xec   : > { %v262_v11 = vpop.f32.mrf.mxu0 }
  0xed   : > { %v263_v12 = vadd.f32 %v262_v11, %v179_v10 }
  0xee   : > { %v362_v13 = vpop.f32.mrf.mxu0 }
  0xef   : > { %v268_v14 = vmax.f32 %v263_v12, 0.0 }
  0xf0   : > { %v265_v16 = vpop.f32.mrf.mxu0 }
  0xf1   : > { %v269_v17 = vpack.c.bf16 %v268_v14, %v268_v14 }
  0xf2   : > { %v363_v18 = vpop.f32.mrf.mxu0 }
  0xf3   : > { %v274_v19 = vsel %vm272_vm3, %v269_v17, %v273_v15 }
  0xf4   : > { %275 = vst [vmem:[%s160_s10] sm:$0x1] %v274_v19 }
  0xf5 PF: > { %s13_s12 = sadd.s32 1, %s388_s12  }
  0xf6   : > { %p10_p4 = scmp.ge.s32.totalorder %s13_s12, 4  }
  0xf8   :  { %12 = sbr.rel (!%p10_p4) target bundleno = 1 (0x1), region = 62 }

// kernel: deeplabv3_forward.20
= control target key start
LH: loop header
LB: loop body
LE: loop exit
PB: predicated region body
PF: predicated region fallthrough
CT: control target
= control target key end

     0   :  { %s2193_s12 = smov 0   ;;  %s2569_s0 = inlined_call_operand.vmem [shape: bf16[2,28,28,128], index: 0, kind: input, shape index: {}]   ;;  %s2570_s1 = inlined_call_operand.vmem [shape: bf16[9,128,128], index: 1, kind: input, shape index: {}]   ;;  %s2571_s2 = inlined_call_operand.vmem [shape: f32[1,1,128], index: 2, kind: input, shape index: {}]   ;;  %s2572_s3 = inlined_call_operand.vmem [shape: bf16[2,4,4,128], index: 3, kind: output, shape index: {}]  }
   0x1 LB: > { %s1551_s13 = sadd.s32 4294967295, %s2168_s12   ;;  %p1555_p0 = scmp.ge.s32.totalorder %s2168_s12, 1  ;;  %s2168_s12 = sphi %s2193_s12, %s13_s12  }
   0x2   : > { %p137_p1 = scmp.lt.s32.totalorder %s2168_s12, 3 }
   0x4   : > { %p138_p2 = pnand %p1555_p0, %p137_p1 }
   0x5   : > { %p161_p3 = scmp.lt.s32.totalorder (!%p138_p2), %s1551_s13, 1 }
   0x6   : > { %141 = sbr.rel (%p138_p2) target bundleno = 380 (0x17c), region = 32 }
   0xb   : > { %v2078_v0 = vld [vmem:[%s2570_s1 + $0x78] sm:$0xff]   ;;  %v2170_v1 = vmov 0.0   ;;  %v2080_v3 = vld [vmem:[%s2570_s1 + $0x70] sm:$0xff]   ;;  %vm2171_vm0 = vmmov 0   ;;  %s2574_s13 = smov (!%p161_p3, %s1551_s13), 1  ;;  %v2082_v5 = vld [vmem:[%s2570_s1 + $0x68] sm:$0xff]   ;;  %v254_v9 = vlaneseq }
   0xc   : > { %1886 = vmatprep.subr.bf16.mxu0 %v2170_v1  ;;  %1906 = vmatprep.subr.bf16.mxu1 %v2170_v1  ;;  %v2079_v2 = vld [vmem:[%s2570_s1 + $0x38] sm:$0xff]   ;;  %v2081_v4 = vld [vmem:[%s2570_s1 + $0x30] sm:$0xff]   ;;  %v2083_v6 = vld [vmem:[%s2570_s1 + $0x28] sm:$0xff]   ;;  %s2066_s26 = smul.u32 448, %s2574_s13  ;;  %v2172_v17 = vmov 1983009808  }
   0xd   : > { %1887 = vmatpush3.bf16.msra.mxu0 %v2078_v0  ;;  %1902 = vmatprep.mubr.msk.bf16.mxu0 %vm2171_vm0, %v2170_v1  ;;  %v2084_v7 = vld [vmem:[%s2570_s1 + $0x60] sm:$0xff]   ;;  %v2086_v10 = vld [vmem:[%s2570_s1 + $0x58] sm:$0xff]   ;;  %v255_v12 = vshrl.u32 %v254_v9, 7  ;;  %v2088_v13 = vld [vmem:[%s2570_s1 + $0x50] sm:$0xff]   ;;  %v252_v18 = vunpack.c.l.s4 %v2172_v17  ;;  %s1804_s18 = sshll.u32 %s2574_s13, 3 }
   0xe   : > { %1907 = vmatpush3.bf16.msra.mxu1 %v2079_v2  ;;  %1888 = vmatprep.subr.bf16.mxu0 %v2170_v1  ;;  %v2085_v8 = vld [vmem:[%s2570_s1 + $0x20] sm:$0xff]   ;;  %s2243_s6 = scalar_lea.vmem %s2569_s0, %s2066_s26  ;;  %v2087_v11 = vld [vmem:[%s2570_s1 + $0x18] sm:$0xff]   ;;  %v2089_v15 = vld [vmem:[%s2570_s1 + $0x10] sm:$0xff]   ;;  %s170_s21 = scalar_lea.vmem %s2572_s3, %s1804_s18 }
   0xf   : > { %1908 = vmatprep.subr.bf16.mxu1 %v2170_v1  ;;  %1922 = vmatprep.mubr.msk.bf16.mxu1 %vm2171_vm0, %v2170_v1  ;;  %v1559_v14 = vld.sshfl [vmem:[%s2243_s6 + $0x4] sm:$0x30 pattern:$0x76325410]  ;;  %v253_v21 = vunpack.c.0.s8 %v252_v18  ;;  %v2090_v23 = vld [vmem:[%s2570_s1 + $0x48] sm:$0xff]   ;;  %v2096_v37 = vld [vmem:[%s2570_s1 + $0xb8] sm:$0xff]  }
  0x10   : > { %v1560_v16 = vld.sshfl [vmem:[%s2243_s6 + $0x14] sm:$0x30 pattern:$0x76325410]  ;;  %v2091_v28 = vld [vmem:[%s2570_s1 + $0x8] sm:$0xff]   ;;  %v2092_v31 = vld [vmem:[%s2570_s1 + $0x40] sm:$0xff]  }
  0x11   : > { %1889 = vmatpush3.bf16.msra.mxu0 %v2080_v3  ;;  %v1561_v19 = vld.sshfl [vmem:[%s2243_s6 + $0x24] sm:$0x30 pattern:$0x76325410]  ;;  %v1579_v24 = vcombine.high %v1559_v14, %v1560_v16  ;;  %v2269_v26 = vsub.s32 %v253_v21, %v255_v12  ;;  %v2097_v38 = vld [vmem:[%s2570_s1 + $0xf8] sm:$0xff]   ;;  %v2098_v39 = vld [vmem:[%s2570_s1 + $0xb0] sm:$0xff]  }
  0x12   : > { %1909 = vmatpush3.bf16.msra.mxu1 %v2081_v4  ;;  %1890 = vmatprep.subr.bf16.mxu0 %v2170_v1  ;;  %v1562_v20 = vld.sshfl [vmem:[%s2243_s6 + $0x34] sm:$0x30 pattern:$0x76325410]  ;;  %v2093_v34 = vld [vmem:[%s2570_s1] sm:$0xff]   ;;  %v2100_v41 = vld [vmem:[%s2570_s1 + $0xa8] sm:$0xff]  }
  0x13   : > { %1910 = vmatprep.subr.bf16.mxu1 %v2170_v1  ;;  %v2094_v22 = vld [vmem:[%s2243_s6] ss:$16 sps:$4 sm:$0x33]   ;;  %v1580_v25 = vcombine.high %v1561_v19, %v1562_v20  ;;  %v257_v29 = vrot.slane %v1579_v24, %v2269_v26  ;;  %v2101_v42 = vld [vmem:[%s2570_s1 + $0xe8] sm:$0xff]   ;;  %v2104_v45 = vld [vmem:[%s2570_s1 + $0x98] sm:$0xff]  }
  0x14   : > { %v2095_v27 = vld [vmem:[%s2243_s6 + $0x20] ss:$16 sps:$4 sm:$0x33]   ;;  %v368_v32 = vrot.slane %v2094_v22, %v2269_v26  ;;  %v2105_v46 = vld [vmem:[%s2570_s1 + $0xd8] sm:$0xff]   ;;  %v2108_v53 = vld [vmem:[%s2570_s1 + $0x88] sm:$0xff]  }
  0x15   : > { %1891 = vmatpush3.bf16.msra.mxu0 %v2082_v5  ;;  %v264_v30 = vrot.slane %v1580_v25, %v2269_v26  ;;  %v375_v33 = vrot.slane %v2095_v27, %v2269_v26  ;;  %v2099_v40 = vld [vmem:[%s2570_s1 + $0xf0] sm:$0xff]   ;;  %v2102_v43 = vld [vmem:[%s2570_s1 + $0xa0] sm:$0xff]   ;;  %v2112_v49 = vld [vmem:[%s2243_s6 + $0xc] ss:$16 sps:$4 sm:$0x33]  }
  0x16   : > { %1911 = vmatpush3.bf16.msra.mxu1 %v2083_v6  ;;  %1892 = vmatprep.subr.bf16.mxu0 %v2170_v1  ;;  %v2103_v44 = vld [vmem:[%s2570_s1 + $0xe0] sm:$0xff]   ;;  %v2106_v47 = vld [vmem:[%s2570_s1 + $0x90] sm:$0xff]   ;;  %v2113_v50 = vld [vmem:[%s2243_s6 + $0x2c] ss:$16 sps:$4 sm:$0x33]   ;;  %v500_v55 = vrot.slane %v2112_v49, %v2269_v26 }
  0x17   : > { %1912 = vmatprep.subr.bf16.mxu1 %v2170_v1  ;;  %v265_v35 = vcombine.low %v257_v29, %v264_v30  ;;  %v376_v36 = vcombine.low %v368_v32, %v375_v33  ;;  %v2107_v48 = vld [vmem:[%s2570_s1 + $0xd0] sm:$0xff]   ;;  %v2109_v54 = vld [vmem:[%s2570_s1 + $0xc8] sm:$0xff]   ;;  %v507_v56 = vrot.slane %v2113_v50, %v2269_v26  ;;  %v2110_v57 = vld [vmem:[%s2570_s1 + $0x80] sm:$0xff]  }
  0x18   : > { %v2115_v51 = vld [vmem:[%s2243_s6 + $0xc0] ss:$16 sps:$4 sm:$0x33]   ;;  %v2114_v62 = vld [vmem:[%s2570_s1 + $0x138] sm:$0xff]   ;;  %v2120_v4 = vld [vmem:[%s2570_s1 + $0x128] sm:$0xff]  }
  0x19   : > { %1893 = vmatpush3.bf16.msra.mxu0 %v2084_v7  ;;  %v2116_v52 = vld [vmem:[%s2243_s6 + $0xe0] ss:$16 sps:$4 sm:$0x33]   ;;  %v635_v58 = vrot.slane %v2115_v51, %v2269_v26  ;;  %v508_v61 = vcombine.low %v500_v55, %v507_v56  ;;  %v2117_v0 = vld [vmem:[%s2570_s1 + $0x178] sm:$0xff]   ;;  %v2121_v5 = vld [vmem:[%s2570_s1 + $0x168] sm:$0xff]  }
  0x1a   : > { %1913 = vmatpush3.bf16.msra.mxu1 %v2085_v8  ;;  %1894 = vmatprep.subr.bf16.mxu0 %v2170_v1  ;;  %v642_v59 = vrot.slane %v2116_v52, %v2269_v26  ;;  %v2111_v60 = vld [vmem:[%s2570_s1 + $0xc0] sm:$0xff]   ;;  %v2118_v2 = vld [vmem:[%s2570_s1 + $0x130] sm:$0xff]   ;;  %v2124_v8 = vld [vmem:[%s2570_s1 + $0x118] sm:$0xff]  }
  0x1b   : > { %1914 = vmatprep.subr.bf16.mxu1 %v2170_v1  ;;  %v2119_v3 = vld [vmem:[%s2570_s1 + $0x170] sm:$0xff]   ;;  %v2122_v6 = vld [vmem:[%s2570_s1 + $0x120] sm:$0xff]   ;;  %v2125_v9 = vld [vmem:[%s2570_s1 + $0x158] sm:$0xff]  }
  0x1c   : > { %v643_v63 = vcombine.low %v635_v58, %v642_v59  ;;  %v2123_v7 = vld [vmem:[%s2570_s1 + $0x160] sm:$0xff]   ;;  %v1654_v12 = vld.sshfl [vmem:[%s2243_s6 + $0xd4] sm:$0x30 pattern:$0x76325410]  ;;  %v2128_v20 = vld [vmem:[%s2570_s1 + $0x108] sm:$0xff]  }
  0x1d   : > { %1895 = vmatpush3.bf16.msra.mxu0 %v2086_v10  ;;  %v2126_v10 = vld [vmem:[%s2570_s1 + $0x110] sm:$0xff]   ;;  %v2133_v16 = vld [vmem:[%s2243_s6 + $0xcc] ss:$16 sps:$4 sm:$0x33]   ;;  %v2130_v22 = vld [vmem:[%s2570_s1 + $0x100] sm:$0xff]  }
  0x1e   : > { %1915 = vmatpush3.bf16.msra.mxu1 %v2087_v11  ;;  %1896 = vmatprep.subr.bf16.mxu0 %v2170_v1  ;;  %v1653_v11 = vld.sshfl [vmem:[%s2243_s6 + $0xc4] sm:$0x30 pattern:$0x76325410]  ;;  %v2129_v21 = vld [vmem:[%s2570_s1 + $0x148] sm:$0xff]   ;;  %v935_v27 = vrot.slane %v2133_v16, %v2269_v26  ;;  %v2132_v30 = vld [vmem:[%s2570_s1 + $0x1b8] sm:$0xff]  }
  0x1f   : > { %1916 = vmatprep.subr.bf16.mxu1 %v2170_v1  ;;  %v1656_v14 = vld.sshfl [vmem:[%s2243_s6 + $0xf4] sm:$0x30 pattern:$0x76325410]  ;;  %v1673_v18 = vcombine.high %v1653_v11, %v1654_v12  ;;  %v2131_v25 = vld [vmem:[%s2570_s1 + $0x140] sm:$0xff]   ;;  %v2135_v32 = vld [vmem:[%s2570_s1 + $0x1f8] sm:$0xff]  }
  0x20   : > { %v2134_v17 = vld [vmem:[%s2243_s6 + $0xec] ss:$16 sps:$4 sm:$0x33]   ;;  %v2136_v33 = vld [vmem:[%s2570_s1 + $0x1b0] sm:$0xff]   ;;  %v2148_v55 = vld [vmem:[%s2570_s1 + $0x180] sm:$0xff]  }
  0x21   : > { %1897 = vmatpush3.bf16.msra.mxu0 %v2088_v13  ;;  %v1655_v13 = vld.sshfl [vmem:[%s2243_s6 + $0xe4] sm:$0x30 pattern:$0x76325410]  ;;  %v2146_v49 = vld [vmem:[%s2570_s1 + $0x188] sm:$0xff]  }
  0x22   : > { %1917 = vmatpush3.bf16.msra.mxu1 %v2089_v15  ;;  %1898 = vmatprep.subr.bf16.mxu0 %v2170_v1  ;;  %v2127_v15 = vld [vmem:[%s2570_s1 + $0x150] sm:$0xff]   ;;  %v1674_v19 = vcombine.high %v1655_v13, %v1656_v14  ;;  %v2147_v52 = vld [vmem:[%s2570_s1 + $0x1c8] sm:$0xff]   ;;  %v2149_v58 = vld [vmem:[%s2570_s1 + $0x1c0] sm:$0xff]  }
  0x23   : > { %1918 = vmatprep.subr.bf16.mxu1 %v2170_v1 }
  0x24   : > { %v808_v24 = vrot.slane %v1674_v19, %v2269_v26 }
  0x25   : > { %1899 = vmatpush3.bf16.msra.mxu0 %v2090_v23  ;;  %v801_v23 = vrot.slane %v1673_v18, %v2269_v26 }
  0x26   : > { %1919 = vmatpush3.bf16.msra.mxu1 %v2091_v28  ;;  %1900 = vmatprep.subr.bf16.mxu0 %v2170_v1  ;;  %v942_v28 = vrot.slane %v2134_v17, %v2269_v26 }
  0x27   : > { %1920 = vmatprep.subr.bf16.mxu1 %v2170_v1  ;;  %v809_v29 = vcombine.low %v801_v23, %v808_v24 }
  0x29   : > { %1901 = vmatpush3.bf16.msra.mxu0 %v2092_v31  ;;  %v943_v31 = vcombine.low %v935_v27, %v942_v28 }
  0x2a   : > { %1921 = vmatpush3.bf16.msra.mxu1 %v2093_v34  ;;  %1926 = vmatprep.subr.bf16.mxu0 %v2170_v1  ;;  %v2137_v34 = vld [vmem:[%s2570_s1 + $0x1f0] sm:$0xff]  }
  0x2b   : > { %1946 = vmatprep.subr.bf16.mxu1 %v2170_v1 }
  0x2c   : > { %1903 = vmatmul.mubr.bf16.vlgmr.msra.gmra.mxu0 %v265_v35  ;;  %v2138_v35 = vld [vmem:[%s2570_s1 + $0x1a8] sm:$0xff]  }
  0x2d   : > { %1923 = vmatmul.mubr.bf16.vlgmr.msra.gmra.mxu1 %v376_v36  ;;  %1927 = vmatpush3.bf16.msra.mxu0 %v2096_v37  ;;  %v2139_v36 = vld [vmem:[%s2570_s1 + $0x1e8] sm:$0xff]   ;;  %v2140_v37 = vld [vmem:[%s2570_s1 + $0x1a0] sm:$0xff]  }
  0x2e   : > { %1947 = vmatpush3.bf16.msra.mxu1 %v2097_v38  ;;  %1928 = vmatprep.subr.bf16.mxu0 %v2170_v1  ;;  %v2141_v38 = vld [vmem:[%s2570_s1 + $0x1e0] sm:$0xff]  }
  0x2f   : > { %1948 = vmatprep.subr.bf16.mxu1 %v2170_v1  ;;  %1942 = vmatprep.mubr.msk.bf16.mxu0 %vm2171_vm0, %v2170_v1 }
  0x30   : > { %1962 = vmatprep.mubr.msk.bf16.mxu1 %vm2171_vm0, %v2170_v1 }
  0x31   : > { %1929 = vmatpush3.bf16.msra.mxu0 %v2098_v39  ;;  %v2142_v39 = vld [vmem:[%s2570_s1 + $0x198] sm:$0xff]  }
  0x32   : > { %1949 = vmatpush3.bf16.msra.mxu1 %v2099_v40  ;;  %1930 = vmatprep.subr.bf16.mxu0 %v2170_v1  ;;  %v2143_v40 = vld [vmem:[%s2570_s1 + $0x1d8] sm:$0xff]  }
  0x33   : > { %1950 = vmatprep.subr.bf16.mxu1 %v2170_v1 }
  0x35   : > { %1931 = vmatpush3.bf16.msra.mxu0 %v2100_v41  ;;  %v1743_v41 = vld.sshfl [vmem:[%s2243_s6 + $0x184] sm:$0x30 pattern:$0x76325410] }
  0x36   : > { %1951 = vmatpush3.bf16.msra.mxu1 %v2101_v42  ;;  %1932 = vmatprep.subr.bf16.mxu0 %v2170_v1  ;;  %v1744_v42 = vld.sshfl [vmem:[%s2243_s6 + $0x194] sm:$0x30 pattern:$0x76325410] }
  0x37   : > { %1952 = vmatprep.subr.bf16.mxu1 %v2170_v1  ;;  %v1763_v50 = vcombine.high %v1743_v41, %v1744_v42 }
  0x39   : > { %1933 = vmatpush3.bf16.msra.mxu0 %v2102_v43  ;;  %v2144_v43 = vld [vmem:[%s2570_s1 + $0x190] sm:$0xff]   ;;  %v1236_v56 = vrot.slane %v1763_v50, %v2269_v26 }
  0x3a   : > { %1953 = vmatpush3.bf16.msra.mxu1 %v2103_v44  ;;  %1934 = vmatprep.subr.bf16.mxu0 %v2170_v1  ;;  %v1745_v44 = vld.sshfl [vmem:[%s2243_s6 + $0x1a4] sm:$0x30 pattern:$0x76325410] }
  0x3b   : > { %1954 = vmatprep.subr.bf16.mxu1 %v2170_v1 }
  0x3d   : > { %1935 = vmatpush3.bf16.msra.mxu0 %v2104_v45  ;;  %v2145_v45 = vld [vmem:[%s2570_s1 + $0x1d0] sm:$0xff]  }
  0x3e   : > { %1955 = vmatpush3.bf16.msra.mxu1 %v2105_v46  ;;  %1936 = vmatprep.subr.bf16.mxu0 %v2170_v1  ;;  %v1746_v46 = vld.sshfl [vmem:[%s2243_s6 + $0x1b4] sm:$0x30 pattern:$0x76325410] }
  0x3f   : > { %1956 = vmatprep.subr.bf16.mxu1 %v2170_v1  ;;  %v1764_v51 = vcombine.high %v1745_v44, %v1746_v46 }
  0x41   : > { %1937 = vmatpush3.bf16.msra.mxu0 %v2106_v47  ;;  %v2150_v47 = vld [vmem:[%s2243_s6 + $0x180] ss:$16 sps:$4 sm:$0x33]  }
  0x42   : > { %1957 = vmatpush3.bf16.msra.mxu1 %v2107_v48  ;;  %1938 = vmatprep.subr.bf16.mxu0 %v2170_v1  ;;  %v2151_v48 = vld [vmem:[%s2243_s6 + $0x1a0] ss:$16 sps:$4 sm:$0x33]  }
  0x43   : > { %1958 = vmatprep.subr.bf16.mxu1 %v2170_v1 }
  0x45   : > { %1939 = vmatpush3.bf16.msra.mxu0 %v2108_v53  ;;  %v1070_v53 = vrot.slane %v2150_v47, %v2269_v26 }
  0x46   : > { %1959 = vmatpush3.bf16.msra.mxu1 %v2109_v54  ;;  %1940 = vmatprep.subr.bf16.mxu0 %v2170_v1  ;;  %v1077_v54 = vrot.slane %v2151_v48, %v2269_v26 }
  0x47   : > { %1960 = vmatprep.subr.bf16.mxu1 %v2170_v1 }
  0x48   : > { %v1078_v59 = vcombine.low %v1070_v53, %v1077_v54 }
  0x49   : > { %1941 = vmatpush3.bf16.msra.mxu0 %v2110_v57  ;;  %v1243_v57 = vrot.slane %v1764_v51, %v2269_v26 }
  0x4a   : > { %1961 = vmatpush3.bf16.msra.mxu1 %v2111_v60  ;;  %1966 = vmatprep.subr.bf16.mxu0 %v2170_v1  ;;  %v2152_v60 = vld [vmem:[%s2570_s1 + $0x238] sm:$0xff]  }
  0x4b   : > { %1986 = vmatprep.subr.bf16.mxu1 %v2170_v1 }
  0x4c   : > { %1943 = vmatmul.mubr.bf16.vlgmr.msra.gmra.mxu0 %v508_v61  ;;  %v1244_v61 = vcombine.low %v1236_v56, %v1243_v57  ;;  %v1801_v56 = vld [vmem:[%s2571_s2] ss:$0 sm:$0xff] }
  0x4d   : > { %1967 = vmatpush3.bf16.msra.mxu0 %v2114_v62  ;;  %1963 = vmatmul.mubr.bf16.vlgmr.msra.gmra.mxu1 %v643_v63  ;;  %v2153_v62 = vld [vmem:[%s2570_s1 + $0x230] sm:$0xff]   ;;  %v2154_v63 = vld [vmem:[%s2570_s1 + $0x228] sm:$0xff]  }
  0x4e   : > { %1987 = vmatpush3.bf16.msra.mxu1 %v2117_v0  ;;  %1968 = vmatprep.subr.bf16.mxu0 %v2170_v1  ;;  %v2155_v0 = vld [vmem:[%s2570_s1 + $0x220] sm:$0xff]  }
  0x4f   : > { %1988 = vmatprep.subr.bf16.mxu1 %v2170_v1  ;;  %1982 = vmatprep.mubr.msk.bf16.mxu0 %vm2171_vm0, %v2170_v1 }
  0x50   : > { %2002 = vmatprep.mubr.msk.bf16.mxu1 %vm2171_vm0, %v2170_v1 }
  0x51   : > { %1969 = vmatpush3.bf16.msra.mxu0 %v2118_v2  ;;  %v2156_v2 = vld [vmem:[%s2570_s1 + $0x218] sm:$0xff]  }
  0x52   : > { %1989 = vmatpush3.bf16.msra.mxu1 %v2119_v3  ;;  %1970 = vmatprep.subr.bf16.mxu0 %v2170_v1  ;;  %v2157_v3 = vld [vmem:[%s2570_s1 + $0x210] sm:$0xff]  }
  0x53   : > { %1990 = vmatprep.subr.bf16.mxu1 %v2170_v1 }
  0x55   : > { %1971 = vmatpush3.bf16.msra.mxu0 %v2120_v4  ;;  %v2160_v4 = vld [vmem:[%s2243_s6 + $0x18c] ss:$16 sps:$4 sm:$0x33]  }
  0x56   : > { %1991 = vmatpush3.bf16.msra.mxu1 %v2121_v5  ;;  %1972 = vmatprep.subr.bf16.mxu0 %v2170_v1  ;;  %v2161_v5 = vld [vmem:[%s2243_s6 + $0x1ac] ss:$16 sps:$4 sm:$0x33]  }
  0x57   : > { %1992 = vmatprep.subr.bf16.mxu1 %v2170_v1 }
  0x59   : > { %1973 = vmatpush3.bf16.msra.mxu0 %v2122_v6  ;;  %v2158_v6 = vld [vmem:[%s2570_s1 + $0x208] sm:$0xff]  }
  0x5a   : > { %1993 = vmatpush3.bf16.msra.mxu1 %v2123_v7  ;;  %1974 = vmatprep.subr.bf16.mxu0 %v2170_v1  ;;  %v1370_v7 = vrot.slane %v2160_v4, %v2269_v26 }
  0x5b   : > { %1994 = vmatprep.subr.bf16.mxu1 %v2170_v1 }
  0x5d   : > { %1975 = vmatpush3.bf16.msra.mxu0 %v2124_v8  ;;  %v1377_v8 = vrot.slane %v2161_v5, %v2269_v26 }
  0x5e   : > { %1995 = vmatpush3.bf16.msra.mxu1 %v2125_v9  ;;  %1976 = vmatprep.subr.bf16.mxu0 %v2170_v1  ;;  %v2159_v9 = vld [vmem:[%s2570_s1 + $0x200] sm:$0xff]  }
  0x5f   : > { %1996 = vmatprep.subr.bf16.mxu1 %v2170_v1 }
  0x61   : > { %1977 = vmatpush3.bf16.msra.mxu0 %v2126_v10  ;;  %v1378_v10 = vcombine.low %v1370_v7, %v1377_v8 }
  0x62   : > { %1997 = vmatpush3.bf16.msra.mxu1 %v2127_v15  ;;  %1978 = vmatprep.subr.bf16.mxu0 %v2170_v1 }
  0x63   : > { %1998 = vmatprep.subr.bf16.mxu1 %v2170_v1 }
  0x65   : > { %1979 = vmatpush3.bf16.msra.mxu0 %v2128_v20 }
  0x66   : > { %1999 = vmatpush3.bf16.msra.mxu1 %v2129_v21  ;;  %1980 = vmatprep.subr.bf16.mxu0 %v2170_v1 }
  0x67   : > { %2000 = vmatprep.subr.bf16.mxu1 %v2170_v1 }
  0x69   : > { %1981 = vmatpush3.bf16.msra.mxu0 %v2130_v22 }
  0x6a   : > { %2001 = vmatpush3.bf16.msra.mxu1 %v2131_v25  ;;  %2006 = vmatprep.subr.bf16.mxu0 %v2170_v1 }
  0x6b   : > { %2026 = vmatprep.subr.bf16.mxu1 %v2170_v1 }
  0x6c   : > { %1983 = vmatmul.mubr.bf16.vlgmr.msra.gmra.mxu0 %v809_v29 }
  0x6d   : > { %2007 = vmatpush3.bf16.msra.mxu0 %v2132_v30  ;;  %2003 = vmatmul.mubr.bf16.vlgmr.msra.gmra.mxu1 %v943_v31 }
  0x6e   : > { %2027 = vmatpush3.bf16.msra.mxu1 %v2135_v32  ;;  %2008 = vmatprep.subr.bf16.mxu0 %v2170_v1 }
  0x6f   : > { %2028 = vmatprep.subr.bf16.mxu1 %v2170_v1  ;;  %2022 = vmatprep.mubr.msk.bf16.mxu0 %vm2171_vm0, %v2170_v1 }
  0x70   : > { %2042 = vmatprep.mubr.msk.bf16.mxu1 %vm2171_vm0, %v2170_v1 }
  0x71   : > { %2009 = vmatpush3.bf16.msra.mxu0 %v2136_v33 }
  0x72   : > { %2029 = vmatpush3.bf16.msra.mxu1 %v2137_v34  ;;  %2010 = vmatprep.subr.bf16.mxu0 %v2170_v1 }
  0x73   : > { %2030 = vmatprep.subr.bf16.mxu1 %v2170_v1 }
  0x75   : > { %2011 = vmatpush3.bf16.msra.mxu0 %v2138_v35 }
  0x76   : > { %2031 = vmatpush3.bf16.msra.mxu1 %v2139_v36  ;;  %2012 = vmatprep.subr.bf16.mxu0 %v2170_v1 }
  0x77   : > { %2032 = vmatprep.subr.bf16.mxu1 %v2170_v1 }
  0x79   : > { %2013 = vmatpush3.bf16.msra.mxu0 %v2140_v37 }
  0x7a   : > { %2033 = vmatpush3.bf16.msra.mxu1 %v2141_v38  ;;  %2014 = vmatprep.subr.bf16.mxu0 %v2170_v1 }
  0x7b   : > { %2034 = vmatprep.subr.bf16.mxu1 %v2170_v1 }
  0x7d   : > { %2015 = vmatpush3.bf16.msra.mxu0 %v2142_v39 }
  0x7e   : > { %2035 = vmatpush3.bf16.msra.mxu1 %v2143_v40  ;;  %2016 = vmatprep.subr.bf16.mxu0 %v2170_v1 }
  0x7f   : > { %2036 = vmatprep.subr.bf16.mxu1 %v2170_v1 }
  0x81   : > { %2017 = vmatpush3.bf16.msra.mxu0 %v2144_v43 }
  0x82   : > { %2037 = vmatpush3.bf16.msra.mxu1 %v2145_v45  ;;  %2018 = vmatprep.subr.bf16.mxu0 %v2170_v1 }
  0x83   : > { %2038 = vmatprep.subr.bf16.mxu1 %v2170_v1 }
  0x85   : > { %2019 = vmatpush3.bf16.msra.mxu0 %v2146_v49 }
  0x86   : > { %2039 = vmatpush3.bf16.msra.mxu1 %v2147_v52  ;;  %2020 = vmatprep.subr.bf16.mxu0 %v2170_v1 }
  0x87   : > { %2040 = vmatprep.subr.bf16.mxu1 %v2170_v1 }
  0x89   : > { %2021 = vmatpush3.bf16.msra.mxu0 %v2148_v55 }
  0x8a   : > { %2041 = vmatpush3.bf16.msra.mxu1 %v2149_v58  ;;  %2046 = vmatprep.subr.bf16.mxu0 %v2170_v1 }
  0x8c   : > { %2023 = vmatmul.mubr.bf16.vlgmr.msra.gmra.mxu0 %v1078_v59 }
  0x8d   : > { %2047 = vmatpush3.bf16.msra.mxu0 %v2152_v60  ;;  %2043 = vmatmul.mubr.bf16.vlgmr.msra.gmra.mxu1 %v1244_v61 }
  0x8e   : > { %2048 = vmatprep.subr.bf16.mxu0 %v2170_v1  ;;  %2062 = vmatprep.mubr.msk.bf16.mxu0 %vm2171_vm0, %v2170_v1 }
  0x91   : > { %2049 = vmatpush3.bf16.msra.mxu0 %v2153_v62 }
  0x92   : > { %2050 = vmatprep.subr.bf16.mxu0 %v2170_v1 }
  0x95   : > { %2051 = vmatpush3.bf16.msra.mxu0 %v2154_v63 }
  0x96   : > { %2052 = vmatprep.subr.bf16.mxu0 %v2170_v1 }
  0x99   : > { %2053 = vmatpush3.bf16.msra.mxu0 %v2155_v0 }
  0x9a   : > { %2054 = vmatprep.subr.bf16.mxu0 %v2170_v1 }
  0x9d   : > { %2055 = vmatpush3.bf16.msra.mxu0 %v2156_v2 }
  0x9e   : > { %2056 = vmatprep.subr.bf16.mxu0 %v2170_v1 }
  0xa1   : > { %2057 = vmatpush3.bf16.msra.mxu0 %v2157_v3 }
  0xa2   : > { %2058 = vmatprep.subr.bf16.mxu0 %v2170_v1 }
  0xa5   : > { %2059 = vmatpush3.bf16.msra.mxu0 %v2158_v6 }
  0xa6   : > { %2060 = vmatprep.subr.bf16.mxu0 %v2170_v1 }
  0xa9   : > { %2061 = vmatpush3.bf16.msra.mxu0 %v2159_v9 }
  0xac   : > { %2063 = vmatmul.mubr.bf16.vlgmr.msra.gmra.mxu0 %v1378_v10 }
  0xec   : > { %v349_v11 = vpop.f32.mrf.mxu0 }
  0xed   : > { %v460_v12 = vpop.f32.mrf.mxu1 }
  0xee   : > { %v461_v13 = vadd.f32 %v460_v12, %v349_v11  ;;  %v1904_v14 = vpop.f32.mrf.mxu0 }
  0xef   : > { %v1924_v15 = vpop.f32.mrf.mxu1 }
  0xf0   : > { %v352_v16 = vpop.f32.mrf.mxu0 }
  0xf1   : > { %v463_v17 = vpop.f32.mrf.mxu1 }
  0xf2   : > { %v464_v18 = vadd.f32 %v463_v17, %v352_v16  ;;  %v1905_v19 = vpop.f32.mrf.mxu0 }
  0xf3   : > { %v1925_v26 = vpop.f32.mrf.mxu1 }
 0x10c   : > { %v592_v20 = vpop.f32.mrf.mxu0 }
 0x10d   : > { %v599_v21 = vadd.f32 %v592_v20, %v461_v13  ;;  %v727_v22 = vpop.f32.mrf.mxu1 }
 0x10e   : > { %v1944_v23 = vpop.f32.mrf.mxu0 }
 0x10f   : > { %v734_v24 = vadd.f32 %v727_v22, %v599_v21  ;;  %v1964_v25 = vpop.f32.mrf.mxu1 }
 0x110   : > { %v595_v1 = vpop.f32.mrf.mxu0 }
 0x111   : > { %v600_v27 = vadd.f32 %v595_v1, %v464_v18  ;;  %v730_v28 = vpop.f32.mrf.mxu1 }
 0x112   : > { %v1945_v29 = vpop.f32.mrf.mxu0 }
 0x113   : > { %v735_v30 = vadd.f32 %v730_v28, %v600_v27  ;;  %v1965_v31 = vpop.f32.mrf.mxu1 }
 0x12c   : > { %v893_v32 = vpop.f32.mrf.mxu0 }
 0x12d   : > { %v1027_v33 = vpop.f32.mrf.mxu1  ;;  %v900_v48 = vadd.f32 %v893_v32, %v734_v24 }
 0x12e   : > { %v1984_v34 = vpop.f32.mrf.mxu0 }
 0x12f   : > { %v2004_v35 = vpop.f32.mrf.mxu1  ;;  %v1034_v49 = vadd.f32 %v1027_v33, %v900_v48 }
 0x130   : > { %v896_v36 = vpop.f32.mrf.mxu0 }
 0x131   : > { %v1030_v37 = vpop.f32.mrf.mxu1  ;;  %v901_v50 = vadd.f32 %v896_v36, %v735_v30 }
 0x132   : > { %v1985_v38 = vpop.f32.mrf.mxu0 }
 0x133   : > { %v2005_v39 = vpop.f32.mrf.mxu1  ;;  %v1035_v52 = vadd.f32 %v1030_v37, %v901_v50 }
 0x14c   : > { %v1162_v40 = vpop.f32.mrf.mxu0 }
 0x14d   : > { %v1328_v41 = vpop.f32.mrf.mxu1  ;;  %v1169_v51 = vadd.f32 %v1162_v40, %v1034_v49 }
 0x14e   : > { %v2024_v42 = vpop.f32.mrf.mxu0 }
 0x14f   : > { %v2044_v43 = vpop.f32.mrf.mxu1  ;;  %v1335_v53 = vadd.f32 %v1328_v41, %v1169_v51 }
 0x150   : > { %v1165_v44 = vpop.f32.mrf.mxu0 }
 0x151   : > { %v1331_v45 = vpop.f32.mrf.mxu1  ;;  %v1170_v54 = vadd.f32 %v1165_v44, %v1035_v52 }
 0x152   : > { %v2025_v46 = vpop.f32.mrf.mxu0 }
 0x153   : > { %v2045_v47 = vpop.f32.mrf.mxu1  ;;  %v1336_v59 = vadd.f32 %v1331_v45, %v1170_v54 }
 0x16c   : > { %v1462_v55 = vpop.f32.mrf.mxu0 }
 0x16d   : > { %v1469_v57 = vadd.f32 %v1462_v55, %v1335_v53 }
 0x16e   : > { %v2064_v58 = vpop.f32.mrf.mxu0 }
 0x16f   : > { %v1478_v60 = vadd.f32 %v1801_v56, %v1469_v57 }
 0x170   : > { %v1465_v61 = vpop.f32.mrf.mxu0 }
 0x171   : > { %v1480_v62 = vmax.f32 %v1478_v60, 0.0  ;;  %v1470_v63 = vadd.f32 %v1465_v61, %v1336_v59 }
 0x172   : > { %v2065_v0 = vpop.f32.mrf.mxu0 }
 0x173   : > { %v1484_v2 = vcombine.high %v1480_v62, %v1480_v62  ;;  %v1488_v3 = vpack.c.bf16 %v1480_v62, %v1480_v62  ;;  %v1479_v4 = vadd.f32 %v1801_v56, %v1470_v63 }
 0x175   : > { %v1489_v5 = vpack.c.bf16 %v1484_v2, %v1484_v2  ;;  %1492 = vst [vmem:[%s170_s21] sm:$0x3] %v1488_v3  ;;  %v1481_v6 = vmax.f32 %v1479_v4, 0.0 }
 0x177   : > { %1493 = vst [vmem:[%s170_s21 + $0x2] sm:$0x3] %v1489_v5  ;;  %v1485_v7 = vcombine.high %v1481_v6, %v1481_v6  ;;  %v1490_v8 = vpack.c.bf16 %v1481_v6, %v1481_v6 }
 0x179   : > { %v1491_v9 = vpack.c.bf16 %v1485_v7, %v1485_v7  ;;  %1494 = vst [vmem:[%s170_s21 + $0x4] sm:$0x3] %v1490_v8 }
 0x17b   : > { %1495 = vst [vmem:[%s170_s21 + $0x6] sm:$0x3] %v1491_v9 }
 0x17c PF: > { %s13_s12 = sadd.s32 1, %s2168_s12  }
 0x17d   : > { %p10_p4 = scmp.ge.s32.totalorder %s13_s12, 4  }
 0x17f   :  { %12 = sbr.rel (!%p10_p4) target bundleno = 1 (0x1), region = 72 }

// kernel: deeplabv3_forward.26
= control target key start
LH: loop header
LB: loop body
LE: loop exit
PB: predicated region body
PF: predicated region fallthrough
CT: control target
= control target key end

     0   :  { %s1291_s21 = smov 0   ;;  %s1477_s0 = inlined_call_operand.vmem [shape: bf16[2,4,4,128], index: 0, kind: input, shape index: {}]   ;;  %s1478_s1 = inlined_call_operand.vmem [shape: bf16[2,4,4,128], index: 1, kind: input, shape index: {}]   ;;  %s1479_s2 = inlined_call_operand.vmem [shape: bf16[2,4,4,128], index: 2, kind: input, shape index: {}]   ;;  %s1480_s3 = inlined_call_operand.vmem [shape: bf16[2,4,4,128], index: 3, kind: input, shape index: {}]   ;;  %s1481_s4 = inlined_call_operand.vmem [shape: bf16[4,128,128], index: 4, kind: input, shape index: {}]   ;;  %s1482_s5 = inlined_call_operand.vmem [shape: f32[2,1,128], index: 5, kind: input, shape index: {}]   ;;  %s1483_s6 = inlined_call_operand.vmem [shape: bf16[2,4,4,128], index: 6, kind: output, shape index: {}]  }
   0x1 LB: > { %s983_s22 = sadd.s32 4294967295, %s1251_s21   ;;  %p987_p0 = scmp.ge.s32.totalorder %s1251_s21, 1  ;;  %s1251_s21 = sphi %s1291_s21, %s16_s21  }
   0x2   : > { %p250_p1 = scmp.lt.s32.totalorder %s1251_s21, 3 }
   0x4   : > { %p251_p2 = pnand %p987_p0, %p250_p1 }
   0x5   : > { %p298_p3 = scmp.lt.s32.totalorder (!%p251_p2), %s983_s22, 1 }
   0x6   : > { %254 = sbr.rel (%p251_p2) target bundleno = 286 (0x11e), region = 44 }
   0xb   : > { %v1213_v0 = vld [vmem:[%s1481_s4 + $0x78] sm:$0xff]   ;;  %v1253_v1 = vmov 0.0   ;;  %v1215_v3 = vld [vmem:[%s1481_s4 + $0x70] sm:$0xff]   ;;  %vm1254_vm0 = vmmov 0   ;;  %v1217_v5 = vld [vmem:[%s1481_s4 + $0x68] sm:$0xff]   ;;  %s1485_s22 = smov (!%p298_p3, %s983_s22), 1  ;;  %v377_v9 = vlaneseq }
   0xc   : > { %1122 = vmatprep.subr.bf16.mxu0 %v1253_v1  ;;  %1142 = vmatprep.subr.bf16.mxu1 %v1253_v1  ;;  %v1214_v2 = vld [vmem:[%s1481_s4 + $0x38] sm:$0xff]   ;;  %v1216_v4 = vld [vmem:[%s1481_s4 + $0x30] sm:$0xff]   ;;  %v1218_v6 = vld [vmem:[%s1481_s4 + $0x28] sm:$0xff]   ;;  %s1333_s13 = sshll.u32 %s1485_s22, 3  ;;  %v1255_v19 = vmov 1983009808   ;;  %s320_s15 = scalar_lea.vmem %s1482_s5, %s1485_s22 }
   0xd   : > { %1123 = vmatpush3.bf16.msra.mxu0 %v1213_v0  ;;  %1138 = vmatprep.mubr.msk.bf16.mxu0 %vm1254_vm0, %v1253_v1  ;;  %v1219_v7 = vld [vmem:[%s1481_s4 + $0x60] sm:$0xff]   ;;  %s307_s18 = scalar_lea.vmem %s1478_s1, %s1333_s13  ;;  %v1221_v10 = vld [vmem:[%s1481_s4 + $0x58] sm:$0xff]   ;;  %s302_s27 = scalar_lea.vmem %s1477_s0, %s1333_s13  ;;  %v1223_v12 = vld [vmem:[%s1481_s4 + $0x50] sm:$0xff]   ;;  %v378_v15 = vshrl.u32 %v377_v9, 7  ;;  %v375_v20 = vunpack.c.l.s4 %v1255_v19 }
   0xe   : > { %1143 = vmatpush3.bf16.msra.mxu1 %v1214_v2  ;;  %1124 = vmatprep.subr.bf16.mxu0 %v1253_v1  ;;  %v1220_v8 = vld [vmem:[%s1481_s4 + $0x20] sm:$0xff]   ;;  %v1222_v11 = vld [vmem:[%s1481_s4 + $0x18] sm:$0xff]   ;;  %v1224_v16 = vld [vmem:[%s1481_s4 + $0x10] sm:$0xff]   ;;  %s312_s16 = scalar_lea.vmem %s1479_s2, %s1333_s13  ;;  %s317_s23 = scalar_lea.vmem %s1480_s3, %s1333_s13 }
   0xf   : > { %1144 = vmatprep.subr.bf16.mxu1 %v1253_v1  ;;  %1158 = vmatprep.mubr.msk.bf16.mxu1 %vm1254_vm0, %v1253_v1  ;;  %v347_v13 = vld [vmem:[%s307_s18] sm:$0x3]  ;;  %v348_v14 = vld [vmem:[%s307_s18 + $0x2] sm:$0x3]  ;;  %v349_v17 = vld [vmem:[%s307_s18 + $0x4] sm:$0x3]  ;;  %v376_v25 = vunpack.c.0.s8 %v375_v20  ;;  %s325_s22 = scalar_lea.vmem %s1483_s6, %s1333_s13 }
  0x10   : > { %v350_v18 = vld [vmem:[%s307_s18 + $0x6] sm:$0x3]  ;;  %v327_v21 = vld [vmem:[%s302_s27] sm:$0x3]  ;;  %v328_v22 = vld [vmem:[%s302_s27 + $0x2] sm:$0x3]  ;;  %v372_v26 = vcombine.low %v347_v13, %v348_v14 }
  0x11   : > { %1125 = vmatpush3.bf16.msra.mxu0 %v1215_v3  ;;  %v329_v23 = vld [vmem:[%s302_s27 + $0x4] sm:$0x3]  ;;  %v330_v24 = vld [vmem:[%s302_s27 + $0x6] sm:$0x3]  ;;  %v373_v27 = vcombine.low %v349_v17, %v350_v18  ;;  %v1225_v28 = vld [vmem:[%s1481_s4 + $0x48] sm:$0xff]   ;;  %v1367_v29 = vsub.s32 %v376_v25, %v378_v15  ;;  %v483_v30 = vcombine.low %v327_v21, %v328_v22 }
  0x12   : > { %1145 = vmatpush3.bf16.msra.mxu1 %v1216_v4  ;;  %1126 = vmatprep.subr.bf16.mxu0 %v1253_v1  ;;  %v484_v31 = vcombine.low %v329_v23, %v330_v24  ;;  %v1226_v32 = vld [vmem:[%s1481_s4 + $0x8] sm:$0xff]   ;;  %v1227_v35 = vld [vmem:[%s1481_s4 + $0x40] sm:$0xff]   ;;  %v1229_v41 = vld [vmem:[%s1481_s4 + $0xb8] sm:$0xff]  }
  0x13   : > { %1146 = vmatprep.subr.bf16.mxu1 %v1253_v1  ;;  %v380_v33 = vrot.slane %v372_v26, %v1367_v29  ;;  %v387_v34 = vrot.slane %v373_v27, %v1367_v29  ;;  %v491_v36 = vrot.slane %v483_v30, %v1367_v29  ;;  %v1228_v38 = vld [vmem:[%s1481_s4] sm:$0xff]   ;;  %v1230_v42 = vld [vmem:[%s1481_s4 + $0xf8] sm:$0xff]   ;;  %v1231_v43 = vld [vmem:[%s1481_s4 + $0xb0] sm:$0xff]  }
  0x14   : > { %v498_v37 = vrot.slane %v484_v31, %v1367_v29  ;;  %v1232_v44 = vld [vmem:[%s1481_s4 + $0xf0] sm:$0xff]   ;;  %v1233_v45 = vld [vmem:[%s1481_s4 + $0xa8] sm:$0xff]   ;;  %v1235_v47 = vld [vmem:[%s1481_s4 + $0xa0] sm:$0xff]  }
  0x15   : > { %1127 = vmatpush3.bf16.msra.mxu0 %v1217_v5  ;;  %v388_v39 = vcombine.low %v380_v33, %v387_v34  ;;  %v1234_v46 = vld [vmem:[%s1481_s4 + $0xe8] sm:$0xff]   ;;  %v1236_v48 = vld [vmem:[%s1481_s4 + $0xe0] sm:$0xff]   ;;  %v1237_v49 = vld [vmem:[%s1481_s4 + $0x98] sm:$0xff]  }
  0x16   : > { %1147 = vmatpush3.bf16.msra.mxu1 %v1218_v6  ;;  %1128 = vmatprep.subr.bf16.mxu0 %v1253_v1  ;;  %v499_v40 = vcombine.low %v491_v36, %v498_v37  ;;  %v1238_v50 = vld [vmem:[%s1481_s4 + $0xd8] sm:$0xff]   ;;  %v1239_v51 = vld [vmem:[%s1481_s4 + $0x90] sm:$0xff]   ;;  %v590_v53 = vld [vmem:[%s312_s16] sm:$0x3] }
  0x17   : > { %1148 = vmatprep.subr.bf16.mxu1 %v1253_v1  ;;  %v1240_v52 = vld [vmem:[%s1481_s4 + $0xd0] sm:$0xff]   ;;  %v591_v54 = vld [vmem:[%s312_s16 + $0x2] sm:$0x3]  ;;  %v592_v55 = vld [vmem:[%s312_s16 + $0x4] sm:$0x3] }
  0x18   : > { %v593_v56 = vld [vmem:[%s312_s16 + $0x6] sm:$0x3]  ;;  %v724_v57 = vld [vmem:[%s317_s23] sm:$0x3]  ;;  %v725_v58 = vld [vmem:[%s317_s23 + $0x2] sm:$0x3]  ;;  %v615_v61 = vcombine.low %v590_v53, %v591_v54 }
  0x19   : > { %1129 = vmatpush3.bf16.msra.mxu0 %v1219_v7  ;;  %v726_v59 = vld [vmem:[%s317_s23 + $0x4] sm:$0x3]  ;;  %v727_v60 = vld [vmem:[%s317_s23 + $0x6] sm:$0x3]  ;;  %v616_v62 = vcombine.low %v592_v55, %v593_v56  ;;  %v1241_v63 = vld [vmem:[%s1481_s4 + $0x88] sm:$0xff]   ;;  %v749_v0 = vcombine.low %v724_v57, %v725_v58 }
  0x1a   : > { %1149 = vmatpush3.bf16.msra.mxu1 %v1220_v8  ;;  %1130 = vmatprep.subr.bf16.mxu0 %v1253_v1  ;;  %v750_v2 = vcombine.low %v726_v59, %v727_v60  ;;  %v1242_v3 = vld [vmem:[%s1481_s4 + $0xc8] sm:$0xff]   ;;  %v623_v4 = vrot.slane %v615_v61, %v1367_v29  ;;  %v1243_v6 = vld [vmem:[%s1481_s4 + $0x80] sm:$0xff]  }
  0x1b   : > { %1150 = vmatprep.subr.bf16.mxu1 %v1253_v1  ;;  %v630_v5 = vrot.slane %v616_v62, %v1367_v29  ;;  %v757_v7 = vrot.slane %v749_v0, %v1367_v29  ;;  %v1244_v9 = vld [vmem:[%s1481_s4 + $0xc0] sm:$0xff]  }
  0x1c   : > { %v764_v8 = vrot.slane %v750_v2, %v1367_v29  ;;  %v1078_v23 = vld [vmem:[%s320_s15] ss:$0 sm:$0xff] }
  0x1d   : > { %1131 = vmatpush3.bf16.msra.mxu0 %v1221_v10  ;;  %v631_v10 = vcombine.low %v623_v4, %v630_v5 }
  0x1e   : > { %1151 = vmatpush3.bf16.msra.mxu1 %v1222_v11  ;;  %1132 = vmatprep.subr.bf16.mxu0 %v1253_v1  ;;  %v765_v11 = vcombine.low %v757_v7, %v764_v8 }
  0x1f   : > { %1152 = vmatprep.subr.bf16.mxu1 %v1253_v1 }
  0x21   : > { %1133 = vmatpush3.bf16.msra.mxu0 %v1223_v12 }
  0x22   : > { %1153 = vmatpush3.bf16.msra.mxu1 %v1224_v16  ;;  %1134 = vmatprep.subr.bf16.mxu0 %v1253_v1 }
  0x23   : > { %1154 = vmatprep.subr.bf16.mxu1 %v1253_v1 }
  0x25   : > { %1135 = vmatpush3.bf16.msra.mxu0 %v1225_v28 }
  0x26   : > { %1155 = vmatpush3.bf16.msra.mxu1 %v1226_v32  ;;  %1136 = vmatprep.subr.bf16.mxu0 %v1253_v1 }
  0x27   : > { %1156 = vmatprep.subr.bf16.mxu1 %v1253_v1 }
  0x29   : > { %1137 = vmatpush3.bf16.msra.mxu0 %v1227_v35 }
  0x2a   : > { %1157 = vmatpush3.bf16.msra.mxu1 %v1228_v38  ;;  %1162 = vmatprep.subr.bf16.mxu0 %v1253_v1 }
  0x2b   : > { %1182 = vmatprep.subr.bf16.mxu1 %v1253_v1 }
  0x2c   : > { %1139 = vmatmul.mubr.bf16.vlgmr.msra.gmra.mxu0 %v388_v39 }
  0x2d   : > { %1159 = vmatmul.mubr.bf16.vlgmr.msra.gmra.mxu1 %v499_v40  ;;  %1163 = vmatpush3.bf16.msra.mxu0 %v1229_v41 }
  0x2e   : > { %1183 = vmatpush3.bf16.msra.mxu1 %v1230_v42  ;;  %1164 = vmatprep.subr.bf16.mxu0 %v1253_v1 }
  0x2f   : > { %1184 = vmatprep.subr.bf16.mxu1 %v1253_v1  ;;  %1178 = vmatprep.mubr.msk.bf16.mxu0 %vm1254_vm0, %v1253_v1 }
  0x30   : > { %1198 = vmatprep.mubr.msk.bf16.mxu1 %vm1254_vm0, %v1253_v1 }
  0x31   : > { %1165 = vmatpush3.bf16.msra.mxu0 %v1231_v43 }
  0x32   : > { %1185 = vmatpush3.bf16.msra.mxu1 %v1232_v44  ;;  %1166 = vmatprep.subr.bf16.mxu0 %v1253_v1 }
  0x33   : > { %1186 = vmatprep.subr.bf16.mxu1 %v1253_v1 }
  0x35   : > { %1167 = vmatpush3.bf16.msra.mxu0 %v1233_v45 }
  0x36   : > { %1187 = vmatpush3.bf16.msra.mxu1 %v1234_v46  ;;  %1168 = vmatprep.subr.bf16.mxu0 %v1253_v1 }
  0x37   : > { %1188 = vmatprep.subr.bf16.mxu1 %v1253_v1 }
  0x39   : > { %1169 = vmatpush3.bf16.msra.mxu0 %v1235_v47 }
  0x3a   : > { %1189 = vmatpush3.bf16.msra.mxu1 %v1236_v48  ;;  %1170 = vmatprep.subr.bf16.mxu0 %v1253_v1 }
  0x3b   : > { %1190 = vmatprep.subr.bf16.mxu1 %v1253_v1 }
  0x3d   : > { %1171 = vmatpush3.bf16.msra.mxu0 %v1237_v49 }
  0x3e   : > { %1191 = vmatpush3.bf16.msra.mxu1 %v1238_v50  ;;  %1172 = vmatprep.subr.bf16.mxu0 %v1253_v1 }
  0x3f   : > { %1192 = vmatprep.subr.bf16.mxu1 %v1253_v1 }
  0x41   : > { %1173 = vmatpush3.bf16.msra.mxu0 %v1239_v51 }
  0x42   : > { %1193 = vmatpush3.bf16.msra.mxu1 %v1240_v52  ;;  %1174 = vmatprep.subr.bf16.mxu0 %v1253_v1 }
  0x43   : > { %1194 = vmatprep.subr.bf16.mxu1 %v1253_v1 }
  0x45   : > { %1175 = vmatpush3.bf16.msra.mxu0 %v1241_v63 }
  0x46   : > { %1195 = vmatpush3.bf16.msra.mxu1 %v1242_v3  ;;  %1176 = vmatprep.subr.bf16.mxu0 %v1253_v1 }
  0x47   : > { %1196 = vmatprep.subr.bf16.mxu1 %v1253_v1 }
  0x49   : > { %1177 = vmatpush3.bf16.msra.mxu0 %v1243_v6 }
  0x4a   : > { %1197 = vmatpush3.bf16.msra.mxu1 %v1244_v9 }
  0x4c   : > { %1179 = vmatmul.mubr.bf16.vlgmr.msra.gmra.mxu0 %v631_v10 }
  0x4d   : > { %1199 = vmatmul.mubr.bf16.vlgmr.msra.gmra.mxu1 %v765_v11 }
  0xec   : > { %v472_v12 = vpop.f32.mrf.mxu0 }
  0xed   : > { %v583_v13 = vpop.f32.mrf.mxu1 }
  0xee   : > { %v1140_v14 = vpop.f32.mrf.mxu0  ;;  %v584_v20 = vadd.f32 %v583_v13, %v472_v12 }
  0xef   : > { %v1160_v15 = vpop.f32.mrf.mxu1 }
  0xf0   : > { %v475_v16 = vpop.f32.mrf.mxu0 }
  0xf1   : > { %v586_v17 = vpop.f32.mrf.mxu1 }
  0xf2   : > { %v1141_v18 = vpop.f32.mrf.mxu0  ;;  %v587_v25 = vadd.f32 %v586_v17, %v475_v16 }
  0xf3   : > { %v1161_v19 = vpop.f32.mrf.mxu1 }
 0x10c   : > { %v715_v1 = vpop.f32.mrf.mxu0 }
 0x10d   : > { %v722_v21 = vadd.f32 %v715_v1, %v584_v20  ;;  %v849_v22 = vpop.f32.mrf.mxu1 }
 0x10e   : > { %v1180_v24 = vpop.f32.mrf.mxu0 }
 0x10f   : > { %v856_v26 = vadd.f32 %v849_v22, %v722_v21  ;;  %v1200_v27 = vpop.f32.mrf.mxu1 }
 0x110   : > { %v718_v28 = vpop.f32.mrf.mxu0 }
 0x111   : > { %v865_v29 = vadd.f32 %v1078_v23, %v856_v26  ;;  %v723_v30 = vadd.f32 %v718_v28, %v587_v25  ;;  %v852_v31 = vpop.f32.mrf.mxu1 }
 0x112   : > { %v1181_v32 = vpop.f32.mrf.mxu0 }
 0x113   : > { %v867_v33 = vmax.f32 %v865_v29, 0.0  ;;  %v857_v34 = vadd.f32 %v852_v31, %v723_v30  ;;  %v1201_v35 = vpop.f32.mrf.mxu1 }
 0x115   : > { %v871_v36 = vcombine.high %v867_v33, %v867_v33  ;;  %v875_v37 = vpack.c.bf16 %v867_v33, %v867_v33  ;;  %v866_v38 = vadd.f32 %v1078_v23, %v857_v34 }
 0x117   : > { %v876_v39 = vpack.c.bf16 %v871_v36, %v871_v36  ;;  %879 = vst [vmem:[%s325_s22] sm:$0x3] %v875_v37  ;;  %v868_v40 = vmax.f32 %v866_v38, 0.0 }
 0x119   : > { %880 = vst [vmem:[%s325_s22 + $0x2] sm:$0x3] %v876_v39  ;;  %v872_v41 = vcombine.high %v868_v40, %v868_v40  ;;  %v877_v42 = vpack.c.bf16 %v868_v40, %v868_v40 }
 0x11b   : > { %v878_v43 = vpack.c.bf16 %v872_v41, %v872_v41  ;;  %881 = vst [vmem:[%s325_s22 + $0x4] sm:$0x3] %v877_v42 }
 0x11d   : > { %882 = vst [vmem:[%s325_s22 + $0x6] sm:$0x3] %v878_v43 }
 0x11e PF: > { %s16_s21 = sadd.s32 1, %s1251_s21  }
 0x11f   : > { %p13_p4 = scmp.ge.s32.totalorder %s16_s21, 4  }
 0x121   :  { %15 = sbr.rel (!%p13_p4) target bundleno = 1 (0x1), region = 89 }

// kernel: deeplabv3_forward.28
= control target key start
LH: loop header
LB: loop body
LE: loop exit
PB: predicated region body
PF: predicated region fallthrough
CT: control target
= control target key end

     0   :  { %s480_s12 = smov 0   ;;  %s531_s0 = inlined_call_operand.vmem [shape: bf16[2,4,4,128], index: 0, kind: input, shape index: {}]   ;;  %s532_s1 = inlined_call_operand.vmem [shape: bf16[1,128,128], index: 1, kind: input, shape index: {}]   ;;  %s533_s2 = inlined_call_operand.vmem [shape: f32[1,1,128], index: 2, kind: input, shape index: {}]   ;;  %s534_s3 = inlined_call_operand.vmem [shape: bf16[2,4,4,128], index: 3, kind: output, shape index: {}]  }
   0x1 LB: > { %s379_s13 = sadd.s32 4294967295, %s455_s12   ;;  %p383_p0 = scmp.ge.s32.totalorder %s455_s12, 1  ;;  %s455_s12 = sphi %s480_s12, %s13_s12  }
   0x2   : > { %p137_p1 = scmp.lt.s32.totalorder %s455_s12, 3 }
   0x4   : > { %p138_p2 = pnand %p383_p0, %p137_p1 }
   0x5   : > { %p161_p3 = scmp.lt.s32.totalorder (!%p138_p2), %s379_s13, 1 }
   0x6   : > { %141 = sbr.rel (%p138_p2) target bundleno = 248 (0xf8), region = 32 }
   0xb   : > { %v441_v0 = vld [vmem:[%s532_s1 + $0x38] sm:$0xff]   ;;  %v457_v1 = vmov 0.0   ;;  %v442_v2 = vld [vmem:[%s532_s1 + $0x30] sm:$0xff]   ;;  %vm458_vm0 = vmmov 0   ;;  %v443_v3 = vld [vmem:[%s532_s1 + $0x28] sm:$0xff]   ;;  %s536_s13 = smov (!%p161_p3, %s379_s13), 1  ;;  %v208_v7 = vlaneseq }
   0xc   : > { %410 = vmatprep.subr.bf16.mxu0 %v457_v1  ;;  %426 = vmatprep.mubr.msk.bf16.mxu0 %vm458_vm0, %v457_v1  ;;  %v444_v4 = vld [vmem:[%s532_s1 + $0x20] sm:$0xff]   ;;  %s399_s22 = sshll.u32 %s536_s13, 3  ;;  %v459_v5 = vmov 1983009808   ;;  %v445_v8 = vld [vmem:[%s532_s1 + $0x18] sm:$0xff]   ;;  %v446_v9 = vld [vmem:[%s532_s1 + $0x10] sm:$0xff]  }
   0xd   : > { %411 = vmatpush3.bf16.msra.mxu0 %v441_v0  ;;  %v206_v6 = vunpack.c.l.s4 %v459_v5  ;;  %s165_s27 = scalar_lea.vmem %s531_s0, %s399_s22  ;;  %v209_v12 = vshrl.u32 %v208_v7, 7  ;;  %v447_v19 = vld [vmem:[%s532_s1 + $0x8] sm:$0xff]   ;;  %v448_v22 = vld [vmem:[%s532_s1] sm:$0xff]   ;;  %s170_s11 = scalar_lea.vmem %s534_s3, %s399_s22 }
   0xe   : > { %412 = vmatprep.subr.bf16.mxu0 %v457_v1  ;;  %v172_v10 = vld [vmem:[%s165_s27] sm:$0x3]  ;;  %v173_v13 = vld [vmem:[%s165_s27 + $0x2] sm:$0x3]  ;;  %v174_v14 = vld [vmem:[%s165_s27 + $0x4] sm:$0x3] }
   0xf   : > { %v207_v11 = vunpack.c.0.s8 %v206_v6  ;;  %v175_v15 = vld [vmem:[%s165_s27 + $0x6] sm:$0x3]  ;;  %v203_v16 = vcombine.low %v172_v10, %v173_v13  ;;  %v388_v24 = vld [vmem:[%s533_s2] ss:$0 sm:$0xff] }
  0x10   : > { %v204_v17 = vcombine.low %v174_v14, %v175_v15 }
  0x11   : > { %413 = vmatpush3.bf16.msra.mxu0 %v442_v2  ;;  %v210_v18 = vsub.s32 %v207_v11, %v209_v12 }
  0x12   : > { %414 = vmatprep.subr.bf16.mxu0 %v457_v1 }
  0x13   : > { %v211_v20 = vrot.slane %v203_v16, %v210_v18  ;;  %v218_v21 = vrot.slane %v204_v17, %v210_v18 }
  0x15   : > { %415 = vmatpush3.bf16.msra.mxu0 %v443_v3  ;;  %v219_v23 = vcombine.low %v211_v20, %v218_v21 }
  0x16   : > { %416 = vmatprep.subr.bf16.mxu0 %v457_v1 }
  0x19   : > { %417 = vmatpush3.bf16.msra.mxu0 %v444_v4 }
  0x1a   : > { %418 = vmatprep.subr.bf16.mxu0 %v457_v1 }
  0x1d   : > { %419 = vmatpush3.bf16.msra.mxu0 %v445_v8 }
  0x1e   : > { %420 = vmatprep.subr.bf16.mxu0 %v457_v1 }
  0x21   : > { %421 = vmatpush3.bf16.msra.mxu0 %v446_v9 }
  0x22   : > { %422 = vmatprep.subr.bf16.mxu0 %v457_v1 }
  0x25   : > { %423 = vmatpush3.bf16.msra.mxu0 %v447_v19 }
  0x26   : > { %424 = vmatprep.subr.bf16.mxu0 %v457_v1 }
  0x29   : > { %425 = vmatpush3.bf16.msra.mxu0 %v448_v22 }
  0x2c   : > { %427 = vmatmul.mubr.bf16.vlgmr.msra.gmra.mxu0 %v219_v23 }
  0xec   : > { %v303_v25 = vpop.f32.mrf.mxu0 }
  0xed   : > { %v304_v26 = vadd.f32 %v388_v24, %v303_v25 }
  0xee   : > { %v428_v27 = vpop.f32.mrf.mxu0 }
  0xef   : > { %v312_v28 = vcombine.high %v304_v26, %v304_v26  ;;  %v316_v29 = vpack.c.bf16 %v304_v26, %v304_v26 }
  0xf0   : > { %v306_v30 = vpop.f32.mrf.mxu0 }
  0xf1   : > { %v317_v31 = vpack.c.bf16 %v312_v28, %v312_v28  ;;  %320 = vst [vmem:[%s170_s11] sm:$0x3] %v316_v29  ;;  %v307_v32 = vadd.f32 %v388_v24, %v306_v30 }
  0xf2   : > { %v429_v33 = vpop.f32.mrf.mxu0 }
  0xf3   : > { %321 = vst [vmem:[%s170_s11 + $0x2] sm:$0x3] %v317_v31  ;;  %v313_v34 = vcombine.high %v307_v32, %v307_v32  ;;  %v318_v35 = vpack.c.bf16 %v307_v32, %v307_v32 }
  0xf5   : > { %v319_v36 = vpack.c.bf16 %v313_v34, %v313_v34  ;;  %322 = vst [vmem:[%s170_s11 + $0x4] sm:$0x3] %v318_v35 }
  0xf7   : > { %323 = vst [vmem:[%s170_s11 + $0x6] sm:$0x3] %v319_v36 }
  0xf8 PF: > { %s13_s12 = sadd.s32 1, %s455_s12  }
  0xf9   : > { %p10_p4 = scmp.ge.s32.totalorder %s13_s12, 4  }
  0xfb   :  { %12 = sbr.rel (!%p10_p4) target bundleno = 1 (0x1), region = 62 }

// kernel: deeplabv3_forward.29
= control target key start
LH: loop header
LB: loop body
LE: loop exit
PB: predicated region body
PF: predicated region fallthrough
CT: control target
= control target key end

     0   :  { %s767_s9 = smov 0   ;;  %s950_s0 = inlined_call_operand.vmem [shape: bf16[2,4,4,128], index: 0, kind: input, shape index: {}]   ;;  %s951_s1 = inlined_call_operand.vmem [shape: f32[256,16], index: 1, kind: input, shape index: {}]   ;;  %s952_s2 = inlined_call_operand.vmem [shape: f32[2,16,16,128], index: 2, kind: output, shape index: {}]  }
   0x1 LB: > { %s601_s10 = sadd.s32 4294967295, %s750_s9   ;;  %p605_p0 = scmp.ge.s32.totalorder %s750_s9, 1  ;;  %s750_s9 = sphi %s767_s9, %s12_s9  }
   0x2   : > { %p112_p1 = scmp.lt.s32.totalorder %s750_s9, 3 }
   0x4   : > { %p113_p2 = pnand %p605_p0, %p112_p1 }
   0x5   : > { %p134_p3 = scmp.lt.s32.totalorder (!%p113_p2), %s601_s10, 1 }
   0x6   : > { %116 = sbr.rel (%p113_p2) target bundleno = 247 (0xf7), region = 28 }
   0xb   : > { %v152_v0 = vld [vmem:[%s951_s1] sm:$0xff]  ;;  %vm192_vm0 = vcmask 130048   ;;  %s954_s10 = smov (!%p134_p3, %s601_s10), 1  ;;  %v153_v12 = vld [vmem:[%s951_s1 + $0x8] sm:$0xff]  ;;  %v154_v14 = vld [vmem:[%s951_s1 + $0x10] sm:$0xff] }
   0xc   : > { %v168_v1 = vld [vmem:[%s951_s1 + $0x80] sm:$0xff]  ;;  %684 = vmatprep.mubr.msk.f32.mxu0 %vm192_vm0, %v152_v0  ;;  %s644_s15 = sshll.u32 %s954_s10, 3  ;;  %v169_v13 = vld [vmem:[%s951_s1 + $0x88] sm:$0xff]  ;;  %v170_v15 = vld [vmem:[%s951_s1 + $0x90] sm:$0xff]  ;;  %s645_s27 = sshll.u32 %s954_s10, 8 }
   0xd   : > { %708 = vmatprep.mubr.msk.f32.mxu1 %vm192_vm0, %v168_v1  ;;  %s138_s18 = scalar_lea.vmem %s950_s0, %s644_s15  ;;  %v155_v16 = vld [vmem:[%s951_s1 + $0x18] sm:$0xff]  ;;  %v156_v18 = vld [vmem:[%s951_s1 + $0x20] sm:$0xff]  ;;  %v157_v20 = vld [vmem:[%s951_s1 + $0x28] sm:$0xff]  ;;  %s913_s30 = scalar_lea.vmem %s952_s2, %s645_s27 }
   0xe   : > { %v146_v2 = vld [vmem:[%s138_s18 + $0x4] sm:$0x3]  ;;  %v147_v3 = vld [vmem:[%s138_s18 + $0x6] sm:$0x3]  ;;  %v144_v4 = vld [vmem:[%s138_s18] sm:$0x3] }
   0xf   : > { %v150_v5 = vunpack.c.l.bf16 %v146_v2  ;;  %v151_v6 = vunpack.c.l.bf16 %v147_v3  ;;  %v145_v7 = vld [vmem:[%s138_s18 + $0x2] sm:$0x3]  ;;  %v148_v8 = vunpack.c.l.bf16 %v144_v4  ;;  %v171_v17 = vld [vmem:[%s951_s1 + $0x98] sm:$0xff]  ;;  %v173_v21 = vld [vmem:[%s951_s1 + $0xa8] sm:$0xff] }
  0x10   : > { %v149_v9 = vunpack.c.l.bf16 %v145_v7  ;;  %v172_v19 = vld [vmem:[%s951_s1 + $0xa0] sm:$0xff]  ;;  %v158_v22 = vld [vmem:[%s951_s1 + $0x30] sm:$0xff]  ;;  %v159_v24 = vld [vmem:[%s951_s1 + $0x38] sm:$0xff] }
  0x11   : > { %v189_v10 = vcombine.low %v150_v5, %v151_v6  ;;  %v174_v23 = vld [vmem:[%s951_s1 + $0xb0] sm:$0xff]  ;;  %v175_v25 = vld [vmem:[%s951_s1 + $0xb8] sm:$0xff]  ;;  %v160_v26 = vld [vmem:[%s951_s1 + $0x40] sm:$0xff] }
  0x12   : > { %v188_v11 = vcombine.low %v148_v8, %v149_v9  ;;  %v176_v27 = vld [vmem:[%s951_s1 + $0xc0] sm:$0xff]  ;;  %v161_v28 = vld [vmem:[%s951_s1 + $0x48] sm:$0xff]  ;;  %v162_v30 = vld [vmem:[%s951_s1 + $0x50] sm:$0xff] }
  0x13   : > { %680 = vmatprep.subr.mxu0 %v189_v10  ;;  %732 = vmatprep.subr.mxu1 %v189_v10  ;;  %v177_v29 = vld [vmem:[%s951_s1 + $0xc8] sm:$0xff]  ;;  %v178_v31 = vld [vmem:[%s951_s1 + $0xd0] sm:$0xff]  ;;  %v163_v32 = vld [vmem:[%s951_s1 + $0x58] sm:$0xff] }
  0x14   : > { %681 = vmatpush3.msra.mxu0 %v189_v10  ;;  %734 = vmatpush3.msra.mxu1 %v189_v10  ;;  %v179_v33 = vld [vmem:[%s951_s1 + $0xd8] sm:$0xff]  ;;  %v164_v34 = vld [vmem:[%s951_s1 + $0x60] sm:$0xff]  ;;  %v165_v36 = vld [vmem:[%s951_s1 + $0x68] sm:$0xff] }
  0x15   : > { %682 = vmatprep.subr.mxu0 %v188_v11  ;;  %733 = vmatprep.subr.mxu1 %v188_v11  ;;  %v180_v35 = vld [vmem:[%s951_s1 + $0xe0] sm:$0xff]  ;;  %v181_v37 = vld [vmem:[%s951_s1 + $0xe8] sm:$0xff]  ;;  %v166_v38 = vld [vmem:[%s951_s1 + $0x70] sm:$0xff] }
  0x16   : > { %683 = vmatpush3.msra.mxu0 %v188_v11  ;;  %735 = vmatpush3.msra.mxu1 %v188_v11  ;;  %v182_v39 = vld [vmem:[%s951_s1 + $0xf0] sm:$0xff]  ;;  %v167_v40 = vld [vmem:[%s951_s1 + $0x78] sm:$0xff] }
  0x17   : > { %685 = vmatmul.mubr.msk.f32.vlgmr.msra.gmra.mxu0 %vm192_vm0, %v153_v12  ;;  %709 = vmatmul.mubr.msk.f32.vlgmr.msra.gmra.mxu1 %vm192_vm0, %v169_v13  ;;  %v183_v41 = vld [vmem:[%s951_s1 + $0xf8] sm:$0xff] }
  0x18   : > { %687 = vmatprep.mubr.msk.f32.mxu0 %vm192_vm0, %v154_v14  ;;  %711 = vmatprep.mubr.msk.f32.mxu1 %vm192_vm0, %v170_v15 }
  0x1b   : > { %688 = vmatmul.mubr.msk.f32.gmra.mxu0 %vm192_vm0, %v155_v16  ;;  %712 = vmatmul.mubr.msk.f32.gmra.mxu1 %vm192_vm0, %v171_v17 }
  0x1c   : > { %690 = vmatprep.mubr.msk.f32.mxu0 %vm192_vm0, %v156_v18  ;;  %714 = vmatprep.mubr.msk.f32.mxu1 %vm192_vm0, %v172_v19 }
  0x1f   : > { %691 = vmatmul.mubr.msk.f32.gmra.mxu0 %vm192_vm0, %v157_v20  ;;  %715 = vmatmul.mubr.msk.f32.gmra.mxu1 %vm192_vm0, %v173_v21 }
  0x20   : > { %693 = vmatprep.mubr.msk.f32.mxu0 %vm192_vm0, %v158_v22  ;;  %717 = vmatprep.mubr.msk.f32.mxu1 %vm192_vm0, %v174_v23 }
  0x23   : > { %694 = vmatmul.mubr.msk.f32.gmra.mxu0 %vm192_vm0, %v159_v24  ;;  %718 = vmatmul.mubr.msk.f32.gmra.mxu1 %vm192_vm0, %v175_v25 }
  0x24   : > { %696 = vmatprep.mubr.msk.f32.mxu0 %vm192_vm0, %v160_v26  ;;  %720 = vmatprep.mubr.msk.f32.mxu1 %vm192_vm0, %v176_v27 }
  0x27   : > { %697 = vmatmul.mubr.msk.f32.gmra.mxu0 %vm192_vm0, %v161_v28  ;;  %721 = vmatmul.mubr.msk.f32.gmra.mxu1 %vm192_vm0, %v177_v29 }
  0x28   : > { %699 = vmatprep.mubr.msk.f32.mxu0 %vm192_vm0, %v162_v30  ;;  %723 = vmatprep.mubr.msk.f32.mxu1 %vm192_vm0, %v178_v31 }
  0x2b   : > { %700 = vmatmul.mubr.msk.f32.gmra.mxu0 %vm192_vm0, %v163_v32  ;;  %724 = vmatmul.mubr.msk.f32.gmra.mxu1 %vm192_vm0, %v179_v33 }
  0x2c   : > { %702 = vmatprep.mubr.msk.f32.mxu0 %vm192_vm0, %v164_v34  ;;  %726 = vmatprep.mubr.msk.f32.mxu1 %vm192_vm0, %v180_v35 }
  0x2f   : > { %703 = vmatmul.mubr.msk.f32.gmra.mxu0 %vm192_vm0, %v165_v36  ;;  %727 = vmatmul.mubr.msk.f32.gmra.mxu1 %vm192_vm0, %v181_v37 }
  0x30   : > { %705 = vmatprep.mubr.msk.f32.mxu0 %vm192_vm0, %v166_v38  ;;  %729 = vmatprep.mubr.msk.f32.mxu1 %vm192_vm0, %v182_v39 }
  0x33   : > { %706 = vmatmul.mubr.msk.f32.gmra.mxu0 %vm192_vm0, %v167_v40  ;;  %730 = vmatmul.mubr.msk.f32.gmra.mxu1 %vm192_vm0, %v183_v41 }
  0xd7   : > { %v686_v42 = vpop.f32.mrf.mxu0  ;;  %v710_v43 = vpop.f32.mrf.mxu1 }
  0xd8   : > { %515 = vst [vmem:[%s913_s30 + $0x8] sm:$0xff] %v686_v42  ;;  %531 = vst [vmem:[%s913_s30 + $0x88] sm:$0xff] %v710_v43 }
  0xd9   : > { %v355_v44 = vpop.f32.mrf.mxu0  ;;  %v435_v45 = vpop.f32.mrf.mxu1 }
  0xda   : > { %514 = vst [vmem:[%s913_s30] sm:$0xff] %v355_v44  ;;  %530 = vst [vmem:[%s913_s30 + $0x80] sm:$0xff] %v435_v45 }
  0xdb   : > { %v689_v46 = vpop.f32.mrf.mxu0  ;;  %v713_v47 = vpop.f32.mrf.mxu1 }
  0xdc   : > { %517 = vst [vmem:[%s913_s30 + $0x18] sm:$0xff] %v689_v46  ;;  %533 = vst [vmem:[%s913_s30 + $0x98] sm:$0xff] %v713_v47 }
  0xdd   : > { %v365_v48 = vpop.f32.mrf.mxu0  ;;  %v445_v49 = vpop.f32.mrf.mxu1 }
  0xde   : > { %516 = vst [vmem:[%s913_s30 + $0x10] sm:$0xff] %v365_v48  ;;  %532 = vst [vmem:[%s913_s30 + $0x90] sm:$0xff] %v445_v49 }
  0xdf   : > { %v692_v50 = vpop.f32.mrf.mxu0  ;;  %v716_v51 = vpop.f32.mrf.mxu1 }
  0xe0   : > { %519 = vst [vmem:[%s913_s30 + $0x28] sm:$0xff] %v692_v50  ;;  %535 = vst [vmem:[%s913_s30 + $0xa8] sm:$0xff] %v716_v51 }
  0xe1   : > { %v375_v52 = vpop.f32.mrf.mxu0  ;;  %v455_v53 = vpop.f32.mrf.mxu1 }
  0xe2   : > { %518 = vst [vmem:[%s913_s30 + $0x20] sm:$0xff] %v375_v52  ;;  %534 = vst [vmem:[%s913_s30 + $0xa0] sm:$0xff] %v455_v53 }
  0xe3   : > { %v695_v54 = vpop.f32.mrf.mxu0  ;;  %v719_v55 = vpop.f32.mrf.mxu1 }
  0xe4   : > { %521 = vst [vmem:[%s913_s30 + $0x38] sm:$0xff] %v695_v54  ;;  %537 = vst [vmem:[%s913_s30 + $0xb8] sm:$0xff] %v719_v55 }
  0xe5   : > { %v385_v56 = vpop.f32.mrf.mxu0  ;;  %v465_v57 = vpop.f32.mrf.mxu1 }
  0xe6   : > { %520 = vst [vmem:[%s913_s30 + $0x30] sm:$0xff] %v385_v56  ;;  %536 = vst [vmem:[%s913_s30 + $0xb0] sm:$0xff] %v465_v57 }
  0xe7   : > { %v698_v58 = vpop.f32.mrf.mxu0  ;;  %v722_v59 = vpop.f32.mrf.mxu1 }
  0xe8   : > { %523 = vst [vmem:[%s913_s30 + $0x48] sm:$0xff] %v698_v58  ;;  %539 = vst [vmem:[%s913_s30 + $0xc8] sm:$0xff] %v722_v59 }
  0xe9   : > { %v395_v60 = vpop.f32.mrf.mxu0  ;;  %v475_v61 = vpop.f32.mrf.mxu1 }
  0xea   : > { %522 = vst [vmem:[%s913_s30 + $0x40] sm:$0xff] %v395_v60  ;;  %538 = vst [vmem:[%s913_s30 + $0xc0] sm:$0xff] %v475_v61 }
  0xeb   : > { %v701_v62 = vpop.f32.mrf.mxu0  ;;  %v725_v63 = vpop.f32.mrf.mxu1 }
  0xec   : > { %525 = vst [vmem:[%s913_s30 + $0x58] sm:$0xff] %v701_v62  ;;  %541 = vst [vmem:[%s913_s30 + $0xd8] sm:$0xff] %v725_v63 }
  0xed   : > { %v405_v0 = vpop.f32.mrf.mxu0  ;;  %v485_v1 = vpop.f32.mrf.mxu1 }
  0xee   : > { %524 = vst [vmem:[%s913_s30 + $0x50] sm:$0xff] %v405_v0  ;;  %540 = vst [vmem:[%s913_s30 + $0xd0] sm:$0xff] %v485_v1 }
  0xef   : > { %v704_v2 = vpop.f32.mrf.mxu0  ;;  %v728_v3 = vpop.f32.mrf.mxu1 }
  0xf0   : > { %527 = vst [vmem:[%s913_s30 + $0x68] sm:$0xff] %v704_v2  ;;  %543 = vst [vmem:[%s913_s30 + $0xe8] sm:$0xff] %v728_v3 }
  0xf1   : > { %v415_v4 = vpop.f32.mrf.mxu0  ;;  %v495_v5 = vpop.f32.mrf.mxu1 }
  0xf2   : > { %526 = vst [vmem:[%s913_s30 + $0x60] sm:$0xff] %v415_v4  ;;  %542 = vst [vmem:[%s913_s30 + $0xe0] sm:$0xff] %v495_v5 }
  0xf3   : > { %v707_v6 = vpop.f32.mrf.mxu0  ;;  %v731_v7 = vpop.f32.mrf.mxu1 }
  0xf4   : > { %529 = vst [vmem:[%s913_s30 + $0x78] sm:$0xff] %v707_v6  ;;  %545 = vst [vmem:[%s913_s30 + $0xf8] sm:$0xff] %v731_v7 }
  0xf5   : > { %v425_v8 = vpop.f32.mrf.mxu0  ;;  %v505_v9 = vpop.f32.mrf.mxu1 }
  0xf6   : > { %528 = vst [vmem:[%s913_s30 + $0x70] sm:$0xff] %v425_v8  ;;  %544 = vst [vmem:[%s913_s30 + $0xf0] sm:$0xff] %v505_v9 }
  0xf7 PF: > { %s12_s9 = sadd.s32 1, %s750_s9  }
  0xf8   : > { %p9_p4 = scmp.ge.s32.totalorder %s12_s9, 4  }
  0xfa   :  { %11 = sbr.rel (!%p9_p4) target bundleno = 1 (0x1), region = 58 }

// kernel: deeplabv3_forward.27
= control target key start
LH: loop header
LB: loop body
LE: loop exit
PB: predicated region body
PF: predicated region fallthrough
CT: control target
= control target key end

     0   :  { %s2537_s12 = smov 0   ;;  %s3004_s0 = inlined_call_operand.vmem [shape: bf16[2,6,6,128], index: 0, kind: input, shape index: {}]   ;;  %s3005_s1 = inlined_call_operand.vmem [shape: bf16[9,128,128], index: 1, kind: input, shape index: {}]   ;;  %s3006_s2 = inlined_call_operand.vmem [shape: f32[1,1,128], index: 2, kind: input, shape index: {}]   ;;  %s3007_s3 = inlined_call_operand.vmem [shape: bf16[2,4,4,128], index: 3, kind: output, shape index: {}]  }
   0x1 LB: > { %s1877_s13 = sadd.s32 4294967295, %s2512_s12   ;;  %p1881_p0 = scmp.ge.s32.totalorder %s2512_s12, 1  ;;  %s2512_s12 = sphi %s2537_s12, %s13_s12  }
   0x2   : > { %p137_p1 = scmp.lt.s32.totalorder %s2512_s12, 3 }
   0x4   : > { %p138_p2 = pnand %p1881_p0, %p137_p1 }
   0x5   : > { %p161_p3 = scmp.lt.s32.totalorder (!%p138_p2), %s1877_s13, 1 }
   0x6   : > { %141 = sbr.rel (%p138_p2) target bundleno = 380 (0x17c), region = 32 }
   0xb   : > { %v2422_v0 = vld [vmem:[%s3005_s1 + $0x78] sm:$0xff]   ;;  %v2514_v1 = vmov 0.0   ;;  %v2424_v3 = vld [vmem:[%s3005_s1 + $0x70] sm:$0xff]   ;;  %vm2515_vm0 = vmmov 0   ;;  %s3017_s13 = smov (!%p161_p3, %s1877_s13), 1  ;;  %v2426_v5 = vld [vmem:[%s3005_s1 + $0x68] sm:$0xff]   ;;  %v317_v9 = vlaneseq }
   0xc   : > { %2230 = vmatprep.subr.bf16.mxu0 %v2514_v1  ;;  %2250 = vmatprep.subr.bf16.mxu1 %v2514_v1  ;;  %v2423_v2 = vld [vmem:[%s3005_s1 + $0x38] sm:$0xff]   ;;  %v2425_v4 = vld [vmem:[%s3005_s1 + $0x30] sm:$0xff]   ;;  %v2427_v6 = vld [vmem:[%s3005_s1 + $0x28] sm:$0xff]   ;;  %s2410_s26 = smul.u32 24, %s3017_s13  ;;  %vm232_vm1 = vsmask.f32 1280 }
   0xd   : > { %2231 = vmatpush3.bf16.msra.mxu0 %v2422_v0  ;;  %2246 = vmatprep.mubr.msk.bf16.mxu0 %vm2515_vm0, %v2514_v1  ;;  %v2428_v7 = vld [vmem:[%s3005_s1 + $0x60] sm:$0xff]   ;;  %v2430_v10 = vld [vmem:[%s3005_s1 + $0x58] sm:$0xff]   ;;  %v2596_v12 = vshrl.u32 %v317_v9, 7  ;;  %v2432_v13 = vld [vmem:[%s3005_s1 + $0x50] sm:$0xff]   ;;  %vm233_vm2 = vsmask.f32 3336 }
   0xe   : > { %2251 = vmatpush3.bf16.msra.mxu1 %v2423_v2  ;;  %2232 = vmatprep.subr.bf16.mxu0 %v2514_v1  ;;  %v2429_v8 = vld [vmem:[%s3005_s1 + $0x20] sm:$0xff]   ;;  %s2587_s6 = scalar_lea.vmem %s3004_s0, %s2410_s26  ;;  %v2431_v11 = vld [vmem:[%s3005_s1 + $0x18] sm:$0xff]   ;;  %v2433_v15 = vld [vmem:[%s3005_s1 + $0x10] sm:$0xff]   ;;  %vm235_vm3 = vsmask.f32 5392  ;;  %vm570_vm8 = vcmask 1040384  }
   0xf   : > { %2252 = vmatprep.subr.bf16.mxu1 %v2514_v1  ;;  %2266 = vmatprep.mubr.msk.bf16.mxu1 %vm2515_vm0, %v2514_v1  ;;  %v1885_v14 = vld.sshfl [vmem:[%s2587_s6] sm:$0x13 pattern:$0x76325410]  ;;  %vm234_vm4 = vmor %vm232_vm1, %vm233_vm2  ;;  %vm237_vm5 = vsmask.f32 7448 }
  0x10   : > { %v1886_v16 = vld.sshfl [vmem:[%s2587_s6 + $0x4] sm:$0x13 pattern:$0x76325410]  ;;  %v207_v17 = vcombine.high %v1885_v14, %v1885_v14  ;;  %v2434_v22 = vld [vmem:[%s3005_s1 + $0x48] sm:$0xff]   ;;  %v240_v24 = vshrl.u32 %v1885_v14, 16  ;;  %vm2618_vm6 = vmor %vm234_vm4, %vm235_vm3 }
  0x11   : > { %2233 = vmatpush3.bf16.msra.mxu0 %v2424_v3  ;;  %v1887_v18 = vld.sshfl [vmem:[%s2587_s6 + $0x8] sm:$0x13 pattern:$0x76325410]  ;;  %v215_v19 = vcombine.high %v1886_v16, %v1886_v16  ;;  %v243_v25 = vshll.u32 %v1885_v14, 16  ;;  %v254_v28 = vshrl.u32 %v1886_v16, 16  ;;  %vm2630_vm7 = vmor %vm2618_vm6, %vm237_vm5 }
  0x12   : > { %2253 = vmatpush3.bf16.msra.mxu1 %v2425_v4  ;;  %2234 = vmatprep.subr.bf16.mxu0 %v2514_v1  ;;  %v1888_v20 = vld.sshfl [vmem:[%s2587_s6 + $0xc] sm:$0x13 pattern:$0x76325410]  ;;  %v223_v21 = vcombine.high %v1887_v18, %v1887_v18  ;;  %v249_v26 = vshll.u32 %v207_v17, 16  ;;  %v257_v29 = vshll.u32 %v1886_v16, 16 }
  0x13   : > { %2254 = vmatprep.subr.bf16.mxu1 %v2514_v1  ;;  %v231_v23 = vcombine.high %v1888_v20, %v1888_v20  ;;  %v2435_v27 = vld [vmem:[%s3005_s1 + $0x8] sm:$0xff]   ;;  %v263_v30 = vshll.u32 %v215_v19, 16  ;;  %v268_v31 = vshrl.u32 %v1887_v18, 16  ;;  %v242_v33 = vrot.slane %v240_v24, 6  ;;  %v2436_v45 = vld [vmem:[%s3005_s1 + $0x40] sm:$0xff]   ;;  %v2443_v17 = vld [vmem:[%s3005_s1 + $0xf0] sm:$0xff]  }
  0x14   : > { %v245_v34 = vrot.slane %v243_v25, 7  ;;  %v251_v35 = vrot.slane %v249_v26, 7  ;;  %v271_v36 = vshll.u32 %v1887_v18, 16  ;;  %v256_v37 = vrot.slane %v254_v28, 6  ;;  %v2437_v50 = vld [vmem:[%s3005_s1] sm:$0xff]   ;;  %v2442_v18 = vld [vmem:[%s3005_s1 + $0xb0] sm:$0xff]  }
  0x15   : > { %2235 = vmatpush3.bf16.msra.mxu0 %v2426_v5  ;;  %v259_v38 = vrot.slane %v257_v29, 7  ;;  %v265_v39 = vrot.slane %v263_v30, 7  ;;  %v270_v40 = vrot.slane %v268_v31, 6  ;;  %v277_v43 = vshll.u32 %v223_v21, 16  ;;  %v2445_v19 = vld [vmem:[%s3005_s1 + $0xe8] sm:$0xff]   ;;  %v2446_v28 = vld [vmem:[%s3005_s1 + $0xa0] sm:$0xff]  }
  0x16   : > { %2255 = vmatpush3.bf16.msra.mxu1 %v2427_v6  ;;  %2236 = vmatprep.subr.bf16.mxu0 %v2514_v1  ;;  %v246_v41 = vor.u32 %v245_v34, %v242_v33  ;;  %v273_v42 = vrot.slane %v271_v36, 7  ;;  %v282_v44 = vshrl.u32 %v1888_v20, 16  ;;  %v285_v48 = vshll.u32 %v1888_v20, 16  ;;  %v2449_v29 = vld [vmem:[%s3005_s1 + $0xd8] sm:$0xff]   ;;  %s2148_s18 = sshll.u32 %s3017_s13, 3 }
  0x17   : > { %2256 = vmatprep.subr.bf16.mxu1 %v2514_v1  ;;  %v260_v47 = vor.u32 %v259_v38, %v256_v37  ;;  %v291_v49 = vshll.u32 %v231_v23, 16  ;;  %v279_v53 = vrot.slane %v277_v43, 7  ;;  %v2516_v57 = vmov 1983009808   ;;  %v2444_v23 = vld [vmem:[%s3005_s1 + $0xa8] sm:$0xff]   ;;  %v2448_v37 = vld [vmem:[%s3005_s1 + $0x98] sm:$0xff]   ;;  %s170_s21 = scalar_lea.vmem %s3007_s3, %s2148_s18 }
  0x18   : > { %v247_v51 = vrot.slane %v246_v41, 2  ;;  %v274_v52 = vor.u32 %v273_v42, %v270_v40  ;;  %v284_v54 = vrot.slane %v282_v44, 6  ;;  %v287_v56 = vrot.slane %v285_v48, 7  ;;  %v2451_v43 = vld [vmem:[%s3005_s1 + $0xd0] sm:$0xff]   ;;  %v2467_v26 = vld [vmem:[%s3005_s1 + $0x158] sm:$0xff]  }
  0x19   : > { %2237 = vmatpush3.bf16.msra.mxu0 %v2428_v7  ;;  %v261_v55 = vrot.slane %v260_v47, 2  ;;  %v315_v58 = vunpack.c.l.s4 %v2516_v57  ;;  %v2500_v59 = vld.sshfl [vmem:[%s2587_s6] sm:$0xf pattern:$0x76325410]  ;;  %v293_v63 = vrot.slane %v291_v49, 7 }
  0x1a   : > { %2257 = vmatpush3.bf16.msra.mxu1 %v2429_v8  ;;  %2238 = vmatprep.subr.bf16.mxu0 %v2514_v1  ;;  %v2501_v60 = vld.sshfl [vmem:[%s2587_s6 + $0x8] sm:$0xf pattern:$0x76325410]  ;;  %v252_v61 = vsel %vm2630_vm7, %v247_v51, %v251_v35  ;;  %v275_v62 = vrot.slane %v274_v52, 2  ;;  %v288_v2 = vor.u32 %v287_v56, %v284_v54  ;;  %vm571_vm9 = vcmask 1042434  }
  0x1b   : > { %2258 = vmatprep.subr.bf16.mxu1 %v2514_v1  ;;  %v2645_v0 = vsel %vm2630_vm7, %v261_v55, %v265_v39  ;;  %v316_v3 = vunpack.c.0.s8 %v315_v58  ;;  %v1921_v20 = vld.sshfl [vmem:[%s2587_s6] sm:$0x12 pattern:$0x76325410]  ;;  %vm2700_vm10 = vmor %vm570_vm8, %vm571_vm9  ;;  %vm573_vm11 = vcmask 1044484   ;;  %vm575_vm12 = vcmask 1046534  }
  0x1c   : > { %v2649_v4 = vsel %vm2630_vm7, %v275_v62, %v279_v53  ;;  %v312_v5 = vcombine.low %v252_v61, %v2645_v0  ;;  %v289_v6 = vrot.slane %v288_v2, 2  ;;  %v1922_v21 = vld.sshfl [vmem:[%s2587_s6 + $0x4] sm:$0x12 pattern:$0x76325410]  ;;  %v545_v25 = vcombine.high %v1921_v20, %v1921_v20  ;;  %vm574_vm13 = vmor %vm2700_vm10, %vm573_vm11  ;;  %v2450_v44 = vld [vmem:[%s3005_s1 + $0x90] sm:$0xff]  }
  0x1d   : > { %2239 = vmatpush3.bf16.msra.mxu0 %v2430_v10  ;;  %v2653_v7 = vsub.s32 %v316_v3, %v2596_v12  ;;  %v967_v8 = vcombine.low %v2645_v0, %v2649_v4  ;;  %v2441_v12 = vld [vmem:[%s3005_s1 + $0xf8] sm:$0xff]   ;;  %v1924_v24 = vld.sshfl [vmem:[%s2587_s6 + $0xc] sm:$0x12 pattern:$0x76325410]  ;;  %v553_v30 = vcombine.high %v1922_v21, %v1922_v21  ;;  %v1925_v31 = vrot.slane %v1921_v20, 9  ;;  %vm2723_vm14 = vmor %vm574_vm13, %vm575_vm12 }
  0x1e   : > { %2259 = vmatpush3.bf16.msra.mxu1 %v2431_v11  ;;  %2240 = vmatprep.subr.bf16.mxu0 %v2514_v1  ;;  %v2661_v9 = vsel %vm2630_vm7, %v289_v6, %v293_v63  ;;  %v1926_v32 = vrot.slane %v1922_v21, 9  ;;  %v569_v34 = vcombine.high %v1924_v24, %v1924_v24  ;;  %v579_v35 = vrot.slane %v545_v25, 7  ;;  %v2502_v48 = vld.sshfl [vmem:[%s2587_s6 + $0x4] sm:$0xf pattern:$0x76325410] }
  0x1f   : > { %2260 = vmatprep.subr.bf16.mxu1 %v2514_v1  ;;  %v313_v10 = vcombine.low %v2649_v4, %v2661_v9  ;;  %v320_v11 = vrot.slane %v312_v5, %v2653_v7  ;;  %v583_v38 = vrot.slane %v553_v30, 7  ;;  %v1928_v39 = vrot.slane %v1924_v24, 9  ;;  %v2503_v51 = vld.sshfl [vmem:[%s2587_s6 + $0xc] sm:$0xf pattern:$0x76325410] }
  0x20   : > { %v591_v42 = vrot.slane %v569_v34, 7  ;;  %v2453_v52 = vld [vmem:[%s3005_s1 + $0xc8] sm:$0xff]   ;;  %v2455_v56 = vld [vmem:[%s3005_s1 + $0xc0] sm:$0xff]   ;;  %v761_v2 = vcombine.low %v2502_v48, %v2503_v51  ;;  %v2459_v3 = vld [vmem:[%s3005_s1 + $0x178] sm:$0xff]   ;;  %v2806_v21 = vrot.slane %v967_v8, %v2653_v7 }
  0x21   : > { %2241 = vmatpush3.bf16.msra.mxu0 %v2432_v13  ;;  %v439_v13 = vcombine.low %v2500_v59, %v2501_v60  ;;  %v2670_v14 = vrot.slane %v313_v10, %v2653_v7  ;;  %v2739_v47 = vsel %vm2723_vm14, %v1926_v32, %v583_v38  ;;  %v2452_v55 = vld [vmem:[%s3005_s1 + $0x88] sm:$0xff]   ;;  %v1988_v58 = vld.sshfl [vmem:[%s2587_s6 + $0x10] sm:$0x13 pattern:$0x76325410]  ;;  %v2454_v63 = vld [vmem:[%s3005_s1 + $0x80] sm:$0xff]  }
  0x22   : > { %2261 = vmatpush3.bf16.msra.mxu1 %v2433_v15  ;;  %2242 = vmatprep.subr.bf16.mxu0 %v2514_v1  ;;  %v2440_v15 = vld [vmem:[%s3005_s1 + $0xb8] sm:$0xff]   ;;  %v893_v60 = vcombine.high %v1988_v58, %v1988_v58  ;;  %v937_v61 = vshrl.u32 %v1988_v58, 16  ;;  %v940_v62 = vshll.u32 %v1988_v58, 16  ;;  %v2462_v0 = vld [vmem:[%s3005_s1 + $0x128] sm:$0xff]   ;;  %v2465_v8 = vld [vmem:[%s3005_s1 + $0x160] sm:$0xff]  }
  0x23   : > { %2262 = vmatprep.subr.bf16.mxu1 %v2514_v1  ;;  %v328_v16 = vcombine.low %v320_v11, %v2670_v14  ;;  %v2464_v25 = vld [vmem:[%s3005_s1 + $0x120] sm:$0xff]   ;;  %v2469_v30 = vld [vmem:[%s3005_s1 + $0x150] sm:$0xff]   ;;  %v2474_v40 = vld [vmem:[%s3005_s1 + $0x1b8] sm:$0xff]  }
  0x24   : > { %v939_v5 = vrot.slane %v937_v61, 6  ;;  %v942_v6 = vrot.slane %v940_v62, 7  ;;  %v946_v10 = vshll.u32 %v893_v60, 16  ;;  %v2468_v32 = vld [vmem:[%s3005_s1 + $0x110] sm:$0xff]   ;;  %v2479_v58 = vld [vmem:[%s3005_s1 + $0x1e8] sm:$0xff]  }
  0x25   : > { %2243 = vmatpush3.bf16.msra.mxu0 %v2434_v22  ;;  %v1923_v22 = vld.sshfl [vmem:[%s2587_s6 + $0x8] sm:$0x12 pattern:$0x76325410] }
  0x26   : > { %2263 = vmatpush3.bf16.msra.mxu1 %v2435_v27  ;;  %2244 = vmatprep.subr.bf16.mxu0 %v2514_v1  ;;  %v2447_v27 = vld [vmem:[%s3005_s1 + $0xe0] sm:$0xff]   ;;  %v561_v33 = vcombine.high %v1923_v22, %v1923_v22  ;;  %v1927_v36 = vrot.slane %v1923_v22, 9  ;;  %v2020_v22 = vld.sshfl [vmem:[%s2587_s6 + $0x10] sm:$0x12 pattern:$0x76325410] }
  0x27   : > { %2264 = vmatprep.subr.bf16.mxu1 %v2514_v1  ;;  %v2084_v51 = vld.sshfl [vmem:[%s2587_s6 + $0x14] sm:$0x13 pattern:$0x76325410] }
  0x28   : > { %v587_v41 = vrot.slane %v561_v33, 7  ;;  %v1432_v60 = vcombine.high %v2084_v51, %v2084_v51  ;;  %v2504_v46 = vld.sshfl [vmem:[%s2587_s6 + $0x8] sm:$0xf pattern:$0x76325410] }
  0x29   : > { %2245 = vmatpush3.bf16.msra.mxu0 %v2436_v45  ;;  %v580_v45 = vsel %vm2723_vm14, %v1925_v31, %v579_v35  ;;  %v2471_v35 = vld [vmem:[%s3005_s1 + $0x148] sm:$0xff]  }
  0x2a   : > { %2265 = vmatpush3.bf16.msra.mxu1 %v2437_v50  ;;  %2270 = vmatprep.subr.bf16.mxu0 %v2514_v1  ;;  %v2744_v49 = vsel %vm2723_vm14, %v1927_v36, %v587_v41  ;;  %v2748_v50 = vsel %vm2723_vm14, %v1928_v39, %v591_v42  ;;  %v610_v53 = vcombine.low %v580_v45, %v2739_v47  ;;  %v2116_v36 = vld.sshfl [vmem:[%s2587_s6 + $0x14] sm:$0x12 pattern:$0x76325410]  ;;  %v2472_v45 = vld [vmem:[%s3005_s1 + $0x100] sm:$0xff]  }
  0x2b   : > { %2290 = vmatprep.subr.bf16.mxu1 %v2514_v1  ;;  %v611_v54 = vcombine.low %v2744_v49, %v2748_v50  ;;  %v1149_v33 = vcombine.low %v2739_v47, %v2744_v49  ;;  %v1654_v41 = vcombine.high %v2116_v36, %v2116_v36  ;;  %v2120_v42 = vrot.slane %v2116_v36, 9  ;;  %v2475_v49 = vld [vmem:[%s3005_s1 + $0x1f8] sm:$0xff]  }
  0x2c   : > { %2247 = vmatmul.mubr.bf16.vlgmr.msra.gmra.mxu0 %v328_v16  ;;  %v618_v57 = vrot.slane %v610_v53, %v2653_v7  ;;  %v2461_v16 = vld [vmem:[%s3005_s1 + $0x170] sm:$0xff]  }
  0x2d   : > { %2267 = vmatmul.mubr.bf16.vlgmr.msra.gmra.mxu1 %v439_v13  ;;  %2271 = vmatpush3.bf16.msra.mxu0 %v2440_v15  ;;  %v2770_v59 = vrot.slane %v611_v54, %v2653_v7  ;;  %v948_v13 = vrot.slane %v946_v10, 7  ;;  %v2456_v15 = vld [vmem:[%s3005_s1 + $0x138] sm:$0xff]   ;;  %v1157_v38 = vrot.slane %v1149_v33, %v2653_v7  ;;  %v2477_v53 = vld [vmem:[%s3005_s1 + $0x1f0] sm:$0xff]   ;;  %v1476_v54 = vshrl.u32 %v2084_v51, 16 }
  0x2e   : > { %2291 = vmatpush3.bf16.msra.mxu1 %v2441_v12  ;;  %2306 = vmatprep.mubr.msk.bf16.mxu1 %vm2515_vm0, %v2514_v1  ;;  %v943_v12 = vor.u32 %v942_v6, %v939_v5  ;;  %v1485_v5 = vshll.u32 %v1432_v60, 16  ;;  %v2480_v6 = vld [vmem:[%s3005_s1 + $0x1a0] sm:$0xff]   ;;  %v2483_v10 = vld [vmem:[%s3005_s1 + $0x1d8] sm:$0xff]  }
  0x2f   : > { %2292 = vmatprep.subr.bf16.mxu1 %v2514_v1  ;;  %2286 = vmatprep.mubr.msk.bf16.mxu0 %vm2515_vm0, %v2514_v1  ;;  %v626_v11 = vcombine.low %v618_v57, %v2770_v59  ;;  %v2476_v57 = vld [vmem:[%s3005_s1 + $0x1b0] sm:$0xff]   ;;  %v1478_v61 = vrot.slane %v1476_v54, 6 }
  0x30   : > { %2272 = vmatprep.subr.bf16.mxu0 %v2514_v1 }
  0x31   : > { %2273 = vmatpush3.bf16.msra.mxu0 %v2442_v18 }
  0x32   : > { %2293 = vmatpush3.bf16.msra.mxu1 %v2443_v17  ;;  %2274 = vmatprep.subr.bf16.mxu0 %v2514_v1  ;;  %v944_v17 = vrot.slane %v943_v12, 2  ;;  %v1487_v12 = vrot.slane %v1485_v5, 7 }
  0x33   : > { %2294 = vmatprep.subr.bf16.mxu1 %v2514_v1 }
  0x34   : > { %v2793_v18 = vsel %vm2630_vm7, %v944_v17, %v948_v13  ;;  %v2482_v13 = vld [vmem:[%s3005_s1 + $0x198] sm:$0xff]   ;;  %v2484_v17 = vld [vmem:[%s3005_s1 + $0x190] sm:$0xff]  }
  0x35   : > { %2275 = vmatpush3.bf16.msra.mxu0 %v2444_v23  ;;  %v968_v20 = vcombine.low %v2661_v9, %v2793_v18  ;;  %v2463_v23 = vld [vmem:[%s3005_s1 + $0x168] sm:$0xff]   ;;  %v1115_v9 = vcombine.high %v2020_v22, %v2020_v22 }
  0x36   : > { %2295 = vmatpush3.bf16.msra.mxu1 %v2445_v19  ;;  %2276 = vmatprep.subr.bf16.mxu0 %v2514_v1  ;;  %v2460_v19 = vld [vmem:[%s3005_s1 + $0x130] sm:$0xff]  }
  0x37   : > { %2296 = vmatprep.subr.bf16.mxu1 %v2514_v1  ;;  %v2815_v24 = vrot.slane %v968_v20, %v2653_v7  ;;  %v2487_v20 = vld [vmem:[%s3005_s1 + $0x1c8] sm:$0xff]  }
  0x39   : > { %2277 = vmatpush3.bf16.msra.mxu0 %v2446_v28  ;;  %v983_v4 = vcombine.low %v2806_v21, %v2815_v24  ;;  %v1130_v28 = vrot.slane %v1115_v9, 7  ;;  %v2505_v21 = vld.sshfl [vmem:[%s2587_s6 + $0x10] sm:$0xf pattern:$0x76325410]  ;;  %v2488_v24 = vld [vmem:[%s3005_s1 + $0x180] sm:$0xff]  }
  0x3a   : > { %2297 = vmatpush3.bf16.msra.mxu1 %v2447_v27  ;;  %2278 = vmatprep.subr.bf16.mxu0 %v2514_v1  ;;  %v2024_v27 = vrot.slane %v2020_v22, 9  ;;  %v2486_v22 = vld [vmem:[%s3005_s1 + $0x188] sm:$0xff]   ;;  %v2495_v9 = vld [vmem:[%s3005_s1 + $0x220] sm:$0xff]  }
  0x3b   : > { %2298 = vmatprep.subr.bf16.mxu1 %v2514_v1 }
  0x3c   : > { %v1131_v31 = vsel %vm2723_vm14, %v2024_v27, %v1130_v28  ;;  %v2498_v27 = vld [vmem:[%s3005_s1 + $0x208] sm:$0xff]   ;;  %v2499_v28 = vld [vmem:[%s3005_s1 + $0x200] sm:$0xff]  }
  0x3d   : > { %2279 = vmatpush3.bf16.msra.mxu0 %v2448_v37  ;;  %v1150_v34 = vcombine.low %v2748_v50, %v1131_v31  ;;  %v2470_v37 = vld [vmem:[%s3005_s1 + $0x108] sm:$0xff]  }
  0x3e   : > { %2299 = vmatpush3.bf16.msra.mxu1 %v2449_v29  ;;  %2280 = vmatprep.subr.bf16.mxu0 %v2514_v1  ;;  %v2466_v29 = vld [vmem:[%s3005_s1 + $0x118] sm:$0xff]  }
  0x3f   : > { %2300 = vmatprep.subr.bf16.mxu1 %v2514_v1  ;;  %v1164_v39 = vrot.slane %v1150_v34, %v2653_v7 }
  0x41   : > { %2281 = vmatpush3.bf16.msra.mxu0 %v2450_v44  ;;  %v1669_v44 = vrot.slane %v1654_v41, 7  ;;  %v1165_v47 = vcombine.low %v1157_v38, %v1164_v39 }
  0x42   : > { %2301 = vmatpush3.bf16.msra.mxu1 %v2451_v43  ;;  %2282 = vmatprep.subr.bf16.mxu0 %v2514_v1  ;;  %v2473_v43 = vld [vmem:[%s3005_s1 + $0x140] sm:$0xff]  }
  0x43   : > { %2302 = vmatprep.subr.bf16.mxu1 %v2514_v1  ;;  %v1670_v48 = vsel %vm2723_vm14, %v2120_v42, %v1669_v44 }
  0x44   : > { %v1689_v50 = vcombine.low %v1131_v31, %v1670_v48 }
  0x45   : > { %2283 = vmatpush3.bf16.msra.mxu0 %v2452_v55  ;;  %v1479_v55 = vshll.u32 %v2084_v51, 16 }
  0x46   : > { %2303 = vmatpush3.bf16.msra.mxu1 %v2453_v52  ;;  %2284 = vmatprep.subr.bf16.mxu0 %v2514_v1  ;;  %v2879_v52 = vrot.slane %v1689_v50, %v2653_v7 }
  0x47   : > { %2304 = vmatprep.subr.bf16.mxu1 %v2514_v1  ;;  %v1481_v62 = vrot.slane %v1479_v55, 7 }
  0x49   : > { %2285 = vmatpush3.bf16.msra.mxu0 %v2454_v63  ;;  %v2478_v63 = vld [vmem:[%s3005_s1 + $0x1a8] sm:$0xff]  }
  0x4a   : > { %2305 = vmatpush3.bf16.msra.mxu1 %v2455_v56  ;;  %2310 = vmatprep.subr.bf16.mxu0 %v2514_v1  ;;  %v1704_v56 = vcombine.low %v2770_v59, %v2879_v52 }
  0x4b   : > { %2330 = vmatprep.subr.bf16.mxu1 %v2514_v1 }
  0x4c   : > { %2287 = vmatmul.mubr.bf16.vlgmr.msra.gmra.mxu0 %v626_v11 }
  0x4d   : > { %2307 = vmatmul.mubr.bf16.vlgmr.msra.gmra.mxu1 %v761_v2  ;;  %2311 = vmatpush3.bf16.msra.mxu0 %v2456_v15  ;;  %v2481_v2 = vld [vmem:[%s3005_s1 + $0x1e0] sm:$0xff]   ;;  %v2485_v15 = vld [vmem:[%s3005_s1 + $0x1d0] sm:$0xff]  }
  0x4e   : > { %2331 = vmatpush3.bf16.msra.mxu1 %v2459_v3  ;;  %2346 = vmatprep.mubr.msk.bf16.mxu1 %vm2515_vm0, %v2514_v1  ;;  %v1482_v3 = vor.u32 %v1481_v62, %v1478_v61 }
  0x4f   : > { %2332 = vmatprep.subr.bf16.mxu1 %v2514_v1  ;;  %2326 = vmatprep.mubr.msk.bf16.mxu0 %vm2515_vm0, %v2514_v1 }
  0x50   : > { %2312 = vmatprep.subr.bf16.mxu0 %v2514_v1  ;;  %v1483_v11 = vrot.slane %v1482_v3, 2 }
  0x51   : > { %2313 = vmatpush3.bf16.msra.mxu0 %v2460_v19 }
  0x52   : > { %2333 = vmatpush3.bf16.msra.mxu1 %v2461_v16  ;;  %2314 = vmatprep.subr.bf16.mxu0 %v2514_v1  ;;  %v1488_v16 = vsel %vm2630_vm7, %v1483_v11, %v1487_v12 }
  0x53   : > { %2334 = vmatprep.subr.bf16.mxu1 %v2514_v1  ;;  %v1507_v19 = vcombine.low %v2793_v18, %v1488_v16  ;;  %v2489_v18 = vld [vmem:[%s3005_s1 + $0x1c0] sm:$0xff]  }
  0x55   : > { %2315 = vmatpush3.bf16.msra.mxu0 %v2462_v0 }
  0x56   : > { %2335 = vmatpush3.bf16.msra.mxu1 %v2463_v23  ;;  %2316 = vmatprep.subr.bf16.mxu0 %v2514_v1  ;;  %v1521_v23 = vrot.slane %v1507_v19, %v2653_v7  ;;  %v1300_v7 = vcombine.low %v2504_v46, %v2505_v21  ;;  %v2145_v19 = vld [vmem:[%s3006_s2] ss:$0 sm:$0xff] }
  0x57   : > { %2336 = vmatprep.subr.bf16.mxu1 %v2514_v1 }
  0x58   : > { %v1522_v0 = vcombine.low %v2670_v14, %v1521_v23  ;;  %v2494_v14 = vld [vmem:[%s3005_s1 + $0x228] sm:$0xff]  }
  0x59   : > { %2317 = vmatpush3.bf16.msra.mxu0 %v2464_v25  ;;  %v2496_v25 = vld [vmem:[%s3005_s1 + $0x218] sm:$0xff]  }
  0x5a   : > { %2337 = vmatpush3.bf16.msra.mxu1 %v2465_v8  ;;  %2318 = vmatprep.subr.bf16.mxu0 %v2514_v1  ;;  %v2493_v8 = vld [vmem:[%s3005_s1 + $0x230] sm:$0xff]  }
  0x5b   : > { %2338 = vmatprep.subr.bf16.mxu1 %v2514_v1 }
  0x5d   : > { %2319 = vmatpush3.bf16.msra.mxu0 %v2466_v29 }
  0x5e   : > { %2339 = vmatpush3.bf16.msra.mxu1 %v2467_v26  ;;  %2320 = vmatprep.subr.bf16.mxu0 %v2514_v1  ;;  %v2497_v26 = vld [vmem:[%s3005_s1 + $0x210] sm:$0xff]  }
  0x5f   : > { %2340 = vmatprep.subr.bf16.mxu1 %v2514_v1 }
  0x61   : > { %2321 = vmatpush3.bf16.msra.mxu0 %v2468_v32 }
  0x62   : > { %2341 = vmatpush3.bf16.msra.mxu1 %v2469_v30  ;;  %2322 = vmatprep.subr.bf16.mxu0 %v2514_v1 }
  0x63   : > { %2342 = vmatprep.subr.bf16.mxu1 %v2514_v1 }
  0x65   : > { %2323 = vmatpush3.bf16.msra.mxu0 %v2470_v37 }
  0x66   : > { %2343 = vmatpush3.bf16.msra.mxu1 %v2471_v35  ;;  %2324 = vmatprep.subr.bf16.mxu0 %v2514_v1 }
  0x67   : > { %2344 = vmatprep.subr.bf16.mxu1 %v2514_v1 }
  0x69   : > { %2325 = vmatpush3.bf16.msra.mxu0 %v2472_v45 }
  0x6a   : > { %2345 = vmatpush3.bf16.msra.mxu1 %v2473_v43  ;;  %2350 = vmatprep.subr.bf16.mxu0 %v2514_v1 }
  0x6b   : > { %2370 = vmatprep.subr.bf16.mxu1 %v2514_v1 }
  0x6c   : > { %2327 = vmatmul.mubr.bf16.vlgmr.msra.gmra.mxu0 %v983_v4  ;;  %v2492_v4 = vld [vmem:[%s3005_s1 + $0x238] sm:$0xff]  }
  0x6d   : > { %2347 = vmatmul.mubr.bf16.vlgmr.msra.gmra.mxu1 %v1165_v47  ;;  %2351 = vmatpush3.bf16.msra.mxu0 %v2474_v40 }
  0x6e   : > { %2371 = vmatpush3.bf16.msra.mxu1 %v2475_v49  ;;  %2386 = vmatprep.mubr.msk.bf16.mxu1 %vm2515_vm0, %v2514_v1 }
  0x6f   : > { %2372 = vmatprep.subr.bf16.mxu1 %v2514_v1  ;;  %2366 = vmatprep.mubr.msk.bf16.mxu0 %vm2515_vm0, %v2514_v1 }
  0x70   : > { %2352 = vmatprep.subr.bf16.mxu0 %v2514_v1 }
  0x71   : > { %2353 = vmatpush3.bf16.msra.mxu0 %v2476_v57 }
  0x72   : > { %2373 = vmatpush3.bf16.msra.mxu1 %v2477_v53  ;;  %2354 = vmatprep.subr.bf16.mxu0 %v2514_v1 }
  0x73   : > { %2374 = vmatprep.subr.bf16.mxu1 %v2514_v1 }
  0x75   : > { %2355 = vmatpush3.bf16.msra.mxu0 %v2478_v63 }
  0x76   : > { %2375 = vmatpush3.bf16.msra.mxu1 %v2479_v58  ;;  %2356 = vmatprep.subr.bf16.mxu0 %v2514_v1 }
  0x77   : > { %2376 = vmatprep.subr.bf16.mxu1 %v2514_v1 }
  0x79   : > { %2357 = vmatpush3.bf16.msra.mxu0 %v2480_v6 }
  0x7a   : > { %2377 = vmatpush3.bf16.msra.mxu1 %v2481_v2  ;;  %2358 = vmatprep.subr.bf16.mxu0 %v2514_v1 }
  0x7b   : > { %2378 = vmatprep.subr.bf16.mxu1 %v2514_v1 }
  0x7d   : > { %2359 = vmatpush3.bf16.msra.mxu0 %v2482_v13 }
  0x7e   : > { %2379 = vmatpush3.bf16.msra.mxu1 %v2483_v10  ;;  %2360 = vmatprep.subr.bf16.mxu0 %v2514_v1 }
  0x7f   : > { %2380 = vmatprep.subr.bf16.mxu1 %v2514_v1 }
  0x81   : > { %2361 = vmatpush3.bf16.msra.mxu0 %v2484_v17 }
  0x82   : > { %2381 = vmatpush3.bf16.msra.mxu1 %v2485_v15  ;;  %2362 = vmatprep.subr.bf16.mxu0 %v2514_v1 }
  0x83   : > { %2382 = vmatprep.subr.bf16.mxu1 %v2514_v1 }
  0x85   : > { %2363 = vmatpush3.bf16.msra.mxu0 %v2486_v22 }
  0x86   : > { %2383 = vmatpush3.bf16.msra.mxu1 %v2487_v20  ;;  %2364 = vmatprep.subr.bf16.mxu0 %v2514_v1 }
  0x87   : > { %2384 = vmatprep.subr.bf16.mxu1 %v2514_v1 }
  0x89   : > { %2365 = vmatpush3.bf16.msra.mxu0 %v2488_v24 }
  0x8a   : > { %2385 = vmatpush3.bf16.msra.mxu1 %v2489_v18  ;;  %2390 = vmatprep.subr.bf16.mxu0 %v2514_v1 }
  0x8c   : > { %2367 = vmatmul.mubr.bf16.vlgmr.msra.gmra.mxu0 %v1300_v7 }
  0x8d   : > { %2387 = vmatmul.mubr.bf16.vlgmr.msra.gmra.mxu1 %v1522_v0  ;;  %2391 = vmatpush3.bf16.msra.mxu0 %v2492_v4 }
  0x8e   : > { %2406 = vmatprep.mubr.msk.bf16.mxu0 %vm2515_vm0, %v2514_v1  ;;  %2392 = vmatprep.subr.bf16.mxu0 %v2514_v1 }
  0x91   : > { %2393 = vmatpush3.bf16.msra.mxu0 %v2493_v8 }
  0x92   : > { %2394 = vmatprep.subr.bf16.mxu0 %v2514_v1 }
  0x95   : > { %2395 = vmatpush3.bf16.msra.mxu0 %v2494_v14 }
  0x96   : > { %2396 = vmatprep.subr.bf16.mxu0 %v2514_v1 }
  0x99   : > { %2397 = vmatpush3.bf16.msra.mxu0 %v2495_v9 }
  0x9a   : > { %2398 = vmatprep.subr.bf16.mxu0 %v2514_v1 }
  0x9d   : > { %2399 = vmatpush3.bf16.msra.mxu0 %v2496_v25 }
  0x9e   : > { %2400 = vmatprep.subr.bf16.mxu0 %v2514_v1 }
  0xa1   : > { %2401 = vmatpush3.bf16.msra.mxu0 %v2497_v26 }
  0xa2   : > { %2402 = vmatprep.subr.bf16.mxu0 %v2514_v1 }
  0xa5   : > { %2403 = vmatpush3.bf16.msra.mxu0 %v2498_v27 }
  0xa6   : > { %2404 = vmatprep.subr.bf16.mxu0 %v2514_v1 }
  0xa9   : > { %2405 = vmatpush3.bf16.msra.mxu0 %v2499_v28 }
  0xac   : > { %2407 = vmatmul.mubr.bf16.vlgmr.msra.gmra.mxu0 %v1704_v56 }
  0xec   : > { %v412_v31 = vpop.f32.mrf.mxu0 }
  0xed   : > { %v523_v29 = vpop.f32.mrf.mxu1 }
  0xee   : > { %v524_v32 = vadd.f32 %v523_v29, %v412_v31  ;;  %v2248_v34 = vpop.f32.mrf.mxu0 }
  0xef   : > { %v2268_v30 = vpop.f32.mrf.mxu1 }
  0xf0   : > { %v415_v36 = vpop.f32.mrf.mxu0 }
  0xf1   : > { %v526_v33 = vpop.f32.mrf.mxu1 }
  0xf2   : > { %v527_v37 = vadd.f32 %v526_v33, %v415_v36  ;;  %v2249_v38 = vpop.f32.mrf.mxu0 }
  0xf3   : > { %v2269_v35 = vpop.f32.mrf.mxu1 }
 0x10c   : > { %v710_v42 = vpop.f32.mrf.mxu0 }
 0x10d   : > { %v845_v39 = vpop.f32.mrf.mxu1  ;;  %v717_v43 = vadd.f32 %v710_v42, %v524_v32 }
 0x10e   : > { %v2288_v44 = vpop.f32.mrf.mxu0 }
 0x10f   : > { %v2308_v41 = vpop.f32.mrf.mxu1  ;;  %v852_v45 = vadd.f32 %v845_v39, %v717_v43 }
 0x110   : > { %v713_v59 = vpop.f32.mrf.mxu0 }
 0x111   : > { %v848_v1 = vpop.f32.mrf.mxu1  ;;  %v718_v48 = vadd.f32 %v713_v59, %v527_v37 }
 0x112   : > { %v2289_v49 = vpop.f32.mrf.mxu0 }
 0x113   : > { %v2309_v47 = vpop.f32.mrf.mxu1  ;;  %v853_v50 = vadd.f32 %v848_v1, %v718_v48 }
 0x12c   : > { %v1067_v40 = vpop.f32.mrf.mxu0 }
 0x12d   : > { %v1249_v51 = vpop.f32.mrf.mxu1  ;;  %v1074_v6 = vadd.f32 %v1067_v40, %v852_v45 }
 0x12e   : > { %v2328_v54 = vpop.f32.mrf.mxu0 }
 0x12f   : > { %v2348_v52 = vpop.f32.mrf.mxu1  ;;  %v1256_v10 = vadd.f32 %v1249_v51, %v1074_v6 }
 0x130   : > { %v1070_v56 = vpop.f32.mrf.mxu0 }
 0x131   : > { %v1252_v53 = vpop.f32.mrf.mxu1  ;;  %v1075_v11 = vadd.f32 %v1070_v56, %v853_v50 }
 0x132   : > { %v2329_v57 = vpop.f32.mrf.mxu0 }
 0x133   : > { %v2349_v55 = vpop.f32.mrf.mxu1  ;;  %v1257_v13 = vadd.f32 %v1252_v53, %v1075_v11 }
 0x14c   : > { %v1384_v61 = vpop.f32.mrf.mxu0 }
 0x14d   : > { %v1606_v58 = vpop.f32.mrf.mxu1  ;;  %v1391_v12 = vadd.f32 %v1384_v61, %v1256_v10 }
 0x14e   : > { %v2368_v63 = vpop.f32.mrf.mxu0 }
 0x14f   : > { %v2388_v60 = vpop.f32.mrf.mxu1  ;;  %v1613_v15 = vadd.f32 %v1606_v58, %v1391_v12 }
 0x150   : > { %v1387_v3 = vpop.f32.mrf.mxu0 }
 0x151   : > { %v1609_v62 = vpop.f32.mrf.mxu1  ;;  %v1392_v16 = vadd.f32 %v1387_v3, %v1257_v13 }
 0x152   : > { %v2369_v5 = vpop.f32.mrf.mxu0 }
 0x153   : > { %v2389_v2 = vpop.f32.mrf.mxu1  ;;  %v1614_v21 = vadd.f32 %v1609_v62, %v1392_v16 }
 0x16c   : > { %v1788_v17 = vpop.f32.mrf.mxu0 }
 0x16d   : > { %v1795_v20 = vadd.f32 %v1788_v17, %v1613_v15 }
 0x16e   : > { %v2408_v46 = vpop.f32.mrf.mxu0 }
 0x16f   : > { %v1804_v22 = vadd.f32 %v2145_v19, %v1795_v20 }
 0x170   : > { %v1791_v23 = vpop.f32.mrf.mxu0 }
 0x171   : > { %v1806_v18 = vmax.f32 %v1804_v22, 0.0  ;;  %v1796_v24 = vadd.f32 %v1791_v23, %v1614_v21 }
 0x172   : > { %v2409_v0 = vpop.f32.mrf.mxu0 }
 0x173   : > { %v1810_v7 = vcombine.high %v1806_v18, %v1806_v18  ;;  %v1814_v4 = vpack.c.bf16 %v1806_v18, %v1806_v18  ;;  %v1805_v8 = vadd.f32 %v2145_v19, %v1796_v24 }
 0x175   : > { %v1815_v14 = vpack.c.bf16 %v1810_v7, %v1810_v7  ;;  %1818 = vst [vmem:[%s170_s21] sm:$0x3] %v1814_v4  ;;  %v1807_v9 = vmax.f32 %v1805_v8, 0.0 }
 0x177   : > { %1819 = vst [vmem:[%s170_s21 + $0x2] sm:$0x3] %v1815_v14  ;;  %v1811_v25 = vcombine.high %v1807_v9, %v1807_v9  ;;  %v1816_v26 = vpack.c.bf16 %v1807_v9, %v1807_v9 }
 0x179   : > { %v1817_v27 = vpack.c.bf16 %v1811_v25, %v1811_v25  ;;  %1820 = vst [vmem:[%s170_s21 + $0x4] sm:$0x3] %v1816_v26 }
 0x17b   : > { %1821 = vst [vmem:[%s170_s21 + $0x6] sm:$0x3] %v1817_v27 }
 0x17c PF: > { %s13_s12 = sadd.s32 1, %s2512_s12  }
 0x17d   : > { %p10_p4 = scmp.ge.s32.totalorder %s13_s12, 4  }
 0x17f   :  { %12 = sbr.rel (!%p10_p4) target bundleno = 1 (0x1), region = 72 }

</bundles_post_ra>
